<compile_context>
chip_gen: v6e
topology: v6e:2x2x1
jax: 0.10.0
libtpu: 0.0.40
codegen_flags: <defaults>
</compile_context>

<pallas_src>
import functools

import jax
import jax.numpy as jnp
from jax.experimental import pallas as pl
from jax.experimental.pallas import tpu as pltpu

EPS = 1e-5


def _fused_kernel(xpatch_ref, w1_ref, w2_ref, vec_ref, out_ref, *, B, C, P, Q):
    """Fused conv->bn->relu->pool->conv->bn->relu->global-pool.

    xpatch_ref: (4*B*P*P, 9)  conv1 im2col patches, row = block*B*P*P + b*P*P + i*P + j
                              where block in {0..3} is the AvgPool2d(2) sub-grid (di,dj).
    w1_ref:     (9, C)        conv1 weights (tap-major, matching patch columns).
    w2_ref:     (4, C, C)     conv2 per-tap (Cin, Cout) matrices, tap = di*2 + dj.
    vec_ref:    (8, C)        rows: b1, gamma1, beta1, b2, gamma2, beta2, 0, 0.
    out_ref:    (B, C)
    P = 13 (pooled map side), Q = 12 (conv2 output side).
    """
    PP = P * P                         # 169 rows per batch element in the pooled map
    NP = B * PP                        # B*169 rows in the pooled map
    SLAB = (Q - 1) * P + Q             # 155 rows covering one batch element's conv2 window
    LG = (B - 1) * PP + SLAB           # one global slab length covering all batch elements
    n_valid = B * Q * Q                # number of real conv2 output positions

    vec = vec_ref[...]
    b1, g1, be1 = vec[0:1], vec[1:2], vec[2:3]
    b2, g2, be2 = vec[3:4], vec[4:5], vec[5:6]

    # ---------------- conv1: one MXU matmul over all output positions ----------------
    a1 = jnp.dot(xpatch_ref[...], w1_ref[...],
                 preferred_element_type=jnp.float32) + b1               # (4*NP, C)

    # BatchNorm2d #1 (batch stats over every (b,h,w) position == every row) + ReLU.
    m1 = jnp.mean(a1, axis=0, keepdims=True)                            # (1, C)
    d1 = a1 - m1
    v1 = jnp.mean(d1 * d1, axis=0, keepdims=True)                       # biased var, as torch
    r1 = jnp.maximum(g1 * d1 * jax.lax.rsqrt(v1 + EPS) + be1, 0.0)

    # AvgPool2d(2): mean of the four sub-grid row blocks -> (NP, C), row = b*PP + i*P + j.
    p1 = 0.25 * (r1[0 * NP:1 * NP] + r1[1 * NP:2 * NP] +
                 r1[2 * NP:3 * NP] + r1[3 * NP:4 * NP])

    # ---------------- conv2: 4 tap matmuls on ONE global contiguous row slab ----------
    # Output row r = b*PP + oi*P + oj'; rows with oj' >= Q (column wrap) or with
    # (r mod PP) >= SLAB (batch-boundary garbage) are invalid and masked out below.
    taps = ((0, 0), (0, 1), (1, 0), (1, 1))
    acc = jnp.zeros((LG, C), jnp.float32)
    for t, (di, dj) in enumerate(taps):
        start = di * P + dj
        acc = acc + jnp.dot(p1[start:start + LG], w2_ref[t],
                            preferred_element_type=jnp.float32)
    z = acc + b2                                                         # (LG, C)

    # Selection matrix: sel[b, r] = 1 iff row r is a valid conv2 output of batch b.
    bidx = jax.lax.broadcasted_iota(jnp.int32, (B, LG), 0)
    ridx = jax.lax.broadcasted_iota(jnp.int32, (B, LG), 1)
    within = ridx - bidx * PP
    valid = (within >= 0) & (within < SLAB) & ((ridx % P) < Q)
    sel = valid.astype(jnp.float32)                                      # (B, LG), Q*Q ones/row

    # BatchNorm2d #2 batch statistics over valid rows only (via two tiny matmuls).
    s_pb = jnp.dot(sel, z, preferred_element_type=jnp.float32)           # (B, C) per-batch sums
    m2 = jnp.sum(s_pb, axis=0, keepdims=True) / n_valid                  # (1, C) mean
    d2 = z - m2
    ss_pb = jnp.dot(sel, d2 * d2, preferred_element_type=jnp.float32)
    inv2 = jax.lax.rsqrt(jnp.sum(ss_pb, axis=0, keepdims=True) / n_valid + EPS)

    # BN2 affine -> ReLU -> AvgPool2d(12) (per-batch mean over the 12x12 map) -> squeeze.
    y = jnp.maximum(g2 * d2 * inv2 + be2, 0.0)                           # (LG, C)
    out_ref[...] = jnp.dot(sel, y, preferred_element_type=jnp.float32) * (1.0 / (Q * Q))


def init_params(key, n_targets):
    """torch-style init: conv weights/bias U(-1/sqrt(fan_in), ..), BN gamma=1, beta=0."""
    C = n_targets
    ks = jax.random.split(key, 4)
    k1 = 1.0 / jnp.sqrt(jnp.float32(1 * 3 * 3))
    k2 = 1.0 / jnp.sqrt(jnp.float32(C * 2 * 2))
    return dict(
        w1=jax.random.uniform(ks[0], (C, 1, 3, 3), jnp.float32, -k1, k1),
        b1=jax.random.uniform(ks[1], (C,), jnp.float32, -k1, k1),
        g1=jnp.ones((C,), jnp.float32), be1=jnp.zeros((C,), jnp.float32),
        w2=jax.random.uniform(ks[2], (C, C, 2, 2), jnp.float32, -k2, k2),
        b2=jax.random.uniform(ks[3], (C,), jnp.float32, -k2, k2),
        g2=jnp.ones((C,), jnp.float32), be2=jnp.zeros((C,), jnp.float32),
    )


def prepare_params(p):
    """One-time weight re-layout so the jitted forward does no per-call reshapes."""
    C = p["w1"].shape[0]
    w1m = p["w1"].reshape(C, 9).T                                        # (9, C), k = ky*3+kx
    w2t = jnp.transpose(p["w2"], (2, 3, 1, 0)).reshape(4, C, C)          # tap-major, (Cin, Cout)
    vec = jnp.stack([p["b1"], p["g1"], p["be1"], p["b2"], p["g2"], p["be2"],
                     jnp.zeros((C,), jnp.float32), jnp.zeros((C,), jnp.float32)], axis=0)
    return w1m, w2t, vec


@jax.jit
def fashion_mnist_forward(x, w1m, w2t, vec):
    B = x.shape[0]
    C = w1m.shape[1]
    H, W = x.shape[2], x.shape[3]
    if (H, W) != (28, 28):
        raise ValueError("FashionMNISTConvModel geometry requires 28x28 inputs.")
    H1, W1 = H - 2, W - 2          # 26, 26 (conv1 output)
    P = H1 // 2                    # 13     (after AvgPool2d(2))
    Q = P - 1                      # 12     (conv2 output; AvgPool2d(12) is then global)

    xs = x[:, 0].astype(jnp.float32)                                     # (B, 28, 28)
    # im2col for conv1, grouped by AvgPool2d(2) sub-grid (di, dj) so the in-kernel pool
    # is a plain mean of 4 row blocks. Cheap XLA glue fused under jit.
    taps = [xs[:, ky:ky + H1, kx:kx + W1] for ky in range(3) for kx in range(3)]
    patches = jnp.stack(taps, axis=-1)                                   # (B, 26, 26, 9)
    blocks = [patches[:, di::2, dj::2, :] for di in (0, 1) for dj in (0, 1)]
    xpatch = jnp.stack(blocks, axis=0).reshape(4 * B * P * P, 9)         # (4*B*169, 9)

    kernel = functools.partial(_fused_kernel, B=B, C=C, P=P, Q=Q)
    vmem = pl.BlockSpec(memory_space=pltpu.MemorySpace.VMEM)
    return pl.pallas_call(
        kernel,
        out_shape=jax.ShapeDtypeStruct((B, C), jnp.float32),
        in_specs=[vmem] * 4,
        out_specs=vmem,
    )(xpatch, w1m, w2t, vec)


def _reference_forward(x, p, eps=EPS):
    """Pure-JAX (XLA) reference with identical (training-mode BN) semantics."""
    def bn(y, g, b):
        m = jnp.mean(y, axis=(0, 2, 3), keepdims=True)
        v = jnp.mean((y - m) ** 2, axis=(0, 2, 3), keepdims=True)
        return g.reshape(1, -1, 1, 1) * (y - m) * jax.lax.rsqrt(v + eps) + b.reshape(1, -1, 1, 1)

    dn = ("NCHW", "OIHW", "NCHW")
    y = jax.lax.conv_general_dilated(x, p["w1"], (1, 1), "VALID", dimension_numbers=dn)
    y = y + p["b1"].reshape(1, -1, 1, 1)
    y = jnp.maximum(bn(y, p["g1"], p["be1"]), 0.0)
    B, C, H, W = y.shape
    y = y.reshape(B, C, H // 2, 2, W // 2, 2).mean(axis=(3, 5))           # AvgPool2d(2)
    y = jax.lax.conv_general_dilated(y, p["w2"], (1, 1), "VALID", dimension_numbers=dn)
    y = y + p["b2"].reshape(1, -1, 1, 1)
    y = jnp.maximum(bn(y, p["g2"], p["be2"]), 0.0)
    return jnp.squeeze(jnp.mean(y, axis=(2, 3), keepdims=True))           # AvgPool2d(12) + squeeze


if __name__ == "__main__":
    B, n_targets, H, W = 2, 10, 28, 28      # FashionMNIST geometry, 10 classes

    key = jax.random.PRNGKey(0)
    kx, kp = jax.random.split(key)
    x = jax.random.normal(kx, (B, 1, H, W), jnp.float32)
    params = init_params(kp, n_targets)
    w1m, w2t, vec = prepare_params(params)

    out = fashion_mnist_forward(x, w1m, w2t, vec)
    jax.block_until_ready(out)

    assert out.shape == (B, n_targets)
    ref = _reference_forward(x, params)
    assert bool(jnp.allclose(out, ref, atol=1e-4, rtol=1e-4))
    print("KERNEL_OK")
</pallas_src>

<mosaic_0001>
module attributes {stable_mosaic.version = 11 : i64} {
  func.func @_fused_kernel(%arg0: memref<1352x9xf32, #tpu.memory_space<vmem>>, %arg1: memref<9x10xf32, #tpu.memory_space<vmem>>, %arg2: memref<4x10x10xf32, #tpu.memory_space<vmem>>, %arg3: memref<8x10xf32, #tpu.memory_space<vmem>>, %arg4: memref<2x10xf32, #tpu.memory_space<vmem>>) attributes {dimension_semantics = [], scalar_prefetch = 0 : i64, scratch_operands = 0 : i64, tpu.core_type = #tpu.core_type<tc>} {
    %c0 = arith.constant 0 : index
    %c0_0 = arith.constant 0 : index
    %0 = vector.load %arg3[%c0, %c0_0] : memref<8x10xf32, #tpu.memory_space<vmem>>, vector<8x10xf32>
    %1 = vector.extract_strided_slice %0 {offsets = [0, 0], sizes = [1, 10], strides = [1, 1]} : vector<8x10xf32> to vector<1x10xf32>
    %2 = vector.extract_strided_slice %0 {offsets = [1, 0], sizes = [1, 10], strides = [1, 1]} : vector<8x10xf32> to vector<1x10xf32>
    %3 = vector.extract_strided_slice %0 {offsets = [2, 0], sizes = [1, 10], strides = [1, 1]} : vector<8x10xf32> to vector<1x10xf32>
    %4 = vector.extract_strided_slice %0 {offsets = [3, 0], sizes = [1, 10], strides = [1, 1]} : vector<8x10xf32> to vector<1x10xf32>
    %5 = vector.extract_strided_slice %0 {offsets = [4, 0], sizes = [1, 10], strides = [1, 1]} : vector<8x10xf32> to vector<1x10xf32>
    %6 = vector.extract_strided_slice %0 {offsets = [5, 0], sizes = [1, 10], strides = [1, 1]} : vector<8x10xf32> to vector<1x10xf32>
    %c0_1 = arith.constant 0 : index
    %c0_2 = arith.constant 0 : index
    %7 = vector.load %arg0[%c0_1, %c0_2] : memref<1352x9xf32, #tpu.memory_space<vmem>>, vector<1352x9xf32>
    %c0_3 = arith.constant 0 : index
    %c0_4 = arith.constant 0 : index
    %8 = vector.load %arg1[%c0_3, %c0_4] : memref<9x10xf32, #tpu.memory_space<vmem>>, vector<9x10xf32>
    %cst = arith.constant dense<0.000000e+00> : vector<1352x10xf32>
    %9 = tpu.matmul %7, %8, %cst {dimension_numbers = #tpu.dot_dimension_numbers<[1], [0], [0], [1], [0, 0, 1, 1], [], []>} : vector<1352x9xf32>, vector<9x10xf32>, vector<1352x10xf32> -> vector<1352x10xf32>
    %10 = vector.broadcast %1 : vector<1x10xf32> to vector<1352x10xf32>
    %11 = arith.addf %9, %10 : vector<1352x10xf32>
    %cst_5 = arith.constant dense<0.000000e+00> : vector<10xf32>
    %12 = vector.multi_reduction <add>, %11, %cst_5 [0] : vector<1352x10xf32> to vector<10xf32>
    %13 = vector.shape_cast %12 : vector<10xf32> to vector<1x10xf32>
    %cst_6 = arith.constant 1.352000e+03 : f32
    %14 = vector.broadcast %cst_6 : f32 to vector<1x10xf32>
    %15 = arith.divf %13, %14 : vector<1x10xf32>
    %16 = vector.broadcast %15 : vector<1x10xf32> to vector<1352x10xf32>
    %17 = arith.subf %11, %16 : vector<1352x10xf32>
    %18 = arith.mulf %17, %17 : vector<1352x10xf32>
    %cst_7 = arith.constant dense<0.000000e+00> : vector<10xf32>
    %19 = vector.multi_reduction <add>, %18, %cst_7 [0] : vector<1352x10xf32> to vector<10xf32>
    %20 = vector.shape_cast %19 : vector<10xf32> to vector<1x10xf32>
    %cst_8 = arith.constant 1.352000e+03 : f32
    %21 = vector.broadcast %cst_8 : f32 to vector<1x10xf32>
    %22 = arith.divf %20, %21 : vector<1x10xf32>
    %23 = vector.broadcast %2 : vector<1x10xf32> to vector<1352x10xf32>
    %24 = arith.mulf %23, %17 : vector<1352x10xf32>
    %cst_9 = arith.constant 9.99999974E-6 : f32
    %25 = vector.broadcast %cst_9 : f32 to vector<1x10xf32>
    %26 = arith.addf %22, %25 : vector<1x10xf32>
    %27 = math.rsqrt %26 : vector<1x10xf32>
    %28 = vector.broadcast %27 : vector<1x10xf32> to vector<1352x10xf32>
    %29 = arith.mulf %24, %28 : vector<1352x10xf32>
    %30 = vector.broadcast %3 : vector<1x10xf32> to vector<1352x10xf32>
    %31 = arith.addf %29, %30 : vector<1352x10xf32>
    %cst_10 = arith.constant 0.000000e+00 : f32
    %32 = vector.broadcast %cst_10 : f32 to vector<1352x10xf32>
    %33 = arith.maximumf %31, %32 : vector<1352x10xf32>
    %34 = vector.extract_strided_slice %33 {offsets = [0, 0], sizes = [338, 10], strides = [1, 1]} : vector<1352x10xf32> to vector<338x10xf32>
    %35 = vector.extract_strided_slice %33 {offsets = [338, 0], sizes = [338, 10], strides = [1, 1]} : vector<1352x10xf32> to vector<338x10xf32>
    %36 = arith.addf %34, %35 : vector<338x10xf32>
    %37 = vector.extract_strided_slice %33 {offsets = [676, 0], sizes = [338, 10], strides = [1, 1]} : vector<1352x10xf32> to vector<338x10xf32>
    %38 = arith.addf %36, %37 : vector<338x10xf32>
    %39 = vector.extract_strided_slice %33 {offsets = [1014, 0], sizes = [338, 10], strides = [1, 1]} : vector<1352x10xf32> to vector<338x10xf32>
    %40 = arith.addf %38, %39 : vector<338x10xf32>
    %cst_11 = arith.constant 2.500000e-01 : f32
    %41 = vector.broadcast %cst_11 : f32 to vector<338x10xf32>
    %42 = arith.mulf %41, %40 : vector<338x10xf32>
    %cst_12 = arith.constant 0.000000e+00 : f32
    %43 = vector.broadcast %cst_12 : f32 to vector<324x10xf32>
    %44 = vector.extract_strided_slice %42 {offsets = [0, 0], sizes = [324, 10], strides = [1, 1]} : vector<338x10xf32> to vector<324x10xf32>
    %c0_13 = arith.constant 0 : index
    %c0_14 = arith.constant 0 : index
    %c0_15 = arith.constant 0 : index
    %45 = vector.load %arg2[%c0_13, %c0_14, %c0_15] : memref<4x10x10xf32, #tpu.memory_space<vmem>>, vector<1x10x10xf32>
    %46 = vector.shape_cast %45 : vector<1x10x10xf32> to vector<10x10xf32>
    %cst_16 = arith.constant dense<0.000000e+00> : vector<324x10xf32>
    %47 = tpu.matmul %44, %46, %cst_16 {dimension_numbers = #tpu.dot_dimension_numbers<[1], [0], [0], [1], [0, 0, 1, 1], [], []>} : vector<324x10xf32>, vector<10x10xf32>, vector<324x10xf32> -> vector<324x10xf32>
    %48 = arith.addf %43, %47 : vector<324x10xf32>
    %49 = vector.extract_strided_slice %42 {offsets = [1, 0], sizes = [324, 10], strides = [1, 1]} : vector<338x10xf32> to vector<324x10xf32>
    %c1 = arith.constant 1 : index
    %c0_17 = arith.constant 0 : index
    %c0_18 = arith.constant 0 : index
    %50 = vector.load %arg2[%c1, %c0_17, %c0_18] : memref<4x10x10xf32, #tpu.memory_space<vmem>>, vector<1x10x10xf32>
    %51 = vector.shape_cast %50 : vector<1x10x10xf32> to vector<10x10xf32>
    %cst_19 = arith.constant dense<0.000000e+00> : vector<324x10xf32>
    %52 = tpu.matmul %49, %51, %cst_19 {dimension_numbers = #tpu.dot_dimension_numbers<[1], [0], [0], [1], [0, 0, 1, 1], [], []>} : vector<324x10xf32>, vector<10x10xf32>, vector<324x10xf32> -> vector<324x10xf32>
    %53 = arith.addf %48, %52 : vector<324x10xf32>
    %54 = vector.extract_strided_slice %42 {offsets = [13, 0], sizes = [324, 10], strides = [1, 1]} : vector<338x10xf32> to vector<324x10xf32>
    %c2 = arith.constant 2 : index
    %c0_20 = arith.constant 0 : index
    %c0_21 = arith.constant 0 : index
    %55 = vector.load %arg2[%c2, %c0_20, %c0_21] : memref<4x10x10xf32, #tpu.memory_space<vmem>>, vector<1x10x10xf32>
    %56 = vector.shape_cast %55 : vector<1x10x10xf32> to vector<10x10xf32>
    %cst_22 = arith.constant dense<0.000000e+00> : vector<324x10xf32>
    %57 = tpu.matmul %54, %56, %cst_22 {dimension_numbers = #tpu.dot_dimension_numbers<[1], [0], [0], [1], [0, 0, 1, 1], [], []>} : vector<324x10xf32>, vector<10x10xf32>, vector<324x10xf32> -> vector<324x10xf32>
    %58 = arith.addf %53, %57 : vector<324x10xf32>
    %59 = vector.extract_strided_slice %42 {offsets = [14, 0], sizes = [324, 10], strides = [1, 1]} : vector<338x10xf32> to vector<324x10xf32>
    %c3 = arith.constant 3 : index
    %c0_23 = arith.constant 0 : index
    %c0_24 = arith.constant 0 : index
    %60 = vector.load %arg2[%c3, %c0_23, %c0_24] : memref<4x10x10xf32, #tpu.memory_space<vmem>>, vector<1x10x10xf32>
    %61 = vector.shape_cast %60 : vector<1x10x10xf32> to vector<10x10xf32>
    %cst_25 = arith.constant dense<0.000000e+00> : vector<324x10xf32>
    %62 = tpu.matmul %59, %61, %cst_25 {dimension_numbers = #tpu.dot_dimension_numbers<[1], [0], [0], [1], [0, 0, 1, 1], [], []>} : vector<324x10xf32>, vector<10x10xf32>, vector<324x10xf32> -> vector<324x10xf32>
    %63 = arith.addf %58, %62 : vector<324x10xf32>
    %64 = vector.broadcast %4 : vector<1x10xf32> to vector<324x10xf32>
    %65 = arith.addf %63, %64 : vector<324x10xf32>
    %66 = tpu.iota {dimensions = array<i32: 0>} : vector<2x324xi32>
    %67 = tpu.iota {dimensions = array<i32: 1>} : vector<2x324xi32>
    %c169_i32 = arith.constant 169 : i32
    %68 = vector.broadcast %c169_i32 : i32 to vector<2x324xi32>
    %69 = arith.muli %66, %68 : vector<2x324xi32>
    %70 = arith.subi %67, %69 : vector<2x324xi32>
    %c0_i32 = arith.constant 0 : i32
    %71 = vector.broadcast %c0_i32 : i32 to vector<2x324xi32>
    %72 = arith.cmpi sge, %70, %71 : vector<2x324xi32>
    %c155_i32 = arith.constant 155 : i32
    %73 = vector.broadcast %c155_i32 : i32 to vector<2x324xi32>
    %74 = arith.cmpi slt, %70, %73 : vector<2x324xi32>
    %75 = arith.andi %72, %74 : vector<2x324xi1>
    %c13_i32 = arith.constant 13 : i32
    %c0_i32_26 = arith.constant 0 : i32
    %76 = arith.cmpi eq, %c13_i32, %c0_i32_26 : i32
    %c1_i32 = arith.constant 1 : i32
    %77 = arith.select %76, %c1_i32, %c13_i32 : i32
    %78 = vector.broadcast %77 : i32 to vector<2x324xi32>
    %79 = arith.remsi %67, %78 : vector<2x324xi32>
    %c0_i32_27 = arith.constant 0 : i32
    %80 = vector.broadcast %c0_i32_27 : i32 to vector<2x324xi32>
    %81 = arith.cmpi ne, %79, %80 : vector<2x324xi32>
    %c0_i32_28 = arith.constant 0 : i32
    %82 = vector.broadcast %c0_i32_28 : i32 to vector<2x324xi32>
    %83 = arith.cmpi slt, %79, %82 : vector<2x324xi32>
    %c0_i32_29 = arith.constant 0 : i32
    %84 = arith.cmpi slt, %77, %c0_i32_29 : i32
    %85 = vector.broadcast %84 : i1 to vector<2x324xi1>
    %86 = vector.broadcast %85 : vector<2x324xi1> to vector<2x324xi1>
    %87 = arith.xori %83, %86 : vector<2x324xi1>
    %88 = arith.andi %87, %81 : vector<2x324xi1>
    %89 = vector.broadcast %77 : i32 to vector<2x324xi32>
    %90 = arith.addi %79, %89 : vector<2x324xi32>
    %91 = arith.select %88, %90, %79 : vector<2x324xi1>, vector<2x324xi32>
    %c12_i32 = arith.constant 12 : i32
    %92 = vector.broadcast %c12_i32 : i32 to vector<2x324xi32>
    %93 = arith.cmpi slt, %91, %92 : vector<2x324xi32>
    %94 = arith.andi %75, %93 : vector<2x324xi1>
    %95 = arith.extui %94 : vector<2x324xi1> to vector<2x324xi32>
    %96 = arith.sitofp %95 : vector<2x324xi32> to vector<2x324xf32>
    %cst_30 = arith.constant dense<0.000000e+00> : vector<2x10xf32>
    %97 = tpu.matmul %96, %65, %cst_30 {dimension_numbers = #tpu.dot_dimension_numbers<[1], [0], [0], [1], [0, 0, 1, 1], [], []>} : vector<2x324xf32>, vector<324x10xf32>, vector<2x10xf32> -> vector<2x10xf32>
    %cst_31 = arith.constant dense<0.000000e+00> : vector<10xf32>
    %98 = vector.multi_reduction <add>, %97, %cst_31 [0] : vector<2x10xf32> to vector<10xf32>
    %99 = vector.shape_cast %98 : vector<10xf32> to vector<1x10xf32>
    %cst_32 = arith.constant 2.880000e+02 : f32
    %100 = vector.broadcast %cst_32 : f32 to vector<1x10xf32>
    %101 = arith.divf %99, %100 : vector<1x10xf32>
    %102 = vector.broadcast %101 : vector<1x10xf32> to vector<324x10xf32>
    %103 = arith.subf %65, %102 : vector<324x10xf32>
    %104 = arith.mulf %103, %103 : vector<324x10xf32>
    %cst_33 = arith.constant dense<0.000000e+00> : vector<2x10xf32>
    %105 = tpu.matmul %96, %104, %cst_33 {dimension_numbers = #tpu.dot_dimension_numbers<[1], [0], [0], [1], [0, 0, 1, 1], [], []>} : vector<2x324xf32>, vector<324x10xf32>, vector<2x10xf32> -> vector<2x10xf32>
    %cst_34 = arith.constant dense<0.000000e+00> : vector<10xf32>
    %106 = vector.multi_reduction <add>, %105, %cst_34 [0] : vector<2x10xf32> to vector<10xf32>
    %107 = vector.shape_cast %106 : vector<10xf32> to vector<1x10xf32>
    %cst_35 = arith.constant 2.880000e+02 : f32
    %108 = vector.broadcast %cst_35 : f32 to vector<1x10xf32>
    %109 = arith.divf %107, %108 : vector<1x10xf32>
    %cst_36 = arith.constant 9.99999974E-6 : f32
    %110 = vector.broadcast %cst_36 : f32 to vector<1x10xf32>
    %111 = arith.addf %109, %110 : vector<1x10xf32>
    %112 = math.rsqrt %111 : vector<1x10xf32>
    %113 = vector.broadcast %5 : vector<1x10xf32> to vector<324x10xf32>
    %114 = arith.mulf %113, %103 : vector<324x10xf32>
    %115 = vector.broadcast %112 : vector<1x10xf32> to vector<324x10xf32>
    %116 = arith.mulf %114, %115 : vector<324x10xf32>
    %117 = vector.broadcast %6 : vector<1x10xf32> to vector<324x10xf32>
    %118 = arith.addf %116, %117 : vector<324x10xf32>
    %cst_37 = arith.constant 0.000000e+00 : f32
    %119 = vector.broadcast %cst_37 : f32 to vector<324x10xf32>
    %120 = arith.maximumf %118, %119 : vector<324x10xf32>
    %cst_38 = arith.constant dense<0.000000e+00> : vector<2x10xf32>
    %121 = tpu.matmul %96, %120, %cst_38 {dimension_numbers = #tpu.dot_dimension_numbers<[1], [0], [0], [1], [0, 0, 1, 1], [], []>} : vector<2x324xf32>, vector<324x10xf32>, vector<2x10xf32> -> vector<2x10xf32>
    %cst_39 = arith.constant 0.0069444445 : f32
    %122 = vector.broadcast %cst_39 : f32 to vector<2x10xf32>
    %123 = arith.mulf %121, %122 : vector<2x10xf32>
    %c0_40 = arith.constant 0 : index
    %c0_41 = arith.constant 0 : index
    %124 = vector.load %arg4[%c0_40, %c0_41] : memref<2x10xf32, #tpu.memory_space<vmem>>, vector<2x10xf32>
    tpu.vector_store %arg4[%c0_40, %c0_41], %123 {strides = array<i32>} : memref<2x10xf32, #tpu.memory_space<vmem>>, vector<2x10xf32>,
    return
  }
}

</mosaic_0001>

<bundles_post_ra>
// kernel: fashion_mnist_forward.1
= control target key start
LH: loop header
LB: loop body
LE: loop exit
PB: predicated region body
PF: predicated region fallthrough
CT: control target
= control target key end

     0   :  { %vm702_vm0 = vcmask 1040384   ;;  %v16804_v1 = vmov 0.0   ;;  %vm8627_vm1 = vmmov 0   ;;  %vm194_vm2 = vcmask 72704   ;;  %s16793_s0 = inlined_call_operand.vmem [shape: f32[1352,9], index: 0, kind: input, shape index: {}]   ;;  %s16794_s1 = inlined_call_operand.vmem [shape: f32[9,10], index: 1, kind: input, shape index: {}]   ;;  %s16795_s2 = inlined_call_operand.vmem [shape: f32[4,10,10], index: 2, kind: input, shape index: {}]   ;;  %s16796_s3 = inlined_call_operand.vmem [shape: f32[8,10], index: 3, kind: input, shape index: {}]   ;;  %s16797_s4 = inlined_call_operand.hbm [shape: f32[2,10], index: 4, kind: output, shape index: {}]  }
   0x1   :  { %v189_v0 = vld [vmem:[%s16794_s1 + $0x8] sm:$0x1]  ;;  %7505 = vmatprep.subr.mxu0 %v16804_v1  ;;  %v188_v2 = vld [vmem:[%s16794_s1] sm:$0xff]  ;;  %7509 = vmatprep.mubr.msk.f32.mxu0 %vm8627_vm1, %v16804_v1  ;;  %v21_v5 = vld [vmem:[%s16793_s0 + $0x10] sm:$0xff] }
   0x2   :  { %7506 = vmatpush3.msk.msra.mxu0 %vm702_vm0, %v189_v0  ;;  %v19_v3 = vld [vmem:[%s16793_s0] sm:$0xff]  ;;  %8016 = vmatprep.subr.mxu1 %v16804_v1  ;;  %v20_v4 = vld [vmem:[%s16793_s0 + $0x8] sm:$0xff] }
   0x3   :  { %7507 = vmatprep.subr.mxu0 %v16804_v1  ;;  %8020 = vmatprep.mubr.msk.f32.mxu1 %vm8627_vm1, %v16804_v1 }
   0x4   :  { %7508 = vmatpush3.msra.mxu0 %v188_v2 }
   0x5   :  { %7510 = vmatmul.mubr.msk.f32.vlgmr.msra.gmra.mxu0 %vm194_vm2, %v19_v3 }
   0x6   :  { %7512 = vmatprep.mubr.msk.f32.mxu0 %vm8627_vm1, %v16804_v1 }
   0x9   :  { %7513 = vmatmul.mubr.msk.f32.gmra.mxu0 %vm194_vm2, %v20_v4 }
   0xa   :  { %7515 = vmatprep.mubr.msk.f32.mxu0 %vm8627_vm1, %v16804_v1 }
   0xb   :  { %9 = vsyncpa [#allocation3], 0  ;;  %v22_v6 = vld [vmem:[%s16793_s0 + $0x18] sm:$0xff]  ;;  %v23_v7 = vld [vmem:[%s16793_s0 + $0x20] sm:$0xff]  ;;  %vm1616_vm3 = vcmask 80896   ;;  %vm3801_vm4 = vcmask 1041408  }
   0xc   :  { %v24_v8 = vld [vmem:[%s16793_s0 + $0x28] sm:$0xff]  ;;  %v25_v9 = vld [vmem:[%s16793_s0 + $0x30] sm:$0xff]  ;;  %v26_v10 = vld [vmem:[%s16793_s0 + $0x38] sm:$0xff]  ;;  %vm3373_vm5 = vcmask 1045504   ;;  %vm3587_vm6 = vcmask 1043456   ;;  %vm4062_vm7 = vcmask 1046528  }
   0xd   :  { %7516 = vmatmul.mubr.msk.f32.gmra.mxu0 %vm194_vm2, %v21_v5  ;;  %v27_v11 = vld [vmem:[%s16793_s0 + $0x40] sm:$0xff]  ;;  %v28_v12 = vld [vmem:[%s16793_s0 + $0x48] sm:$0xff]  ;;  %v29_v13 = vld [vmem:[%s16793_s0 + $0x50] sm:$0xff]  ;;  %vm4859_vm8 = vcmask 1042432  }
   0xe   :  { %7518 = vmatprep.mubr.msk.f32.mxu0 %vm8627_vm1, %v16804_v1  ;;  %v30_v14 = vld [vmem:[%s16793_s0 + $0x58] sm:$0xff]  ;;  %v31_v15 = vld [vmem:[%s16793_s0 + $0x60] sm:$0xff]  ;;  %v32_v16 = vld [vmem:[%s16793_s0 + $0x68] sm:$0xff] }
   0xf   :  { %v33_v17 = vld [vmem:[%s16793_s0 + $0x70] sm:$0xff]  ;;  %v34_v18 = vld [vmem:[%s16793_s0 + $0x78] sm:$0xff]  ;;  %v35_v19 = vld [vmem:[%s16793_s0 + $0x80] sm:$0xff] }
  0x10   :  { %v36_v20 = vld [vmem:[%s16793_s0 + $0x88] sm:$0xff]  ;;  %v37_v21 = vld [vmem:[%s16793_s0 + $0x90] sm:$0xff]  ;;  %v38_v22 = vld [vmem:[%s16793_s0 + $0x98] sm:$0xff] }
  0x11   :  { %7519 = vmatmul.mubr.msk.f32.gmra.mxu0 %vm194_vm2, %v22_v6  ;;  %v39_v23 = vld [vmem:[%s16793_s0 + $0xa0] sm:$0xff]  ;;  %v40_v24 = vld [vmem:[%s16793_s0 + $0xa8] sm:$0xff]  ;;  %v41_v25 = vld [vmem:[%s16793_s0 + $0xb0] sm:$0xff] }
  0x12   :  { %7521 = vmatprep.mubr.msk.f32.mxu0 %vm8627_vm1, %v16804_v1  ;;  %v42_v26 = vld [vmem:[%s16793_s0 + $0xb8] sm:$0xff]  ;;  %v43_v27 = vld [vmem:[%s16793_s0 + $0xc0] sm:$0xff]  ;;  %v44_v28 = vld [vmem:[%s16793_s0 + $0xc8] sm:$0xff] }
  0x13   :  { %v45_v29 = vld [vmem:[%s16793_s0 + $0xd0] sm:$0xff]  ;;  %v46_v30 = vld [vmem:[%s16793_s0 + $0xd8] sm:$0xff]  ;;  %v47_v31 = vld [vmem:[%s16793_s0 + $0xe0] sm:$0xff] }
  0x14   :  { %v48_v32 = vld [vmem:[%s16793_s0 + $0xe8] sm:$0xff]  ;;  %v49_v33 = vld [vmem:[%s16793_s0 + $0xf0] sm:$0xff]  ;;  %v50_v34 = vld [vmem:[%s16793_s0 + $0xf8] sm:$0xff] }
  0x15   :  { %7522 = vmatmul.mubr.msk.f32.gmra.mxu0 %vm194_vm2, %v23_v7  ;;  %v51_v35 = vld [vmem:[%s16793_s0 + $0x100] sm:$0xff]  ;;  %v52_v36 = vld [vmem:[%s16793_s0 + $0x108] sm:$0xff]  ;;  %v53_v37 = vld [vmem:[%s16793_s0 + $0x110] sm:$0xff] }
  0x16   :  { %7524 = vmatprep.mubr.msk.f32.mxu0 %vm8627_vm1, %v16804_v1  ;;  %v54_v38 = vld [vmem:[%s16793_s0 + $0x118] sm:$0xff]  ;;  %v55_v39 = vld [vmem:[%s16793_s0 + $0x120] sm:$0xff]  ;;  %v56_v40 = vld [vmem:[%s16793_s0 + $0x128] sm:$0xff] }
  0x17   :  { %v57_v41 = vld [vmem:[%s16793_s0 + $0x130] sm:$0xff]  ;;  %v58_v42 = vld [vmem:[%s16793_s0 + $0x138] sm:$0xff]  ;;  %v59_v43 = vld [vmem:[%s16793_s0 + $0x140] sm:$0xff] }
  0x18   :  { %v60_v44 = vld [vmem:[%s16793_s0 + $0x148] sm:$0xff]  ;;  %v61_v45 = vld [vmem:[%s16793_s0 + $0x150] sm:$0xff]  ;;  %v62_v46 = vld [vmem:[%s16793_s0 + $0x158] sm:$0xff] }
  0x19   :  { %7525 = vmatmul.mubr.msk.f32.gmra.mxu0 %vm194_vm2, %v24_v8  ;;  %v63_v47 = vld [vmem:[%s16793_s0 + $0x160] sm:$0xff]  ;;  %v64_v48 = vld [vmem:[%s16793_s0 + $0x168] sm:$0xff]  ;;  %v65_v49 = vld [vmem:[%s16793_s0 + $0x170] sm:$0xff] }
  0x1a   :  { %7527 = vmatprep.mubr.msk.f32.mxu0 %vm8627_vm1, %v16804_v1  ;;  %v66_v50 = vld [vmem:[%s16793_s0 + $0x178] sm:$0xff]  ;;  %v67_v51 = vld [vmem:[%s16793_s0 + $0x180] sm:$0xff]  ;;  %v68_v53 = vld [vmem:[%s16793_s0 + $0x188] sm:$0xff] }
  0x1b   :  { %v69_v56 = vld [vmem:[%s16793_s0 + $0x190] sm:$0xff]  ;;  %v70_v59 = vld [vmem:[%s16793_s0 + $0x198] sm:$0xff]  ;;  %v71_v62 = vld [vmem:[%s16793_s0 + $0x1a0] sm:$0xff] }
  0x1c   :  { %v72_v2 = vld [vmem:[%s16793_s0 + $0x1a8] sm:$0xff]  ;;  %v73_v5 = vld [vmem:[%s16793_s0 + $0x1b0] sm:$0xff]  ;;  %v74_v8 = vld [vmem:[%s16793_s0 + $0x1b8] sm:$0xff] }
  0x1d   :  { %7528 = vmatmul.mubr.msk.f32.gmra.mxu0 %vm194_vm2, %v25_v9 }
  0x1e   :  { %7530 = vmatprep.mubr.msk.f32.mxu0 %vm8627_vm1, %v16804_v1 }
  0x21   :  { %7531 = vmatmul.mubr.msk.f32.gmra.mxu0 %vm194_vm2, %v26_v10 }
  0x22   :  { %7533 = vmatprep.mubr.msk.f32.mxu0 %vm8627_vm1, %v16804_v1 }
  0x25   :  { %7534 = vmatmul.mubr.msk.f32.gmra.mxu0 %vm194_vm2, %v27_v11  ;;  %v75_v11 = vld [vmem:[%s16793_s0 + $0x1c0] sm:$0xff] }
  0x26   :  { %7536 = vmatprep.mubr.msk.f32.mxu0 %vm8627_vm1, %v16804_v1 }
  0x29   :  { %7537 = vmatmul.mubr.msk.f32.gmra.mxu0 %vm194_vm2, %v28_v12 }
  0x2a   :  { %7539 = vmatprep.mubr.msk.f32.mxu0 %vm8627_vm1, %v16804_v1 }
  0x2d   :  { %7540 = vmatmul.mubr.msk.f32.gmra.mxu0 %vm194_vm2, %v29_v13 }
  0x2e   :  { %7542 = vmatprep.mubr.msk.f32.mxu0 %vm8627_vm1, %v16804_v1 }
  0x31   :  { %7543 = vmatmul.mubr.msk.f32.gmra.mxu0 %vm194_vm2, %v30_v14  ;;  %v76_v14 = vld [vmem:[%s16793_s0 + $0x1c8] sm:$0xff] }
  0x32   :  { %7545 = vmatprep.mubr.msk.f32.mxu0 %vm8627_vm1, %v16804_v1 }
  0x35   :  { %7546 = vmatmul.mubr.msk.f32.gmra.mxu0 %vm194_vm2, %v31_v15 }
  0x36   :  { %7548 = vmatprep.mubr.msk.f32.mxu0 %vm8627_vm1, %v16804_v1 }
  0x39   :  { %7549 = vmatmul.mubr.msk.f32.gmra.mxu0 %vm194_vm2, %v32_v16 }
  0x3a   :  { %7551 = vmatprep.mubr.msk.f32.mxu0 %vm8627_vm1, %v16804_v1 }
  0x3d   :  { %7552 = vmatmul.mubr.msk.f32.gmra.mxu0 %vm194_vm2, %v33_v17  ;;  %v77_v17 = vld [vmem:[%s16793_s0 + $0x1d0] sm:$0xff] }
  0x3e   :  { %7554 = vmatprep.mubr.msk.f32.mxu0 %vm8627_vm1, %v16804_v1 }
  0x41   :  { %7555 = vmatmul.mubr.msk.f32.gmra.mxu0 %vm194_vm2, %v34_v18 }
  0x42   :  { %7557 = vmatprep.mubr.msk.f32.mxu0 %vm8627_vm1, %v16804_v1 }
  0x45   :  { %7558 = vmatmul.mubr.msk.f32.gmra.mxu0 %vm194_vm2, %v35_v19 }
  0x46   :  { %7560 = vmatprep.mubr.msk.f32.mxu0 %vm8627_vm1, %v16804_v1 }
  0x49   :  { %7561 = vmatmul.mubr.msk.f32.gmra.mxu0 %vm194_vm2, %v36_v20  ;;  %v78_v20 = vld [vmem:[%s16793_s0 + $0x1d8] sm:$0xff] }
  0x4a   :  { %7563 = vmatprep.mubr.msk.f32.mxu0 %vm8627_vm1, %v16804_v1 }
  0x4d   :  { %7564 = vmatmul.mubr.msk.f32.gmra.mxu0 %vm194_vm2, %v37_v21 }
  0x4e   :  { %7566 = vmatprep.mubr.msk.f32.mxu0 %vm8627_vm1, %v16804_v1 }
  0x51   :  { %7567 = vmatmul.mubr.msk.f32.gmra.mxu0 %vm194_vm2, %v38_v22 }
  0x52   :  { %7569 = vmatprep.mubr.msk.f32.mxu0 %vm8627_vm1, %v16804_v1 }
  0x55   :  { %7570 = vmatmul.mubr.msk.f32.gmra.mxu0 %vm194_vm2, %v39_v23  ;;  %v79_v23 = vld [vmem:[%s16793_s0 + $0x1e0] sm:$0xff] }
  0x56   :  { %7572 = vmatprep.mubr.msk.f32.mxu0 %vm8627_vm1, %v16804_v1 }
  0x59   :  { %7573 = vmatmul.mubr.msk.f32.gmra.mxu0 %vm194_vm2, %v40_v24 }
  0x5a   :  { %7575 = vmatprep.mubr.msk.f32.mxu0 %vm8627_vm1, %v16804_v1 }
  0x5d   :  { %7576 = vmatmul.mubr.msk.f32.gmra.mxu0 %vm194_vm2, %v41_v25 }
  0x5e   :  { %7578 = vmatprep.mubr.msk.f32.mxu0 %vm8627_vm1, %v16804_v1 }
  0x61   :  { %7579 = vmatmul.mubr.msk.f32.gmra.mxu0 %vm194_vm2, %v42_v26  ;;  %v80_v26 = vld [vmem:[%s16793_s0 + $0x1e8] sm:$0xff] }
  0x62   :  { %7581 = vmatprep.mubr.msk.f32.mxu0 %vm8627_vm1, %v16804_v1 }
  0x65   :  { %7582 = vmatmul.mubr.msk.f32.gmra.mxu0 %vm194_vm2, %v43_v27 }
  0x66   :  { %7584 = vmatprep.mubr.msk.f32.mxu0 %vm8627_vm1, %v16804_v1 }
  0x69   :  { %7585 = vmatmul.mubr.msk.f32.gmra.mxu0 %vm194_vm2, %v44_v28 }
  0x6a   :  { %7587 = vmatprep.mubr.msk.f32.mxu0 %vm8627_vm1, %v16804_v1 }
  0x6d   :  { %7588 = vmatmul.mubr.msk.f32.gmra.mxu0 %vm194_vm2, %v45_v29  ;;  %v81_v29 = vld [vmem:[%s16793_s0 + $0x1f0] sm:$0xff] }
  0x6e   :  { %7590 = vmatprep.mubr.msk.f32.mxu0 %vm8627_vm1, %v16804_v1 }
  0x71   :  { %7591 = vmatmul.mubr.msk.f32.gmra.mxu0 %vm194_vm2, %v46_v30 }
  0x72   :  { %7593 = vmatprep.mubr.msk.f32.mxu0 %vm8627_vm1, %v16804_v1 }
  0x75   :  { %7594 = vmatmul.mubr.msk.f32.gmra.mxu0 %vm194_vm2, %v47_v31 }
  0x76   :  { %7596 = vmatprep.mubr.msk.f32.mxu0 %vm8627_vm1, %v16804_v1 }
  0x79   :  { %7597 = vmatmul.mubr.msk.f32.gmra.mxu0 %vm194_vm2, %v48_v32  ;;  %v82_v32 = vld [vmem:[%s16793_s0 + $0x1f8] sm:$0xff] }
  0x7a   :  { %7599 = vmatprep.mubr.msk.f32.mxu0 %vm8627_vm1, %v16804_v1 }
  0x7d   :  { %7600 = vmatmul.mubr.msk.f32.gmra.mxu0 %vm194_vm2, %v49_v33 }
  0x7e   :  { %7602 = vmatprep.mubr.msk.f32.mxu0 %vm8627_vm1, %v16804_v1 }
  0x81   :  { %7603 = vmatmul.mubr.msk.f32.gmra.mxu0 %vm194_vm2, %v50_v34 }
  0x82   :  { %7605 = vmatprep.mubr.msk.f32.mxu0 %vm8627_vm1, %v16804_v1 }
  0x85   :  { %7606 = vmatmul.mubr.msk.f32.gmra.mxu0 %vm194_vm2, %v51_v35  ;;  %v83_v35 = vld [vmem:[%s16793_s0 + $0x200] sm:$0xff] }
  0x86   :  { %7608 = vmatprep.mubr.msk.f32.mxu0 %vm8627_vm1, %v16804_v1 }
  0x89   :  { %7609 = vmatmul.mubr.msk.f32.gmra.mxu0 %vm194_vm2, %v52_v36 }
  0x8a   :  { %7611 = vmatprep.mubr.msk.f32.mxu0 %vm8627_vm1, %v16804_v1 }
  0x8d   :  { %7612 = vmatmul.mubr.msk.f32.gmra.mxu0 %vm194_vm2, %v53_v37 }
  0x8e   :  { %7614 = vmatprep.mubr.msk.f32.mxu0 %vm8627_vm1, %v16804_v1 }
  0x91   :  { %7615 = vmatmul.mubr.msk.f32.gmra.mxu0 %vm194_vm2, %v54_v38  ;;  %v84_v38 = vld [vmem:[%s16793_s0 + $0x208] sm:$0xff] }
  0x92   :  { %7617 = vmatprep.mubr.msk.f32.mxu0 %vm8627_vm1, %v16804_v1 }
  0x95   :  { %7618 = vmatmul.mubr.msk.f32.gmra.mxu0 %vm194_vm2, %v55_v39 }
  0x96   :  { %7620 = vmatprep.mubr.msk.f32.mxu0 %vm8627_vm1, %v16804_v1 }
  0x99   :  { %7621 = vmatmul.mubr.msk.f32.gmra.mxu0 %vm194_vm2, %v56_v40 }
  0x9a   :  { %7623 = vmatprep.mubr.msk.f32.mxu0 %vm8627_vm1, %v16804_v1 }
  0x9d   :  { %7624 = vmatmul.mubr.msk.f32.gmra.mxu0 %vm194_vm2, %v57_v41  ;;  %v85_v41 = vld [vmem:[%s16793_s0 + $0x210] sm:$0xff] }
  0x9e   :  { %7626 = vmatprep.mubr.msk.f32.mxu0 %vm8627_vm1, %v16804_v1 }
  0xa1   :  { %7627 = vmatmul.mubr.msk.f32.gmra.mxu0 %vm194_vm2, %v58_v42 }
  0xa2   :  { %7629 = vmatprep.mubr.msk.f32.mxu0 %vm8627_vm1, %v16804_v1 }
  0xa5   :  { %7630 = vmatmul.mubr.msk.f32.gmra.mxu0 %vm194_vm2, %v59_v43 }
  0xa6   :  { %7632 = vmatprep.mubr.msk.f32.mxu0 %vm8627_vm1, %v16804_v1 }
  0xa9   :  { %7633 = vmatmul.mubr.msk.f32.gmra.mxu0 %vm194_vm2, %v60_v44  ;;  %v86_v44 = vld [vmem:[%s16793_s0 + $0x218] sm:$0xff] }
  0xaa   :  { %7635 = vmatprep.mubr.msk.f32.mxu0 %vm8627_vm1, %v16804_v1 }
  0xad   :  { %7636 = vmatmul.mubr.msk.f32.gmra.mxu0 %vm194_vm2, %v61_v45 }
  0xae   :  { %7638 = vmatprep.mubr.msk.f32.mxu0 %vm8627_vm1, %v16804_v1 }
  0xb1   :  { %7639 = vmatmul.mubr.msk.f32.gmra.mxu0 %vm194_vm2, %v62_v46 }
  0xb2   :  { %7641 = vmatprep.mubr.msk.f32.mxu0 %vm8627_vm1, %v16804_v1 }
  0xb5   :  { %7642 = vmatmul.mubr.msk.f32.gmra.mxu0 %vm194_vm2, %v63_v47  ;;  %v87_v47 = vld [vmem:[%s16793_s0 + $0x220] sm:$0xff] }
  0xb6   :  { %7644 = vmatprep.mubr.msk.f32.mxu0 %vm8627_vm1, %v16804_v1 }
  0xb9   :  { %7645 = vmatmul.mubr.msk.f32.gmra.mxu0 %vm194_vm2, %v64_v48 }
  0xba   :  { %7647 = vmatprep.mubr.msk.f32.mxu0 %vm8627_vm1, %v16804_v1 }
  0xbd   :  { %7648 = vmatmul.mubr.msk.f32.gmra.mxu0 %vm194_vm2, %v65_v49 }
  0xbe   :  { %7650 = vmatprep.mubr.msk.f32.mxu0 %vm8627_vm1, %v16804_v1 }
  0xc1   :  { %7651 = vmatmul.mubr.msk.f32.gmra.mxu0 %vm194_vm2, %v66_v50  ;;  %v88_v50 = vld [vmem:[%s16793_s0 + $0x228] sm:$0xff] }
  0xc2   :  { %7653 = vmatprep.mubr.msk.f32.mxu0 %vm8627_vm1, %v16804_v1 }
  0xc5   :  { %v8959_v52 = vpop.f32.mrf.mxu0  ;;  %7654 = vmatmul.mubr.msk.f32.gmra.mxu0 %vm194_vm2, %v67_v51 }
  0xc6   :  { %7656 = vmatprep.mubr.msk.f32.mxu0 %vm8627_vm1, %v16804_v1 }
  0xc7   :  { %v7511_v54 = vpop.f32.mrf.mxu0 }
  0xc8   :  { %v89_v54 = vld [vmem:[%s16793_s0 + $0x230] sm:$0xff] }
  0xc9   :  { %v8967_v55 = vpop.f32.mrf.mxu0  ;;  %7657 = vmatmul.mubr.msk.f32.gmra.mxu0 %vm194_vm2, %v68_v53 }
  0xca   :  { %7659 = vmatprep.mubr.msk.f32.mxu0 %vm8627_vm1, %v16804_v1 }
  0xcb   :  { %v7514_v57 = vpop.f32.mrf.mxu0 }
  0xcd   :  { %v8975_v58 = vpop.f32.mrf.mxu0  ;;  %7660 = vmatmul.mubr.msk.f32.gmra.mxu0 %vm194_vm2, %v69_v56 }
  0xce   :  { %7662 = vmatprep.mubr.msk.f32.mxu0 %vm8627_vm1, %v16804_v1 }
  0xcf   :  { %v7517_v60 = vpop.f32.mrf.mxu0 }
  0xd1   :  { %v8983_v61 = vpop.f32.mrf.mxu0  ;;  %7663 = vmatmul.mubr.msk.f32.gmra.mxu0 %vm194_vm2, %v70_v59  ;;  %v90_v59 = vld [vmem:[%s16793_s0 + $0x238] sm:$0xff] }
  0xd2   :  { %7665 = vmatprep.mubr.msk.f32.mxu0 %vm8627_vm1, %v16804_v1 }
  0xd3   :  { %v7520_v63 = vpop.f32.mrf.mxu0 }
  0xd4   :  { %v91_v63 = vld [vmem:[%s16793_s0 + $0x240] sm:$0xff] }
  0xd5   :  { %v8991_v0 = vpop.f32.mrf.mxu0  ;;  %7666 = vmatmul.mubr.msk.f32.gmra.mxu0 %vm194_vm2, %v71_v62 }
  0xd6   :  { %7668 = vmatprep.mubr.msk.f32.mxu0 %vm8627_vm1, %v16804_v1 }
  0xd7   :  { %v7523_v3 = vpop.f32.mrf.mxu0 }
  0xd9   :  { %v8999_v4 = vpop.f32.mrf.mxu0  ;;  %7669 = vmatmul.mubr.msk.f32.gmra.mxu0 %vm194_vm2, %v72_v2 }
  0xda   :  { %7671 = vmatprep.mubr.msk.f32.mxu0 %vm8627_vm1, %v16804_v1 }
  0xdb   :  { %v7526_v6 = vpop.f32.mrf.mxu0 }
  0xdd   :  { %v9007_v7 = vpop.f32.mrf.mxu0  ;;  %7672 = vmatmul.mubr.msk.f32.gmra.mxu0 %vm194_vm2, %v73_v5  ;;  %v92_v5 = vld [vmem:[%s16793_s0 + $0x248] sm:$0xff] }
  0xde   :  { %7674 = vmatprep.mubr.msk.f32.mxu0 %vm8627_vm1, %v16804_v1 }
  0xdf   :  { %v7529_v9 = vpop.f32.mrf.mxu0 }
  0xe0   :  { %v93_v9 = vld [vmem:[%s16793_s0 + $0x250] sm:$0xff] }
  0xe1   :  { %v9015_v10 = vpop.f32.mrf.mxu0  ;;  %7675 = vmatmul.mubr.msk.f32.gmra.mxu0 %vm194_vm2, %v74_v8 }
  0xe2   :  { %7677 = vmatprep.mubr.msk.f32.mxu0 %vm8627_vm1, %v16804_v1 }
  0xe3   :  { %v7532_v12 = vpop.f32.mrf.mxu0 }
  0xe5   :  { %v9023_v13 = vpop.f32.mrf.mxu0  ;;  %7678 = vmatmul.mubr.msk.f32.gmra.mxu0 %vm194_vm2, %v75_v11 }
  0xe6   :  { %7680 = vmatprep.mubr.msk.f32.mxu0 %vm8627_vm1, %v16804_v1 }
  0xe7   :  { %v7535_v15 = vpop.f32.mrf.mxu0 }
  0xe9   :  { %v9031_v16 = vpop.f32.mrf.mxu0  ;;  %7681 = vmatmul.mubr.msk.f32.gmra.mxu0 %vm194_vm2, %v76_v14  ;;  %v94_v14 = vld [vmem:[%s16793_s0 + $0x258] sm:$0xff] }
  0xea   :  { %7683 = vmatprep.mubr.msk.f32.mxu0 %vm8627_vm1, %v16804_v1 }
  0xeb   :  { %v7538_v18 = vpop.f32.mrf.mxu0 }
  0xec   :  { %v95_v18 = vld [vmem:[%s16793_s0 + $0x260] sm:$0xff] }
  0xed   :  { %v9039_v19 = vpop.f32.mrf.mxu0  ;;  %7684 = vmatmul.mubr.msk.f32.gmra.mxu0 %vm194_vm2, %v77_v17 }
  0xee   :  { %7686 = vmatprep.mubr.msk.f32.mxu0 %vm8627_vm1, %v16804_v1 }
  0xef   :  { %v7541_v21 = vpop.f32.mrf.mxu0 }
  0xf1   :  { %v9047_v22 = vpop.f32.mrf.mxu0  ;;  %7687 = vmatmul.mubr.msk.f32.gmra.mxu0 %vm194_vm2, %v78_v20 }
  0xf2   :  { %7689 = vmatprep.mubr.msk.f32.mxu0 %vm8627_vm1, %v16804_v1 }
  0xf3   :  { %v7544_v24 = vpop.f32.mrf.mxu0 }
  0xf5   :  { %v9055_v25 = vpop.f32.mrf.mxu0  ;;  %7690 = vmatmul.mubr.msk.f32.gmra.mxu0 %vm194_vm2, %v79_v23  ;;  %v96_v23 = vld [vmem:[%s16793_s0 + $0x268] sm:$0xff] }
  0xf6   :  { %7692 = vmatprep.mubr.msk.f32.mxu0 %vm8627_vm1, %v16804_v1 }
  0xf7   :  { %v7547_v27 = vpop.f32.mrf.mxu0 }
  0xf8   :  { %v97_v27 = vld [vmem:[%s16793_s0 + $0x270] sm:$0xff] }
  0xf9   :  { %v9063_v28 = vpop.f32.mrf.mxu0  ;;  %7693 = vmatmul.mubr.msk.f32.gmra.mxu0 %vm194_vm2, %v80_v26 }
  0xfa   :  { %7695 = vmatprep.mubr.msk.f32.mxu0 %vm8627_vm1, %v16804_v1 }
  0xfb   :  { %v7550_v30 = vpop.f32.mrf.mxu0 }
  0xfd   :  { %v9071_v31 = vpop.f32.mrf.mxu0  ;;  %7696 = vmatmul.mubr.msk.f32.gmra.mxu0 %vm194_vm2, %v81_v29 }
  0xfe   :  { %7698 = vmatprep.mubr.msk.f32.mxu0 %vm8627_vm1, %v16804_v1 }
  0xff   :  { %v7553_v33 = vpop.f32.mrf.mxu0 }
 0x101   :  { %v9079_v34 = vpop.f32.mrf.mxu0  ;;  %7699 = vmatmul.mubr.msk.f32.gmra.mxu0 %vm194_vm2, %v82_v32  ;;  %v98_v32 = vld [vmem:[%s16793_s0 + $0x278] sm:$0xff] }
 0x102   :  { %7701 = vmatprep.mubr.msk.f32.mxu0 %vm8627_vm1, %v16804_v1 }
 0x103   :  { %v7556_v36 = vpop.f32.mrf.mxu0 }
 0x104   :  { %v99_v36 = vld [vmem:[%s16793_s0 + $0x280] sm:$0xff] }
 0x105   :  { %v9087_v37 = vpop.f32.mrf.mxu0  ;;  %7702 = vmatmul.mubr.msk.f32.gmra.mxu0 %vm194_vm2, %v83_v35 }
 0x106   :  { %7704 = vmatprep.mubr.msk.f32.mxu0 %vm8627_vm1, %v16804_v1 }
 0x107   :  { %v7559_v39 = vpop.f32.mrf.mxu0 }
 0x109   :  { %v9095_v40 = vpop.f32.mrf.mxu0  ;;  %7705 = vmatmul.mubr.msk.f32.gmra.mxu0 %vm194_vm2, %v84_v38 }
 0x10a   :  { %7707 = vmatprep.mubr.msk.f32.mxu0 %vm8627_vm1, %v16804_v1 }
 0x10b   :  { %v7562_v42 = vpop.f32.mrf.mxu0 }
 0x10d   :  { %v9103_v43 = vpop.f32.mrf.mxu0  ;;  %7708 = vmatmul.mubr.msk.f32.gmra.mxu0 %vm194_vm2, %v85_v41  ;;  %v100_v41 = vld [vmem:[%s16793_s0 + $0x288] sm:$0xff] }
 0x10e   :  { %7710 = vmatprep.mubr.msk.f32.mxu0 %vm8627_vm1, %v16804_v1 }
 0x10f   :  { %v7565_v45 = vpop.f32.mrf.mxu0 }
 0x110   :  { %v101_v45 = vld [vmem:[%s16793_s0 + $0x290] sm:$0xff] }
 0x111   :  { %v9111_v46 = vpop.f32.mrf.mxu0  ;;  %7711 = vmatmul.mubr.msk.f32.gmra.mxu0 %vm194_vm2, %v86_v44 }
 0x112   :  { %7713 = vmatprep.mubr.msk.f32.mxu0 %vm8627_vm1, %v16804_v1 }
 0x113   :  { %v7568_v48 = vpop.f32.mrf.mxu0 }
 0x115   :  { %v9119_v49 = vpop.f32.mrf.mxu0  ;;  %7714 = vmatmul.mubr.msk.f32.gmra.mxu0 %vm194_vm2, %v87_v47 }
 0x116   :  { %7716 = vmatprep.mubr.msk.f32.mxu0 %vm8627_vm1, %v16804_v1 }
 0x117   :  { %v7571_v51 = vpop.f32.mrf.mxu0 }
 0x119   :  { %v9127_v53 = vpop.f32.mrf.mxu0  ;;  %7717 = vmatmul.mubr.msk.f32.gmra.mxu0 %vm194_vm2, %v88_v50  ;;  %v102_v50 = vld [vmem:[%s16793_s0 + $0x298] sm:$0xff] }
 0x11a   :  { %7719 = vmatprep.mubr.msk.f32.mxu0 %vm8627_vm1, %v16804_v1 }
 0x11b   :  { %v7574_v56 = vpop.f32.mrf.mxu0 }
 0x11c   :  { %v103_v56 = vld [vmem:[%s16793_s0 + $0x2a0] sm:$0xff] }
 0x11d   :  { %v9135_v57 = vpop.f32.mrf.mxu0  ;;  %7720 = vmatmul.mubr.msk.f32.gmra.mxu0 %vm194_vm2, %v89_v54 }
 0x11e   :  { %7722 = vmatprep.mubr.msk.f32.mxu0 %vm8627_vm1, %v16804_v1 }
 0x11f   :  { %v7577_v60 = vpop.f32.mrf.mxu0 }
 0x121   :  { %v9143_v62 = vpop.f32.mrf.mxu0  ;;  %7723 = vmatmul.mubr.msk.f32.gmra.mxu0 %vm194_vm2, %v90_v59 }
 0x122   :  { %7725 = vmatprep.mubr.msk.f32.mxu0 %vm8627_vm1, %v16804_v1 }
 0x123   :  { %v7580_v2 = vpop.f32.mrf.mxu0 }
 0x125   :  { %v9151_v3 = vpop.f32.mrf.mxu0  ;;  %7726 = vmatmul.mubr.msk.f32.gmra.mxu0 %vm194_vm2, %v91_v63  ;;  %v104_v63 = vld [vmem:[%s16793_s0 + $0x2a8] sm:$0xff] }
 0x126   :  { %7728 = vmatprep.mubr.msk.f32.mxu0 %vm8627_vm1, %v16804_v1 }
 0x127   :  { %v7583_v6 = vpop.f32.mrf.mxu0 }
 0x128   :  { %v105_v6 = vld [vmem:[%s16793_s0 + $0x2b0] sm:$0xff] }
 0x129   :  { %v9159_v8 = vpop.f32.mrf.mxu0  ;;  %7729 = vmatmul.mubr.msk.f32.gmra.mxu0 %vm194_vm2, %v92_v5 }
 0x12a   :  { %7731 = vmatprep.mubr.msk.f32.mxu0 %vm8627_vm1, %v16804_v1 }
 0x12b   :  { %v7586_v11 = vpop.f32.mrf.mxu0 }
 0x12d   :  { %v9167_v12 = vpop.f32.mrf.mxu0  ;;  %7732 = vmatmul.mubr.msk.f32.gmra.mxu0 %vm194_vm2, %v93_v9 }
 0x12e   :  { %7734 = vmatprep.mubr.msk.f32.mxu0 %vm8627_vm1, %v16804_v1 }
 0x12f   :  { %v7589_v15 = vpop.f32.mrf.mxu0 }
 0x131   :  { %v9175_v17 = vpop.f32.mrf.mxu0  ;;  %7735 = vmatmul.mubr.msk.f32.gmra.mxu0 %vm194_vm2, %v94_v14  ;;  %v106_v14 = vld [vmem:[%s16793_s0 + $0x2b8] sm:$0xff] }
 0x132   :  { %7737 = vmatprep.mubr.msk.f32.mxu0 %vm8627_vm1, %v16804_v1 }
 0x133   :  { %v7592_v20 = vpop.f32.mrf.mxu0 }
 0x134   :  { %v107_v20 = vld [vmem:[%s16793_s0 + $0x2c0] sm:$0xff] }
 0x135   :  { %v9183_v21 = vpop.f32.mrf.mxu0  ;;  %7738 = vmatmul.mubr.msk.f32.gmra.mxu0 %vm194_vm2, %v95_v18 }
 0x136   :  { %7740 = vmatprep.mubr.msk.f32.mxu0 %vm8627_vm1, %v16804_v1 }
 0x137   :  { %v7595_v24 = vpop.f32.mrf.mxu0 }
 0x139   :  { %v9191_v26 = vpop.f32.mrf.mxu0  ;;  %7741 = vmatmul.mubr.msk.f32.gmra.mxu0 %vm194_vm2, %v96_v23 }
 0x13a   :  { %7743 = vmatprep.mubr.msk.f32.mxu0 %vm8627_vm1, %v16804_v1 }
 0x13b   :  { %v7598_v29 = vpop.f32.mrf.mxu0 }
 0x13d   :  { %v9199_v30 = vpop.f32.mrf.mxu0  ;;  %7744 = vmatmul.mubr.msk.f32.gmra.mxu0 %vm194_vm2, %v97_v27  ;;  %v108_v27 = vld [vmem:[%s16793_s0 + $0x2c8] sm:$0xff] }
 0x13e   :  { %7746 = vmatprep.mubr.msk.f32.mxu0 %vm8627_vm1, %v16804_v1 }
 0x13f   :  { %v7601_v33 = vpop.f32.mrf.mxu0 }
 0x140   :  { %v109_v33 = vld [vmem:[%s16793_s0 + $0x2d0] sm:$0xff] }
 0x141   :  { %v9207_v35 = vpop.f32.mrf.mxu0  ;;  %7747 = vmatmul.mubr.msk.f32.gmra.mxu0 %vm194_vm2, %v98_v32 }
 0x142   :  { %7749 = vmatprep.mubr.msk.f32.mxu0 %vm8627_vm1, %v16804_v1 }
 0x143   :  { %v7604_v38 = vpop.f32.mrf.mxu0 }
 0x145   :  { %v9215_v39 = vpop.f32.mrf.mxu0  ;;  %7750 = vmatmul.mubr.msk.f32.gmra.mxu0 %vm194_vm2, %v99_v36 }
 0x146   :  { %7752 = vmatprep.mubr.msk.f32.mxu0 %vm8627_vm1, %v16804_v1 }
 0x147   :  { %v7607_v42 = vpop.f32.mrf.mxu0 }
 0x149   :  { %v9223_v44 = vpop.f32.mrf.mxu0  ;;  %7753 = vmatmul.mubr.msk.f32.gmra.mxu0 %vm194_vm2, %v100_v41  ;;  %v110_v41 = vld [vmem:[%s16793_s0 + $0x2d8] sm:$0xff] }
 0x14a   :  { %7755 = vmatprep.mubr.msk.f32.mxu0 %vm8627_vm1, %v16804_v1 }
 0x14b   :  { %v7610_v47 = vpop.f32.mrf.mxu0 }
 0x14c   :  { %v111_v47 = vld [vmem:[%s16793_s0 + $0x2e0] sm:$0xff] }
 0x14d   :  { %v9231_v48 = vpop.f32.mrf.mxu0  ;;  %7756 = vmatmul.mubr.msk.f32.gmra.mxu0 %vm194_vm2, %v101_v45 }
 0x14e   :  { %7758 = vmatprep.mubr.msk.f32.mxu0 %vm8627_vm1, %v16804_v1 }
 0x14f   :  { %v7613_v51 = vpop.f32.mrf.mxu0 }
 0x151   :  { %v9239_v54 = vpop.f32.mrf.mxu0  ;;  %7759 = vmatmul.mubr.msk.f32.gmra.mxu0 %vm194_vm2, %v102_v50 }
 0x152   :  { %7761 = vmatprep.mubr.msk.f32.mxu0 %vm8627_vm1, %v16804_v1 }
 0x153   :  { %v7616_v59 = vpop.f32.mrf.mxu0 }
 0x155   :  { %v9247_v60 = vpop.f32.mrf.mxu0  ;;  %7762 = vmatmul.mubr.msk.f32.gmra.mxu0 %vm194_vm2, %v103_v56  ;;  %v112_v56 = vld [vmem:[%s16793_s0 + $0x2e8] sm:$0xff] }
 0x156   :  { %7764 = vmatprep.mubr.msk.f32.mxu0 %vm8627_vm1, %v16804_v1 }
 0x157   :  { %v7619_v2 = vpop.f32.mrf.mxu0 }
 0x158   :  { %v113_v2 = vld [vmem:[%s16793_s0 + $0x2f0] sm:$0xff] }
 0x159   :  { %v9255_v5 = vpop.f32.mrf.mxu0  ;;  %7765 = vmatmul.mubr.msk.f32.gmra.mxu0 %vm194_vm2, %v104_v63 }
 0x15a   :  { %7767 = vmatprep.mubr.msk.f32.mxu0 %vm8627_vm1, %v16804_v1 }
 0x15b   :  { %v7622_v9 = vpop.f32.mrf.mxu0 }
 0x15d   :  { %v9263_v11 = vpop.f32.mrf.mxu0  ;;  %7768 = vmatmul.mubr.msk.f32.gmra.mxu0 %vm194_vm2, %v105_v6 }
 0x15e   :  { %7770 = vmatprep.mubr.msk.f32.mxu0 %vm8627_vm1, %v16804_v1 }
 0x15f   :  { %v7625_v15 = vpop.f32.mrf.mxu0 }
 0x161   :  { %v9271_v18 = vpop.f32.mrf.mxu0  ;;  %7771 = vmatmul.mubr.msk.f32.gmra.mxu0 %vm194_vm2, %v106_v14  ;;  %v114_v14 = vld [vmem:[%s16793_s0 + $0x2f8] sm:$0xff] }
 0x162   :  { %7773 = vmatprep.mubr.msk.f32.mxu0 %vm8627_vm1, %v16804_v1 }
 0x163   :  { %v7628_v23 = vpop.f32.mrf.mxu0 }
 0x164   :  { %v115_v23 = vld [vmem:[%s16793_s0 + $0x300] sm:$0xff] }
 0x165   :  { %v9279_v24 = vpop.f32.mrf.mxu0  ;;  %7774 = vmatmul.mubr.msk.f32.gmra.mxu0 %vm194_vm2, %v107_v20 }
 0x166   :  { %7776 = vmatprep.mubr.msk.f32.mxu0 %vm8627_vm1, %v16804_v1 }
 0x167   :  { %v7631_v29 = vpop.f32.mrf.mxu0 }
 0x169   :  { %v9287_v32 = vpop.f32.mrf.mxu0  ;;  %7777 = vmatmul.mubr.msk.f32.gmra.mxu0 %vm194_vm2, %v108_v27 }
 0x16a   :  { %7779 = vmatprep.mubr.msk.f32.mxu0 %vm8627_vm1, %v16804_v1 }
 0x16b   :  { %v7634_v36 = vpop.f32.mrf.mxu0 }
 0x16d   :  { %v9295_v38 = vpop.f32.mrf.mxu0  ;;  %7780 = vmatmul.mubr.msk.f32.gmra.mxu0 %vm194_vm2, %v109_v33  ;;  %v116_v33 = vld [vmem:[%s16793_s0 + $0x308] sm:$0xff] }
 0x16e   :  { %7782 = vmatprep.mubr.msk.f32.mxu0 %vm8627_vm1, %v16804_v1 }
 0x16f   :  { %v7637_v42 = vpop.f32.mrf.mxu0 }
 0x170   :  { %v117_v42 = vld [vmem:[%s16793_s0 + $0x310] sm:$0xff] }
 0x171   :  { %v9303_v45 = vpop.f32.mrf.mxu0  ;;  %7783 = vmatmul.mubr.msk.f32.gmra.mxu0 %vm194_vm2, %v110_v41 }
 0x172   :  { %7785 = vmatprep.mubr.msk.f32.mxu0 %vm8627_vm1, %v16804_v1 }
 0x173   :  { %v7640_v50 = vpop.f32.mrf.mxu0 }
 0x175   :  { %v9311_v51 = vpop.f32.mrf.mxu0  ;;  %7786 = vmatmul.mubr.msk.f32.gmra.mxu0 %vm194_vm2, %v111_v47 }
 0x176   :  { %7788 = vmatprep.mubr.msk.f32.mxu0 %vm8627_vm1, %v16804_v1 }
 0x177   :  { %v7643_v59 = vpop.f32.mrf.mxu0 }
 0x179   :  { %v9319_v63 = vpop.f32.mrf.mxu0  ;;  %7789 = vmatmul.mubr.msk.f32.gmra.mxu0 %vm194_vm2, %v112_v56  ;;  %v118_v56 = vld [vmem:[%s16793_s0 + $0x318] sm:$0xff] }
 0x17a   :  { %7791 = vmatprep.mubr.msk.f32.mxu0 %vm8627_vm1, %v16804_v1 }
 0x17b   :  { %v7646_v6 = vpop.f32.mrf.mxu0 }
 0x17c   :  { %v119_v6 = vld [vmem:[%s16793_s0 + $0x320] sm:$0xff] }
 0x17d   :  { %v9327_v9 = vpop.f32.mrf.mxu0  ;;  %7792 = vmatmul.mubr.msk.f32.gmra.mxu0 %vm194_vm2, %v113_v2 }
 0x17e   :  { %7794 = vmatprep.mubr.msk.f32.mxu0 %vm8627_vm1, %v16804_v1 }
 0x17f   :  { %v7649_v15 = vpop.f32.mrf.mxu0 }
 0x181   :  { %v9335_v20 = vpop.f32.mrf.mxu0  ;;  %7795 = vmatmul.mubr.msk.f32.gmra.mxu0 %vm194_vm2, %v114_v14 }
 0x182   :  { %7797 = vmatprep.mubr.msk.f32.mxu0 %vm8627_vm1, %v16804_v1 }
 0x183   :  { %v7652_v27 = vpop.f32.mrf.mxu0 }
 0x185   :  { %v9343_v29 = vpop.f32.mrf.mxu0  ;;  %7798 = vmatmul.mubr.msk.f32.gmra.mxu0 %vm194_vm2, %v115_v23  ;;  %v120_v23 = vld [vmem:[%s16793_s0 + $0x328] sm:$0xff] }
 0x186   :  { %7800 = vmatprep.mubr.msk.f32.mxu0 %vm8627_vm1, %v16804_v1 }
 0x187   :  { %v7655_v36 = vpop.f32.mrf.mxu0 }
 0x188   :  { %v121_v36 = vld [vmem:[%s16793_s0 + $0x330] sm:$0xff] }
 0x189   :  { %v9351_v41 = vpop.f32.mrf.mxu0  ;;  %7801 = vmatmul.mubr.msk.f32.gmra.mxu0 %vm194_vm2, %v116_v33 }
 0x18a   :  { %7803 = vmatprep.mubr.msk.f32.mxu0 %vm8627_vm1, %v16804_v1 }
 0x18b   :  { %v7658_v47 = vpop.f32.mrf.mxu0 }
 0x18d   :  { %v9359_v50 = vpop.f32.mrf.mxu0  ;;  %7804 = vmatmul.mubr.msk.f32.gmra.mxu0 %vm194_vm2, %v117_v42 }
 0x18e   :  { %7806 = vmatprep.mubr.msk.f32.mxu0 %vm8627_vm1, %v16804_v1 }
 0x18f   :  { %v7661_v59 = vpop.f32.mrf.mxu0 }
 0x191   :  { %v9367_v2 = vpop.f32.mrf.mxu0  ;;  %7807 = vmatmul.mubr.msk.f32.gmra.mxu0 %vm194_vm2, %v118_v56  ;;  %v122_v56 = vld [vmem:[%s16793_s0 + $0x338] sm:$0xff] }
 0x192   :  { %7809 = vmatprep.mubr.msk.f32.mxu0 %vm8627_vm1, %v16804_v1 }
 0x193   :  { %v7664_v14 = vpop.f32.mrf.mxu0 }
 0x194   :  { %v123_v14 = vld [vmem:[%s16793_s0 + $0x340] sm:$0xff] }
 0x195   :  { %v9375_v15 = vpop.f32.mrf.mxu0  ;;  %7810 = vmatmul.mubr.msk.f32.gmra.mxu0 %vm194_vm2, %v119_v6 }
 0x196   :  { %7812 = vmatprep.mubr.msk.f32.mxu0 %vm8627_vm1, %v16804_v1 }
 0x197   :  { %v7667_v27 = vpop.f32.mrf.mxu0 }
 0x199   :  { %v9383_v33 = vpop.f32.mrf.mxu0  ;;  %7813 = vmatmul.mubr.msk.f32.gmra.mxu0 %vm194_vm2, %v120_v23 }
 0x19a   :  { %17138 = vst [vmem:[#allocation5_spill] sm:$0xff] %v9383_v33  ;;  %7815 = vmatprep.mubr.msk.f32.mxu0 %vm8627_vm1, %v16804_v1 }
 0x19b   :  { %v7670_v42 = vpop.f32.mrf.mxu0 }
 0x19d   :  { %v9391_v47 = vpop.f32.mrf.mxu0  ;;  %7816 = vmatmul.mubr.msk.f32.gmra.mxu0 %vm194_vm2, %v121_v36  ;;  %v124_v36 = vld [vmem:[%s16793_s0 + $0x348] sm:$0xff] }
 0x19e   :  { %17139 = vst [vmem:[#allocation6_spill] sm:$0xff] %v9391_v47  ;;  %7818 = vmatprep.mubr.msk.f32.mxu0 %vm8627_vm1, %v16804_v1 }
 0x19f   :  { %v7673_v59 = vpop.f32.mrf.mxu0 }
 0x1a0   :  { %v125_v59 = vld [vmem:[%s16793_s0 + $0x350] sm:$0xff] }
 0x1a1   :  { %v9399_v6 = vpop.f32.mrf.mxu0  ;;  %7819 = vmatmul.mubr.msk.f32.gmra.mxu0 %vm194_vm2, %v122_v56 }
 0x1a2   :  { %17140 = vst [vmem:[#allocation7_spill] sm:$0xff] %v9399_v6  ;;  %7821 = vmatprep.mubr.msk.f32.mxu0 %vm8627_vm1, %v16804_v1 }
 0x1a3   :  { %v7676_v23 = vpop.f32.mrf.mxu0 }
 0x1a5   :  { %v9407_v27 = vpop.f32.mrf.mxu0  ;;  %7822 = vmatmul.mubr.msk.f32.gmra.mxu0 %vm194_vm2, %v123_v14 }
 0x1a6   :  { %17141 = vst [vmem:[#allocation8_spill] sm:$0xff] %v9407_v27  ;;  %7824 = vmatprep.mubr.msk.f32.mxu0 %vm8627_vm1, %v16804_v1  ;;  %v16798_v27 = vlaneseq }
 0x1a7   :  { %v7679_v42 = vpop.f32.mrf.mxu0 }
 0x1a8   :  { %v126_v42 = vld [vmem:[%s16793_s0 + $0x358] sm:$0xff]  ;;  %v9611_v6 = vshrl.u32 %v16798_v27, 7  ;;  %v18_v27 = vld [vmem:[%s16796_s3] sm:$0xff] }
 0x1a9   :  { %v9415_v56 = vpop.f32.mrf.mxu0  ;;  %7825 = vmatmul.mubr.msk.f32.gmra.mxu0 %vm194_vm2, %v124_v36 }
 0x1aa   :  { %17142 = vst [vmem:[#allocation9_spill] sm:$0xff] %v9415_v56  ;;  %7827 = vmatprep.mubr.msk.f32.mxu0 %vm8627_vm1, %v16804_v1  ;;  %17167 = vst [vmem:[#allocation34_spill] sm:$0xff] %v9611_v6 }
 0x1ab   :  { %v7682_v14 = vpop.f32.mrf.mxu0 }
 0x1ac   :  { %v127_v14 = vld [vmem:[%s16793_s0 + $0x360] sm:$0xff] }
 0x1ad   :  { %v9423_v23 = vpop.f32.mrf.mxu0  ;;  %7828 = vmatmul.mubr.msk.f32.gmra.mxu0 %vm194_vm2, %v125_v59 }
 0x1ae   :  { %17143 = vst [vmem:[#allocation10_spill] sm:$0xff] %v9423_v23  ;;  %7830 = vmatprep.mubr.msk.f32.mxu0 %vm8627_vm1, %v16804_v1 }
 0x1af   :  { %v7685_v36 = vpop.f32.mrf.mxu0 }
 0x1b0   :  { %v128_v36 = vld [vmem:[%s16793_s0 + $0x368] sm:$0xff] }
 0x1b1   :  { %v9431_v56 = vpop.f32.mrf.mxu0  ;;  %7831 = vmatmul.mubr.msk.f32.gmra.mxu0 %vm194_vm2, %v126_v42 }
 0x1b2   :  { %17144 = vst [vmem:[#allocation11_spill] sm:$0xff] %v9431_v56  ;;  %7833 = vmatprep.mubr.msk.f32.mxu0 %vm8627_vm1, %v16804_v1 }
 0x1b3   :  { %v7688_v59 = vpop.f32.mrf.mxu0 }
 0x1b4   :  { %v129_v59 = vld [vmem:[%s16793_s0 + $0x370] sm:$0xff] }
 0x1b5   :  { %v9439_v23 = vpop.f32.mrf.mxu0  ;;  %7834 = vmatmul.mubr.msk.f32.gmra.mxu0 %vm194_vm2, %v127_v14 }
 0x1b6   :  { %17145 = vst [vmem:[#allocation12_spill] sm:$0xff] %v9439_v23  ;;  %7836 = vmatprep.mubr.msk.f32.mxu0 %vm8627_vm1, %v16804_v1 }
 0x1b7   :  { %v7691_v42 = vpop.f32.mrf.mxu0 }
 0x1b8   :  { %v130_v42 = vld [vmem:[%s16793_s0 + $0x378] sm:$0xff] }
 0x1b9   :  { %v9447_v56 = vpop.f32.mrf.mxu0  ;;  %7837 = vmatmul.mubr.msk.f32.gmra.mxu0 %vm194_vm2, %v128_v36 }
 0x1ba   :  { %17146 = vst [vmem:[#allocation13_spill] sm:$0xff] %v9447_v56  ;;  %7839 = vmatprep.mubr.msk.f32.mxu0 %vm8627_vm1, %v16804_v1 }
 0x1bb   :  { %v7694_v14 = vpop.f32.mrf.mxu0 }
 0x1bc   :  { %v131_v14 = vld [vmem:[%s16793_s0 + $0x380] sm:$0xff] }
 0x1bd   :  { %v9455_v23 = vpop.f32.mrf.mxu0  ;;  %7840 = vmatmul.mubr.msk.f32.gmra.mxu0 %vm194_vm2, %v129_v59 }
 0x1be   :  { %17147 = vst [vmem:[#allocation14_spill] sm:$0xff] %v9455_v23  ;;  %7842 = vmatprep.mubr.msk.f32.mxu0 %vm8627_vm1, %v16804_v1 }
 0x1bf   :  { %v7697_v36 = vpop.f32.mrf.mxu0 }
 0x1c0   :  { %v132_v36 = vld [vmem:[%s16793_s0 + $0x388] sm:$0xff] }
 0x1c1   :  { %v9463_v56 = vpop.f32.mrf.mxu0  ;;  %7843 = vmatmul.mubr.msk.f32.gmra.mxu0 %vm194_vm2, %v130_v42 }
 0x1c2   :  { %17148 = vst [vmem:[#allocation15_spill] sm:$0xff] %v9463_v56  ;;  %7845 = vmatprep.mubr.msk.f32.mxu0 %vm8627_vm1, %v16804_v1 }
 0x1c3   :  { %v7700_v59 = vpop.f32.mrf.mxu0 }
 0x1c4   :  { %v133_v59 = vld [vmem:[%s16793_s0 + $0x390] sm:$0xff] }
 0x1c5   :  { %v9471_v23 = vpop.f32.mrf.mxu0  ;;  %7846 = vmatmul.mubr.msk.f32.gmra.mxu0 %vm194_vm2, %v131_v14 }
 0x1c6   :  { %17149 = vst [vmem:[#allocation16_spill] sm:$0xff] %v9471_v23  ;;  %7848 = vmatprep.mubr.msk.f32.mxu0 %vm8627_vm1, %v16804_v1 }
 0x1c7   :  { %v7703_v42 = vpop.f32.mrf.mxu0 }
 0x1c8   :  { %v134_v42 = vld [vmem:[%s16793_s0 + $0x398] sm:$0xff] }
 0x1c9   :  { %v9479_v56 = vpop.f32.mrf.mxu0  ;;  %7849 = vmatmul.mubr.msk.f32.gmra.mxu0 %vm194_vm2, %v132_v36 }
 0x1ca   :  { %17150 = vst [vmem:[#allocation17_spill] sm:$0xff] %v9479_v56  ;;  %7851 = vmatprep.mubr.msk.f32.mxu0 %vm8627_vm1, %v16804_v1 }
 0x1cb   :  { %v7706_v14 = vpop.f32.mrf.mxu0 }
 0x1cc   :  { %v135_v14 = vld [vmem:[%s16793_s0 + $0x3a0] sm:$0xff] }
 0x1cd   :  { %v9487_v23 = vpop.f32.mrf.mxu0  ;;  %7852 = vmatmul.mubr.msk.f32.gmra.mxu0 %vm194_vm2, %v133_v59 }
 0x1ce   :  { %17151 = vst [vmem:[#allocation18_spill] sm:$0xff] %v9487_v23  ;;  %7854 = vmatprep.mubr.msk.f32.mxu0 %vm8627_vm1, %v16804_v1 }
 0x1cf   :  { %v7709_v36 = vpop.f32.mrf.mxu0 }
 0x1d0   :  { %v136_v36 = vld [vmem:[%s16793_s0 + $0x3a8] sm:$0xff] }
 0x1d1   :  { %v9495_v56 = vpop.f32.mrf.mxu0  ;;  %7855 = vmatmul.mubr.msk.f32.gmra.mxu0 %vm194_vm2, %v134_v42 }
 0x1d2   :  { %17152 = vst [vmem:[#allocation19_spill] sm:$0xff] %v9495_v56  ;;  %7857 = vmatprep.mubr.msk.f32.mxu0 %vm8627_vm1, %v16804_v1 }
 0x1d3   :  { %v7712_v59 = vpop.f32.mrf.mxu0 }
 0x1d4   :  { %v137_v59 = vld [vmem:[%s16793_s0 + $0x3b0] sm:$0xff] }
 0x1d5   :  { %v9503_v23 = vpop.f32.mrf.mxu0  ;;  %7858 = vmatmul.mubr.msk.f32.gmra.mxu0 %vm194_vm2, %v135_v14 }
 0x1d6   :  { %17153 = vst [vmem:[#allocation20_spill] sm:$0xff] %v9503_v23  ;;  %7860 = vmatprep.mubr.msk.f32.mxu0 %vm8627_vm1, %v16804_v1 }
 0x1d7   :  { %v7715_v42 = vpop.f32.mrf.mxu0 }
 0x1d8   :  { %v138_v42 = vld [vmem:[%s16793_s0 + $0x3b8] sm:$0xff] }
 0x1d9   :  { %v9511_v56 = vpop.f32.mrf.mxu0  ;;  %7861 = vmatmul.mubr.msk.f32.gmra.mxu0 %vm194_vm2, %v136_v36 }
 0x1da   :  { %17154 = vst [vmem:[#allocation21_spill] sm:$0xff] %v9511_v56  ;;  %7863 = vmatprep.mubr.msk.f32.mxu0 %vm8627_vm1, %v16804_v1 }
 0x1db   :  { %v7718_v14 = vpop.f32.mrf.mxu0 }
 0x1dc   :  { %v139_v14 = vld [vmem:[%s16793_s0 + $0x3c0] sm:$0xff] }
 0x1dd   :  { %v9519_v23 = vpop.f32.mrf.mxu0  ;;  %7864 = vmatmul.mubr.msk.f32.gmra.mxu0 %vm194_vm2, %v137_v59 }
 0x1de   :  { %17155 = vst [vmem:[#allocation22_spill] sm:$0xff] %v9519_v23  ;;  %7866 = vmatprep.mubr.msk.f32.mxu0 %vm8627_vm1, %v16804_v1 }
 0x1df   :  { %v7721_v36 = vpop.f32.mrf.mxu0 }
 0x1e0   :  { %v140_v36 = vld [vmem:[%s16793_s0 + $0x3c8] sm:$0xff] }
 0x1e1   :  { %v9527_v56 = vpop.f32.mrf.mxu0  ;;  %7867 = vmatmul.mubr.msk.f32.gmra.mxu0 %vm194_vm2, %v138_v42 }
 0x1e2   :  { %17156 = vst [vmem:[#allocation23_spill] sm:$0xff] %v9527_v56  ;;  %7869 = vmatprep.mubr.msk.f32.mxu0 %vm8627_vm1, %v16804_v1 }
 0x1e3   :  { %v7724_v59 = vpop.f32.mrf.mxu0 }
 0x1e4   :  { %v141_v59 = vld [vmem:[%s16793_s0 + $0x3d0] sm:$0xff] }
 0x1e5   :  { %v9535_v23 = vpop.f32.mrf.mxu0  ;;  %7870 = vmatmul.mubr.msk.f32.gmra.mxu0 %vm194_vm2, %v139_v14 }
 0x1e6   :  { %17157 = vst [vmem:[#allocation24_spill] sm:$0xff] %v9535_v23  ;;  %7872 = vmatprep.mubr.msk.f32.mxu0 %vm8627_vm1, %v16804_v1 }
 0x1e7   :  { %v7727_v42 = vpop.f32.mrf.mxu0 }
 0x1e8   :  { %v142_v42 = vld [vmem:[%s16793_s0 + $0x3d8] sm:$0xff] }
 0x1e9   :  { %v9543_v56 = vpop.f32.mrf.mxu0  ;;  %7873 = vmatmul.mubr.msk.f32.gmra.mxu0 %vm194_vm2, %v140_v36 }
 0x1ea   :  { %17158 = vst [vmem:[#allocation25_spill] sm:$0xff] %v9543_v56  ;;  %7875 = vmatprep.mubr.msk.f32.mxu0 %vm8627_vm1, %v16804_v1 }
 0x1eb   :  { %v7730_v14 = vpop.f32.mrf.mxu0 }
 0x1ec   :  { %v143_v14 = vld [vmem:[%s16793_s0 + $0x3e0] sm:$0xff] }
 0x1ed   :  { %v9551_v23 = vpop.f32.mrf.mxu0  ;;  %7876 = vmatmul.mubr.msk.f32.gmra.mxu0 %vm194_vm2, %v141_v59 }
 0x1ee   :  { %17159 = vst [vmem:[#allocation26_spill] sm:$0xff] %v9551_v23  ;;  %7878 = vmatprep.mubr.msk.f32.mxu0 %vm8627_vm1, %v16804_v1 }
 0x1ef   :  { %v7733_v36 = vpop.f32.mrf.mxu0 }
 0x1f0   :  { %v144_v36 = vld [vmem:[%s16793_s0 + $0x3e8] sm:$0xff] }
 0x1f1   :  { %v9559_v56 = vpop.f32.mrf.mxu0  ;;  %7879 = vmatmul.mubr.msk.f32.gmra.mxu0 %vm194_vm2, %v142_v42 }
 0x1f2   :  { %17160 = vst [vmem:[#allocation27_spill] sm:$0xff] %v9559_v56  ;;  %7881 = vmatprep.mubr.msk.f32.mxu0 %vm8627_vm1, %v16804_v1 }
 0x1f3   :  { %v7736_v59 = vpop.f32.mrf.mxu0 }
 0x1f4   :  { %v145_v59 = vld [vmem:[%s16793_s0 + $0x3f0] sm:$0xff] }
 0x1f5   :  { %v9567_v23 = vpop.f32.mrf.mxu0  ;;  %7882 = vmatmul.mubr.msk.f32.gmra.mxu0 %vm194_vm2, %v143_v14 }
 0x1f6   :  { %17161 = vst [vmem:[#allocation28_spill] sm:$0xff] %v9567_v23  ;;  %7884 = vmatprep.mubr.msk.f32.mxu0 %vm8627_vm1, %v16804_v1 }
 0x1f7   :  { %v7739_v42 = vpop.f32.mrf.mxu0 }
 0x1f8   :  { %v146_v42 = vld [vmem:[%s16793_s0 + $0x3f8] sm:$0xff] }
 0x1f9   :  { %v9575_v56 = vpop.f32.mrf.mxu0  ;;  %7885 = vmatmul.mubr.msk.f32.gmra.mxu0 %vm194_vm2, %v144_v36 }
 0x1fa   :  { %17162 = vst [vmem:[#allocation29_spill] sm:$0xff] %v9575_v56  ;;  %7887 = vmatprep.mubr.msk.f32.mxu0 %vm8627_vm1, %v16804_v1 }
 0x1fb   :  { %v7742_v14 = vpop.f32.mrf.mxu0 }
 0x1fc   :  { %v147_v14 = vld [vmem:[%s16793_s0 + $0x400] sm:$0xff] }
 0x1fd   :  { %v9583_v23 = vpop.f32.mrf.mxu0  ;;  %7888 = vmatmul.mubr.msk.f32.gmra.mxu0 %vm194_vm2, %v145_v59 }
 0x1fe   :  { %17163 = vst [vmem:[#allocation30_spill] sm:$0xff] %v9583_v23  ;;  %7890 = vmatprep.mubr.msk.f32.mxu0 %vm8627_vm1, %v16804_v1 }
 0x1ff   :  { %v7745_v36 = vpop.f32.mrf.mxu0 }
 0x201   :  { %v9591_v56 = vpop.f32.mrf.mxu0  ;;  %7891 = vmatmul.mubr.msk.f32.gmra.mxu0 %vm194_vm2, %v146_v42  ;;  %v148_v42 = vld [vmem:[%s16793_s0 + $0x408] sm:$0xff] }
 0x202   :  { %17164 = vst [vmem:[#allocation31_spill] sm:$0xff] %v9591_v56  ;;  %7893 = vmatprep.mubr.msk.f32.mxu0 %vm8627_vm1, %v16804_v1 }
 0x203   :  { %v7748_v59 = vpop.f32.mrf.mxu0 }
 0x205   :  { %v9599_v23 = vpop.f32.mrf.mxu0  ;;  %7894 = vmatmul.mubr.msk.f32.gmra.mxu0 %vm194_vm2, %v147_v14  ;;  %v149_v14 = vld [vmem:[%s16793_s0 + $0x410] sm:$0xff] }
 0x206   :  { %17165 = vst [vmem:[#allocation32_spill] sm:$0xff] %v9599_v23  ;;  %7896 = vmatprep.mubr.msk.f32.mxu0 %vm8627_vm1, %v16804_v1 }
 0x207   :  { %v7751_v36 = vpop.f32.mrf.mxu0 }
 0x208   :  { %v192_v36 = vsub.s32 0, %v9611_v6 }
 0x209   :  { %v9607_v56 = vpop.f32.mrf.mxu0  ;;  %7897 = vmatmul.mubr.msk.f32.gmra.mxu0 %vm194_vm2, %v148_v42  ;;  %v150_v42 = vld [vmem:[%s16793_s0 + $0x418] sm:$0xff] }
 0x20a   :  { %17166 = vst [vmem:[#allocation33_spill] sm:$0xff] %v9607_v56  ;;  %7899 = vmatprep.mubr.msk.f32.mxu0 %vm8627_vm1, %v16804_v1 }
 0x20b   :  { %v7754_v59 = vpop.f32.mrf.mxu0 }
 0x20c   :  { %v9633_v59 = vrot.slane %v18_v27, %v192_v36 }
 0x20d   :  { %v9618_v23 = vpop.f32.mrf.mxu0  ;;  %7900 = vmatmul.mubr.msk.f32.gmra.mxu0 %vm194_vm2, %v149_v14  ;;  %v151_v14 = vld [vmem:[%s16793_s0 + $0x420] sm:$0xff] }
 0x20e   :  { %17168 = vst [vmem:[#allocation35_spill] sm:$0xff] %v9618_v23  ;;  %7902 = vmatprep.mubr.msk.f32.mxu0 %vm8627_vm1, %v16804_v1  ;;  %v9642_v23 = vadd.f32 %v8967_v55, %v9633_v59  ;;  %v9649_v27 = vadd.f32 %v8959_v52, %v9633_v59  ;;  %v152_v55 = vld [vmem:[%s16793_s0 + $0x428] sm:$0xff]  ;;  %v9664_v52 = vadd.f32 %v8983_v61, %v9633_v59  ;;  %v153_v61 = vld [vmem:[%s16793_s0 + $0x430] sm:$0xff] }
 0x20f   :  { %v7757_v56 = vpop.f32.mrf.mxu0 }
 0x210   :  { %17169 = vst [vmem:[#allocation36_spill] sm:$0xff] %v9642_v23  ;;  %17171 = vst [vmem:[#allocation38_spill] sm:$0xff] %v9649_v27  ;;  %v9653_v56 = vadd.f32 %v8975_v58, %v9633_v59  ;;  %v1618_v36 = vsel %vm1616_vm3, %v9642_v23, 0.0  ;;  %v1617_v58 = vsel %vm1616_vm3, %v9649_v27, 0.0  ;;  %v9686_v27 = vadd.f32 %v8999_v4, %v9633_v59  ;;  %v154_v4 = vld [vmem:[%s16793_s0 + $0x438] sm:$0xff] }
 0x211   :  { %v9630_v47 = vpop.f32.mrf.mxu0  ;;  %7903 = vmatmul.mubr.msk.f32.gmra.mxu0 %vm194_vm2, %v150_v42  ;;  %17173 = vst [vmem:[#allocation40_spill] sm:$0xff] %v9664_v52  ;;  %v1619_v23 = vadd.f32 %v1618_v36, %v1617_v58  ;;  %v17177_v36 = vmov 0.0  }
 0x212   :  { %7905 = vmatprep.mubr.msk.f32.mxu0 %vm8627_vm1, %v16804_v1  ;;  %17172 = vst [vmem:[#allocation39_spill] sm:$0xff] %v9653_v56  ;;  %v1626_v58 = vsel %vm1616_vm3, %v9686_v27, 0.0 }
 0x213   :  { %v7760_v6 = vpop.f32.mrf.mxu0 }
 0x215   :  { %v9644_v33 = vpop.f32.mrf.mxu0  ;;  %7906 = vmatmul.mubr.msk.f32.gmra.mxu0 %vm194_vm2, %v151_v14  ;;  %v1620_v14 = vsel %vm1616_vm3, %v9653_v56, 0.0 }
 0x216   :  { %17170 = vst [vmem:[#allocation37_spill] sm:$0xff] %v9644_v33  ;;  %7908 = vmatprep.mubr.msk.f32.mxu0 %vm8627_vm1, %v16804_v1  ;;  %v1621_v56 = vadd.f32 %v1620_v14, %v1619_v23  ;;  %v9706_v14 = vadd.f32 %v9015_v10, %v9633_v59  ;;  %v155_v10 = vld [vmem:[%s16793_s0 + $0x440] sm:$0xff] }
 0x217   :  { %v7763_v6 = vpop.f32.mrf.mxu0 }
 0x218   :  { %v9675_v6 = vadd.f32 %v8991_v0, %v9633_v59 }
 0x219   :  { %v9666_v42 = vpop.f32.mrf.mxu0  ;;  %7909 = vmatmul.mubr.msk.f32.gmra.mxu0 %vm194_vm2, %v152_v55  ;;  %v1622_v55 = vsel %vm1616_vm3, %v9664_v52, 0.0  ;;  %v9715_v52 = vadd.f32 %v9023_v13, %v9633_v59 }
 0x21a   :  { %17174 = vst [vmem:[#allocation41_spill] sm:$0xff] %v9666_v42  ;;  %17175 = vst [vmem:[#allocation42_spill] sm:$0xff] %v9675_v6  ;;  %7911 = vmatprep.mubr.msk.f32.mxu0 %vm8627_vm1, %v16804_v1  ;;  %v1624_v0 = vsel %vm1616_vm3, %v9675_v6, 0.0  ;;  %v9695_v1 = vadd.f32 %v9007_v7, %v9633_v59 }
 0x21b   :  { %v7766_v42 = vpop.f32.mrf.mxu0  ;;  %17178 = vst [vmem:[#allocation44_spill] sm:$0xff] %v9715_v52  ;;  %v1632_v13 = vsel %vm1616_vm3, %v9715_v52, 0.0  ;;  %v9755_v52 = vadd.f32 %v9055_v25, %v9633_v59 }
 0x21c   :  { %17176 = vst [vmem:[#allocation43_spill] sm:$0xff] %v9695_v1  ;;  %v1623_v42 = vadd.f32 %v1622_v55, %v1621_v56  ;;  %v1628_v7 = vsel %vm1616_vm3, %v9695_v1, 0.0  ;;  %v9735_v1 = vadd.f32 %v9039_v19, %v9633_v59 }
 0x21d   :  { %v9688_v33 = vpop.f32.mrf.mxu0  ;;  %7912 = vmatmul.mubr.msk.f32.gmra.mxu0 %vm194_vm2, %v153_v61  ;;  %17180 = vst [vmem:[#allocation46_spill] sm:$0xff] %v9755_v52  ;;  %v1640_v25 = vsel %vm1616_vm3, %v9755_v52, 0.0  ;;  %v9795_v52 = vadd.f32 %v9087_v37, %v9633_v59 }
 0x21e   :  { %7914 = vmatprep.mubr.msk.f32.mxu0 %vm8627_vm1, %v17177_v36  ;;  %v1625_v61 = vadd.f32 %v1624_v0, %v1623_v42  ;;  %v1630_v0 = vsel %vm1616_vm3, %v9706_v14, 0.0  ;;  %17179 = vst [vmem:[#allocation45_spill] sm:$0xff] %v9735_v1  ;;  %v1636_v19 = vsel %vm1616_vm3, %v9735_v1, 0.0  ;;  %v9775_v1 = vadd.f32 %v9071_v31, %v9633_v59 }
 0x21f   :  { %v7769_v23 = vpop.f32.mrf.mxu0  ;;  %17182 = vst [vmem:[#allocation48_spill] sm:$0xff] %v9795_v52  ;;  %v1648_v37 = vsel %vm1616_vm3, %v9795_v52, 0.0  ;;  %v9835_v52 = vadd.f32 %v9119_v49, %v9633_v59 }
 0x220   :  { %v1627_v56 = vadd.f32 %v1626_v58, %v1625_v61  ;;  %17181 = vst [vmem:[#allocation47_spill] sm:$0xff] %v9775_v1  ;;  %v1644_v31 = vsel %vm1616_vm3, %v9775_v1, 0.0  ;;  %v9815_v1 = vadd.f32 %v9103_v43, %v9633_v59 }
 0x221   :  { %v9708_v6 = vpop.f32.mrf.mxu0  ;;  %7915 = vmatmul.mubr.msk.f32.gmra.mxu0 %vm194_vm2, %v154_v4  ;;  %v9726_v4 = vadd.f32 %v9031_v16, %v9633_v59  ;;  %v156_v16 = vld [vmem:[%s16793_s0 + $0x448] sm:$0xff]  ;;  %17184 = vst [vmem:[#allocation50_spill] sm:$0xff] %v9835_v52  ;;  %v1656_v49 = vsel %vm1616_vm3, %v9835_v52, 0.0  ;;  %v9875_v52 = vadd.f32 %v9151_v3, %v9633_v59 }
 0x222   :  { %7917 = vmatprep.mubr.msk.f32.mxu0 %vm8627_vm1, %v17177_v36  ;;  %v1629_v42 = vadd.f32 %v1628_v7, %v1627_v56  ;;  %17183 = vst [vmem:[#allocation49_spill] sm:$0xff] %v9815_v1  ;;  %v1652_v43 = vsel %vm1616_vm3, %v9815_v1, 0.0  ;;  %v9855_v1 = vadd.f32 %v9135_v57, %v9633_v59 }
 0x223   :  { %v7772_v55 = vpop.f32.mrf.mxu0  ;;  %v1634_v7 = vsel %vm1616_vm3, %v9726_v4, 0.0  ;;  %17188 = vst [vmem:[#allocation54_spill] sm:$0xff] %v9875_v52  ;;  %v1664_v3 = vsel %vm1616_vm3, %v9875_v52, 0.0  ;;  %v9915_v52 = vadd.f32 %v9183_v21, %v9633_v59 }
 0x224   :  { %v1631_v58 = vadd.f32 %v1630_v0, %v1629_v42  ;;  %17186 = vst [vmem:[#allocation52_spill] sm:$0xff] %v9855_v1  ;;  %v1660_v57 = vsel %vm1616_vm3, %v9855_v1, 0.0  ;;  %v9895_v1 = vadd.f32 %v9167_v12, %v9633_v59 }
 0x225   :  { %v9728_v23 = vpop.f32.mrf.mxu0  ;;  %7918 = vmatmul.mubr.msk.f32.gmra.mxu0 %vm194_vm2, %v155_v10  ;;  %v9746_v10 = vadd.f32 %v9047_v22, %v9633_v59  ;;  %v157_v22 = vld [vmem:[%s16793_s0 + $0x450] sm:$0xff]  ;;  %17192 = vst [vmem:[#allocation58_spill] sm:$0xff] %v9915_v52  ;;  %v1672_v21 = vsel %vm1616_vm3, %v9915_v52, 0.0  ;;  %v9955_v52 = vadd.f32 %v9215_v39, %v9633_v59 }
 0x226   :  { %7920 = vmatprep.mubr.msk.f32.mxu0 %vm8627_vm1, %v17177_v36  ;;  %v1633_v56 = vadd.f32 %v1632_v13, %v1631_v58  ;;  %17190 = vst [vmem:[#allocation56_spill] sm:$0xff] %v9895_v1  ;;  %v1668_v12 = vsel %vm1616_vm3, %v9895_v1, 0.0  ;;  %v9935_v1 = vadd.f32 %v9199_v30, %v9633_v59 }
 0x227   :  { %v7775_v61 = vpop.f32.mrf.mxu0  ;;  %v1638_v13 = vsel %vm1616_vm3, %v9746_v10, 0.0  ;;  %17196 = vst [vmem:[#allocation62_spill] sm:$0xff] %v9955_v52  ;;  %v1680_v39 = vsel %vm1616_vm3, %v9955_v52, 0.0  ;;  %v9995_v52 = vadd.f32 %v9247_v60, %v9633_v59 }
 0x228   :  { %v1635_v0 = vadd.f32 %v1634_v7, %v1633_v56  ;;  %17194 = vst [vmem:[#allocation60_spill] sm:$0xff] %v9935_v1  ;;  %v1676_v30 = vsel %vm1616_vm3, %v9935_v1, 0.0  ;;  %v9975_v1 = vadd.f32 %v9231_v48, %v9633_v59 }
 0x229   :  { %v9748_v55 = vpop.f32.mrf.mxu0  ;;  %7921 = vmatmul.mubr.msk.f32.gmra.mxu0 %vm194_vm2, %v156_v16  ;;  %v9766_v16 = vadd.f32 %v9063_v28, %v9633_v59  ;;  %v158_v28 = vld [vmem:[%s16793_s0 + $0x458] sm:$0xff]  ;;  %17200 = vst [vmem:[#allocation66_spill] sm:$0xff] %v9995_v52  ;;  %v1688_v60 = vsel %vm1616_vm3, %v9995_v52, 0.0  ;;  %v10035_v52 = vadd.f32 %v9279_v24, %v9633_v59 }
 0x22a   :  { %7923 = vmatprep.mubr.msk.f32.mxu0 %vm8627_vm1, %v17177_v36  ;;  %v1637_v58 = vadd.f32 %v1636_v19, %v1635_v0  ;;  %17198 = vst [vmem:[#allocation64_spill] sm:$0xff] %v9975_v1  ;;  %v1684_v48 = vsel %vm1616_vm3, %v9975_v1, 0.0  ;;  %v10015_v1 = vadd.f32 %v9263_v11, %v9633_v59 }
 0x22b   :  { %v7778_v42 = vpop.f32.mrf.mxu0  ;;  %v1642_v19 = vsel %vm1616_vm3, %v9766_v16, 0.0  ;;  %17204 = vst [vmem:[#allocation70_spill] sm:$0xff] %v10035_v52  ;;  %v1696_v24 = vsel %vm1616_vm3, %v10035_v52, 0.0  ;;  %v10075_v52 = vadd.f32 %v9311_v51, %v9633_v59 }
 0x22c   :  { %v1639_v7 = vadd.f32 %v1638_v13, %v1637_v58  ;;  %17202 = vst [vmem:[#allocation68_spill] sm:$0xff] %v10015_v1  ;;  %v1692_v11 = vsel %vm1616_vm3, %v10015_v1, 0.0  ;;  %v10055_v1 = vadd.f32 %v9295_v38, %v9633_v59 }
 0x22d   :  { %v9768_v61 = vpop.f32.mrf.mxu0  ;;  %7924 = vmatmul.mubr.msk.f32.gmra.mxu0 %vm194_vm2, %v157_v22  ;;  %v9786_v22 = vadd.f32 %v9079_v34, %v9633_v59  ;;  %v159_v34 = vld [vmem:[%s16793_s0 + $0x460] sm:$0xff]  ;;  %17208 = vst [vmem:[#allocation74_spill] sm:$0xff] %v10075_v52  ;;  %v1704_v51 = vsel %vm1616_vm3, %v10075_v52, 0.0  ;;  %v10115_v52 = vadd.f32 %v9343_v29, %v9633_v59 }
 0x22e   :  { %7926 = vmatprep.mubr.msk.f32.mxu0 %vm8627_vm1, %v17177_v36  ;;  %v1641_v0 = vadd.f32 %v1640_v25, %v1639_v7  ;;  %17206 = vst [vmem:[#allocation72_spill] sm:$0xff] %v10055_v1  ;;  %v1700_v38 = vsel %vm1616_vm3, %v10055_v1, 0.0  ;;  %v10095_v1 = vadd.f32 %v9327_v9, %v9633_v59 }
 0x22f   :  { %v7781_v56 = vpop.f32.mrf.mxu0  ;;  %v1646_v25 = vsel %vm1616_vm3, %v9786_v22, 0.0  ;;  %17212 = vst [vmem:[#allocation78_spill] sm:$0xff] %v10115_v52  ;;  %v1712_v29 = vsel %vm1616_vm3, %v10115_v52, 0.0  ;;  %v10155_v52 = vadd.f32 %v9375_v15, %v9633_v59 }
 0x230   :  { %v1643_v13 = vadd.f32 %v1642_v19, %v1641_v0  ;;  %17210 = vst [vmem:[#allocation76_spill] sm:$0xff] %v10095_v1  ;;  %v1708_v9 = vsel %vm1616_vm3, %v10095_v1, 0.0  ;;  %v10135_v1 = vadd.f32 %v9359_v50, %v9633_v59 }
 0x231   :  { %v9788_v42 = vpop.f32.mrf.mxu0  ;;  %7927 = vmatmul.mubr.msk.f32.gmra.mxu0 %vm194_vm2, %v158_v28  ;;  %v9806_v28 = vadd.f32 %v9095_v40, %v9633_v59  ;;  %v160_v40 = vld [vmem:[%s16793_s0 + $0x468] sm:$0xff]  ;;  %17216 = vst [vmem:[#allocation82_spill] sm:$0xff] %v10155_v52  ;;  %v1720_v15 = vsel %vm1616_vm3, %v10155_v52, 0.0 }
 0x232   :  { %7929 = vmatprep.mubr.msk.f32.mxu0 %vm8627_vm1, %v17177_v36  ;;  %v1645_v7 = vadd.f32 %v1644_v31, %v1643_v13  ;;  %17214 = vst [vmem:[#allocation80_spill] sm:$0xff] %v10135_v1  ;;  %v1716_v50 = vsel %vm1616_vm3, %v10135_v1, 0.0 }
 0x233   :  { %v7784_v58 = vpop.f32.mrf.mxu0  ;;  %v1650_v31 = vsel %vm1616_vm3, %v9806_v28, 0.0 }
 0x234   :  { %v1647_v19 = vadd.f32 %v1646_v25, %v1645_v7 }
 0x235   :  { %v9808_v56 = vpop.f32.mrf.mxu0  ;;  %7930 = vmatmul.mubr.msk.f32.gmra.mxu0 %vm194_vm2, %v159_v34  ;;  %v9826_v34 = vadd.f32 %v9111_v46, %v9633_v59  ;;  %v161_v46 = vld [vmem:[%s16793_s0 + $0x470] sm:$0xff] }
 0x236   :  { %7932 = vmatprep.mubr.msk.f32.mxu0 %vm8627_vm1, %v17177_v36  ;;  %v1649_v13 = vadd.f32 %v1648_v37, %v1647_v19 }
 0x237   :  { %v7787_v0 = vpop.f32.mrf.mxu0  ;;  %v1654_v37 = vsel %vm1616_vm3, %v9826_v34, 0.0 }
 0x238   :  { %v1651_v25 = vadd.f32 %v1650_v31, %v1649_v13 }
 0x239   :  { %v9828_v58 = vpop.f32.mrf.mxu0  ;;  %7933 = vmatmul.mubr.msk.f32.gmra.mxu0 %vm194_vm2, %v160_v40  ;;  %v9846_v40 = vadd.f32 %v9127_v53, %v9633_v59  ;;  %v162_v53 = vld [vmem:[%s16793_s0 + $0x478] sm:$0xff] }
 0x23a   :  { %7935 = vmatprep.mubr.msk.f32.mxu0 %vm8627_vm1, %v17177_v36  ;;  %v1653_v19 = vadd.f32 %v1652_v43, %v1651_v25 }
 0x23b   :  { %v7790_v7 = vpop.f32.mrf.mxu0  ;;  %17185 = vst [vmem:[#allocation51_spill] sm:$0xff] %v9846_v40  ;;  %v1658_v43 = vsel %vm1616_vm3, %v9846_v40, 0.0 }
 0x23c   :  { %v1655_v31 = vadd.f32 %v1654_v37, %v1653_v19 }
 0x23d   :  { %v9848_v0 = vpop.f32.mrf.mxu0  ;;  %7936 = vmatmul.mubr.msk.f32.gmra.mxu0 %vm194_vm2, %v161_v46  ;;  %v9866_v46 = vadd.f32 %v9143_v62, %v9633_v59  ;;  %v163_v62 = vld [vmem:[%s16793_s0 + $0x480] sm:$0xff] }
 0x23e   :  { %7938 = vmatprep.mubr.msk.f32.mxu0 %vm8627_vm1, %v17177_v36  ;;  %v1657_v25 = vadd.f32 %v1656_v49, %v1655_v31 }
 0x23f   :  { %v7793_v13 = vpop.f32.mrf.mxu0  ;;  %17187 = vst [vmem:[#allocation53_spill] sm:$0xff] %v9866_v46  ;;  %v1662_v49 = vsel %vm1616_vm3, %v9866_v46, 0.0 }
 0x240   :  { %v1659_v37 = vadd.f32 %v1658_v43, %v1657_v25 }
 0x241   :  { %v9868_v7 = vpop.f32.mrf.mxu0  ;;  %7939 = vmatmul.mubr.msk.f32.gmra.mxu0 %vm194_vm2, %v162_v53  ;;  %v9886_v53 = vadd.f32 %v9159_v8, %v9633_v59  ;;  %v164_v8 = vld [vmem:[%s16793_s0 + $0x488] sm:$0xff] }
 0x242   :  { %7941 = vmatprep.mubr.msk.f32.mxu0 %vm8627_vm1, %v17177_v36  ;;  %v1661_v31 = vadd.f32 %v1660_v57, %v1659_v37 }
 0x243   :  { %v7796_v19 = vpop.f32.mrf.mxu0  ;;  %17189 = vst [vmem:[#allocation55_spill] sm:$0xff] %v9886_v53  ;;  %v1666_v57 = vsel %vm1616_vm3, %v9886_v53, 0.0 }
 0x244   :  { %v1663_v43 = vadd.f32 %v1662_v49, %v1661_v31 }
 0x245   :  { %v9888_v13 = vpop.f32.mrf.mxu0  ;;  %7942 = vmatmul.mubr.msk.f32.gmra.mxu0 %vm194_vm2, %v163_v62  ;;  %v9906_v62 = vadd.f32 %v9175_v17, %v9633_v59  ;;  %v165_v17 = vld [vmem:[%s16793_s0 + $0x490] sm:$0xff] }
 0x246   :  { %7944 = vmatprep.mubr.msk.f32.mxu0 %vm8627_vm1, %v17177_v36  ;;  %v1665_v37 = vadd.f32 %v1664_v3, %v1663_v43 }
 0x247   :  { %v7799_v25 = vpop.f32.mrf.mxu0  ;;  %17191 = vst [vmem:[#allocation57_spill] sm:$0xff] %v9906_v62  ;;  %v1670_v3 = vsel %vm1616_vm3, %v9906_v62, 0.0 }
 0x248   :  { %v1667_v49 = vadd.f32 %v1666_v57, %v1665_v37 }
 0x249   :  { %v9908_v19 = vpop.f32.mrf.mxu0  ;;  %7945 = vmatmul.mubr.msk.f32.gmra.mxu0 %vm194_vm2, %v164_v8  ;;  %v9926_v8 = vadd.f32 %v9191_v26, %v9633_v59  ;;  %v166_v26 = vld [vmem:[%s16793_s0 + $0x498] sm:$0xff] }
 0x24a   :  { %7947 = vmatprep.mubr.msk.f32.mxu0 %vm8627_vm1, %v17177_v36  ;;  %v1669_v43 = vadd.f32 %v1668_v12, %v1667_v49 }
 0x24b   :  { %v7802_v31 = vpop.f32.mrf.mxu0  ;;  %17193 = vst [vmem:[#allocation59_spill] sm:$0xff] %v9926_v8  ;;  %v1674_v12 = vsel %vm1616_vm3, %v9926_v8, 0.0 }
 0x24c   :  { %v1671_v57 = vadd.f32 %v1670_v3, %v1669_v43 }
 0x24d   :  { %v9928_v25 = vpop.f32.mrf.mxu0  ;;  %7948 = vmatmul.mubr.msk.f32.gmra.mxu0 %vm194_vm2, %v165_v17  ;;  %v9946_v17 = vadd.f32 %v9207_v35, %v9633_v59  ;;  %v167_v35 = vld [vmem:[%s16793_s0 + $0x4a0] sm:$0xff] }
 0x24e   :  { %7950 = vmatprep.mubr.msk.f32.mxu0 %vm8627_vm1, %v17177_v36  ;;  %v1673_v49 = vadd.f32 %v1672_v21, %v1671_v57 }
 0x24f   :  { %v7805_v37 = vpop.f32.mrf.mxu0  ;;  %17195 = vst [vmem:[#allocation61_spill] sm:$0xff] %v9946_v17  ;;  %v1678_v21 = vsel %vm1616_vm3, %v9946_v17, 0.0 }
 0x250   :  { %v1675_v3 = vadd.f32 %v1674_v12, %v1673_v49 }
 0x251   :  { %v9948_v31 = vpop.f32.mrf.mxu0  ;;  %7951 = vmatmul.mubr.msk.f32.gmra.mxu0 %vm194_vm2, %v166_v26  ;;  %v9966_v26 = vadd.f32 %v9223_v44, %v9633_v59  ;;  %v168_v44 = vld [vmem:[%s16793_s0 + $0x4a8] sm:$0xff] }
 0x252   :  { %7953 = vmatprep.mubr.msk.f32.mxu0 %vm8627_vm1, %v17177_v36  ;;  %v1677_v57 = vadd.f32 %v1676_v30, %v1675_v3 }
 0x253   :  { %v7808_v43 = vpop.f32.mrf.mxu0  ;;  %17197 = vst [vmem:[#allocation63_spill] sm:$0xff] %v9966_v26  ;;  %v1682_v30 = vsel %vm1616_vm3, %v9966_v26, 0.0 }
 0x254   :  { %v1679_v12 = vadd.f32 %v1678_v21, %v1677_v57 }
 0x255   :  { %v9968_v37 = vpop.f32.mrf.mxu0  ;;  %7954 = vmatmul.mubr.msk.f32.gmra.mxu0 %vm194_vm2, %v167_v35  ;;  %v9986_v35 = vadd.f32 %v9239_v54, %v9633_v59  ;;  %v169_v54 = vld [vmem:[%s16793_s0 + $0x4b0] sm:$0xff] }
 0x256   :  { %7956 = vmatprep.mubr.msk.f32.mxu0 %vm8627_vm1, %v17177_v36  ;;  %v1681_v3 = vadd.f32 %v1680_v39, %v1679_v12 }
 0x257   :  { %v7811_v49 = vpop.f32.mrf.mxu0  ;;  %17199 = vst [vmem:[#allocation65_spill] sm:$0xff] %v9986_v35  ;;  %v1686_v39 = vsel %vm1616_vm3, %v9986_v35, 0.0 }
 0x258   :  { %v1683_v21 = vadd.f32 %v1682_v30, %v1681_v3 }
 0x259   :  { %v9988_v43 = vpop.f32.mrf.mxu0  ;;  %7957 = vmatmul.mubr.msk.f32.gmra.mxu0 %vm194_vm2, %v168_v44  ;;  %v10006_v44 = vadd.f32 %v9255_v5, %v9633_v59  ;;  %v170_v5 = vld [vmem:[%s16793_s0 + $0x4b8] sm:$0xff] }
 0x25a   :  { %7959 = vmatprep.mubr.msk.f32.mxu0 %vm8627_vm1, %v17177_v36  ;;  %v1685_v12 = vadd.f32 %v1684_v48, %v1683_v21 }
 0x25b   :  { %v7814_v57 = vpop.f32.mrf.mxu0  ;;  %17201 = vst [vmem:[#allocation67_spill] sm:$0xff] %v10006_v44  ;;  %v1690_v48 = vsel %vm1616_vm3, %v10006_v44, 0.0 }
 0x25c   :  { %v1687_v30 = vadd.f32 %v1686_v39, %v1685_v12 }
 0x25d   :  { %v10008_v49 = vpop.f32.mrf.mxu0  ;;  %7960 = vmatmul.mubr.msk.f32.gmra.mxu0 %vm194_vm2, %v169_v54  ;;  %v10026_v54 = vadd.f32 %v9271_v18, %v9633_v59  ;;  %v171_v18 = vld [vmem:[%s16793_s0 + $0x4c0] sm:$0xff] }
 0x25e   :  { %7962 = vmatprep.mubr.msk.f32.mxu0 %vm8627_vm1, %v17177_v36  ;;  %v1689_v21 = vadd.f32 %v1688_v60, %v1687_v30 }
 0x25f   :  { %v7817_v3 = vpop.f32.mrf.mxu0  ;;  %17203 = vst [vmem:[#allocation69_spill] sm:$0xff] %v10026_v54  ;;  %v1694_v60 = vsel %vm1616_vm3, %v10026_v54, 0.0 }
 0x260   :  { %v1691_v39 = vadd.f32 %v1690_v48, %v1689_v21 }
 0x261   :  { %v10028_v57 = vpop.f32.mrf.mxu0  ;;  %7963 = vmatmul.mubr.msk.f32.gmra.mxu0 %vm194_vm2, %v170_v5  ;;  %v10046_v5 = vadd.f32 %v9287_v32, %v9633_v59  ;;  %v172_v32 = vld [vmem:[%s16793_s0 + $0x4c8] sm:$0xff] }
 0x262   :  { %7965 = vmatprep.mubr.msk.f32.mxu0 %vm8627_vm1, %v17177_v36  ;;  %v1693_v30 = vadd.f32 %v1692_v11, %v1691_v39 }
 0x263   :  { %v7820_v12 = vpop.f32.mrf.mxu0  ;;  %17205 = vst [vmem:[#allocation71_spill] sm:$0xff] %v10046_v5  ;;  %v1698_v11 = vsel %vm1616_vm3, %v10046_v5, 0.0 }
 0x264   :  { %v1695_v48 = vadd.f32 %v1694_v60, %v1693_v30 }
 0x265   :  { %v10048_v3 = vpop.f32.mrf.mxu0  ;;  %7966 = vmatmul.mubr.msk.f32.gmra.mxu0 %vm194_vm2, %v171_v18  ;;  %v10066_v18 = vadd.f32 %v9303_v45, %v9633_v59  ;;  %v173_v45 = vld [vmem:[%s16793_s0 + $0x4d0] sm:$0xff] }
 0x266   :  { %7968 = vmatprep.mubr.msk.f32.mxu0 %vm8627_vm1, %v17177_v36  ;;  %v1697_v39 = vadd.f32 %v1696_v24, %v1695_v48 }
 0x267   :  { %v7823_v21 = vpop.f32.mrf.mxu0  ;;  %17207 = vst [vmem:[#allocation73_spill] sm:$0xff] %v10066_v18  ;;  %v1702_v24 = vsel %vm1616_vm3, %v10066_v18, 0.0 }
 0x268   :  { %v1699_v60 = vadd.f32 %v1698_v11, %v1697_v39 }
 0x269   :  { %v10068_v12 = vpop.f32.mrf.mxu0  ;;  %7969 = vmatmul.mubr.msk.f32.gmra.mxu0 %vm194_vm2, %v172_v32  ;;  %v10086_v32 = vadd.f32 %v9319_v63, %v9633_v59  ;;  %v174_v63 = vld [vmem:[%s16793_s0 + $0x4d8] sm:$0xff] }
 0x26a   :  { %7971 = vmatprep.mubr.msk.f32.mxu0 %vm8627_vm1, %v17177_v36  ;;  %v1701_v48 = vadd.f32 %v1700_v38, %v1699_v60 }
 0x26b   :  { %v7826_v30 = vpop.f32.mrf.mxu0  ;;  %17209 = vst [vmem:[#allocation75_spill] sm:$0xff] %v10086_v32  ;;  %v1706_v38 = vsel %vm1616_vm3, %v10086_v32, 0.0 }
 0x26c   :  { %v1703_v11 = vadd.f32 %v1702_v24, %v1701_v48 }
 0x26d   :  { %v10088_v21 = vpop.f32.mrf.mxu0  ;;  %7972 = vmatmul.mubr.msk.f32.gmra.mxu0 %vm194_vm2, %v173_v45  ;;  %v10106_v45 = vadd.f32 %v9335_v20, %v9633_v59  ;;  %v175_v20 = vld [vmem:[%s16793_s0 + $0x4e0] sm:$0xff] }
 0x26e   :  { %7974 = vmatprep.mubr.msk.f32.mxu0 %vm8627_vm1, %v17177_v36  ;;  %v1705_v60 = vadd.f32 %v1704_v51, %v1703_v11 }
 0x26f   :  { %v7829_v39 = vpop.f32.mrf.mxu0  ;;  %17211 = vst [vmem:[#allocation77_spill] sm:$0xff] %v10106_v45  ;;  %v1710_v51 = vsel %vm1616_vm3, %v10106_v45, 0.0 }
 0x270   :  { %v1707_v24 = vadd.f32 %v1706_v38, %v1705_v60 }
 0x271   :  { %v10108_v30 = vpop.f32.mrf.mxu0  ;;  %7975 = vmatmul.mubr.msk.f32.gmra.mxu0 %vm194_vm2, %v174_v63  ;;  %v10126_v63 = vadd.f32 %v9351_v41, %v9633_v59  ;;  %v176_v41 = vld [vmem:[%s16793_s0 + $0x4e8] sm:$0xff] }
 0x272   :  { %7977 = vmatprep.mubr.msk.f32.mxu0 %vm8627_vm1, %v17177_v36  ;;  %v1709_v11 = vadd.f32 %v1708_v9, %v1707_v24 }
 0x273   :  { %v7832_v48 = vpop.f32.mrf.mxu0  ;;  %17213 = vst [vmem:[#allocation79_spill] sm:$0xff] %v10126_v63  ;;  %v1714_v9 = vsel %vm1616_vm3, %v10126_v63, 0.0  ;;  %v17219_v63 = vld [vmem:[#allocation6_spill] sm:$0xff] }
 0x274   :  { %v1711_v38 = vadd.f32 %v1710_v51, %v1709_v11  ;;  %v10175_v45 = vadd.f32 %v17219_v63, %v9633_v59 }
 0x275   :  { %v10128_v39 = vpop.f32.mrf.mxu0  ;;  %7978 = vmatmul.mubr.msk.f32.gmra.mxu0 %vm194_vm2, %v175_v20  ;;  %v10146_v20 = vadd.f32 %v9367_v2, %v9633_v59  ;;  %v177_v2 = vld [vmem:[%s16793_s0 + $0x4f0] sm:$0xff] }
 0x276   :  { %7980 = vmatprep.mubr.msk.f32.mxu0 %vm8627_vm1, %v17177_v36  ;;  %v1713_v24 = vadd.f32 %v1712_v29, %v1711_v38  ;;  %17220 = vst [vmem:[#allocation6_spill] sm:$0xff] %v10175_v45  ;;  %v1724_v63 = vsel %vm1616_vm3, %v10175_v45, 0.0 }
 0x277   :  { %v7835_v60 = vpop.f32.mrf.mxu0  ;;  %17215 = vst [vmem:[#allocation81_spill] sm:$0xff] %v10146_v20  ;;  %v1718_v29 = vsel %vm1616_vm3, %v10146_v20, 0.0  ;;  %v17223_v20 = vld [vmem:[#allocation8_spill] sm:$0xff] }
 0x278   :  { %v1715_v51 = vadd.f32 %v1714_v9, %v1713_v24  ;;  %v178_v9 = vld [vmem:[%s16793_s0 + $0x4f8] sm:$0xff]  ;;  %v10195_v32 = vadd.f32 %v17223_v20, %v9633_v59 }
 0x279   :  { %v10148_v48 = vpop.f32.mrf.mxu0  ;;  %7981 = vmatmul.mubr.msk.f32.gmra.mxu0 %vm194_vm2, %v176_v41  ;;  %v17217_v41 = vld [vmem:[#allocation5_spill] sm:$0xff] }
 0x27a   :  { %7983 = vmatprep.mubr.msk.f32.mxu0 %vm8627_vm1, %v17177_v36  ;;  %v10166_v38 = vadd.f32 %v17217_v41, %v9633_v59  ;;  %v1717_v60 = vadd.f32 %v1716_v50, %v1715_v51  ;;  %17224 = vst [vmem:[#allocation8_spill] sm:$0xff] %v10195_v32  ;;  %v1728_v20 = vsel %vm1616_vm3, %v10195_v32, 0.0 }
 0x27b   :  { %v7838_v11 = vpop.f32.mrf.mxu0 }
 0x27c   :  { %17218 = vst [vmem:[#allocation5_spill] sm:$0xff] %v10166_v38  ;;  %v1719_v24 = vadd.f32 %v1718_v29, %v1717_v60  ;;  %v1722_v51 = vsel %vm1616_vm3, %v10166_v38, 0.0  ;;  %v179_v29 = vld [vmem:[%s16793_s0 + $0x500] sm:$0xff]  ;;  %v17227_v38 = vld [vmem:[#allocation10_spill] sm:$0xff] }
 0x27d   :  { %v10168_v1 = vpop.f32.mrf.mxu0  ;;  %7984 = vmatmul.mubr.msk.f32.gmra.mxu0 %vm194_vm2, %v177_v2  ;;  %v17221_v2 = vld [vmem:[#allocation7_spill] sm:$0xff]  ;;  %v10215_v18 = vadd.f32 %v17227_v38, %v9633_v59 }
 0x27e   :  { %7986 = vmatprep.mubr.msk.f32.mxu0 %vm8627_vm1, %v17177_v36  ;;  %v10186_v11 = vadd.f32 %v17221_v2, %v9633_v59  ;;  %v1721_v41 = vadd.f32 %v1720_v15, %v1719_v24 }
 0x27f   :  { %v7841_v50 = vpop.f32.mrf.mxu0  ;;  %17228 = vst [vmem:[#allocation10_spill] sm:$0xff] %v10215_v18  ;;  %v1732_v38 = vsel %vm1616_vm3, %v10215_v18, 0.0 }
 0x280   :  { %17222 = vst [vmem:[#allocation7_spill] sm:$0xff] %v10186_v11  ;;  %v1723_v60 = vadd.f32 %v1722_v51, %v1721_v41  ;;  %v1726_v24 = vsel %vm1616_vm3, %v10186_v11, 0.0  ;;  %v180_v51 = vld [vmem:[%s16793_s0 + $0x508] sm:$0xff]  ;;  %v17231_v11 = vld [vmem:[#allocation12_spill] sm:$0xff] }
 0x281   :  { %v10188_v52 = vpop.f32.mrf.mxu0  ;;  %7987 = vmatmul.mubr.msk.f32.gmra.mxu0 %vm194_vm2, %v178_v9  ;;  %v17225_v9 = vld [vmem:[#allocation9_spill] sm:$0xff]  ;;  %v10235_v5 = vadd.f32 %v17231_v11, %v9633_v59 }
 0x282   :  { %7989 = vmatprep.mubr.msk.f32.mxu0 %vm8627_vm1, %v17177_v36  ;;  %v10206_v50 = vadd.f32 %v17225_v9, %v9633_v59  ;;  %v1725_v2 = vadd.f32 %v1724_v63, %v1723_v60 }
 0x283   :  { %v7844_v15 = vpop.f32.mrf.mxu0  ;;  %17232 = vst [vmem:[#allocation12_spill] sm:$0xff] %v10235_v5  ;;  %v1736_v11 = vsel %vm1616_vm3, %v10235_v5, 0.0 }
 0x284   :  { %17226 = vst [vmem:[#allocation9_spill] sm:$0xff] %v10206_v50  ;;  %v1727_v41 = vadd.f32 %v1726_v24, %v1725_v2  ;;  %v1730_v60 = vsel %vm1616_vm3, %v10206_v50, 0.0  ;;  %v181_v24 = vld [vmem:[%s16793_s0 + $0x510] sm:$0xff] }
 0x285   :  { %v10208_v45 = vpop.f32.mrf.mxu0  ;;  %7990 = vmatmul.mubr.msk.f32.gmra.mxu0 %vm194_vm2, %v179_v29  ;;  %v17229_v29 = vld [vmem:[#allocation11_spill] sm:$0xff]  ;;  %v17235_v50 = vld [vmem:[#allocation14_spill] sm:$0xff] }
 0x286   :  { %7992 = vmatprep.mubr.msk.f32.mxu0 %vm8627_vm1, %v17177_v36  ;;  %v10226_v15 = vadd.f32 %v17229_v29, %v9633_v59  ;;  %v1729_v9 = vadd.f32 %v1728_v20, %v1727_v41  ;;  %v10255_v54 = vadd.f32 %v17235_v50, %v9633_v59 }
 0x287   :  { %v7847_v63 = vpop.f32.mrf.mxu0 }
 0x288   :  { %17230 = vst [vmem:[#allocation11_spill] sm:$0xff] %v10226_v15  ;;  %v1731_v2 = vadd.f32 %v1730_v60, %v1729_v9  ;;  %v1734_v41 = vsel %vm1616_vm3, %v10226_v15, 0.0  ;;  %17236 = vst [vmem:[#allocation14_spill] sm:$0xff] %v10255_v54  ;;  %v182_v60 = vld [vmem:[%s16793_s0 + $0x518] sm:$0xff]  ;;  %v1740_v50 = vsel %vm1616_vm3, %v10255_v54, 0.0 }
 0x289   :  { %v10228_v32 = vpop.f32.mrf.mxu0  ;;  %7993 = vmatmul.mubr.msk.f32.gmra.mxu0 %vm194_vm2, %v180_v51  ;;  %v17233_v51 = vld [vmem:[#allocation13_spill] sm:$0xff]  ;;  %v17239_v15 = vld [vmem:[#allocation16_spill] sm:$0xff] }
 0x28a   :  { %7995 = vmatprep.mubr.msk.f32.mxu0 %vm8627_vm1, %v17177_v36  ;;  %v10246_v63 = vadd.f32 %v17233_v51, %v9633_v59  ;;  %v1733_v29 = vadd.f32 %v1732_v38, %v1731_v2  ;;  %v10275_v44 = vadd.f32 %v17239_v15, %v9633_v59 }
 0x28b   :  { %v7850_v20 = vpop.f32.mrf.mxu0 }
 0x28c   :  { %17234 = vst [vmem:[#allocation13_spill] sm:$0xff] %v10246_v63  ;;  %v1735_v9 = vadd.f32 %v1734_v41, %v1733_v29  ;;  %v1738_v2 = vsel %vm1616_vm3, %v10246_v63, 0.0  ;;  %17240 = vst [vmem:[#allocation16_spill] sm:$0xff] %v10275_v44  ;;  %v183_v41 = vld [vmem:[%s16793_s0 + $0x520] sm:$0xff]  ;;  %v1744_v15 = vsel %vm1616_vm3, %v10275_v44, 0.0  ;;  %v17243_v63 = vld [vmem:[#allocation18_spill] sm:$0xff] }
 0x28d   :  { %v10248_v18 = vpop.f32.mrf.mxu0  ;;  %7996 = vmatmul.mubr.msk.f32.gmra.mxu0 %vm194_vm2, %v181_v24  ;;  %v17237_v24 = vld [vmem:[#allocation15_spill] sm:$0xff]  ;;  %v10295_v35 = vadd.f32 %v17243_v63, %v9633_v59 }
 0x28e   :  { %7998 = vmatprep.mubr.msk.f32.mxu0 %vm8627_vm1, %v17177_v36  ;;  %v10266_v20 = vadd.f32 %v17237_v24, %v9633_v59  ;;  %v1737_v51 = vadd.f32 %v1736_v11, %v1735_v9 }
 0x28f   :  { %v7853_v38 = vpop.f32.mrf.mxu0  ;;  %17244 = vst [vmem:[#allocation18_spill] sm:$0xff] %v10295_v35  ;;  %v1748_v63 = vsel %vm1616_vm3, %v10295_v35, 0.0 }
 0x290   :  { %17238 = vst [vmem:[#allocation15_spill] sm:$0xff] %v10266_v20  ;;  %v1739_v29 = vadd.f32 %v1738_v2, %v1737_v51  ;;  %v1742_v9 = vsel %vm1616_vm3, %v10266_v20, 0.0  ;;  %v184_v2 = vld [vmem:[%s16793_s0 + $0x528] sm:$0xff]  ;;  %v17247_v20 = vld [vmem:[#allocation20_spill] sm:$0xff] }
 0x291   :  { %v10268_v5 = vpop.f32.mrf.mxu0  ;;  %7999 = vmatmul.mubr.msk.f32.gmra.mxu0 %vm194_vm2, %v182_v60  ;;  %v17241_v60 = vld [vmem:[#allocation17_spill] sm:$0xff]  ;;  %v10315_v26 = vadd.f32 %v17247_v20, %v9633_v59 }
 0x292   :  { %8001 = vmatprep.mubr.msk.f32.mxu0 %vm8627_vm1, %v17177_v36  ;;  %v10286_v38 = vadd.f32 %v17241_v60, %v9633_v59  ;;  %v1741_v24 = vadd.f32 %v1740_v50, %v1739_v29 }
 0x293   :  { %v7856_v11 = vpop.f32.mrf.mxu0  ;;  %17248 = vst [vmem:[#allocation20_spill] sm:$0xff] %v10315_v26  ;;  %v1752_v20 = vsel %vm1616_vm3, %v10315_v26, 0.0 }
 0x294   :  { %17242 = vst [vmem:[#allocation17_spill] sm:$0xff] %v10286_v38  ;;  %v1743_v51 = vadd.f32 %v1742_v9, %v1741_v24  ;;  %v1746_v29 = vsel %vm1616_vm3, %v10286_v38, 0.0  ;;  %v185_v9 = vld [vmem:[%s16793_s0 + $0x530] sm:$0xff] }
 0x295   :  { %v10288_v54 = vpop.f32.mrf.mxu0  ;;  %8002 = vmatmul.mubr.msk.f32.gmra.mxu0 %vm194_vm2, %v183_v41  ;;  %v17245_v41 = vld [vmem:[#allocation19_spill] sm:$0xff]  ;;  %v17251_v38 = vld [vmem:[#allocation22_spill] sm:$0xff] }
 0x296   :  { %8004 = vmatprep.mubr.msk.f32.mxu0 %vm8627_vm1, %v17177_v36  ;;  %v10306_v11 = vadd.f32 %v17245_v41, %v9633_v59  ;;  %v1745_v60 = vadd.f32 %v1744_v15, %v1743_v51  ;;  %v10335_v17 = vadd.f32 %v17251_v38, %v9633_v59 }
 0x297   :  { %v7859_v50 = vpop.f32.mrf.mxu0 }
 0x298   :  { %17246 = vst [vmem:[#allocation19_spill] sm:$0xff] %v10306_v11  ;;  %v1747_v24 = vadd.f32 %v1746_v29, %v1745_v60  ;;  %v1750_v51 = vsel %vm1616_vm3, %v10306_v11, 0.0  ;;  %17252 = vst [vmem:[#allocation22_spill] sm:$0xff] %v10335_v17  ;;  %v186_v29 = vld [vmem:[%s16793_s0 + $0x538] sm:$0xff]  ;;  %v1756_v38 = vsel %vm1616_vm3, %v10335_v17, 0.0 }
 0x299   :  { %v10308_v44 = vpop.f32.mrf.mxu0  ;;  %8005 = vmatmul.mubr.msk.f32.gmra.mxu0 %vm194_vm2, %v184_v2  ;;  %v17249_v2 = vld [vmem:[#allocation21_spill] sm:$0xff]  ;;  %v17255_v11 = vld [vmem:[#allocation24_spill] sm:$0xff] }
 0x29a   :  { %8007 = vmatprep.mubr.msk.f32.mxu0 %vm8627_vm1, %v17177_v36  ;;  %v10326_v50 = vadd.f32 %v17249_v2, %v9633_v59  ;;  %v1749_v41 = vadd.f32 %v1748_v63, %v1747_v24  ;;  %v10355_v8 = vadd.f32 %v17255_v11, %v9633_v59 }
 0x29b   :  { %v7862_v15 = vpop.f32.mrf.mxu0 }
 0x29c   :  { %17250 = vst [vmem:[#allocation21_spill] sm:$0xff] %v10326_v50  ;;  %v1751_v60 = vadd.f32 %v1750_v51, %v1749_v41  ;;  %v1754_v24 = vsel %vm1616_vm3, %v10326_v50, 0.0  ;;  %17256 = vst [vmem:[#allocation24_spill] sm:$0xff] %v10355_v8  ;;  %v187_v51 = vld [vmem:[%s16793_s0 + $0x540] sm:$0xff]  ;;  %v1760_v11 = vsel %vm1616_vm3, %v10355_v8, 0.0 }
 0x29d   :  { %v10328_v35 = vpop.f32.mrf.mxu0  ;;  %8008 = vmatmul.mubr.msk.f32.gmra.mxu0 %vm194_vm2, %v185_v9  ;;  %v17253_v9 = vld [vmem:[#allocation23_spill] sm:$0xff]  ;;  %v17263_v8 = vld [vmem:[#allocation28_spill] sm:$0xff] }
 0x29e   :  { %8010 = vmatprep.mubr.msk.f32.mxu0 %vm8627_vm1, %v17177_v36  ;;  %v10346_v15 = vadd.f32 %v17253_v9, %v9633_v59  ;;  %v1753_v2 = vadd.f32 %v1752_v20, %v1751_v60  ;;  %v10389_v62 = vadd.f32 %v17263_v8, %v9633_v59 }
 0x29f   :  { %v7865_v63 = vpop.f32.mrf.mxu0 }
 0x2a0   :  { %17254 = vst [vmem:[#allocation23_spill] sm:$0xff] %v10346_v15  ;;  %v1755_v41 = vadd.f32 %v1754_v24, %v1753_v2  ;;  %v1758_v60 = vsel %vm1616_vm3, %v10346_v15, 0.0  ;;  %17264 = vst [vmem:[#allocation28_spill] sm:$0xff] %v10389_v62 }
 0x2a1   :  { %v10348_v26 = vpop.f32.mrf.mxu0  ;;  %8011 = vmatmul.mubr.msk.f32.gmra.mxu0 %vm194_vm2, %v186_v29  ;;  %v17257_v29 = vld [vmem:[#allocation25_spill] sm:$0xff] }
 0x2a2   :  { %8013 = vmatprep.mubr.msk.f32.mxu0 %vm8627_vm1, %v17177_v36  ;;  %v10366_v63 = vadd.f32 %v17257_v29, %v9633_v59  ;;  %v1757_v9 = vadd.f32 %v1756_v38, %v1755_v41  ;;  %v17259_v36 = vld [vmem:[#allocation26_spill] sm:$0xff]  ;;  %v17261_v29 = vld [vmem:[#allocation27_spill] sm:$0xff] }
 0x2a3   :  { %v7868_v20 = vpop.f32.mrf.mxu0  ;;  %v10375_v50 = vadd.f32 %v17259_v36, %v9633_v59  ;;  %v10381_v15 = vadd.f32 %v17261_v29, %v9633_v59 }
 0x2a4   :  { %17258 = vst [vmem:[#allocation25_spill] sm:$0xff] %v10366_v63  ;;  %v1759_v24 = vadd.f32 %v1758_v60, %v1757_v9  ;;  %v1762_v20 = vsel %vm1616_vm3, %v10366_v63, 0.0 }
 0x2a5   :  { %v10368_v17 = vpop.f32.mrf.mxu0  ;;  %8014 = vmatmul.mubr.msk.f32.gmra.mxu0 %vm194_vm2, %v187_v51  ;;  %17260 = vst [vmem:[#allocation26_spill] sm:$0xff] %v10375_v50  ;;  %17262 = vst [vmem:[#allocation27_spill] sm:$0xff] %v10381_v15  ;;  %v1764_v51 = vsel %vm1616_vm3, %v10375_v50, 0.0  ;;  %v1766_v9 = vsel %vm1616_vm3, %v10381_v15, 0.0  ;;  %v17267_v50 = vld [vmem:[#allocation30_spill] sm:$0xff] }
 0x2a6   :  { %v1761_v38 = vadd.f32 %v1760_v11, %v1759_v24  ;;  %v1768_v24 = vsel %vm1616_vm3, %v10389_v62, 0.0  ;;  %v10403_v53 = vadd.f32 %v17267_v50, %v9633_v59  ;;  %v17271_v62 = vld [vmem:[#allocation32_spill] sm:$0xff] }
 0x2a7   :  { %v7871_v2 = vpop.f32.mrf.mxu0  ;;  %v10417_v46 = vadd.f32 %v17271_v62, %v9633_v59 }
 0x2a8   :  { %v1763_v36 = vadd.f32 %v1762_v20, %v1761_v38  ;;  %v17265_v2 = vld [vmem:[#allocation29_spill] sm:$0xff]  ;;  %17268 = vst [vmem:[#allocation30_spill] sm:$0xff] %v10403_v53 }
 0x2a9   :  { %v10383_v41 = vpop.f32.mrf.mxu0  ;;  %v10395_v63 = vadd.f32 %v17265_v2, %v9633_v59  ;;  %17272 = vst [vmem:[#allocation32_spill] sm:$0xff] %v10417_v46 }
 0x2aa   :  { %v1765_v29 = vadd.f32 %v1764_v51, %v1763_v36  ;;  %v1772_v36 = vsel %vm1616_vm3, %v10403_v53, 0.0  ;;  %v17275_v53 = vld [vmem:[#allocation35_spill] sm:$0xff] }
 0x2ab   :  { %v7874_v60 = vpop.f32.mrf.mxu0  ;;  %17266 = vst [vmem:[#allocation29_spill] sm:$0xff] %v10395_v63  ;;  %v1770_v38 = vsel %vm1616_vm3, %v10395_v63, 0.0  ;;  %v10431_v40 = vadd.f32 %v17275_v53, %v9633_v59 }
 0x2ac   :  { %v1767_v8 = vadd.f32 %v1766_v9, %v1765_v29  ;;  %v17269_v60 = vld [vmem:[#allocation31_spill] sm:$0xff] }
 0x2ad   :  { %v10397_v11 = vpop.f32.mrf.mxu0  ;;  %v10409_v15 = vadd.f32 %v17269_v60, %v9633_v59  ;;  %17276 = vst [vmem:[#allocation35_spill] sm:$0xff] %v10431_v40 }
 0x2ae   :  { %v1769_v2 = vadd.f32 %v1768_v24, %v1767_v8  ;;  %v1776_v8 = vsel %vm1616_vm3, %v10417_v46, 0.0  ;;  %v17277_v46 = vld [vmem:[#allocation37_spill] sm:$0xff] }
 0x2af   :  { %v7877_v20 = vpop.f32.mrf.mxu0  ;;  %17270 = vst [vmem:[#allocation31_spill] sm:$0xff] %v10409_v15  ;;  %v1774_v29 = vsel %vm1616_vm3, %v10409_v15, 0.0  ;;  %v10445_v15 = vadd.f32 %v17277_v46, %v9633_v59 }
 0x2b0   :  { %v1771_v50 = vadd.f32 %v1770_v38, %v1769_v2  ;;  %v17273_v20 = vld [vmem:[#allocation33_spill] sm:$0xff] }
 0x2b1   :  { %v10411_v51 = vpop.f32.mrf.mxu0  ;;  %v10423_v63 = vadd.f32 %v17273_v20, %v9633_v59  ;;  %17278 = vst [vmem:[#allocation37_spill] sm:$0xff] %v10445_v15 }
 0x2b2   :  { %v1773_v60 = vadd.f32 %v1772_v36, %v1771_v50  ;;  %v1780_v50 = vsel %vm1616_vm3, %v10431_v40, 0.0  ;;  %v10459_v40 = vadd.f32 %v9688_v33, %v9633_v59 }
 0x2b3   :  { %v7880_v9 = vpop.f32.mrf.mxu0  ;;  %17274 = vst [vmem:[#allocation33_spill] sm:$0xff] %v10423_v63  ;;  %v1778_v2 = vsel %vm1616_vm3, %v10423_v63, 0.0 }
 0x2b4   :  { %v1775_v62 = vadd.f32 %v1774_v29, %v1773_v60  ;;  %v10437_v9 = vadd.f32 %v9630_v47, %v9633_v59 }
 0x2b5   :  { %v10425_v24 = vpop.f32.mrf.mxu0 }
 0x2b6   :  { %v1777_v20 = vadd.f32 %v1776_v8, %v1775_v62  ;;  %v1782_v60 = vsel %vm1616_vm3, %v10437_v9, 0.0  ;;  %v1784_v62 = vsel %vm1616_vm3, %v10445_v15, 0.0  ;;  %v10473_v15 = vadd.f32 %v9728_v23, %v9633_v59 }
 0x2b7   :  { %v7883_v38 = vpop.f32.mrf.mxu0 }
 0x2b8   :  { %v1779_v53 = vadd.f32 %v1778_v2, %v1777_v20  ;;  %v17279_v38 = vld [vmem:[#allocation41_spill] sm:$0xff]  ;;  %17281 = vst [vmem:[#allocation83_spill] sm:$0xff] %v10473_v15 }
 0x2b9   :  { %v10439_v36 = vpop.f32.mrf.mxu0  ;;  %v10451_v63 = vadd.f32 %v17279_v38, %v9633_v59  ;;  %17280 = vst [vmem:[#allocation41_spill] sm:$0xff] %v10459_v40 }
 0x2ba   :  { %v1781_v47 = vadd.f32 %v1780_v50, %v1779_v53  ;;  %v1788_v53 = vsel %vm1616_vm3, %v10459_v40, 0.0  ;;  %v10487_v40 = vadd.f32 %v9768_v61, %v9633_v59 }
 0x2bb   :  { %v7886_v29 = vpop.f32.mrf.mxu0  ;;  %v1786_v20 = vsel %vm1616_vm3, %v10451_v63, 0.0 }
 0x2bc   :  { %v1783_v46 = vadd.f32 %v1782_v60, %v1781_v47  ;;  %v10465_v29 = vadd.f32 %v9708_v6, %v9633_v59  ;;  %17282 = vst [vmem:[#allocation84_spill] sm:$0xff] %v10487_v40 }
 0x2bd   :  { %v10453_v8 = vpop.f32.mrf.mxu0 }
 0x2be   :  { %v1785_v38 = vadd.f32 %v1784_v62, %v1783_v46  ;;  %v1790_v47 = vsel %vm1616_vm3, %v10465_v29, 0.0  ;;  %v1792_v46 = vsel %vm1616_vm3, %v10473_v15, 0.0  ;;  %v10501_v15 = vadd.f32 %v9808_v56, %v9633_v59 }
 0x2bf   :  { %v7889_v2 = vpop.f32.mrf.mxu0 }
 0x2c0   :  { %v1787_v33 = vadd.f32 %v1786_v20, %v1785_v38  ;;  %v10479_v2 = vadd.f32 %v9748_v55, %v9633_v59  ;;  %17283 = vst [vmem:[#allocation85_spill] sm:$0xff] %v10501_v15 }
 0x2c1   :  { %v10467_v50 = vpop.f32.mrf.mxu0 }
 0x2c2   :  { %v1789_v6 = vadd.f32 %v1788_v53, %v1787_v33  ;;  %v1794_v38 = vsel %vm1616_vm3, %v10479_v2, 0.0  ;;  %v1796_v33 = vsel %vm1616_vm3, %v10487_v40, 0.0  ;;  %v10515_v40 = vadd.f32 %v9848_v0, %v9633_v59 }
 0x2c3   :  { %v7892_v60 = vpop.f32.mrf.mxu0 }
 0x2c4   :  { %v1791_v23 = vadd.f32 %v1790_v47, %v1789_v6  ;;  %v10493_v60 = vadd.f32 %v9788_v42, %v9633_v59  ;;  %17284 = vst [vmem:[#allocation86_spill] sm:$0xff] %v10515_v40 }
 0x2c5   :  { %v10481_v62 = vpop.f32.mrf.mxu0 }
 0x2c6   :  { %v1793_v55 = vadd.f32 %v1792_v46, %v1791_v23  ;;  %v1798_v6 = vsel %vm1616_vm3, %v10493_v60, 0.0  ;;  %v1800_v23 = vsel %vm1616_vm3, %v10501_v15, 0.0  ;;  %v10529_v15 = vadd.f32 %v9888_v13, %v9633_v59 }
 0x2c7   :  { %v7895_v20 = vpop.f32.mrf.mxu0 }
 0x2c8   :  { %v1795_v61 = vadd.f32 %v1794_v38, %v1793_v55  ;;  %v10507_v20 = vadd.f32 %v9828_v58, %v9633_v59  ;;  %17285 = vst [vmem:[#allocation87_spill] sm:$0xff] %v10529_v15 }
 0x2c9   :  { %v10495_v53 = vpop.f32.mrf.mxu0 }
 0x2ca   :  { %v1797_v42 = vadd.f32 %v1796_v33, %v1795_v61  ;;  %v1802_v55 = vsel %vm1616_vm3, %v10507_v20, 0.0  ;;  %v1804_v61 = vsel %vm1616_vm3, %v10515_v40, 0.0  ;;  %v10543_v40 = vadd.f32 %v9928_v25, %v9633_v59 }
 0x2cb   :  { %v7898_v47 = vpop.f32.mrf.mxu0 }
 0x2cc   :  { %v1799_v56 = vadd.f32 %v1798_v6, %v1797_v42  ;;  %v10521_v47 = vadd.f32 %v9868_v7, %v9633_v59  ;;  %17286 = vst [vmem:[#allocation88_spill] sm:$0xff] %v10543_v40 }
 0x2cd   :  { %v10509_v46 = vpop.f32.mrf.mxu0 }
 0x2ce   :  { %v1801_v58 = vadd.f32 %v1800_v23, %v1799_v56  ;;  %v1806_v42 = vsel %vm1616_vm3, %v10521_v47, 0.0  ;;  %v1808_v56 = vsel %vm1616_vm3, %v10529_v15, 0.0  ;;  %v10557_v15 = vadd.f32 %v9968_v37, %v9633_v59 }
 0x2cf   :  { %v7901_v38 = vpop.f32.mrf.mxu0 }
 0x2d0   :  { %v1803_v0 = vadd.f32 %v1802_v55, %v1801_v58  ;;  %v10535_v38 = vadd.f32 %v9908_v19, %v9633_v59  ;;  %17287 = vst [vmem:[#allocation89_spill] sm:$0xff] %v10557_v15 }
 0x2d1   :  { %v10523_v33 = vpop.f32.mrf.mxu0 }
 0x2d2   :  { %v1805_v7 = vadd.f32 %v1804_v61, %v1803_v0  ;;  %v1810_v58 = vsel %vm1616_vm3, %v10535_v38, 0.0  ;;  %v1812_v0 = vsel %vm1616_vm3, %v10543_v40, 0.0  ;;  %v10571_v40 = vadd.f32 %v10008_v49, %v9633_v59 }
 0x2d3   :  { %v7904_v6 = vpop.f32.mrf.mxu0 }
 0x2d4   :  { %v1807_v13 = vadd.f32 %v1806_v42, %v1805_v7  ;;  %v10549_v6 = vadd.f32 %v9948_v31, %v9633_v59  ;;  %17288 = vst [vmem:[#allocation90_spill] sm:$0xff] %v10571_v40 }
 0x2d5   :  { %v10537_v23 = vpop.f32.mrf.mxu0 }
 0x2d6   :  { %v1809_v19 = vadd.f32 %v1808_v56, %v1807_v13  ;;  %v1814_v7 = vsel %vm1616_vm3, %v10549_v6, 0.0  ;;  %v1816_v13 = vsel %vm1616_vm3, %v10557_v15, 0.0  ;;  %v10585_v15 = vadd.f32 %v10048_v3, %v9633_v59 }
 0x2d7   :  { %v7907_v55 = vpop.f32.mrf.mxu0 }
 0x2d8   :  { %v1811_v25 = vadd.f32 %v1810_v58, %v1809_v19  ;;  %v10563_v55 = vadd.f32 %v9988_v43, %v9633_v59  ;;  %17289 = vst [vmem:[#allocation91_spill] sm:$0xff] %v10585_v15 }
 0x2d9   :  { %v10551_v61 = vpop.f32.mrf.mxu0 }
 0x2da   :  { %v1813_v31 = vadd.f32 %v1812_v0, %v1811_v25  ;;  %v1818_v19 = vsel %vm1616_vm3, %v10563_v55, 0.0  ;;  %v1820_v25 = vsel %vm1616_vm3, %v10571_v40, 0.0  ;;  %v10599_v40 = vadd.f32 %v10088_v21, %v9633_v59 }
 0x2db   :  { %v7910_v42 = vpop.f32.mrf.mxu0 }
 0x2dc   :  { %v1815_v37 = vadd.f32 %v1814_v7, %v1813_v31  ;;  %v10577_v42 = vadd.f32 %v10028_v57, %v9633_v59  ;;  %17290 = vst [vmem:[#allocation92_spill] sm:$0xff] %v10599_v40 }
 0x2dd   :  { %v10565_v56 = vpop.f32.mrf.mxu0 }
 0x2de   :  { %v1817_v43 = vadd.f32 %v1816_v13, %v1815_v37  ;;  %v1822_v31 = vsel %vm1616_vm3, %v10577_v42, 0.0  ;;  %v1824_v37 = vsel %vm1616_vm3, %v10585_v15, 0.0  ;;  %v10613_v15 = vadd.f32 %v10128_v39, %v9633_v59 }
 0x2df   :  { %v7913_v58 = vpop.f32.mrf.mxu0 }
 0x2e0   :  { %v1819_v49 = vadd.f32 %v1818_v19, %v1817_v43  ;;  %v10591_v58 = vadd.f32 %v10068_v12, %v9633_v59  ;;  %17291 = vst [vmem:[#allocation93_spill] sm:$0xff] %v10613_v15 }
 0x2e1   :  { %v10579_v0 = vpop.f32.mrf.mxu0 }
 0x2e2   :  { %v1821_v57 = vadd.f32 %v1820_v25, %v1819_v49  ;;  %v1826_v43 = vsel %vm1616_vm3, %v10591_v58, 0.0  ;;  %v1828_v49 = vsel %vm1616_vm3, %v10599_v40, 0.0  ;;  %v10627_v40 = vadd.f32 %v10168_v1, %v9633_v59 }
 0x2e3   :  { %v7916_v7 = vpop.f32.mrf.mxu0 }
 0x2e4   :  { %v1823_v3 = vadd.f32 %v1822_v31, %v1821_v57  ;;  %v10605_v7 = vadd.f32 %v10108_v30, %v9633_v59  ;;  %17292 = vst [vmem:[#allocation94_spill] sm:$0xff] %v10627_v40 }
 0x2e5   :  { %v10593_v13 = vpop.f32.mrf.mxu0 }
 0x2e6   :  { %v1825_v12 = vadd.f32 %v1824_v37, %v1823_v3  ;;  %v1830_v57 = vsel %vm1616_vm3, %v10605_v7, 0.0  ;;  %v1832_v3 = vsel %vm1616_vm3, %v10613_v15, 0.0  ;;  %v10641_v15 = vadd.f32 %v10208_v45, %v9633_v59 }
 0x2e7   :  { %v7919_v19 = vpop.f32.mrf.mxu0 }
 0x2e8   :  { %v1827_v21 = vadd.f32 %v1826_v43, %v1825_v12  ;;  %v10619_v19 = vadd.f32 %v10148_v48, %v9633_v59  ;;  %17293 = vst [vmem:[#allocation95_spill] sm:$0xff] %v10641_v15 }
 0x2e9   :  { %v10607_v25 = vpop.f32.mrf.mxu0 }
 0x2ea   :  { %v1829_v30 = vadd.f32 %v1828_v49, %v1827_v21  ;;  %v1834_v12 = vsel %vm1616_vm3, %v10619_v19, 0.0  ;;  %v1836_v21 = vsel %vm1616_vm3, %v10627_v40, 0.0  ;;  %v10655_v40 = vadd.f32 %v10248_v18, %v9633_v59 }
 0x2eb   :  { %v7922_v31 = vpop.f32.mrf.mxu0 }
 0x2ec   :  { %v1831_v39 = vadd.f32 %v1830_v57, %v1829_v30  ;;  %v10633_v31 = vadd.f32 %v10188_v52, %v9633_v59  ;;  %17294 = vst [vmem:[#allocation96_spill] sm:$0xff] %v10655_v40 }
 0x2ed   :  { %v10621_v37 = vpop.f32.mrf.mxu0 }
 0x2ee   :  { %v1833_v48 = vadd.f32 %v1832_v3, %v1831_v39  ;;  %v1838_v30 = vsel %vm1616_vm3, %v10633_v31, 0.0  ;;  %v1840_v39 = vsel %vm1616_vm3, %v10641_v15, 0.0  ;;  %v10669_v15 = vadd.f32 %v10288_v54, %v9633_v59 }
 0x2ef   :  { %v7925_v43 = vpop.f32.mrf.mxu0 }
 0x2f0   :  { %v1835_v1 = vadd.f32 %v1834_v12, %v1833_v48  ;;  %v10647_v43 = vadd.f32 %v10228_v32, %v9633_v59  ;;  %17295 = vst [vmem:[#allocation97_spill] sm:$0xff] %v10669_v15 }
 0x2f1   :  { %v10635_v49 = vpop.f32.mrf.mxu0 }
 0x2f2   :  { %v1837_v52 = vadd.f32 %v1836_v21, %v1835_v1  ;;  %v1842_v48 = vsel %vm1616_vm3, %v10647_v43, 0.0  ;;  %v1844_v1 = vsel %vm1616_vm3, %v10655_v40, 0.0  ;;  %v10683_v40 = vadd.f32 %v10328_v35, %v9633_v59 }
 0x2f3   :  { %v7928_v57 = vpop.f32.mrf.mxu0 }
 0x2f4   :  { %v1839_v45 = vadd.f32 %v1838_v30, %v1837_v52  ;;  %v10661_v57 = vadd.f32 %v10268_v5, %v9633_v59  ;;  %17296 = vst [vmem:[#allocation98_spill] sm:$0xff] %v10683_v40 }
 0x2f5   :  { %v10649_v3 = vpop.f32.mrf.mxu0 }
 0x2f6   :  { %v1841_v32 = vadd.f32 %v1840_v39, %v1839_v45  ;;  %v1846_v52 = vsel %vm1616_vm3, %v10661_v57, 0.0  ;;  %v1848_v45 = vsel %vm1616_vm3, %v10669_v15, 0.0  ;;  %v10697_v15 = vadd.f32 %v10368_v17, %v9633_v59 }
 0x2f7   :  { %v7931_v12 = vpop.f32.mrf.mxu0 }
 0x2f8   :  { %v1843_v18 = vadd.f32 %v1842_v48, %v1841_v32  ;;  %v10675_v12 = vadd.f32 %v10308_v44, %v9633_v59  ;;  %17297 = vst [vmem:[#allocation99_spill] sm:$0xff] %v10697_v15 }
 0x2f9   :  { %v10663_v21 = vpop.f32.mrf.mxu0 }
 0x2fa   :  { %v1845_v5 = vadd.f32 %v1844_v1, %v1843_v18  ;;  %v1850_v32 = vsel %vm1616_vm3, %v10675_v12, 0.0  ;;  %v1852_v18 = vsel %vm1616_vm3, %v10683_v40, 0.0  ;;  %v10711_v40 = vadd.f32 %v10397_v11, %v9633_v59 }
 0x2fb   :  { %v7934_v30 = vpop.f32.mrf.mxu0 }
 0x2fc   :  { %v1847_v54 = vadd.f32 %v1846_v52, %v1845_v5  ;;  %v10689_v30 = vadd.f32 %v10348_v26, %v9633_v59  ;;  %17298 = vst [vmem:[#allocation100_spill] sm:$0xff] %v10711_v40 }
 0x2fd   :  { %v10677_v39 = vpop.f32.mrf.mxu0 }
 0x2fe   :  { %v1849_v44 = vadd.f32 %v1848_v45, %v1847_v54  ;;  %v1854_v5 = vsel %vm1616_vm3, %v10689_v30, 0.0  ;;  %v1856_v54 = vsel %vm1616_vm3, %v10697_v15, 0.0  ;;  %v10725_v15 = vadd.f32 %v10425_v24, %v9633_v59 }
 0x2ff   :  { %v7937_v48 = vpop.f32.mrf.mxu0 }
 0x300   :  { %v1851_v35 = vadd.f32 %v1850_v32, %v1849_v44  ;;  %v10703_v48 = vadd.f32 %v10383_v41, %v9633_v59  ;;  %17299 = vst [vmem:[#allocation101_spill] sm:$0xff] %v10725_v15 }
 0x301   :  { %v10691_v1 = vpop.f32.mrf.mxu0 }
 0x302   :  { %v1853_v26 = vadd.f32 %v1852_v18, %v1851_v35  ;;  %v1858_v44 = vsel %vm1616_vm3, %v10703_v48, 0.0  ;;  %v1860_v35 = vsel %vm1616_vm3, %v10711_v40, 0.0  ;;  %v10739_v40 = vadd.f32 %v10453_v8, %v9633_v59 }
 0x303   :  { %v7940_v52 = vpop.f32.mrf.mxu0 }
 0x304   :  { %v1855_v17 = vadd.f32 %v1854_v5, %v1853_v26  ;;  %v10717_v52 = vadd.f32 %v10411_v51, %v9633_v59  ;;  %17300 = vst [vmem:[#allocation102_spill] sm:$0xff] %v10739_v40 }
 0x305   :  { %v10705_v45 = vpop.f32.mrf.mxu0 }
 0x306   :  { %v1857_v41 = vadd.f32 %v1856_v54, %v1855_v17  ;;  %v1862_v26 = vsel %vm1616_vm3, %v10717_v52, 0.0  ;;  %v1864_v17 = vsel %vm1616_vm3, %v10725_v15, 0.0  ;;  %v10753_v15 = vadd.f32 %v10481_v62, %v9633_v59 }
 0x307   :  { %v7943_v32 = vpop.f32.mrf.mxu0 }
 0x308   :  { %v1859_v11 = vadd.f32 %v1858_v44, %v1857_v41  ;;  %v10731_v32 = vadd.f32 %v10439_v36, %v9633_v59  ;;  %17301 = vst [vmem:[#allocation103_spill] sm:$0xff] %v10753_v15 }
 0x309   :  { %v10719_v18 = vpop.f32.mrf.mxu0 }
 0x30a   :  { %v1861_v51 = vadd.f32 %v1860_v35, %v1859_v11  ;;  %v1866_v41 = vsel %vm1616_vm3, %v10731_v32, 0.0  ;;  %v1868_v11 = vsel %vm1616_vm3, %v10739_v40, 0.0  ;;  %v10767_v40 = vadd.f32 %v10509_v46, %v9633_v59 }
 0x30b   :  { %v7946_v5 = vpop.f32.mrf.mxu0 }
 0x30c   :  { %v1863_v24 = vadd.f32 %v1862_v26, %v1861_v51  ;;  %v10745_v5 = vadd.f32 %v10467_v50, %v9633_v59  ;;  %17302 = vst [vmem:[#allocation104_spill] sm:$0xff] %v10767_v40 }
 0x30d   :  { %v10733_v54 = vpop.f32.mrf.mxu0 }
 0x30e   :  { %v1865_v36 = vadd.f32 %v1864_v17, %v1863_v24  ;;  %v1870_v51 = vsel %vm1616_vm3, %v10745_v5, 0.0  ;;  %v1872_v24 = vsel %vm1616_vm3, %v10753_v15, 0.0  ;;  %v10781_v15 = vadd.f32 %v10537_v23, %v9633_v59 }
 0x30f   :  { %v7949_v44 = vpop.f32.mrf.mxu0 }
 0x310   :  { %v1867_v8 = vadd.f32 %v1866_v41, %v1865_v36  ;;  %v10759_v44 = vadd.f32 %v10495_v53, %v9633_v59  ;;  %17304 = vst [vmem:[#allocation106_spill] sm:$0xff] %v10781_v15 }
 0x311   :  { %v10747_v35 = vpop.f32.mrf.mxu0 }
 0x312   :  { %v1869_v50 = vadd.f32 %v1868_v11, %v1867_v8  ;;  %v1874_v36 = vsel %vm1616_vm3, %v10759_v44, 0.0  ;;  %v1876_v8 = vsel %vm1616_vm3, %v10767_v40, 0.0  ;;  %v10795_v40 = vadd.f32 %v10565_v56, %v9633_v59 }
 0x313   :  { %v7952_v26 = vpop.f32.mrf.mxu0 }
 0x314   :  { %v1871_v62 = vadd.f32 %v1870_v51, %v1869_v50  ;;  %v10773_v26 = vadd.f32 %v10523_v33, %v9633_v59  ;;  %17305 = vst [vmem:[#allocation107_spill] sm:$0xff] %v10795_v40 }
 0x315   :  { %v10761_v17 = vpop.f32.mrf.mxu0 }
 0x316   :  { %17303 = vst [vmem:[#allocation105_spill] sm:$0xff] %v10773_v26  ;;  %v1873_v53 = vadd.f32 %v1872_v24, %v1871_v62  ;;  %v1878_v50 = vsel %vm1616_vm3, %v10773_v26, 0.0  ;;  %v1880_v62 = vsel %vm1616_vm3, %v10781_v15, 0.0  ;;  %v10807_v15 = vadd.f32 %v10593_v13, %v9633_v59 }
 0x317   :  { %v7955_v41 = vpop.f32.mrf.mxu0 }
 0x318   :  { %v1875_v46 = vadd.f32 %v1874_v36, %v1873_v53  ;;  %v10787_v41 = vadd.f32 %v10551_v61, %v9633_v59  ;;  %17306 = vst [vmem:[#allocation108_spill] sm:$0xff] %v10807_v15 }
 0x319   :  { %v10775_v11 = vpop.f32.mrf.mxu0 }
 0x31a   :  { %v1877_v33 = vadd.f32 %v1876_v8, %v1875_v46  ;;  %v1882_v53 = vsel %vm1616_vm3, %v10787_v41, 0.0  ;;  %v1884_v46 = vsel %vm1616_vm3, %v10795_v40, 0.0 }
 0x31b   :  { %v7958_v51 = vpop.f32.mrf.mxu0 }
 0x31c   :  { %v1879_v23 = vadd.f32 %v1878_v50, %v1877_v33  ;;  %v10801_v51 = vadd.f32 %v10579_v0, %v9633_v59  ;;  %v10813_v33 = vadd.f32 %v10607_v25, %v9633_v59 }
 0x31d   :  { %v10789_v24 = vpop.f32.mrf.mxu0 }
 0x31e   :  { %v1881_v61 = vadd.f32 %v1880_v62, %v1879_v23  ;;  %v1886_v50 = vsel %vm1616_vm3, %v10801_v51, 0.0  ;;  %v1888_v62 = vsel %vm1616_vm3, %v10807_v15, 0.0  ;;  %v10819_v23 = vadd.f32 %v10621_v37, %v9633_v59 }
 0x31f   :  { %v7961_v36 = vpop.f32.mrf.mxu0 }
 0x320   :  { %v1883_v56 = vadd.f32 %v1882_v53, %v1881_v61  ;;  %17307 = vst [vmem:[#allocation109_spill] sm:$0xff] %v10819_v23  ;;  %v10825_v53 = vadd.f32 %v10635_v49, %v9633_v59 }
 0x321   :  { %v1527_v8 = vpop.f32.mrf.mxu0 }
 0x322   :  { %v1885_v0 = vadd.f32 %v1884_v46, %v1883_v56  ;;  %v1892_v46 = vsel %vm1616_vm3, %v10819_v23, 0.0  ;;  %v10831_v56 = vadd.f32 %v10649_v3, %v9633_v59 }
 0x323   :  { %v7964_v26 = vpop.f32.mrf.mxu0 }
 0x324   :  { %v1887_v13 = vadd.f32 %v1886_v50, %v1885_v0  ;;  %v1890_v26 = vsel %vm1616_vm3, %v10813_v33, 0.0  ;;  %17308 = vst [vmem:[#allocation110_spill] sm:$0xff] %v10831_v56  ;;  %v10837_v50 = vadd.f32 %v10663_v21, %v9633_v59 }
 0x325   :  { %v1532_v36 = vpop.f32.mrf.mxu0 }
 0x326   :  { %v1889_v25 = vadd.f32 %v1888_v62, %v1887_v13  ;;  %v1896_v62 = vsel %vm1616_vm3, %v10831_v56, 0.0  ;;  %v10843_v13 = vadd.f32 %v10677_v39, %v9633_v59 }
 0x327   :  { %v7967_v40 = vpop.f32.mrf.mxu0 }
 0x328   :  { %v1891_v37 = vadd.f32 %v1890_v26, %v1889_v25  ;;  %v1894_v40 = vsel %vm1616_vm3, %v10825_v53, 0.0  ;;  %17309 = vst [vmem:[#allocation111_spill] sm:$0xff] %v10843_v13  ;;  %v10849_v26 = vadd.f32 %v10691_v1, %v9633_v59 }
 0x329   :  { %v1537_v61 = vpop.f32.mrf.mxu0 }
 0x32a   :  { %v1893_v49 = vadd.f32 %v1892_v46, %v1891_v37  ;;  %v1900_v46 = vsel %vm1616_vm3, %v10843_v13, 0.0  ;;  %v10855_v37 = vadd.f32 %v10705_v45, %v9633_v59 }
 0x32b   :  { %v7970_v15 = vpop.f32.mrf.mxu0 }
 0x32c   :  { %v1895_v3 = vadd.f32 %v1894_v40, %v1893_v49  ;;  %v1898_v15 = vsel %vm1616_vm3, %v10837_v50, 0.0  ;;  %17310 = vst [vmem:[#allocation112_spill] sm:$0xff] %v10855_v37  ;;  %v10861_v40 = vadd.f32 %v10719_v18, %v9633_v59 }
 0x32d   :  { %v1542_v0 = vpop.f32.mrf.mxu0 }
 0x32e   :  { %v1897_v21 = vadd.f32 %v1896_v62, %v1895_v3  ;;  %v1904_v62 = vsel %vm1616_vm3, %v10855_v37, 0.0  ;;  %v10867_v3 = vadd.f32 %v10733_v54, %v9633_v59 }
 0x32f   :  { %v7973_v23 = vpop.f32.mrf.mxu0 }
 0x330   :  { %v1899_v39 = vadd.f32 %v1898_v15, %v1897_v21  ;;  %v1902_v23 = vsel %vm1616_vm3, %v10849_v26, 0.0  ;;  %17311 = vst [vmem:[#allocation113_spill] sm:$0xff] %v10867_v3  ;;  %v10873_v15 = vadd.f32 %v10747_v35, %v9633_v59 }
 0x331   :  { %v1547_v25 = vpop.f32.mrf.mxu0 }
 0x332   :  { %v1901_v1 = vadd.f32 %v1900_v46, %v1899_v39  ;;  %17312 = vst [vmem:[#allocation114_spill] sm:$0xff] %v10873_v15  ;;  %v1908_v46 = vsel %vm1616_vm3, %v10867_v3, 0.0  ;;  %v10879_v39 = vadd.f32 %v10761_v17, %v9633_v59 }
 0x333   :  { %v7976_v56 = vpop.f32.mrf.mxu0 }
 0x334   :  { %v1903_v45 = vadd.f32 %v1902_v23, %v1901_v1  ;;  %v1906_v56 = vsel %vm1616_vm3, %v10861_v40, 0.0  ;;  %17313 = vst [vmem:[#allocation115_spill] sm:$0xff] %v10879_v39  ;;  %v10885_v23 = vadd.f32 %v10775_v11, %v9633_v59 }
 0x335   :  { %v1552_v49 = vpop.f32.mrf.mxu0 }
 0x336   :  { %v1905_v18 = vadd.f32 %v1904_v62, %v1903_v45  ;;  %v1912_v62 = vsel %vm1616_vm3, %v10879_v39, 0.0  ;;  %v10891_v45 = vadd.f32 %v10789_v24, %v9633_v59 }
 0x337   :  { %v7979_v13 = vpop.f32.mrf.mxu0 }
 0x338   :  { %v1907_v54 = vadd.f32 %v1906_v56, %v1905_v18  ;;  %v1910_v13 = vsel %vm1616_vm3, %v10873_v15, 0.0  ;;  %17314 = vst [vmem:[#allocation116_spill] sm:$0xff] %v10891_v45  ;;  %v10896_v56 = vadd.f32 %v1527_v8, %v9633_v59 }
 0x339   :  { %v1557_v21 = vpop.f32.mrf.mxu0 }
 0x33a   :  { %v1909_v35 = vadd.f32 %v1908_v46, %v1907_v54  ;;  %v1916_v46 = vsel %vm1616_vm3, %v10891_v45, 0.0  ;;  %v10901_v54 = vadd.f32 %v1532_v36, %v9633_v59  ;;  %v1918_v24 = vsel %vm1616_vm3, %v10896_v56, 0.0 }
 0x33b   :  { %v7982_v37 = vpop.f32.mrf.mxu0 }
 0x33c   :  { %v1911_v17 = vadd.f32 %v1910_v13, %v1909_v35  ;;  %v1914_v37 = vsel %vm1616_vm3, %v10885_v23, 0.0  ;;  %17315 = vst [vmem:[#allocation117_spill] sm:$0xff] %v10901_v54  ;;  %v1920_v8 = vsel %vm1616_vm3, %v10901_v54, 0.0 }
 0x33d   :  { %v1562_v1 = vpop.f32.mrf.mxu0 }
 0x33e   :  { %v1913_v18 = vadd.f32 %v1912_v62, %v1911_v17  ;;  %v10911_v62 = vadd.f32 %v1542_v0, %v9633_v59 }
 0x33f   :  { %v7985_v3 = vpop.f32.mrf.mxu0 }
 0x340   :  { %v1915_v39 = vadd.f32 %v1914_v37, %v1913_v18  ;;  %v10906_v3 = vadd.f32 %v1537_v61, %v9633_v59  ;;  %17316 = vst [vmem:[#allocation118_spill] sm:$0xff] %v10911_v62  ;;  %v1924_v61 = vsel %vm1616_vm3, %v10911_v62, 0.0 }
 0x341   :  { %v1567_v11 = vpop.f32.mrf.mxu0 }
 0x342   :  { %v1917_v13 = vadd.f32 %v1916_v46, %v1915_v39  ;;  %v1922_v36 = vsel %vm1616_vm3, %v10906_v3, 0.0  ;;  %v10921_v39 = vadd.f32 %v1552_v49, %v9633_v59 }
 0x343   :  { %v7988_v15 = vpop.f32.mrf.mxu0 }
 0x344   :  { %v1919_v17 = vadd.f32 %v1918_v24, %v1917_v13  ;;  %v10916_v15 = vadd.f32 %v1547_v25, %v9633_v59  ;;  %17318 = vst [vmem:[#allocation120_spill] sm:$0xff] %v10921_v39  ;;  %v1928_v25 = vsel %vm1616_vm3, %v10921_v39, 0.0 }
 0x345   :  { %v1572_v35 = vpop.f32.mrf.mxu0 }
 0x346   :  { %17317 = vst [vmem:[#allocation119_spill] sm:$0xff] %v10916_v15  ;;  %v1921_v37 = vadd.f32 %v1920_v8, %v1919_v17  ;;  %v1926_v0 = vsel %vm1616_vm3, %v10916_v15, 0.0  ;;  %v10931_v8 = vadd.f32 %v1562_v1, %v9633_v59 }
 0x347   :  { %v7991_v45 = vpop.f32.mrf.mxu0 }
 0x348   :  { %v1923_v46 = vadd.f32 %v1922_v36, %v1921_v37  ;;  %v10926_v45 = vadd.f32 %v1557_v21, %v9633_v59  ;;  %17320 = vst [vmem:[#allocation122_spill] sm:$0xff] %v10931_v8  ;;  %v1932_v21 = vsel %vm1616_vm3, %v10931_v8, 0.0 }
 0x349   :  { %v1577_v18 = vpop.f32.mrf.mxu0 }
 0x34a   :  { %17319 = vst [vmem:[#allocation121_spill] sm:$0xff] %v10926_v45  ;;  %v1925_v24 = vadd.f32 %v1924_v61, %v1923_v46  ;;  %v1930_v49 = vsel %vm1616_vm3, %v10926_v45, 0.0  ;;  %v10941_v61 = vadd.f32 %v1572_v35, %v9633_v59 }
 0x34b   :  { %v7994_v54 = vpop.f32.mrf.mxu0 }
 0x34c   :  { %v1927_v17 = vadd.f32 %v1926_v0, %v1925_v24  ;;  %v10936_v54 = vadd.f32 %v1567_v11, %v9633_v59  ;;  %17322 = vst [vmem:[#allocation124_spill] sm:$0xff] %v10941_v61  ;;  %v1936_v11 = vsel %vm1616_vm3, %v10941_v61, 0.0 }
 0x34d   :  { %v1582_v13 = vpop.f32.mrf.mxu0 }
 0x34e   :  { %17321 = vst [vmem:[#allocation123_spill] sm:$0xff] %v10936_v54  ;;  %v1929_v36 = vadd.f32 %v1928_v25, %v1927_v17  ;;  %v1934_v1 = vsel %vm1616_vm3, %v10936_v54, 0.0  ;;  %v10951_v25 = vadd.f32 %v1582_v13, %v9633_v59 }
 0x34f   :  { %v7997_v62 = vpop.f32.mrf.mxu0 }
 0x350   :  { %v1931_v46 = vadd.f32 %v1930_v49, %v1929_v36  ;;  %v10946_v62 = vadd.f32 %v1577_v18, %v9633_v59  ;;  %17324 = vst [vmem:[#allocation126_spill] sm:$0xff] %v10951_v25  ;;  %v1940_v18 = vsel %vm1616_vm3, %v10951_v25, 0.0 }
 0x351   :  { %v1587_v37 = vpop.f32.mrf.mxu0 }
 0x352   :  { %17323 = vst [vmem:[#allocation125_spill] sm:$0xff] %v10946_v62  ;;  %v1933_v0 = vadd.f32 %v1932_v21, %v1931_v46  ;;  %v1938_v35 = vsel %vm1616_vm3, %v10946_v62, 0.0 }
 0x353   :  { %v8000_v39 = vpop.f32.mrf.mxu0 }
 0x354   :  { %v1935_v17 = vadd.f32 %v1934_v1, %v1933_v0  ;;  %v10956_v39 = vadd.f32 %v1587_v37, %v9633_v59 }
 0x355   :  { %v1592_v24 = vpop.f32.mrf.mxu0 }
 0x356   :  { %17325 = vst [vmem:[#allocation127_spill] sm:$0xff] %v10956_v39  ;;  %v1937_v49 = vadd.f32 %v1936_v11, %v1935_v17  ;;  %v10961_v21 = vadd.f32 %v1592_v24, %v9633_v59  ;;  %v1942_v13 = vsel %vm1616_vm3, %v10956_v39, 0.0 }
 0x357   :  { %v8003_v8 = vpop.f32.mrf.mxu0 }
 0x358   :  { %17326 = vst [vmem:[#allocation128_spill] sm:$0xff] %v10961_v21  ;;  %v1939_v46 = vadd.f32 %v1938_v35, %v1937_v49  ;;  %v1944_v37 = vsel %vm1616_vm3, %v10961_v21, 0.0 }
 0x359   :  { %v1597_v36 = vpop.f32.mrf.mxu0 }
 0x35a   :  { %v10966_v8 = vadd.f32 %v1597_v36, %v9633_v59  ;;  %v1941_v1 = vadd.f32 %v1940_v18, %v1939_v46 }
 0x35b   :  { %v8006_v61 = vpop.f32.mrf.mxu0 }
 0x35c   :  { %17327 = vst [vmem:[#allocation129_spill] sm:$0xff] %v10966_v8  ;;  %v1943_v17 = vadd.f32 %v1942_v13, %v1941_v1  ;;  %v1946_v24 = vsel %vm1616_vm3, %v10966_v8, 0.0 }
 0x35d   :  { %v1602_v0 = vpop.f32.mrf.mxu0 }
 0x35e   :  { %v10971_v11 = vadd.f32 %v1602_v0, %v9633_v59  ;;  %v1945_v61 = vadd.f32 %v1944_v37, %v1943_v17 }
 0x35f   :  { %v8009_v25 = vpop.f32.mrf.mxu0 }
 0x360   :  { %17328 = vst [vmem:[#allocation130_spill] sm:$0xff] %v10971_v11  ;;  %v1948_v49 = vsel %vm1616_vm3, %v10971_v11, 0.0  ;;  %v1947_v18 = vadd.f32 %v1946_v24, %v1945_v61 }
 0x361   :  { %v1607_v35 = vpop.f32.mrf.mxu0 }
 0x362   :  { %v1608_v36 = vadd.f32 %v1607_v35, %v9633_v59  ;;  %v1949_v21 = vadd.f32 %v1948_v49, %v1947_v18 }
 0x363   :  { %v8012_v46 = vpop.f32.mrf.mxu0 }
 0x364   :  { %v1950_v39 = vsel %vm1616_vm3, %v1608_v36, 0.0 }
 0x365   :  { %v1612_v62 = vpop.f32.mrf.mxu0  ;;  %v1951_v13 = vadd.f32 %v1950_v39, %v1949_v21  ;;  %v17332_v39 = vld [vmem:[#allocation36_spill] sm:$0xff] }
 0x366   :  { %v1613_v0 = vadd.f32 %v1612_v62, %v9633_v59  ;;  %v17330_v59 = vld [vmem:[#allocation38_spill] sm:$0xff] }
 0x367   :  { %v8015_v25 = vpop.f32.mrf.mxu0 }
 0x368   :  { %v1952_v1 = vsel %vm1616_vm3, %v1613_v0, 0.0 }
 0x369   :  { %v1953_v8 = vadd.f32 %v1952_v1, %v1951_v13 }
 0x36b   :  { %v1954_v37 = vrot.slane %v1953_v8, 4 }
 0x36d   :  { %v1955_v17 = vadd.f32 %v1954_v37, %v1953_v8 }
 0x36f   :  { %v1956_v54 = vrot.slane %v1955_v17, 2 }
 0x371   :  { %v1957_v45 = vadd.f32 %v1956_v54, %v1955_v17  ;;  %v17334_v54 = vld [vmem:[#allocation39_spill] sm:$0xff] }
 0x372   :  { %v17341_v17 = vld [vmem:[#allocation43_spill] sm:$0xff] }
 0x373   :  { %v1958_v11 = vrot.slane %v1957_v45, 1 }
 0x375   :  { %v1959_v15 = vadd.f32 %v1958_v11, %v1957_v45 }
 0x377   :  { %v10981_v35 = vmul.f32 0.000739645, %v1959_v15  ;;  %v17336_v15 = vld [vmem:[#allocation40_spill] sm:$0xff] }
 0x379   :  { %v10984_v24 = vsub.f32 %v1608_v36, %v10981_v35  ;;  %v10987_v61 = vsub.f32 %v1613_v0, %v10981_v35  ;;  %v10991_v62 = vsub.f32 %v17330_v59, %v10981_v35  ;;  %v10995_v21 = vsub.f32 %v17332_v39, %v10981_v35  ;;  %v17338_v36 = vld [vmem:[#allocation42_spill] sm:$0xff] }
 0x37a   :  { %v10999_v8 = vsub.f32 %v17334_v54, %v10981_v35  ;;  %v11003_v45 = vsub.f32 %v17336_v15, %v10981_v35  ;;  %v11011_v18 = vsub.f32 %v17338_v36, %v10981_v35  ;;  %v11017_v0 = vsub.f32 %v9686_v27, %v10981_v35 }
 0x37b   :  { %17329 = vst [vmem:[#allocation131_spill] sm:$0xff] %v10984_v24  ;;  %17331 = vst [vmem:[#allocation38_spill] sm:$0xff] %v10991_v62  ;;  %v2131_v11 = vmul.f32 %v10991_v62, %v10991_v62  ;;  %v2132_v49 = vmul.f32 %v10995_v21, %v10995_v21  ;;  %v11025_v59 = vsub.f32 %v17341_v17, %v10981_v35  ;;  %v17372_v62 = vld [vmem:[#allocation58_spill] sm:$0xff] }
 0x37c   :  { %17333 = vst [vmem:[#allocation36_spill] sm:$0xff] %v10995_v21  ;;  %17335 = vst [vmem:[#allocation39_spill] sm:$0xff] %v10999_v8  ;;  %v2133_v46 = vmul.f32 %v10999_v8, %v10999_v8  ;;  %v2134_v13 = vmul.f32 %v11003_v45, %v11003_v45  ;;  %v2135_v39 = vmul.f32 %v11011_v18, %v11011_v18 }
 0x37d   :  { %17337 = vst [vmem:[#allocation40_spill] sm:$0xff] %v11003_v45  ;;  %17339 = vst [vmem:[#allocation42_spill] sm:$0xff] %v11011_v18  ;;  %v2300_v25 = vsel %vm1616_vm3, %v2131_v11, 0.0  ;;  %v2301_v1 = vsel %vm1616_vm3, %v2132_v49, 0.0  ;;  %v11032_v27 = vsub.f32 %v9706_v14, %v10981_v35  ;;  %v2136_v11 = vmul.f32 %v11017_v0, %v11017_v0 }
 0x37e   :  { %17340 = vst [vmem:[#allocation132_spill] sm:$0xff] %v11017_v0  ;;  %v2302_v37 = vadd.f32 %v2301_v1, %v2300_v25  ;;  %17342 = vst [vmem:[#allocation43_spill] sm:$0xff] %v11025_v59  ;;  %v2303_v54 = vsel %vm1616_vm3, %v2133_v46, 0.0  ;;  %v2305_v49 = vsel %vm1616_vm3, %v2134_v13, 0.0  ;;  %v17344_v25 = vld [vmem:[#allocation44_spill] sm:$0xff]  ;;  %v2137_v17 = vmul.f32 %v11025_v59, %v11025_v59 }
 0x37f   :  { %17343 = vst [vmem:[#allocation133_spill] sm:$0xff] %v11032_v27  ;;  %v11039_v1 = vsub.f32 %v17344_v25, %v10981_v35  ;;  %v2307_v46 = vsel %vm1616_vm3, %v2135_v39, 0.0  ;;  %v11046_v14 = vsub.f32 %v9726_v4, %v10981_v35  ;;  %v2309_v13 = vsel %vm1616_vm3, %v2136_v11, 0.0 }
 0x380   :  { %v2304_v15 = vadd.f32 %v2303_v54, %v2302_v37  ;;  %v2138_v54 = vmul.f32 %v11032_v27, %v11032_v27  ;;  %v2311_v39 = vsel %vm1616_vm3, %v2137_v17, 0.0  ;;  %v11060_v4 = vsub.f32 %v9746_v10, %v10981_v35 }
 0x381   :  { %17345 = vst [vmem:[#allocation44_spill] sm:$0xff] %v11039_v1  ;;  %17346 = vst [vmem:[#allocation134_spill] sm:$0xff] %v11046_v14  ;;  %v2139_v59 = vmul.f32 %v11039_v1, %v11039_v1  ;;  %v11074_v10 = vsub.f32 %v9766_v16, %v10981_v35  ;;  %v11088_v16 = vsub.f32 %v9786_v22, %v10981_v35 }
 0x382   :  { %v2306_v36 = vadd.f32 %v2305_v49, %v2304_v15  ;;  %v17347_v49 = vld [vmem:[#allocation45_spill] sm:$0xff]  ;;  %17349 = vst [vmem:[#allocation135_spill] sm:$0xff] %v11060_v4  ;;  %v2313_v11 = vsel %vm1616_vm3, %v2138_v54, 0.0  ;;  %v11102_v22 = vsub.f32 %v9806_v28, %v10981_v35  ;;  %v11116_v28 = vsub.f32 %v9826_v34, %v10981_v35 }
 0x383   :  { %v11053_v25 = vsub.f32 %v17347_v49, %v10981_v35  ;;  %v2315_v17 = vsel %vm1616_vm3, %v2139_v59, 0.0  ;;  %17352 = vst [vmem:[#allocation136_spill] sm:$0xff] %v11074_v10  ;;  %17355 = vst [vmem:[#allocation137_spill] sm:$0xff] %v11088_v16 }
 0x384   :  { %v2308_v37 = vadd.f32 %v2307_v46, %v2306_v36  ;;  %v2140_v46 = vmul.f32 %v11046_v14, %v11046_v14 }
 0x385   :  { %17348 = vst [vmem:[#allocation45_spill] sm:$0xff] %v11053_v25  ;;  %v2141_v1 = vmul.f32 %v11053_v25, %v11053_v25 }
 0x386   :  { %v2310_v15 = vadd.f32 %v2309_v13, %v2308_v37  ;;  %v17350_v13 = vld [vmem:[#allocation46_spill] sm:$0xff]  ;;  %v2317_v54 = vsel %vm1616_vm3, %v2140_v46, 0.0 }
 0x387   :  { %v11067_v49 = vsub.f32 %v17350_v13, %v10981_v35  ;;  %v2319_v59 = vsel %vm1616_vm3, %v2141_v1, 0.0 }
 0x388   :  { %v2312_v36 = vadd.f32 %v2311_v39, %v2310_v15  ;;  %v2142_v39 = vmul.f32 %v11060_v4, %v11060_v4 }
 0x389   :  { %17351 = vst [vmem:[#allocation46_spill] sm:$0xff] %v11067_v49  ;;  %v2143_v25 = vmul.f32 %v11067_v49, %v11067_v49 }
 0x38a   :  { %v2314_v37 = vadd.f32 %v2313_v11, %v2312_v36  ;;  %v17353_v11 = vld [vmem:[#allocation47_spill] sm:$0xff]  ;;  %v2321_v46 = vsel %vm1616_vm3, %v2142_v39, 0.0 }
 0x38b   :  { %v11081_v13 = vsub.f32 %v17353_v11, %v10981_v35  ;;  %v2323_v1 = vsel %vm1616_vm3, %v2143_v25, 0.0 }
 0x38c   :  { %v2316_v15 = vadd.f32 %v2315_v17, %v2314_v37  ;;  %v2144_v17 = vmul.f32 %v11074_v10, %v11074_v10  ;;  %v2150_v10 = vmul.f32 %v11116_v28, %v11116_v28 }
 0x38d   :  { %17354 = vst [vmem:[#allocation47_spill] sm:$0xff] %v11081_v13  ;;  %v2145_v49 = vmul.f32 %v11081_v13, %v11081_v13 }
 0x38e   :  { %v2318_v36 = vadd.f32 %v2317_v54, %v2316_v15  ;;  %v17356_v54 = vld [vmem:[#allocation48_spill] sm:$0xff]  ;;  %v2325_v39 = vsel %vm1616_vm3, %v2144_v17, 0.0 }
 0x38f   :  { %v11095_v11 = vsub.f32 %v17356_v54, %v10981_v35  ;;  %v2327_v25 = vsel %vm1616_vm3, %v2145_v49, 0.0 }
 0x390   :  { %v2320_v37 = vadd.f32 %v2319_v59, %v2318_v36  ;;  %v2146_v59 = vmul.f32 %v11088_v16, %v11088_v16 }
 0x391   :  { %v2147_v13 = vmul.f32 %v11095_v11, %v11095_v11 }
 0x392   :  { %v2322_v15 = vadd.f32 %v2321_v46, %v2320_v37  ;;  %v17357_v46 = vld [vmem:[#allocation49_spill] sm:$0xff]  ;;  %v2329_v17 = vsel %vm1616_vm3, %v2146_v59, 0.0 }
 0x393   :  { %v11109_v54 = vsub.f32 %v17357_v46, %v10981_v35  ;;  %v2331_v49 = vsel %vm1616_vm3, %v2147_v13, 0.0 }
 0x394   :  { %v2324_v36 = vadd.f32 %v2323_v1, %v2322_v15  ;;  %v2148_v1 = vmul.f32 %v11102_v22, %v11102_v22 }
 0x395   :  { %v2149_v16 = vmul.f32 %v11109_v54, %v11109_v54 }
 0x396   :  { %v2326_v37 = vadd.f32 %v2325_v39, %v2324_v36  ;;  %v17358_v39 = vld [vmem:[#allocation50_spill] sm:$0xff]  ;;  %v2333_v59 = vsel %vm1616_vm3, %v2148_v1, 0.0  ;;  %v2337_v1 = vsel %vm1616_vm3, %v2150_v10, 0.0 }
 0x397   :  { %v11123_v46 = vsub.f32 %v17358_v39, %v10981_v35  ;;  %v2335_v13 = vsel %vm1616_vm3, %v2149_v16, 0.0 }
 0x398   :  { %v2328_v15 = vadd.f32 %v2327_v25, %v2326_v37  ;;  %v17359_v25 = vld [vmem:[#allocation51_spill] sm:$0xff] }
 0x399   :  { %v11130_v34 = vsub.f32 %v17359_v25, %v10981_v35  ;;  %v2151_v4 = vmul.f32 %v11123_v46, %v11123_v46 }
 0x39a   :  { %v2330_v36 = vadd.f32 %v2329_v17, %v2328_v15  ;;  %v17360_v17 = vld [vmem:[#allocation52_spill] sm:$0xff] }
 0x39b   :  { %v11137_v39 = vsub.f32 %v17360_v17, %v10981_v35  ;;  %v2152_v14 = vmul.f32 %v11130_v34, %v11130_v34  ;;  %v2339_v16 = vsel %vm1616_vm3, %v2151_v4, 0.0 }
 0x39c   :  { %v2332_v37 = vadd.f32 %v2331_v49, %v2330_v36  ;;  %v17361_v49 = vld [vmem:[#allocation53_spill] sm:$0xff] }
 0x39d   :  { %v11144_v25 = vsub.f32 %v17361_v49, %v10981_v35  ;;  %v2153_v27 = vmul.f32 %v11137_v39, %v11137_v39  ;;  %v2341_v10 = vsel %vm1616_vm3, %v2152_v14, 0.0 }
 0x39e   :  { %v2334_v15 = vadd.f32 %v2333_v59, %v2332_v37  ;;  %v17362_v59 = vld [vmem:[#allocation54_spill] sm:$0xff] }
 0x39f   :  { %v11151_v17 = vsub.f32 %v17362_v59, %v10981_v35  ;;  %v2154_v0 = vmul.f32 %v11144_v25, %v11144_v25  ;;  %v17367_v59 = vld [vmem:[#allocation56_spill] sm:$0xff] }
 0x3a0   :  { %v2336_v36 = vadd.f32 %v2335_v13, %v2334_v15  ;;  %v17364_v13 = vld [vmem:[#allocation55_spill] sm:$0xff]  ;;  %v11166_v45 = vsub.f32 %v17367_v59, %v10981_v35 }
 0x3a1   :  { %17363 = vst [vmem:[#allocation48_spill] sm:$0xff] %v11151_v17  ;;  %v11158_v49 = vsub.f32 %v17364_v13, %v10981_v35  ;;  %v2155_v4 = vmul.f32 %v11151_v17, %v11151_v17  ;;  %v17369_v13 = vld [vmem:[#allocation57_spill] sm:$0xff]  ;;  %v2345_v21 = vsel %vm1616_vm3, %v2154_v0, 0.0 }
 0x3a2   :  { %v2338_v37 = vadd.f32 %v2337_v1, %v2336_v36  ;;  %v17366_v36 = vld [vmem:[#allocation34_spill] sm:$0xff]  ;;  %17368 = vst [vmem:[#allocation50_spill] sm:$0xff] %v11166_v45  ;;  %v11173_v8 = vsub.f32 %v17369_v13, %v10981_v35 }
 0x3a3   :  { %17365 = vst [vmem:[#allocation49_spill] sm:$0xff] %v11158_v49  ;;  %v2646_v1 = vsub.s32 1, %v17366_v36  ;;  %v2156_v14 = vmul.f32 %v11158_v49, %v11158_v49  ;;  %v17374_v49 = vld [vmem:[#allocation59_spill] sm:$0xff] }
 0x3a4   :  { %v2340_v15 = vadd.f32 %v2339_v16, %v2338_v37  ;;  %v2343_v37 = vsel %vm1616_vm3, %v2153_v27, 0.0  ;;  %17370 = vst [vmem:[#allocation51_spill] sm:$0xff] %v11173_v8  ;;  %v11185_v27 = vsub.f32 %v17372_v62, %v10981_v35  ;;  %v11192_v0 = vsub.f32 %v17374_v49, %v10981_v35 }
 0x3a5   :  { %v2158_v17 = vmul.f32 %v11173_v8, %v11173_v8 }
 0x3a6   :  { %v2342_v18 = vadd.f32 %v2341_v10, %v2340_v15  ;;  %v8601_v15 = vld [vmem:[%s16796_s3] sm:$0xff]  ;;  %17373 = vst [vmem:[#allocation53_spill] sm:$0xff] %v11185_v27  ;;  %17375 = vst [vmem:[#allocation54_spill] sm:$0xff] %v11192_v0 }
 0x3a7   :  { %v11181_v10 = vrot.slane %v8601_v15, %v2646_v1  ;;  %v2349_v1 = vsel %vm1616_vm3, %v2156_v14, 0.0  ;;  %v2160_v14 = vmul.f32 %v11192_v0, %v11192_v0 }
 0x3a8   :  { %v2344_v16 = vadd.f32 %v2343_v37, %v2342_v18  ;;  %v2157_v18 = vmul.f32 %v11166_v45, %v11166_v45  ;;  %v2347_v37 = vsel %vm1616_vm3, %v2155_v4, 0.0  ;;  %v2159_v4 = vmul.f32 %v11185_v27, %v11185_v27 }
 0x3a9   :  { %17371 = vst [vmem:[#allocation52_spill] sm:$0xff] %v11181_v10  ;;  %v11199_v62 = vmul.f32 %v11181_v10, %v10987_v61 }
 0x3aa   :  { %v2346_v59 = vadd.f32 %v2345_v21, %v2344_v16  ;;  %v17377_v16 = vld [vmem:[#allocation60_spill] sm:$0xff]  ;;  %v2351_v49 = vsel %vm1616_vm3, %v2157_v18, 0.0  ;;  %v2355_v18 = vsel %vm1616_vm3, %v2159_v4, 0.0 }
 0x3ab   :  { %17376 = vst [vmem:[#allocation55_spill] sm:$0xff] %v11199_v62  ;;  %v11203_v15 = vsub.f32 %v17377_v16, %v10981_v35  ;;  %v17381_v62 = vld [vmem:[#allocation62_spill] sm:$0xff] }
 0x3ac   :  { %v2348_v13 = vadd.f32 %v2347_v37, %v2346_v59  ;;  %v17379_v37 = vld [vmem:[#allocation61_spill] sm:$0xff]  ;;  %v11217_v16 = vsub.f32 %v17381_v62, %v10981_v35 }
 0x3ad   :  { %17378 = vst [vmem:[#allocation56_spill] sm:$0xff] %v11203_v15  ;;  %v11210_v8 = vsub.f32 %v17379_v37, %v10981_v35  ;;  %v2161_v27 = vmul.f32 %v11203_v15, %v11203_v15 }
 0x3ae   :  { %v2350_v21 = vadd.f32 %v2349_v1, %v2348_v13  ;;  %v2353_v13 = vsel %vm1616_vm3, %v2158_v17, 0.0  ;;  %17382 = vst [vmem:[#allocation58_spill] sm:$0xff] %v11217_v16  ;;  %v2357_v17 = vsel %vm1616_vm3, %v2160_v14, 0.0  ;;  %v2163_v15 = vmul.f32 %v11217_v16, %v11217_v16 }
 0x3af   :  { %17380 = vst [vmem:[#allocation57_spill] sm:$0xff] %v11210_v8  ;;  %v2162_v0 = vmul.f32 %v11210_v8, %v11210_v8  ;;  %v2359_v4 = vsel %vm1616_vm3, %v2161_v27, 0.0 }
 0x3b0   :  { %v2352_v59 = vadd.f32 %v2351_v49, %v2350_v21  ;;  %v17383_v49 = vld [vmem:[#allocation63_spill] sm:$0xff]  ;;  %v2363_v27 = vsel %vm1616_vm3, %v2163_v15, 0.0 }
 0x3b1   :  { %v11224_v37 = vsub.f32 %v17383_v49, %v10981_v35  ;;  %v2361_v14 = vsel %vm1616_vm3, %v2162_v0, 0.0 }
 0x3b2   :  { %v2354_v1 = vadd.f32 %v2353_v13, %v2352_v59  ;;  %v17385_v13 = vld [vmem:[#allocation64_spill] sm:$0xff] }
 0x3b3   :  { %17384 = vst [vmem:[#allocation59_spill] sm:$0xff] %v11224_v37  ;;  %v11231_v62 = vsub.f32 %v17385_v13, %v10981_v35  ;;  %v2164_v8 = vmul.f32 %v11224_v37, %v11224_v37 }
 0x3b4   :  { %v2356_v21 = vadd.f32 %v2355_v18, %v2354_v1  ;;  %v17387_v18 = vld [vmem:[#allocation65_spill] sm:$0xff] }
 0x3b5   :  { %17386 = vst [vmem:[#allocation60_spill] sm:$0xff] %v11231_v62  ;;  %v11238_v49 = vsub.f32 %v17387_v18, %v10981_v35  ;;  %v2165_v16 = vmul.f32 %v11231_v62, %v11231_v62  ;;  %v2365_v0 = vsel %vm1616_vm3, %v2164_v8, 0.0 }
 0x3b6   :  { %v2358_v59 = vadd.f32 %v2357_v17, %v2356_v21  ;;  %v17389_v17 = vld [vmem:[#allocation66_spill] sm:$0xff] }
 0x3b7   :  { %17388 = vst [vmem:[#allocation61_spill] sm:$0xff] %v11238_v49  ;;  %v11245_v13 = vsub.f32 %v17389_v17, %v10981_v35  ;;  %v2166_v37 = vmul.f32 %v11238_v49, %v11238_v49  ;;  %v2367_v15 = vsel %vm1616_vm3, %v2165_v16, 0.0 }
 0x3b8   :  { %v2360_v1 = vadd.f32 %v2359_v4, %v2358_v59  ;;  %v17391_v4 = vld [vmem:[#allocation67_spill] sm:$0xff] }
 0x3b9   :  { %17390 = vst [vmem:[#allocation62_spill] sm:$0xff] %v11245_v13  ;;  %v11252_v18 = vsub.f32 %v17391_v4, %v10981_v35  ;;  %v2167_v62 = vmul.f32 %v11245_v13, %v11245_v13  ;;  %v2369_v8 = vsel %vm1616_vm3, %v2166_v37, 0.0 }
 0x3ba   :  { %v2362_v21 = vadd.f32 %v2361_v14, %v2360_v1  ;;  %v17393_v14 = vld [vmem:[#allocation68_spill] sm:$0xff] }
 0x3bb   :  { %17392 = vst [vmem:[#allocation63_spill] sm:$0xff] %v11252_v18  ;;  %v11259_v17 = vsub.f32 %v17393_v14, %v10981_v35  ;;  %v2168_v49 = vmul.f32 %v11252_v18, %v11252_v18  ;;  %v2371_v16 = vsel %vm1616_vm3, %v2167_v62, 0.0 }
 0x3bc   :  { %v2364_v59 = vadd.f32 %v2363_v27, %v2362_v21  ;;  %v17395_v27 = vld [vmem:[#allocation69_spill] sm:$0xff] }
 0x3bd   :  { %17394 = vst [vmem:[#allocation64_spill] sm:$0xff] %v11259_v17  ;;  %v11266_v4 = vsub.f32 %v17395_v27, %v10981_v35  ;;  %v2169_v13 = vmul.f32 %v11259_v17, %v11259_v17  ;;  %v2373_v37 = vsel %vm1616_vm3, %v2168_v49, 0.0 }
 0x3be   :  { %v2366_v1 = vadd.f32 %v2365_v0, %v2364_v59  ;;  %v17397_v0 = vld [vmem:[#allocation70_spill] sm:$0xff] }
 0x3bf   :  { %17396 = vst [vmem:[#allocation65_spill] sm:$0xff] %v11266_v4  ;;  %v11273_v14 = vsub.f32 %v17397_v0, %v10981_v35  ;;  %v2170_v18 = vmul.f32 %v11266_v4, %v11266_v4  ;;  %v2375_v62 = vsel %vm1616_vm3, %v2169_v13, 0.0 }
 0x3c0   :  { %v2368_v21 = vadd.f32 %v2367_v15, %v2366_v1  ;;  %v17399_v15 = vld [vmem:[#allocation71_spill] sm:$0xff] }
 0x3c1   :  { %17398 = vst [vmem:[#allocation66_spill] sm:$0xff] %v11273_v14  ;;  %v11280_v27 = vsub.f32 %v17399_v15, %v10981_v35  ;;  %v2171_v17 = vmul.f32 %v11273_v14, %v11273_v14  ;;  %v2377_v49 = vsel %vm1616_vm3, %v2170_v18, 0.0 }
 0x3c2   :  { %v2370_v59 = vadd.f32 %v2369_v8, %v2368_v21  ;;  %v17401_v8 = vld [vmem:[#allocation72_spill] sm:$0xff] }
 0x3c3   :  { %17400 = vst [vmem:[#allocation67_spill] sm:$0xff] %v11280_v27  ;;  %v11287_v0 = vsub.f32 %v17401_v8, %v10981_v35  ;;  %v2172_v4 = vmul.f32 %v11280_v27, %v11280_v27  ;;  %v2379_v13 = vsel %vm1616_vm3, %v2171_v17, 0.0 }
 0x3c4   :  { %v2372_v1 = vadd.f32 %v2371_v16, %v2370_v59  ;;  %v17402_v16 = vld [vmem:[#allocation73_spill] sm:$0xff] }
 0x3c5   :  { %v11294_v15 = vsub.f32 %v17402_v16, %v10981_v35  ;;  %v2173_v14 = vmul.f32 %v11287_v0, %v11287_v0  ;;  %v2381_v18 = vsel %vm1616_vm3, %v2172_v4, 0.0 }
 0x3c6   :  { %v2374_v21 = vadd.f32 %v2373_v37, %v2372_v1  ;;  %v17404_v37 = vld [vmem:[#allocation74_spill] sm:$0xff] }
 0x3c7   :  { %17403 = vst [vmem:[#allocation68_spill] sm:$0xff] %v11294_v15  ;;  %v11301_v8 = vsub.f32 %v17404_v37, %v10981_v35  ;;  %v2174_v27 = vmul.f32 %v11294_v15, %v11294_v15  ;;  %v2383_v17 = vsel %vm1616_vm3, %v2173_v14, 0.0 }
 0x3c8   :  { %v2376_v59 = vadd.f32 %v2375_v62, %v2374_v21  ;;  %v17406_v62 = vld [vmem:[#allocation75_spill] sm:$0xff] }
 0x3c9   :  { %17405 = vst [vmem:[#allocation69_spill] sm:$0xff] %v11301_v8  ;;  %v11308_v16 = vsub.f32 %v17406_v62, %v10981_v35  ;;  %v2175_v45 = vmul.f32 %v11301_v8, %v11301_v8  ;;  %v2385_v4 = vsel %vm1616_vm3, %v2174_v27, 0.0 }
 0x3ca   :  { %v2378_v1 = vadd.f32 %v2377_v49, %v2376_v59  ;;  %v17408_v49 = vld [vmem:[#allocation76_spill] sm:$0xff] }
 0x3cb   :  { %17407 = vst [vmem:[#allocation70_spill] sm:$0xff] %v11308_v16  ;;  %v11315_v37 = vsub.f32 %v17408_v49, %v10981_v35  ;;  %v2176_v15 = vmul.f32 %v11308_v16, %v11308_v16  ;;  %v2387_v14 = vsel %vm1616_vm3, %v2175_v45, 0.0 }
 0x3cc   :  { %v2380_v21 = vadd.f32 %v2379_v13, %v2378_v1  ;;  %v17410_v13 = vld [vmem:[#allocation77_spill] sm:$0xff] }
 0x3cd   :  { %17409 = vst [vmem:[#allocation71_spill] sm:$0xff] %v11315_v37  ;;  %v11322_v62 = vsub.f32 %v17410_v13, %v10981_v35  ;;  %v2177_v8 = vmul.f32 %v11315_v37, %v11315_v37  ;;  %v2389_v27 = vsel %vm1616_vm3, %v2176_v15, 0.0 }
 0x3ce   :  { %v2382_v59 = vadd.f32 %v2381_v18, %v2380_v21  ;;  %v17412_v18 = vld [vmem:[#allocation78_spill] sm:$0xff] }
 0x3cf   :  { %17411 = vst [vmem:[#allocation72_spill] sm:$0xff] %v11322_v62  ;;  %v11329_v49 = vsub.f32 %v17412_v18, %v10981_v35  ;;  %v2178_v16 = vmul.f32 %v11322_v62, %v11322_v62  ;;  %v2391_v45 = vsel %vm1616_vm3, %v2177_v8, 0.0 }
 0x3d0   :  { %v2384_v1 = vadd.f32 %v2383_v17, %v2382_v59  ;;  %v17414_v17 = vld [vmem:[#allocation79_spill] sm:$0xff] }
 0x3d1   :  { %17413 = vst [vmem:[#allocation73_spill] sm:$0xff] %v11329_v49  ;;  %v11336_v13 = vsub.f32 %v17414_v17, %v10981_v35  ;;  %v2179_v37 = vmul.f32 %v11329_v49, %v11329_v49  ;;  %v2393_v15 = vsel %vm1616_vm3, %v2178_v16, 0.0 }
 0x3d2   :  { %v2386_v21 = vadd.f32 %v2385_v4, %v2384_v1  ;;  %v17416_v4 = vld [vmem:[#allocation80_spill] sm:$0xff] }
 0x3d3   :  { %17415 = vst [vmem:[#allocation74_spill] sm:$0xff] %v11336_v13  ;;  %v11343_v18 = vsub.f32 %v17416_v4, %v10981_v35  ;;  %v2180_v62 = vmul.f32 %v11336_v13, %v11336_v13  ;;  %v2395_v8 = vsel %vm1616_vm3, %v2179_v37, 0.0 }
 0x3d4   :  { %v2388_v59 = vadd.f32 %v2387_v14, %v2386_v21  ;;  %v17418_v14 = vld [vmem:[#allocation81_spill] sm:$0xff] }
 0x3d5   :  { %17417 = vst [vmem:[#allocation75_spill] sm:$0xff] %v11343_v18  ;;  %v11350_v17 = vsub.f32 %v17418_v14, %v10981_v35  ;;  %v2181_v49 = vmul.f32 %v11343_v18, %v11343_v18  ;;  %v2397_v16 = vsel %vm1616_vm3, %v2180_v62, 0.0 }
 0x3d6   :  { %v2390_v1 = vadd.f32 %v2389_v27, %v2388_v59  ;;  %v17420_v27 = vld [vmem:[#allocation82_spill] sm:$0xff] }
 0x3d7   :  { %17419 = vst [vmem:[#allocation76_spill] sm:$0xff] %v11350_v17  ;;  %v11357_v4 = vsub.f32 %v17420_v27, %v10981_v35  ;;  %v2182_v13 = vmul.f32 %v11350_v17, %v11350_v17  ;;  %v2399_v37 = vsel %vm1616_vm3, %v2181_v49, 0.0 }
 0x3d8   :  { %v2392_v21 = vadd.f32 %v2391_v45, %v2390_v1  ;;  %v17422_v45 = vld [vmem:[#allocation5_spill] sm:$0xff] }
 0x3d9   :  { %17421 = vst [vmem:[#allocation77_spill] sm:$0xff] %v11357_v4  ;;  %v11364_v14 = vsub.f32 %v17422_v45, %v10981_v35  ;;  %v2183_v18 = vmul.f32 %v11357_v4, %v11357_v4  ;;  %v2401_v62 = vsel %vm1616_vm3, %v2182_v13, 0.0 }
 0x3da   :  { %v2394_v59 = vadd.f32 %v2393_v15, %v2392_v21  ;;  %v17424_v15 = vld [vmem:[#allocation6_spill] sm:$0xff] }
 0x3db   :  { %17423 = vst [vmem:[#allocation78_spill] sm:$0xff] %v11364_v14  ;;  %v11371_v27 = vsub.f32 %v17424_v15, %v10981_v35  ;;  %v2184_v17 = vmul.f32 %v11364_v14, %v11364_v14  ;;  %v2403_v49 = vsel %vm1616_vm3, %v2183_v18, 0.0 }
 0x3dc   :  { %v2396_v1 = vadd.f32 %v2395_v8, %v2394_v59  ;;  %v17426_v8 = vld [vmem:[#allocation7_spill] sm:$0xff] }
 0x3dd   :  { %17425 = vst [vmem:[#allocation79_spill] sm:$0xff] %v11371_v27  ;;  %v11378_v45 = vsub.f32 %v17426_v8, %v10981_v35  ;;  %v2185_v4 = vmul.f32 %v11371_v27, %v11371_v27  ;;  %v2405_v13 = vsel %vm1616_vm3, %v2184_v17, 0.0 }
 0x3de   :  { %v2398_v21 = vadd.f32 %v2397_v16, %v2396_v1  ;;  %v17428_v16 = vld [vmem:[#allocation8_spill] sm:$0xff] }
 0x3df   :  { %17427 = vst [vmem:[#allocation80_spill] sm:$0xff] %v11378_v45  ;;  %v11385_v15 = vsub.f32 %v17428_v16, %v10981_v35  ;;  %v2186_v14 = vmul.f32 %v11378_v45, %v11378_v45  ;;  %v2407_v18 = vsel %vm1616_vm3, %v2185_v4, 0.0 }
 0x3e0   :  { %v2400_v59 = vadd.f32 %v2399_v37, %v2398_v21  ;;  %v17430_v37 = vld [vmem:[#allocation9_spill] sm:$0xff] }
 0x3e1   :  { %17429 = vst [vmem:[#allocation81_spill] sm:$0xff] %v11385_v15  ;;  %v11392_v8 = vsub.f32 %v17430_v37, %v10981_v35  ;;  %v2187_v27 = vmul.f32 %v11385_v15, %v11385_v15  ;;  %v2409_v17 = vsel %vm1616_vm3, %v2186_v14, 0.0 }
 0x3e2   :  { %v2402_v1 = vadd.f32 %v2401_v62, %v2400_v59  ;;  %v17432_v62 = vld [vmem:[#allocation10_spill] sm:$0xff] }
 0x3e3   :  { %17431 = vst [vmem:[#allocation82_spill] sm:$0xff] %v11392_v8  ;;  %v11399_v16 = vsub.f32 %v17432_v62, %v10981_v35  ;;  %v2188_v45 = vmul.f32 %v11392_v8, %v11392_v8  ;;  %v2411_v4 = vsel %vm1616_vm3, %v2187_v27, 0.0 }
 0x3e4   :  { %v2404_v21 = vadd.f32 %v2403_v49, %v2402_v1  ;;  %v17434_v49 = vld [vmem:[#allocation11_spill] sm:$0xff] }
 0x3e5   :  { %17433 = vst [vmem:[#allocation5_spill] sm:$0xff] %v11399_v16  ;;  %v11406_v37 = vsub.f32 %v17434_v49, %v10981_v35  ;;  %v2189_v15 = vmul.f32 %v11399_v16, %v11399_v16  ;;  %v2413_v14 = vsel %vm1616_vm3, %v2188_v45, 0.0 }
 0x3e6   :  { %v2406_v59 = vadd.f32 %v2405_v13, %v2404_v21  ;;  %v17436_v13 = vld [vmem:[#allocation12_spill] sm:$0xff] }
 0x3e7   :  { %17435 = vst [vmem:[#allocation6_spill] sm:$0xff] %v11406_v37  ;;  %v11413_v62 = vsub.f32 %v17436_v13, %v10981_v35  ;;  %v2190_v8 = vmul.f32 %v11406_v37, %v11406_v37  ;;  %v2415_v27 = vsel %vm1616_vm3, %v2189_v15, 0.0 }
 0x3e8   :  { %v2408_v1 = vadd.f32 %v2407_v18, %v2406_v59  ;;  %v17438_v18 = vld [vmem:[#allocation13_spill] sm:$0xff] }
 0x3e9   :  { %17437 = vst [vmem:[#allocation7_spill] sm:$0xff] %v11413_v62  ;;  %v11420_v49 = vsub.f32 %v17438_v18, %v10981_v35  ;;  %v2191_v16 = vmul.f32 %v11413_v62, %v11413_v62  ;;  %v2417_v45 = vsel %vm1616_vm3, %v2190_v8, 0.0 }
 0x3ea   :  { %v2410_v21 = vadd.f32 %v2409_v17, %v2408_v1  ;;  %v17440_v17 = vld [vmem:[#allocation14_spill] sm:$0xff] }
 0x3eb   :  { %17439 = vst [vmem:[#allocation8_spill] sm:$0xff] %v11420_v49  ;;  %v11427_v13 = vsub.f32 %v17440_v17, %v10981_v35  ;;  %v2192_v37 = vmul.f32 %v11420_v49, %v11420_v49  ;;  %v2419_v15 = vsel %vm1616_vm3, %v2191_v16, 0.0 }
 0x3ec   :  { %v2412_v59 = vadd.f32 %v2411_v4, %v2410_v21  ;;  %v17442_v4 = vld [vmem:[#allocation15_spill] sm:$0xff] }
 0x3ed   :  { %17441 = vst [vmem:[#allocation9_spill] sm:$0xff] %v11427_v13  ;;  %v11434_v18 = vsub.f32 %v17442_v4, %v10981_v35  ;;  %v2193_v62 = vmul.f32 %v11427_v13, %v11427_v13  ;;  %v2421_v8 = vsel %vm1616_vm3, %v2192_v37, 0.0 }
 0x3ee   :  { %v2414_v1 = vadd.f32 %v2413_v14, %v2412_v59  ;;  %v17444_v14 = vld [vmem:[#allocation16_spill] sm:$0xff] }
 0x3ef   :  { %17443 = vst [vmem:[#allocation10_spill] sm:$0xff] %v11434_v18  ;;  %v11441_v17 = vsub.f32 %v17444_v14, %v10981_v35  ;;  %v2194_v49 = vmul.f32 %v11434_v18, %v11434_v18  ;;  %v2423_v16 = vsel %vm1616_vm3, %v2193_v62, 0.0 }
 0x3f0   :  { %v2416_v21 = vadd.f32 %v2415_v27, %v2414_v1  ;;  %v17446_v27 = vld [vmem:[#allocation17_spill] sm:$0xff] }
 0x3f1   :  { %17445 = vst [vmem:[#allocation11_spill] sm:$0xff] %v11441_v17  ;;  %v11448_v4 = vsub.f32 %v17446_v27, %v10981_v35  ;;  %v2195_v13 = vmul.f32 %v11441_v17, %v11441_v17  ;;  %v2425_v37 = vsel %vm1616_vm3, %v2194_v49, 0.0 }
 0x3f2   :  { %v2418_v59 = vadd.f32 %v2417_v45, %v2416_v21  ;;  %v17448_v45 = vld [vmem:[#allocation18_spill] sm:$0xff] }
 0x3f3   :  { %17447 = vst [vmem:[#allocation12_spill] sm:$0xff] %v11448_v4  ;;  %v11455_v14 = vsub.f32 %v17448_v45, %v10981_v35  ;;  %v2196_v18 = vmul.f32 %v11448_v4, %v11448_v4  ;;  %v2427_v62 = vsel %vm1616_vm3, %v2195_v13, 0.0 }
 0x3f4   :  { %v2420_v1 = vadd.f32 %v2419_v15, %v2418_v59  ;;  %v17450_v15 = vld [vmem:[#allocation19_spill] sm:$0xff] }
 0x3f5   :  { %17449 = vst [vmem:[#allocation13_spill] sm:$0xff] %v11455_v14  ;;  %v11462_v27 = vsub.f32 %v17450_v15, %v10981_v35  ;;  %v2197_v17 = vmul.f32 %v11455_v14, %v11455_v14  ;;  %v2429_v49 = vsel %vm1616_vm3, %v2196_v18, 0.0 }
 0x3f6   :  { %v2422_v21 = vadd.f32 %v2421_v8, %v2420_v1  ;;  %v17452_v8 = vld [vmem:[#allocation20_spill] sm:$0xff] }
 0x3f7   :  { %17451 = vst [vmem:[#allocation14_spill] sm:$0xff] %v11462_v27  ;;  %v11469_v45 = vsub.f32 %v17452_v8, %v10981_v35  ;;  %v2198_v4 = vmul.f32 %v11462_v27, %v11462_v27  ;;  %v2431_v13 = vsel %vm1616_vm3, %v2197_v17, 0.0 }
 0x3f8   :  { %v2424_v59 = vadd.f32 %v2423_v16, %v2422_v21  ;;  %v17454_v16 = vld [vmem:[#allocation21_spill] sm:$0xff] }
 0x3f9   :  { %17453 = vst [vmem:[#allocation15_spill] sm:$0xff] %v11469_v45  ;;  %v11476_v15 = vsub.f32 %v17454_v16, %v10981_v35  ;;  %v2199_v14 = vmul.f32 %v11469_v45, %v11469_v45  ;;  %v2433_v18 = vsel %vm1616_vm3, %v2198_v4, 0.0 }
 0x3fa   :  { %v2426_v1 = vadd.f32 %v2425_v37, %v2424_v59  ;;  %v17456_v37 = vld [vmem:[#allocation22_spill] sm:$0xff] }
 0x3fb   :  { %17455 = vst [vmem:[#allocation16_spill] sm:$0xff] %v11476_v15  ;;  %v11483_v8 = vsub.f32 %v17456_v37, %v10981_v35  ;;  %v2200_v27 = vmul.f32 %v11476_v15, %v11476_v15  ;;  %v2435_v17 = vsel %vm1616_vm3, %v2199_v14, 0.0 }
 0x3fc   :  { %v2428_v21 = vadd.f32 %v2427_v62, %v2426_v1  ;;  %v17458_v62 = vld [vmem:[#allocation23_spill] sm:$0xff] }
 0x3fd   :  { %17457 = vst [vmem:[#allocation17_spill] sm:$0xff] %v11483_v8  ;;  %v11490_v16 = vsub.f32 %v17458_v62, %v10981_v35  ;;  %v2201_v45 = vmul.f32 %v11483_v8, %v11483_v8  ;;  %v2437_v4 = vsel %vm1616_vm3, %v2200_v27, 0.0 }
 0x3fe   :  { %v2430_v59 = vadd.f32 %v2429_v49, %v2428_v21  ;;  %v17460_v49 = vld [vmem:[#allocation24_spill] sm:$0xff] }
 0x3ff   :  { %17459 = vst [vmem:[#allocation18_spill] sm:$0xff] %v11490_v16  ;;  %v11497_v37 = vsub.f32 %v17460_v49, %v10981_v35  ;;  %v2202_v15 = vmul.f32 %v11490_v16, %v11490_v16  ;;  %v2439_v14 = vsel %vm1616_vm3, %v2201_v45, 0.0 }
 0x400   :  { %v2432_v1 = vadd.f32 %v2431_v13, %v2430_v59  ;;  %v17462_v13 = vld [vmem:[#allocation25_spill] sm:$0xff] }
 0x401   :  { %17461 = vst [vmem:[#allocation19_spill] sm:$0xff] %v11497_v37  ;;  %v11504_v62 = vsub.f32 %v17462_v13, %v10981_v35  ;;  %v2203_v8 = vmul.f32 %v11497_v37, %v11497_v37  ;;  %v2441_v27 = vsel %vm1616_vm3, %v2202_v15, 0.0 }
 0x402   :  { %v2434_v21 = vadd.f32 %v2433_v18, %v2432_v1  ;;  %v17464_v18 = vld [vmem:[#allocation26_spill] sm:$0xff] }
 0x403   :  { %17463 = vst [vmem:[#allocation20_spill] sm:$0xff] %v11504_v62  ;;  %v11511_v49 = vsub.f32 %v17464_v18, %v10981_v35  ;;  %v2204_v16 = vmul.f32 %v11504_v62, %v11504_v62  ;;  %v2443_v45 = vsel %vm1616_vm3, %v2203_v8, 0.0 }
 0x404   :  { %v2436_v59 = vadd.f32 %v2435_v17, %v2434_v21  ;;  %v17466_v17 = vld [vmem:[#allocation27_spill] sm:$0xff] }
 0x405   :  { %17465 = vst [vmem:[#allocation21_spill] sm:$0xff] %v11511_v49  ;;  %v11518_v13 = vsub.f32 %v17466_v17, %v10981_v35  ;;  %v2205_v37 = vmul.f32 %v11511_v49, %v11511_v49  ;;  %v2445_v15 = vsel %vm1616_vm3, %v2204_v16, 0.0 }
 0x406   :  { %v2438_v1 = vadd.f32 %v2437_v4, %v2436_v59  ;;  %v17468_v4 = vld [vmem:[#allocation28_spill] sm:$0xff] }
 0x407   :  { %17467 = vst [vmem:[#allocation22_spill] sm:$0xff] %v11518_v13  ;;  %v11525_v18 = vsub.f32 %v17468_v4, %v10981_v35  ;;  %v2206_v62 = vmul.f32 %v11518_v13, %v11518_v13  ;;  %v2447_v8 = vsel %vm1616_vm3, %v2205_v37, 0.0 }
 0x408   :  { %v2440_v21 = vadd.f32 %v2439_v14, %v2438_v1  ;;  %v17470_v14 = vld [vmem:[#allocation29_spill] sm:$0xff] }
 0x409   :  { %17469 = vst [vmem:[#allocation23_spill] sm:$0xff] %v11525_v18  ;;  %v11532_v17 = vsub.f32 %v17470_v14, %v10981_v35  ;;  %v2207_v49 = vmul.f32 %v11525_v18, %v11525_v18  ;;  %v2449_v16 = vsel %vm1616_vm3, %v2206_v62, 0.0 }
 0x40a   :  { %v2442_v59 = vadd.f32 %v2441_v27, %v2440_v21  ;;  %v17472_v27 = vld [vmem:[#allocation30_spill] sm:$0xff] }
 0x40b   :  { %17471 = vst [vmem:[#allocation24_spill] sm:$0xff] %v11532_v17  ;;  %v11539_v4 = vsub.f32 %v17472_v27, %v10981_v35  ;;  %v2208_v13 = vmul.f32 %v11532_v17, %v11532_v17  ;;  %v2451_v37 = vsel %vm1616_vm3, %v2207_v49, 0.0 }
 0x40c   :  { %v2444_v1 = vadd.f32 %v2443_v45, %v2442_v59  ;;  %v17474_v45 = vld [vmem:[#allocation31_spill] sm:$0xff] }
 0x40d   :  { %17473 = vst [vmem:[#allocation25_spill] sm:$0xff] %v11539_v4  ;;  %v11546_v14 = vsub.f32 %v17474_v45, %v10981_v35  ;;  %v2209_v18 = vmul.f32 %v11539_v4, %v11539_v4  ;;  %v2453_v62 = vsel %vm1616_vm3, %v2208_v13, 0.0 }
 0x40e   :  { %v2446_v21 = vadd.f32 %v2445_v15, %v2444_v1  ;;  %v17475_v15 = vld [vmem:[#allocation32_spill] sm:$0xff] }
 0x40f   :  { %v11553_v27 = vsub.f32 %v17475_v15, %v10981_v35  ;;  %v2210_v17 = vmul.f32 %v11546_v14, %v11546_v14  ;;  %v2455_v49 = vsel %vm1616_vm3, %v2209_v18, 0.0 }
 0x410   :  { %v2448_v59 = vadd.f32 %v2447_v8, %v2446_v21  ;;  %v17477_v8 = vld [vmem:[#allocation33_spill] sm:$0xff] }
 0x411   :  { %17476 = vst [vmem:[#allocation26_spill] sm:$0xff] %v11553_v27  ;;  %v11560_v45 = vsub.f32 %v17477_v8, %v10981_v35  ;;  %v2211_v4 = vmul.f32 %v11553_v27, %v11553_v27  ;;  %v2457_v13 = vsel %vm1616_vm3, %v2210_v17, 0.0 }
 0x412   :  { %v2450_v1 = vadd.f32 %v2449_v16, %v2448_v59  ;;  %v17478_v16 = vld [vmem:[#allocation35_spill] sm:$0xff] }
 0x413   :  { %v11567_v15 = vsub.f32 %v17478_v16, %v10981_v35  ;;  %v2212_v8 = vmul.f32 %v11560_v45, %v11560_v45  ;;  %v2459_v18 = vsel %vm1616_vm3, %v2211_v4, 0.0 }
 0x414   :  { %v2452_v21 = vadd.f32 %v2451_v37, %v2450_v1  ;;  %v11574_v37 = vsub.f32 %v10437_v9, %v10981_v35  ;;  %v11588_v9 = vsub.f32 %v10451_v63, %v10981_v35  ;;  %v11602_v63 = vsub.f32 %v10465_v29, %v10981_v35 }
 0x415   :  { %17479 = vst [vmem:[#allocation27_spill] sm:$0xff] %v11567_v15  ;;  %v2213_v27 = vmul.f32 %v11567_v15, %v11567_v15  ;;  %v2461_v17 = vsel %vm1616_vm3, %v2212_v8, 0.0  ;;  %v11616_v29 = vsub.f32 %v10479_v2, %v10981_v35  ;;  %v11630_v2 = vsub.f32 %v10493_v60, %v10981_v35 }
 0x416   :  { %v2454_v59 = vadd.f32 %v2453_v62, %v2452_v21  ;;  %17480 = vst [vmem:[#allocation28_spill] sm:$0xff] %v11574_v37  ;;  %v17481_v62 = vld [vmem:[#allocation37_spill] sm:$0xff]  ;;  %17482 = vst [vmem:[#allocation29_spill] sm:$0xff] %v11588_v9  ;;  %v11644_v60 = vsub.f32 %v10507_v20, %v10981_v35  ;;  %v11658_v20 = vsub.f32 %v10521_v47, %v10981_v35 }
 0x417   :  { %v11581_v16 = vsub.f32 %v17481_v62, %v10981_v35  ;;  %v2463_v4 = vsel %vm1616_vm3, %v2213_v27, 0.0  ;;  %17485 = vst [vmem:[#allocation31_spill] sm:$0xff] %v11602_v63  ;;  %17488 = vst [vmem:[#allocation33_spill] sm:$0xff] %v11616_v29  ;;  %v11672_v47 = vsub.f32 %v10535_v38, %v10981_v35  ;;  %v11686_v38 = vsub.f32 %v10549_v6, %v10981_v35 }
 0x418   :  { %v2456_v1 = vadd.f32 %v2455_v49, %v2454_v59  ;;  %v2214_v49 = vmul.f32 %v11574_v37, %v11574_v37  ;;  %17491 = vst [vmem:[#allocation37_spill] sm:$0xff] %v11630_v2  ;;  %v11700_v6 = vsub.f32 %v10563_v55, %v10981_v35  ;;  %v11714_v55 = vsub.f32 %v10577_v42, %v10981_v35 }
 0x419   :  { %v2215_v15 = vmul.f32 %v11581_v16, %v11581_v16  ;;  %17503 = vst [vmem:[#allocation138_spill] sm:$0xff] %v11686_v38  ;;  %v11728_v42 = vsub.f32 %v10591_v58, %v10981_v35  ;;  %v11742_v58 = vsub.f32 %v10605_v7, %v10981_v35  ;;  %v11756_v7 = vsub.f32 %v10619_v19, %v10981_v35 }
 0x41a   :  { %v2458_v21 = vadd.f32 %v2457_v13, %v2456_v1  ;;  %v17483_v13 = vld [vmem:[#allocation41_spill] sm:$0xff]  ;;  %v2465_v8 = vsel %vm1616_vm3, %v2214_v49, 0.0  ;;  %17506 = vst [vmem:[#allocation139_spill] sm:$0xff] %v11700_v6  ;;  %v11770_v19 = vsub.f32 %v10633_v31, %v10981_v35  ;;  %v11784_v31 = vsub.f32 %v10647_v43, %v10981_v35 }
 0x41b   :  { %v11595_v62 = vsub.f32 %v17483_v13, %v10981_v35  ;;  %v2467_v27 = vsel %vm1616_vm3, %v2215_v15, 0.0  ;;  %v11798_v43 = vsub.f32 %v10661_v57, %v10981_v35  ;;  %v11812_v57 = vsub.f32 %v10675_v12, %v10981_v35 }
 0x41c   :  { %v2460_v59 = vadd.f32 %v2459_v18, %v2458_v21  ;;  %v2216_v18 = vmul.f32 %v11588_v9, %v11588_v9  ;;  %v11826_v12 = vsub.f32 %v10689_v30, %v10981_v35  ;;  %v11840_v30 = vsub.f32 %v10703_v48, %v10981_v35 }
 0x41d   :  { %17484 = vst [vmem:[#allocation30_spill] sm:$0xff] %v11595_v62  ;;  %v2217_v37 = vmul.f32 %v11595_v62, %v11595_v62  ;;  %v11854_v48 = vsub.f32 %v10717_v52, %v10981_v35  ;;  %v11868_v52 = vsub.f32 %v10731_v32, %v10981_v35  ;;  %v11882_v32 = vsub.f32 %v10745_v5, %v10981_v35 }
 0x41e   :  { %v2462_v1 = vadd.f32 %v2461_v17, %v2460_v59  ;;  %v17486_v17 = vld [vmem:[#allocation83_spill] sm:$0xff]  ;;  %v2469_v49 = vsel %vm1616_vm3, %v2216_v18, 0.0  ;;  %v11896_v5 = vsub.f32 %v10759_v44, %v10981_v35 }
 0x41f   :  { %v11609_v13 = vsub.f32 %v17486_v17, %v10981_v35  ;;  %v2471_v15 = vsel %vm1616_vm3, %v2217_v37, 0.0  ;;  %17494 = vst [vmem:[#allocation83_spill] sm:$0xff] %v11644_v60 }
 0x420   :  { %v2464_v21 = vadd.f32 %v2463_v4, %v2462_v1  ;;  %v2218_v4 = vmul.f32 %v11602_v63, %v11602_v63 }
 0x421   :  { %17487 = vst [vmem:[#allocation32_spill] sm:$0xff] %v11609_v13  ;;  %v2219_v62 = vmul.f32 %v11609_v13, %v11609_v13 }
 0x422   :  { %v2466_v59 = vadd.f32 %v2465_v8, %v2464_v21  ;;  %v17489_v8 = vld [vmem:[#allocation84_spill] sm:$0xff]  ;;  %v2473_v18 = vsel %vm1616_vm3, %v2218_v4, 0.0 }
 0x423   :  { %v11623_v17 = vsub.f32 %v17489_v8, %v10981_v35  ;;  %v2475_v37 = vsel %vm1616_vm3, %v2219_v62, 0.0 }
 0x424   :  { %v2468_v1 = vadd.f32 %v2467_v27, %v2466_v59  ;;  %v2220_v27 = vmul.f32 %v11616_v29, %v11616_v29 }
 0x425   :  { %17490 = vst [vmem:[#allocation35_spill] sm:$0xff] %v11623_v17  ;;  %v2221_v13 = vmul.f32 %v11623_v17, %v11623_v17 }
 0x426   :  { %v2470_v21 = vadd.f32 %v2469_v49, %v2468_v1  ;;  %v17492_v49 = vld [vmem:[#allocation85_spill] sm:$0xff]  ;;  %v2477_v4 = vsel %vm1616_vm3, %v2220_v27, 0.0 }
 0x427   :  { %v11637_v8 = vsub.f32 %v17492_v49, %v10981_v35  ;;  %v2479_v62 = vsel %vm1616_vm3, %v2221_v13, 0.0  ;;  %17497 = vst [vmem:[#allocation85_spill] sm:$0xff] %v11658_v20 }
 0x428   :  { %v2472_v59 = vadd.f32 %v2471_v15, %v2470_v21  ;;  %v2222_v15 = vmul.f32 %v11630_v2, %v11630_v2 }
 0x429   :  { %17493 = vst [vmem:[#allocation41_spill] sm:$0xff] %v11637_v8  ;;  %v2223_v17 = vmul.f32 %v11637_v8, %v11637_v8 }
 0x42a   :  { %v2474_v1 = vadd.f32 %v2473_v18, %v2472_v59  ;;  %v17495_v18 = vld [vmem:[#allocation86_spill] sm:$0xff]  ;;  %v2481_v27 = vsel %vm1616_vm3, %v2222_v15, 0.0 }
 0x42b   :  { %v11651_v49 = vsub.f32 %v17495_v18, %v10981_v35  ;;  %v2483_v13 = vsel %vm1616_vm3, %v2223_v17, 0.0 }
 0x42c   :  { %v2476_v21 = vadd.f32 %v2475_v37, %v2474_v1  ;;  %v2224_v37 = vmul.f32 %v11644_v60, %v11644_v60 }
 0x42d   :  { %17496 = vst [vmem:[#allocation84_spill] sm:$0xff] %v11651_v49  ;;  %v2225_v8 = vmul.f32 %v11651_v49, %v11651_v49 }
 0x42e   :  { %v2478_v59 = vadd.f32 %v2477_v4, %v2476_v21  ;;  %v17498_v4 = vld [vmem:[#allocation87_spill] sm:$0xff]  ;;  %v2485_v15 = vsel %vm1616_vm3, %v2224_v37, 0.0 }
 0x42f   :  { %v11665_v18 = vsub.f32 %v17498_v4, %v10981_v35  ;;  %17500 = vst [vmem:[#allocation87_spill] sm:$0xff] %v11672_v47  ;;  %v2487_v17 = vsel %vm1616_vm3, %v2225_v8, 0.0 }
 0x430   :  { %v2480_v1 = vadd.f32 %v2479_v62, %v2478_v59  ;;  %v2226_v62 = vmul.f32 %v11658_v20, %v11658_v20 }
 0x431   :  { %17499 = vst [vmem:[#allocation86_spill] sm:$0xff] %v11665_v18  ;;  %v2227_v49 = vmul.f32 %v11665_v18, %v11665_v18 }
 0x432   :  { %v2482_v21 = vadd.f32 %v2481_v27, %v2480_v1  ;;  %v17501_v27 = vld [vmem:[#allocation88_spill] sm:$0xff]  ;;  %v2489_v37 = vsel %vm1616_vm3, %v2226_v62, 0.0 }
 0x433   :  { %v11679_v4 = vsub.f32 %v17501_v27, %v10981_v35  ;;  %v2491_v8 = vsel %vm1616_vm3, %v2227_v49, 0.0 }
 0x434   :  { %v2484_v59 = vadd.f32 %v2483_v13, %v2482_v21  ;;  %v2228_v13 = vmul.f32 %v11672_v47, %v11672_v47 }
 0x435   :  { %17502 = vst [vmem:[#allocation88_spill] sm:$0xff] %v11679_v4  ;;  %v2229_v18 = vmul.f32 %v11679_v4, %v11679_v4 }
 0x436   :  { %v2486_v1 = vadd.f32 %v2485_v15, %v2484_v59  ;;  %v17504_v15 = vld [vmem:[#allocation89_spill] sm:$0xff]  ;;  %v2493_v62 = vsel %vm1616_vm3, %v2228_v13, 0.0 }
 0x437   :  { %v11693_v27 = vsub.f32 %v17504_v15, %v10981_v35  ;;  %v2495_v49 = vsel %vm1616_vm3, %v2229_v18, 0.0 }
 0x438   :  { %v2488_v21 = vadd.f32 %v2487_v17, %v2486_v1  ;;  %v2230_v17 = vmul.f32 %v11686_v38, %v11686_v38 }
 0x439   :  { %17505 = vst [vmem:[#allocation89_spill] sm:$0xff] %v11693_v27  ;;  %v2231_v4 = vmul.f32 %v11693_v27, %v11693_v27 }
 0x43a   :  { %v2490_v59 = vadd.f32 %v2489_v37, %v2488_v21  ;;  %v17507_v37 = vld [vmem:[#allocation90_spill] sm:$0xff]  ;;  %v2497_v13 = vsel %vm1616_vm3, %v2230_v17, 0.0 }
 0x43b   :  { %v11707_v15 = vsub.f32 %v17507_v37, %v10981_v35  ;;  %v2499_v18 = vsel %vm1616_vm3, %v2231_v4, 0.0 }
 0x43c   :  { %v2492_v1 = vadd.f32 %v2491_v8, %v2490_v59  ;;  %v2232_v8 = vmul.f32 %v11700_v6, %v11700_v6 }
 0x43d   :  { %v2233_v27 = vmul.f32 %v11707_v15, %v11707_v15 }
 0x43e   :  { %v2494_v21 = vadd.f32 %v2493_v62, %v2492_v1  ;;  %v17508_v62 = vld [vmem:[#allocation91_spill] sm:$0xff]  ;;  %v2501_v17 = vsel %vm1616_vm3, %v2232_v8, 0.0 }
 0x43f   :  { %v11721_v37 = vsub.f32 %v17508_v62, %v10981_v35  ;;  %v2503_v4 = vsel %vm1616_vm3, %v2233_v27, 0.0  ;;  %17517 = vst [vmem:[#allocation91_spill] sm:$0xff] %v11826_v12 }
 0x440   :  { %v2496_v59 = vadd.f32 %v2495_v49, %v2494_v21  ;;  %v2234_v49 = vmul.f32 %v11714_v55, %v11714_v55 }
 0x441   :  { %v2235_v6 = vmul.f32 %v11721_v37, %v11721_v37 }
 0x442   :  { %v2498_v1 = vadd.f32 %v2497_v13, %v2496_v59  ;;  %v17509_v13 = vld [vmem:[#allocation92_spill] sm:$0xff]  ;;  %v2505_v8 = vsel %vm1616_vm3, %v2234_v49, 0.0 }
 0x443   :  { %v11735_v62 = vsub.f32 %v17509_v13, %v10981_v35  ;;  %v2507_v27 = vsel %vm1616_vm3, %v2235_v6, 0.0 }
 0x444   :  { %v2500_v21 = vadd.f32 %v2499_v18, %v2498_v1  ;;  %v2236_v18 = vmul.f32 %v11728_v42, %v11728_v42 }
 0x445   :  { %v2237_v38 = vmul.f32 %v11735_v62, %v11735_v62 }
 0x446   :  { %v2502_v59 = vadd.f32 %v2501_v17, %v2500_v21  ;;  %v17510_v17 = vld [vmem:[#allocation93_spill] sm:$0xff]  ;;  %v2509_v49 = vsel %vm1616_vm3, %v2236_v18, 0.0 }
 0x447   :  { %v11749_v13 = vsub.f32 %v17510_v17, %v10981_v35  ;;  %v2511_v6 = vsel %vm1616_vm3, %v2237_v38, 0.0  ;;  %17520 = vst [vmem:[#allocation93_spill] sm:$0xff] %v11840_v30 }
 0x448   :  { %v2504_v1 = vadd.f32 %v2503_v4, %v2502_v59  ;;  %v2238_v4 = vmul.f32 %v11742_v58, %v11742_v58 }
 0x449   :  { %v2239_v47 = vmul.f32 %v11749_v13, %v11749_v13 }
 0x44a   :  { %v2506_v21 = vadd.f32 %v2505_v8, %v2504_v1  ;;  %v17511_v8 = vld [vmem:[#allocation94_spill] sm:$0xff]  ;;  %v2513_v18 = vsel %vm1616_vm3, %v2238_v4, 0.0 }
 0x44b   :  { %v11763_v17 = vsub.f32 %v17511_v8, %v10981_v35  ;;  %v2515_v38 = vsel %vm1616_vm3, %v2239_v47, 0.0 }
 0x44c   :  { %v2508_v59 = vadd.f32 %v2507_v27, %v2506_v21  ;;  %v2240_v27 = vmul.f32 %v11756_v7, %v11756_v7 }
 0x44d   :  { %v2241_v20 = vmul.f32 %v11763_v17, %v11763_v17 }
 0x44e   :  { %v2510_v1 = vadd.f32 %v2509_v49, %v2508_v59  ;;  %v17512_v49 = vld [vmem:[#allocation95_spill] sm:$0xff]  ;;  %v2517_v4 = vsel %vm1616_vm3, %v2240_v27, 0.0 }
 0x44f   :  { %v11777_v8 = vsub.f32 %v17512_v49, %v10981_v35  ;;  %v2519_v47 = vsel %vm1616_vm3, %v2241_v20, 0.0  ;;  %17523 = vst [vmem:[#allocation95_spill] sm:$0xff] %v11854_v48 }
 0x450   :  { %v2512_v21 = vadd.f32 %v2511_v6, %v2510_v1  ;;  %v2242_v6 = vmul.f32 %v11770_v19, %v11770_v19 }
 0x451   :  { %v2243_v60 = vmul.f32 %v11777_v8, %v11777_v8 }
 0x452   :  { %v2514_v59 = vadd.f32 %v2513_v18, %v2512_v21  ;;  %v17513_v18 = vld [vmem:[#allocation96_spill] sm:$0xff]  ;;  %v2521_v27 = vsel %vm1616_vm3, %v2242_v6, 0.0 }
 0x453   :  { %v11791_v49 = vsub.f32 %v17513_v18, %v10981_v35  ;;  %v2523_v20 = vsel %vm1616_vm3, %v2243_v60, 0.0 }
 0x454   :  { %v2516_v1 = vadd.f32 %v2515_v38, %v2514_v59  ;;  %v2244_v38 = vmul.f32 %v11784_v31, %v11784_v31 }
 0x455   :  { %v2245_v2 = vmul.f32 %v11791_v49, %v11791_v49 }
 0x456   :  { %v2518_v21 = vadd.f32 %v2517_v4, %v2516_v1  ;;  %v17514_v4 = vld [vmem:[#allocation97_spill] sm:$0xff]  ;;  %v2525_v6 = vsel %vm1616_vm3, %v2244_v38, 0.0 }
 0x457   :  { %v11805_v18 = vsub.f32 %v17514_v4, %v10981_v35  ;;  %v2527_v60 = vsel %vm1616_vm3, %v2245_v2, 0.0  ;;  %17526 = vst [vmem:[#allocation97_spill] sm:$0xff] %v11868_v52 }
 0x458   :  { %v2520_v59 = vadd.f32 %v2519_v47, %v2518_v21  ;;  %v2246_v47 = vmul.f32 %v11798_v43, %v11798_v43 }
 0x459   :  { %v2247_v29 = vmul.f32 %v11805_v18, %v11805_v18 }
 0x45a   :  { %v2522_v1 = vadd.f32 %v2521_v27, %v2520_v59  ;;  %v17515_v27 = vld [vmem:[#allocation98_spill] sm:$0xff]  ;;  %v2529_v38 = vsel %vm1616_vm3, %v2246_v47, 0.0 }
 0x45b   :  { %v11819_v4 = vsub.f32 %v17515_v27, %v10981_v35  ;;  %v2531_v2 = vsel %vm1616_vm3, %v2247_v29, 0.0  ;;  %17528 = vst [vmem:[#allocation98_spill] sm:$0xff] %v11882_v32 }
 0x45c   :  { %v2524_v21 = vadd.f32 %v2523_v20, %v2522_v1  ;;  %v2248_v20 = vmul.f32 %v11812_v57, %v11812_v57 }
 0x45d   :  { %17516 = vst [vmem:[#allocation90_spill] sm:$0xff] %v11819_v4  ;;  %v2249_v63 = vmul.f32 %v11819_v4, %v11819_v4  ;;  %v17625_v4 = vld [vmem:[#allocation12_spill] sm:$0xff] }
 0x45e   :  { %v2526_v59 = vadd.f32 %v2525_v6, %v2524_v21  ;;  %v17518_v6 = vld [vmem:[#allocation99_spill] sm:$0xff]  ;;  %v2533_v47 = vsel %vm1616_vm3, %v2248_v20, 0.0 }
 0x45f   :  { %v11833_v27 = vsub.f32 %v17518_v6, %v10981_v35  ;;  %v2535_v29 = vsel %vm1616_vm3, %v2249_v63, 0.0 }
 0x460   :  { %v2528_v1 = vadd.f32 %v2527_v60, %v2526_v59  ;;  %v2250_v60 = vmul.f32 %v11826_v12, %v11826_v12  ;;  %v17623_v12 = vld [vmem:[#allocation11_spill] sm:$0xff] }
 0x461   :  { %17519 = vst [vmem:[#allocation92_spill] sm:$0xff] %v11833_v27  ;;  %v2251_v9 = vmul.f32 %v11833_v27, %v11833_v27 }
 0x462   :  { %v2530_v21 = vadd.f32 %v2529_v38, %v2528_v1  ;;  %v17521_v38 = vld [vmem:[#allocation100_spill] sm:$0xff]  ;;  %v2537_v20 = vsel %vm1616_vm3, %v2250_v60, 0.0 }
 0x463   :  { %v11847_v6 = vsub.f32 %v17521_v38, %v10981_v35  ;;  %v2539_v63 = vsel %vm1616_vm3, %v2251_v9, 0.0  ;;  %17531 = vst [vmem:[#allocation100_spill] sm:$0xff] %v11896_v5 }
 0x464   :  { %v2532_v59 = vadd.f32 %v2531_v2, %v2530_v21  ;;  %v2252_v2 = vmul.f32 %v11840_v30, %v11840_v30  ;;  %v17621_v30 = vld [vmem:[#allocation10_spill] sm:$0xff] }
 0x465   :  { %17522 = vst [vmem:[#allocation94_spill] sm:$0xff] %v11847_v6  ;;  %v2253_v27 = vmul.f32 %v11847_v6, %v11847_v6 }
 0x466   :  { %v2534_v1 = vadd.f32 %v2533_v47, %v2532_v59  ;;  %v17524_v47 = vld [vmem:[#allocation101_spill] sm:$0xff]  ;;  %v2541_v60 = vsel %vm1616_vm3, %v2252_v2, 0.0 }
 0x467   :  { %v11861_v38 = vsub.f32 %v17524_v47, %v10981_v35  ;;  %v2543_v9 = vsel %vm1616_vm3, %v2253_v27, 0.0 }
 0x468   :  { %v2536_v21 = vadd.f32 %v2535_v29, %v2534_v1  ;;  %v2254_v29 = vmul.f32 %v11854_v48, %v11854_v48 }
 0x469   :  { %17525 = vst [vmem:[#allocation96_spill] sm:$0xff] %v11861_v38  ;;  %v2255_v6 = vmul.f32 %v11861_v38, %v11861_v38 }
 0x46a   :  { %v2538_v59 = vadd.f32 %v2537_v20, %v2536_v21  ;;  %v17527_v20 = vld [vmem:[#allocation102_spill] sm:$0xff]  ;;  %v2545_v2 = vsel %vm1616_vm3, %v2254_v29, 0.0 }
 0x46b   :  { %v11875_v47 = vsub.f32 %v17527_v20, %v10981_v35  ;;  %v2547_v27 = vsel %vm1616_vm3, %v2255_v6, 0.0 }
 0x46c   :  { %v2540_v1 = vadd.f32 %v2539_v63, %v2538_v59  ;;  %v2256_v63 = vmul.f32 %v11868_v52, %v11868_v52 }
 0x46d   :  { %v2257_v38 = vmul.f32 %v11875_v47, %v11875_v47 }
 0x46e   :  { %v2542_v21 = vadd.f32 %v2541_v60, %v2540_v1  ;;  %v17529_v60 = vld [vmem:[#allocation103_spill] sm:$0xff]  ;;  %v2549_v29 = vsel %vm1616_vm3, %v2256_v63, 0.0 }
 0x46f   :  { %v11889_v20 = vsub.f32 %v17529_v60, %v10981_v35  ;;  %v2551_v6 = vsel %vm1616_vm3, %v2257_v38, 0.0 }
 0x470   :  { %v2544_v59 = vadd.f32 %v2543_v9, %v2542_v21  ;;  %v2258_v9 = vmul.f32 %v11882_v32, %v11882_v32  ;;  %v2260_v32 = vmul.f32 %v11896_v5, %v11896_v5 }
 0x471   :  { %17530 = vst [vmem:[#allocation99_spill] sm:$0xff] %v11889_v20  ;;  %v2259_v52 = vmul.f32 %v11889_v20, %v11889_v20 }
 0x472   :  { %v2546_v1 = vadd.f32 %v2545_v2, %v2544_v59  ;;  %v17532_v2 = vld [vmem:[#allocation104_spill] sm:$0xff]  ;;  %v2553_v63 = vsel %vm1616_vm3, %v2258_v9, 0.0  ;;  %v2557_v9 = vsel %vm1616_vm3, %v2260_v32, 0.0 }
 0x473   :  { %v11903_v60 = vsub.f32 %v17532_v2, %v10981_v35  ;;  %v2555_v38 = vsel %vm1616_vm3, %v2259_v52, 0.0 }
 0x474   :  { %v2548_v21 = vadd.f32 %v2547_v27, %v2546_v1  ;;  %v17534_v27 = vld [vmem:[#allocation105_spill] sm:$0xff] }
 0x475   :  { %17533 = vst [vmem:[#allocation101_spill] sm:$0xff] %v11903_v60  ;;  %v11910_v44 = vsub.f32 %v17534_v27, %v10981_v35  ;;  %v2261_v20 = vmul.f32 %v11903_v60, %v11903_v60 }
 0x476   :  { %v2550_v59 = vadd.f32 %v2549_v29, %v2548_v21  ;;  %v17536_v29 = vld [vmem:[#allocation106_spill] sm:$0xff] }
 0x477   :  { %17535 = vst [vmem:[#allocation102_spill] sm:$0xff] %v11910_v44  ;;  %v11917_v2 = vsub.f32 %v17536_v29, %v10981_v35  ;;  %v2262_v27 = vmul.f32 %v11910_v44, %v11910_v44  ;;  %v2559_v52 = vsel %vm1616_vm3, %v2261_v20, 0.0 }
 0x478   :  { %v2552_v1 = vadd.f32 %v2551_v6, %v2550_v59  ;;  %v11924_v6 = vsub.f32 %v10787_v41, %v10981_v35  ;;  %v11938_v41 = vsub.f32 %v10801_v51, %v10981_v35  ;;  %v11952_v51 = vsub.f32 %v10813_v33, %v10981_v35 }
 0x479   :  { %17537 = vst [vmem:[#allocation103_spill] sm:$0xff] %v11917_v2  ;;  %v2263_v60 = vmul.f32 %v11917_v2, %v11917_v2  ;;  %v2561_v32 = vsel %vm1616_vm3, %v2262_v27, 0.0  ;;  %v11966_v33 = vsub.f32 %v10825_v53, %v10981_v35  ;;  %v11980_v53 = vsub.f32 %v10837_v50, %v10981_v35 }
 0x47a   :  { %v2554_v21 = vadd.f32 %v2553_v63, %v2552_v1  ;;  %17538 = vst [vmem:[#allocation104_spill] sm:$0xff] %v11924_v6  ;;  %v17539_v63 = vld [vmem:[#allocation107_spill] sm:$0xff]  ;;  %17541 = vst [vmem:[#allocation106_spill] sm:$0xff] %v11938_v41  ;;  %v11994_v50 = vsub.f32 %v10849_v26, %v10981_v35  ;;  %v12008_v26 = vsub.f32 %v10861_v40, %v10981_v35 }
 0x47b   :  { %v11931_v29 = vsub.f32 %v17539_v63, %v10981_v35  ;;  %v2563_v20 = vsel %vm1616_vm3, %v2263_v60, 0.0  ;;  %17547 = vst [vmem:[#allocation140_spill] sm:$0xff] %v11966_v33  ;;  %17550 = vst [vmem:[#allocation141_spill] sm:$0xff] %v11980_v53 }
 0x47c   :  { %v2556_v59 = vadd.f32 %v2555_v38, %v2554_v21  ;;  %v2264_v38 = vmul.f32 %v11924_v6, %v11924_v6  ;;  %17553 = vst [vmem:[#allocation142_spill] sm:$0xff] %v11994_v50  ;;  %17556 = vst [vmem:[#allocation143_spill] sm:$0xff] %v12008_v26 }
 0x47d   :  { %17540 = vst [vmem:[#allocation105_spill] sm:$0xff] %v11931_v29  ;;  %v2265_v2 = vmul.f32 %v11931_v29, %v11931_v29 }
 0x47e   :  { %v2558_v1 = vadd.f32 %v2557_v9, %v2556_v59  ;;  %v17542_v9 = vld [vmem:[#allocation108_spill] sm:$0xff]  ;;  %v2565_v27 = vsel %vm1616_vm3, %v2264_v38, 0.0 }
 0x47f   :  { %v11945_v63 = vsub.f32 %v17542_v9, %v10981_v35  ;;  %17544 = vst [vmem:[#allocation108_spill] sm:$0xff] %v11952_v51  ;;  %v2567_v60 = vsel %vm1616_vm3, %v2265_v2, 0.0 }
 0x480   :  { %v2560_v21 = vadd.f32 %v2559_v52, %v2558_v1  ;;  %v2266_v52 = vmul.f32 %v11938_v41, %v11938_v41 }
 0x481   :  { %17543 = vst [vmem:[#allocation107_spill] sm:$0xff] %v11945_v63  ;;  %v2267_v29 = vmul.f32 %v11945_v63, %v11945_v63 }
 0x482   :  { %v2562_v59 = vadd.f32 %v2561_v32, %v2560_v21  ;;  %v17545_v32 = vld [vmem:[#allocation109_spill] sm:$0xff]  ;;  %v2569_v38 = vsel %vm1616_vm3, %v2266_v52, 0.0 }
 0x483   :  { %v11959_v9 = vsub.f32 %v17545_v32, %v10981_v35  ;;  %v2571_v2 = vsel %vm1616_vm3, %v2267_v29, 0.0 }
 0x484   :  { %v2564_v1 = vadd.f32 %v2563_v20, %v2562_v59  ;;  %v2268_v20 = vmul.f32 %v11952_v51, %v11952_v51 }
 0x485   :  { %17546 = vst [vmem:[#allocation109_spill] sm:$0xff] %v11959_v9  ;;  %v2269_v63 = vmul.f32 %v11959_v9, %v11959_v9 }
 0x486   :  { %v2566_v21 = vadd.f32 %v2565_v27, %v2564_v1  ;;  %v17548_v27 = vld [vmem:[#allocation110_spill] sm:$0xff]  ;;  %v2573_v52 = vsel %vm1616_vm3, %v2268_v20, 0.0 }
 0x487   :  { %v11973_v32 = vsub.f32 %v17548_v27, %v10981_v35  ;;  %v2575_v29 = vsel %vm1616_vm3, %v2269_v63, 0.0 }
 0x488   :  { %v2568_v59 = vadd.f32 %v2567_v60, %v2566_v21  ;;  %v2270_v60 = vmul.f32 %v11966_v33, %v11966_v33 }
 0x489   :  { %17549 = vst [vmem:[#allocation110_spill] sm:$0xff] %v11973_v32  ;;  %v2271_v9 = vmul.f32 %v11973_v32, %v11973_v32 }
 0x48a   :  { %v2570_v1 = vadd.f32 %v2569_v38, %v2568_v59  ;;  %v17551_v38 = vld [vmem:[#allocation111_spill] sm:$0xff]  ;;  %v2577_v20 = vsel %vm1616_vm3, %v2270_v60, 0.0 }
 0x48b   :  { %v11987_v27 = vsub.f32 %v17551_v38, %v10981_v35  ;;  %v2579_v63 = vsel %vm1616_vm3, %v2271_v9, 0.0 }
 0x48c   :  { %v2572_v21 = vadd.f32 %v2571_v2, %v2570_v1  ;;  %v2272_v2 = vmul.f32 %v11980_v53, %v11980_v53  ;;  %v2276_v53 = vmul.f32 %v12008_v26, %v12008_v26 }
 0x48d   :  { %17552 = vst [vmem:[#allocation111_spill] sm:$0xff] %v11987_v27  ;;  %v2273_v32 = vmul.f32 %v11987_v27, %v11987_v27 }
 0x48e   :  { %v2574_v59 = vadd.f32 %v2573_v52, %v2572_v21  ;;  %v17554_v52 = vld [vmem:[#allocation112_spill] sm:$0xff]  ;;  %v2581_v60 = vsel %vm1616_vm3, %v2272_v2, 0.0 }
 0x48f   :  { %v12001_v38 = vsub.f32 %v17554_v52, %v10981_v35  ;;  %v2583_v9 = vsel %vm1616_vm3, %v2273_v32, 0.0 }
 0x490   :  { %v2576_v1 = vadd.f32 %v2575_v29, %v2574_v59  ;;  %v2274_v29 = vmul.f32 %v11994_v50, %v11994_v50 }
 0x491   :  { %17555 = vst [vmem:[#allocation112_spill] sm:$0xff] %v12001_v38  ;;  %v2275_v27 = vmul.f32 %v12001_v38, %v12001_v38 }
 0x492   :  { %v2578_v21 = vadd.f32 %v2577_v20, %v2576_v1  ;;  %v17557_v20 = vld [vmem:[#allocation113_spill] sm:$0xff]  ;;  %v2585_v2 = vsel %vm1616_vm3, %v2274_v29, 0.0  ;;  %v2589_v29 = vsel %vm1616_vm3, %v2276_v53, 0.0 }
 0x493   :  { %v12015_v52 = vsub.f32 %v17557_v20, %v10981_v35  ;;  %v2587_v32 = vsel %vm1616_vm3, %v2275_v27, 0.0 }
 0x494   :  { %v2580_v59 = vadd.f32 %v2579_v63, %v2578_v21  ;;  %v17559_v63 = vld [vmem:[#allocation114_spill] sm:$0xff] }
 0x495   :  { %17558 = vst [vmem:[#allocation113_spill] sm:$0xff] %v12015_v52  ;;  %v12022_v40 = vsub.f32 %v17559_v63, %v10981_v35  ;;  %v2277_v33 = vmul.f32 %v12015_v52, %v12015_v52 }
 0x496   :  { %v2582_v1 = vadd.f32 %v2581_v60, %v2580_v59  ;;  %v17561_v60 = vld [vmem:[#allocation115_spill] sm:$0xff] }
 0x497   :  { %17560 = vst [vmem:[#allocation114_spill] sm:$0xff] %v12022_v40  ;;  %v12029_v20 = vsub.f32 %v17561_v60, %v10981_v35  ;;  %v2278_v63 = vmul.f32 %v12022_v40, %v12022_v40  ;;  %v2591_v27 = vsel %vm1616_vm3, %v2277_v33, 0.0 }
 0x498   :  { %v2584_v21 = vadd.f32 %v2583_v9, %v2582_v1  ;;  %v12036_v9 = vsub.f32 %v10885_v23, %v10981_v35  ;;  %v12050_v23 = vsub.f32 %v10896_v56, %v10981_v35  ;;  %v12064_v56 = vsub.f32 %v10906_v3, %v10981_v35 }
 0x499   :  { %17562 = vst [vmem:[#allocation115_spill] sm:$0xff] %v12029_v20  ;;  %v2279_v51 = vmul.f32 %v12029_v20, %v12029_v20  ;;  %v2593_v53 = vsel %vm1616_vm3, %v2278_v63, 0.0 }
 0x49a   :  { %v2586_v59 = vadd.f32 %v2585_v2, %v2584_v21  ;;  %17563 = vst [vmem:[#allocation144_spill] sm:$0xff] %v12036_v9  ;;  %v17564_v2 = vld [vmem:[#allocation116_spill] sm:$0xff]  ;;  %17566 = vst [vmem:[#allocation145_spill] sm:$0xff] %v12050_v23  ;;  %v2284_v44 = vmul.f32 %v12064_v56, %v12064_v56 }
 0x49b   :  { %v12043_v60 = vsub.f32 %v17564_v2, %v10981_v35  ;;  %v2595_v33 = vsel %vm1616_vm3, %v2279_v51, 0.0  ;;  %17569 = vst [vmem:[#allocation146_spill] sm:$0xff] %v12064_v56 }
 0x49c   :  { %v2588_v1 = vadd.f32 %v2587_v32, %v2586_v59  ;;  %v2280_v32 = vmul.f32 %v12036_v9, %v12036_v9 }
 0x49d   :  { %17565 = vst [vmem:[#allocation116_spill] sm:$0xff] %v12043_v60  ;;  %v2281_v41 = vmul.f32 %v12043_v60, %v12043_v60  ;;  %v17613_v60 = vld [vmem:[#allocation66_spill] sm:$0xff] }
 0x49e   :  { %v2590_v21 = vadd.f32 %v2589_v29, %v2588_v1  ;;  %v17567_v29 = vld [vmem:[#allocation117_spill] sm:$0xff]  ;;  %v2597_v63 = vsel %vm1616_vm3, %v2280_v32, 0.0 }
 0x49f   :  { %v12057_v2 = vsub.f32 %v17567_v29, %v10981_v35  ;;  %v2599_v51 = vsel %vm1616_vm3, %v2281_v41, 0.0 }
 0x4a0   :  { %v2592_v59 = vadd.f32 %v2591_v27, %v2590_v21  ;;  %v2282_v27 = vmul.f32 %v12050_v23, %v12050_v23  ;;  %v17612_v23 = vld [vmem:[#allocation65_spill] sm:$0xff] }
 0x4a1   :  { %17568 = vst [vmem:[#allocation117_spill] sm:$0xff] %v12057_v2  ;;  %v2283_v6 = vmul.f32 %v12057_v2, %v12057_v2 }
 0x4a2   :  { %v2594_v1 = vadd.f32 %v2593_v53, %v2592_v59  ;;  %v17570_v53 = vld [vmem:[#allocation118_spill] sm:$0xff]  ;;  %v2601_v32 = vsel %vm1616_vm3, %v2282_v27, 0.0  ;;  %v2605_v27 = vsel %vm1616_vm3, %v2284_v44, 0.0 }
 0x4a3   :  { %v12071_v29 = vsub.f32 %v17570_v53, %v10981_v35  ;;  %v2603_v41 = vsel %vm1616_vm3, %v2283_v6, 0.0 }
 0x4a4   :  { %v2596_v21 = vadd.f32 %v2595_v33, %v2594_v1  ;;  %v17572_v33 = vld [vmem:[#allocation119_spill] sm:$0xff] }
 0x4a5   :  { %17571 = vst [vmem:[#allocation118_spill] sm:$0xff] %v12071_v29  ;;  %v12078_v3 = vsub.f32 %v17572_v33, %v10981_v35  ;;  %v2285_v5 = vmul.f32 %v12071_v29, %v12071_v29 }
 0x4a6   :  { %v2598_v59 = vadd.f32 %v2597_v63, %v2596_v21  ;;  %v17574_v63 = vld [vmem:[#allocation120_spill] sm:$0xff] }
 0x4a7   :  { %17573 = vst [vmem:[#allocation119_spill] sm:$0xff] %v12078_v3  ;;  %v12085_v53 = vsub.f32 %v17574_v63, %v10981_v35  ;;  %v2286_v56 = vmul.f32 %v12078_v3, %v12078_v3  ;;  %v2607_v6 = vsel %vm1616_vm3, %v2285_v5, 0.0 }
 0x4a8   :  { %v2600_v1 = vadd.f32 %v2599_v51, %v2598_v59  ;;  %v17576_v51 = vld [vmem:[#allocation121_spill] sm:$0xff] }
 0x4a9   :  { %17575 = vst [vmem:[#allocation120_spill] sm:$0xff] %v12085_v53  ;;  %v12092_v33 = vsub.f32 %v17576_v51, %v10981_v35  ;;  %v2287_v29 = vmul.f32 %v12085_v53, %v12085_v53  ;;  %v2609_v44 = vsel %vm1616_vm3, %v2286_v56, 0.0 }
 0x4aa   :  { %v2602_v21 = vadd.f32 %v2601_v32, %v2600_v1  ;;  %v17578_v32 = vld [vmem:[#allocation122_spill] sm:$0xff] }
 0x4ab   :  { %17577 = vst [vmem:[#allocation121_spill] sm:$0xff] %v12092_v33  ;;  %v12099_v63 = vsub.f32 %v17578_v32, %v10981_v35  ;;  %v2288_v3 = vmul.f32 %v12092_v33, %v12092_v33  ;;  %v2611_v5 = vsel %vm1616_vm3, %v2287_v29, 0.0 }
 0x4ac   :  { %v2604_v59 = vadd.f32 %v2603_v41, %v2602_v21  ;;  %v17580_v41 = vld [vmem:[#allocation123_spill] sm:$0xff] }
 0x4ad   :  { %17579 = vst [vmem:[#allocation122_spill] sm:$0xff] %v12099_v63  ;;  %v12106_v51 = vsub.f32 %v17580_v41, %v10981_v35  ;;  %v2289_v53 = vmul.f32 %v12099_v63, %v12099_v63  ;;  %v2613_v56 = vsel %vm1616_vm3, %v2288_v3, 0.0 }
 0x4ae   :  { %v2606_v1 = vadd.f32 %v2605_v27, %v2604_v59  ;;  %v17582_v27 = vld [vmem:[#allocation124_spill] sm:$0xff] }
 0x4af   :  { %17581 = vst [vmem:[#allocation123_spill] sm:$0xff] %v12106_v51  ;;  %v12113_v32 = vsub.f32 %v17582_v27, %v10981_v35  ;;  %v2290_v33 = vmul.f32 %v12106_v51, %v12106_v51  ;;  %v2615_v29 = vsel %vm1616_vm3, %v2289_v53, 0.0 }
 0x4b0   :  { %v2608_v21 = vadd.f32 %v2607_v6, %v2606_v1  ;;  %v17584_v6 = vld [vmem:[#allocation125_spill] sm:$0xff] }
 0x4b1   :  { %17583 = vst [vmem:[#allocation124_spill] sm:$0xff] %v12113_v32  ;;  %v12120_v41 = vsub.f32 %v17584_v6, %v10981_v35  ;;  %v2291_v63 = vmul.f32 %v12113_v32, %v12113_v32  ;;  %v2617_v3 = vsel %vm1616_vm3, %v2290_v33, 0.0 }
 0x4b2   :  { %v2610_v59 = vadd.f32 %v2609_v44, %v2608_v21  ;;  %v17586_v44 = vld [vmem:[#allocation126_spill] sm:$0xff] }
 0x4b3   :  { %17585 = vst [vmem:[#allocation125_spill] sm:$0xff] %v12120_v41  ;;  %v12127_v27 = vsub.f32 %v17586_v44, %v10981_v35  ;;  %v2292_v51 = vmul.f32 %v12120_v41, %v12120_v41  ;;  %v2619_v53 = vsel %vm1616_vm3, %v2291_v63, 0.0 }
 0x4b4   :  { %v2612_v1 = vadd.f32 %v2611_v5, %v2610_v59  ;;  %v17588_v5 = vld [vmem:[#allocation127_spill] sm:$0xff] }
 0x4b5   :  { %17587 = vst [vmem:[#allocation126_spill] sm:$0xff] %v12127_v27  ;;  %v12134_v6 = vsub.f32 %v17588_v5, %v10981_v35  ;;  %v2293_v32 = vmul.f32 %v12127_v27, %v12127_v27  ;;  %v2621_v33 = vsel %vm1616_vm3, %v2292_v51, 0.0 }
 0x4b6   :  { %v2614_v21 = vadd.f32 %v2613_v56, %v2612_v1  ;;  %v17590_v56 = vld [vmem:[#allocation128_spill] sm:$0xff] }
 0x4b7   :  { %17589 = vst [vmem:[#allocation127_spill] sm:$0xff] %v12134_v6  ;;  %v12141_v44 = vsub.f32 %v17590_v56, %v10981_v35  ;;  %v2294_v41 = vmul.f32 %v12134_v6, %v12134_v6  ;;  %v2623_v63 = vsel %vm1616_vm3, %v2293_v32, 0.0  ;;  %v2299_v32 = vmul.f32 %v10987_v61, %v10987_v61 }
 0x4b8   :  { %v2616_v59 = vadd.f32 %v2615_v29, %v2614_v21  ;;  %v17592_v29 = vld [vmem:[#allocation129_spill] sm:$0xff]  ;;  %v2990_v61 = vsub.s32 2, %v17366_v36  ;;  %v17611_v36 = vld [vmem:[#allocation64_spill] sm:$0xff] }
 0x4b9   :  { %17591 = vst [vmem:[#allocation128_spill] sm:$0xff] %v12141_v44  ;;  %v12148_v5 = vsub.f32 %v17592_v29, %v10981_v35  ;;  %v2295_v27 = vmul.f32 %v12141_v44, %v12141_v44  ;;  %v2625_v29 = vsel %vm1616_vm3, %v2294_v41, 0.0 }
 0x4ba   :  { %v2618_v1 = vadd.f32 %v2617_v3, %v2616_v59  ;;  %v17594_v3 = vld [vmem:[#allocation130_spill] sm:$0xff] }
 0x4bb   :  { %17593 = vst [vmem:[#allocation129_spill] sm:$0xff] %v12148_v5  ;;  %v12155_v56 = vsub.f32 %v17594_v3, %v10981_v35  ;;  %v2298_v35 = vmul.f32 %v10984_v24, %v10984_v24 }
 0x4bc   :  { %v2620_v21 = vadd.f32 %v2619_v53, %v2618_v1  ;;  %v2296_v53 = vmul.f32 %v12148_v5, %v12148_v5 }
 0x4bd   :  { %17595 = vst [vmem:[#allocation130_spill] sm:$0xff] %v12155_v56  ;;  %v2297_v51 = vmul.f32 %v12155_v56, %v12155_v56  ;;  %v2633_v41 = vsel %vm1616_vm3, %v2298_v35, 0.0  ;;  %v2690_v35 = vmul.f32 %v11181_v10, %v11287_v0  ;;  %v12200_v0 = vmul.f32 %v11181_v10, %v11116_v28 }
 0x4be   :  { %v2622_v59 = vadd.f32 %v2621_v33, %v2620_v21  ;;  %v2627_v21 = vsel %vm1616_vm3, %v2295_v27, 0.0  ;;  %v2629_v3 = vsel %vm1616_vm3, %v2296_v53, 0.0 }
 0x4c0   :  { %v2624_v1 = vadd.f32 %v2623_v63, %v2622_v59  ;;  %v2631_v59 = vsel %vm1616_vm3, %v2297_v51, 0.0 }
 0x4c2   :  { %v2626_v2 = vadd.f32 %v2625_v29, %v2624_v1  ;;  %v2635_v29 = vsel %vm1616_vm3, %v2299_v32, 0.0  ;;  %v17598_v32 = vld [vmem:[#allocation49_spill] sm:$0xff] }
 0x4c4   :  { %v2628_v33 = vadd.f32 %v2627_v21, %v2626_v2 }
 0x4c6   :  { %v2630_v44 = vadd.f32 %v2629_v3, %v2628_v33  ;;  %v12196_v3 = vmul.f32 %v11181_v10, %v11109_v54  ;;  %v12216_v54 = vmul.f32 %v11181_v10, %v11144_v25 }
 0x4c8   :  { %v2632_v63 = vadd.f32 %v2631_v59, %v2630_v44  ;;  %v8602_v44 = vld [vmem:[%s16796_s3] sm:$0xff]  ;;  %v17599_v59 = vld [vmem:[#allocation50_spill] sm:$0xff] }
 0x4c9   :  { %v12178_v51 = vrot.slane %v8602_v44, %v2990_v61  ;;  %v17606_v44 = vld [vmem:[#allocation59_spill] sm:$0xff] }
 0x4ca   :  { %v2634_v1 = vadd.f32 %v2633_v41, %v2632_v63  ;;  %v17600_v63 = vld [vmem:[#allocation51_spill] sm:$0xff]  ;;  %v17601_v41 = vld [vmem:[#allocation53_spill] sm:$0xff] }
 0x4cb   :  { %17596 = vst [vmem:[#allocation147_spill] sm:$0xff] %v12178_v51  ;;  %v12236_v25 = vmul.f32 %v11181_v10, %v17601_v41 }
 0x4cc   :  { %v2636_v56 = vadd.f32 %v2635_v29, %v2634_v1  ;;  %v17602_v1 = vld [vmem:[#allocation54_spill] sm:$0xff] }
 0x4cd   :  { %v12240_v29 = vmul.f32 %v11181_v10, %v17602_v1  ;;  %v17609_v1 = vld [vmem:[#allocation62_spill] sm:$0xff] }
 0x4ce   :  { %v2637_v27 = vrot.slane %v2636_v56, 4 }
 0x4d0   :  { %v2638_v2 = vadd.f32 %v2637_v27, %v2636_v56  ;;  %v2732_v56 = vmul.f32 %v11181_v10, %v11581_v16  ;;  %v12204_v16 = vmul.f32 %v11181_v10, %v11123_v46  ;;  %v12224_v46 = vmul.f32 %v11181_v10, %v17598_v32  ;;  %v17603_v27 = vld [vmem:[#allocation56_spill] sm:$0xff] }
 0x4d1   :  { %v17607_v32 = vld [vmem:[#allocation60_spill] sm:$0xff] }
 0x4d2   :  { %v2639_v21 = vrot.slane %v2638_v2, 2 }
 0x4d4   :  { %v2640_v5 = vadd.f32 %v2639_v21, %v2638_v2  ;;  %v12244_v2 = vmul.f32 %v11181_v10, %v17603_v27  ;;  %v17604_v21 = vld [vmem:[#allocation57_spill] sm:$0xff]  ;;  %v12268_v27 = vmul.f32 %v11181_v10, %v17609_v1  ;;  %v17615_v1 = vld [vmem:[#allocation67_spill] sm:$0xff] }
 0x4d5   :  { %v12290_v20 = vmul.f32 %v11181_v10, %v17615_v1  ;;  %v17620_v1 = vld [vmem:[#allocation55_spill] sm:$0xff] }
 0x4d6   :  { %v2641_v24 = vrot.slane %v2640_v5, 1 }
 0x4d8   :  { %v2642_v6 = vadd.f32 %v2641_v24, %v2640_v5  ;;  %v2774_v24 = vmul.f32 %v11181_v10, %v11875_v47  ;;  %v12192_v5 = vmul.f32 %v11181_v10, %v11102_v22  ;;  %v12212_v22 = vmul.f32 %v11181_v10, %v11137_v39  ;;  %v17597_v47 = vld [vmem:[#allocation48_spill] sm:$0xff] }
 0x4d9   :  { %v12220_v28 = vmul.f32 %v11181_v10, %v17597_v47  ;;  %v12232_v39 = vmul.f32 %v11181_v10, %v17600_v63  ;;  %v12256_v47 = vmul.f32 %v11181_v10, %v17606_v44  ;;  %v17608_v63 = vld [vmem:[#allocation61_spill] sm:$0xff]  ;;  %v12276_v44 = vmul.f32 %v11181_v10, %v17611_v36  ;;  %v17617_v36 = vld [vmem:[#allocation8_spill] sm:$0xff] }
 0x4da   :  { %v2643_v53 = vmul.f32 0.000739645, %v2642_v6  ;;  %v12188_v6 = vmul.f32 %v11181_v10, %v11095_v11  ;;  %v12208_v11 = vmul.f32 %v11181_v10, %v11130_v34  ;;  %v12228_v34 = vmul.f32 %v11181_v10, %v17599_v59 }
 0x4db   :  { %v12260_v59 = vmul.f32 %v11181_v10, %v17607_v32  ;;  %v12264_v41 = vmul.f32 %v11181_v10, %v17608_v63  ;;  %v12280_v32 = vmul.f32 %v11181_v10, %v17612_v23  ;;  %v12284_v63 = vmul.f32 %v11181_v10, %v17613_v60  ;;  %v17618_v23 = vld [vmem:[#allocation9_spill] sm:$0xff] }
 0x4dc   :  { %v2817_v33 = vadd.f32 1e-05, %v2643_v53  ;;  %v12248_v53 = vmul.f32 %v11181_v10, %v17604_v21  ;;  %v17610_v21 = vld [vmem:[#allocation63_spill] sm:$0xff]  ;;  %v12298_v52 = vmul.f32 %v11181_v10, %v17617_v36  ;;  %v12302_v26 = vmul.f32 %v11181_v10, %v17618_v23 }
 0x4dd   :  { %v12315_v36 = vmul.f32 %v11181_v10, %v17623_v12  ;;  %v12319_v23 = vmul.f32 %v11181_v10, %v17625_v4  ;;  %v17632_v4 = vld [vmem:[#allocation15_spill] sm:$0xff] }
 0x4de   :  { %8597 = vrsqrt.f32 %v2817_v33  ;;  %v17605_v33 = vld [vmem:[#allocation58_spill] sm:$0xff]  ;;  %17619 = vst [vmem:[#allocation49_spill] sm:$0xff] %v12302_v26 }
 0x4df   :  { %v12252_v61 = vmul.f32 %v11181_v10, %v17605_v33  ;;  %v12272_v33 = vmul.f32 %v11181_v10, %v17610_v21  ;;  %v17616_v21 = vld [vmem:[#allocation7_spill] sm:$0xff]  ;;  %17624 = vst [vmem:[#allocation51_spill] sm:$0xff] %v12315_v36  ;;  %17626 = vst [vmem:[#allocation53_spill] sm:$0xff] %v12319_v23  ;;  %v17630_v36 = vld [vmem:[#allocation14_spill] sm:$0xff]  ;;  %v12341_v23 = vmul.f32 %v11181_v10, %v17632_v4 }
 0x4e0   :  { %v12294_v40 = vmul.f32 %v11181_v10, %v17616_v21  ;;  %v12311_v21 = vmul.f32 %v11181_v10, %v17621_v30  ;;  %v17637_v26 = vld [vmem:[#allocation18_spill] sm:$0xff] }
 0x4e1   :  { %17633 = vst [vmem:[#allocation58_spill] sm:$0xff] %v12341_v23  ;;  %v17641_v23 = vld [vmem:[#allocation20_spill] sm:$0xff] }
 0x4e2   :  { %17622 = vst [vmem:[#allocation50_spill] sm:$0xff] %v12311_v21  ;;  %v12337_v21 = vmul.f32 %v11181_v10, %v17630_v36  ;;  %v12355_v36 = vmul.f32 %v11181_v10, %v17637_v26 }
 0x4e4   :  { %17631 = vst [vmem:[#allocation57_spill] sm:$0xff] %v12337_v21  ;;  %17638 = vst [vmem:[#allocation60_spill] sm:$0xff] %v12355_v36  ;;  %v17639_v21 = vld [vmem:[#allocation19_spill] sm:$0xff] }
 0x4e5   :  { %v12359_v4 = vmul.f32 %v11181_v10, %v17639_v21  ;;  %v17648_v21 = vld [vmem:[#allocation23_spill] sm:$0xff] }
 0x4e7   :  { %17640 = vst [vmem:[#allocation61_spill] sm:$0xff] %v12359_v4  ;;  %v12380_v4 = vmul.f32 %v11181_v10, %v17648_v21  ;;  %v12400_v21 = vmul.f32 %v11181_v10, %v11560_v45 }
 0x4eb   :  { %v12286_v9 = vpop.eup %8597 }
 0x4ec   :  { %17614 = vst [vmem:[#allocation48_spill] sm:$0xff] %v12286_v9  ;;  %v2861_v60 = vmul.f32 %v12286_v9, %v2690_v35  ;;  %v2903_v38 = vmul.f32 %v12286_v9, %v2732_v56  ;;  %v2945_v50 = vmul.f32 %v12286_v9, %v2774_v24  ;;  %v2987_v48 = vmul.f32 %v12286_v9, %v17620_v1  ;;  %v17627_v35 = vld [vmem:[#allocation13_spill] sm:$0xff] }
 0x4ed   :  { %v12323_v56 = vmul.f32 %v11181_v10, %v17627_v35  ;;  %v17634_v35 = vld [vmem:[#allocation16_spill] sm:$0xff]  ;;  %v12421_v45 = vmul.f32 %v12286_v9, %v12196_v3  ;;  %v12442_v3 = vmul.f32 %v12286_v9, %v12216_v54  ;;  %v12465_v54 = vmul.f32 %v12286_v9, %v12236_v25 }
 0x4ee   :  { %v12326_v24 = vadd.f32 %v12178_v51, %v2861_v60  ;;  %v12329_v1 = vadd.f32 %v12178_v51, %v2903_v38  ;;  %v12332_v30 = vadd.f32 %v12178_v51, %v2945_v50  ;;  %v3160_v12 = vadd.f32 %v12178_v51, %v2987_v48  ;;  %v17645_v50 = vld [vmem:[#allocation22_spill] sm:$0xff] }
 0x4ef   :  { %17628 = vst [vmem:[#allocation54_spill] sm:$0xff] %v12323_v56  ;;  %v12345_v60 = vmul.f32 %v11181_v10, %v17634_v35  ;;  %v17636_v56 = vld [vmem:[#allocation17_spill] sm:$0xff]  ;;  %v12363_v35 = vmul.f32 %v11181_v10, %v17641_v23  ;;  %v12371_v48 = vmul.f32 %v11181_v10, %v17645_v50  ;;  %v17649_v23 = vld [vmem:[#allocation24_spill] sm:$0xff]  ;;  %v12392_v50 = vmul.f32 %v11181_v10, %v11546_v14 }
 0x4f0   :  { %17629 = vst [vmem:[#allocation56_spill] sm:$0xff] %v12329_v1  ;;  %v12349_v38 = vmul.f32 %v11181_v10, %v17636_v56  ;;  %v3329_v51 = vmax.f32 %v3160_v12, 0.0  ;;  %v17646_v26 = vmax.f32 %v12329_v1, 0.0  ;;  %v17653_v12 = vld [vmem:[#allocation26_spill] sm:$0xff]  ;;  %v17654_v1 = vmax.f32 %v12326_v24, 0.0  ;;  %17660 = vst [vmem:[#allocation55_spill] sm:$0xff] %v12421_v45 }
 0x4f1   :  { %17635 = vst [vmem:[#allocation59_spill] sm:$0xff] %v12345_v60  ;;  %17642 = vst [vmem:[#allocation62_spill] sm:$0xff] %v12363_v35  ;;  %v17643_v60 = vld [vmem:[#allocation21_spill] sm:$0xff]  ;;  %v12384_v35 = vmul.f32 %v11181_v10, %v17649_v23  ;;  %v12413_v14 = vmul.f32 %v12286_v9, %v12188_v6  ;;  %v12434_v6 = vmul.f32 %v12286_v9, %v12208_v11 }
 0x4f2   :  { %v12367_v56 = vmul.f32 %v11181_v10, %v17643_v60  ;;  %v12376_v36 = vrot.slane %v17646_v26, 2  ;;  %v17651_v60 = vld [vmem:[#allocation25_spill] sm:$0xff]  ;;  %v12396_v26 = vmul.f32 %v11181_v10, %v17653_v12  ;;  %v12417_v12 = vmul.f32 %v12286_v9, %v12192_v5  ;;  %17665 = vst [vmem:[#allocation14_spill] sm:$0xff] %v12442_v3  ;;  %17671 = vst [vmem:[#allocation20_spill] sm:$0xff] %v12465_v54 }
 0x4f3   :  { %17650 = vst [vmem:[#allocation65_spill] sm:$0xff] %v12384_v35  ;;  %v17655_v35 = vmax.f32 %v12332_v30, 0.0  ;;  %17658 = vst [vmem:[#allocation8_spill] sm:$0xff] %v12413_v14  ;;  %v12438_v5 = vmul.f32 %v12286_v9, %v12212_v22  ;;  %v12454_v11 = vmul.f32 %v12286_v9, %v12228_v34  ;;  %v12458_v22 = vmul.f32 %v12286_v9, %v12232_v39  ;;  %v17849_v54 = vld [vmem:[#allocation85_spill] sm:$0xff]  ;;  %v17866_v14 = vld [vmem:[#allocation103_spill] sm:$0xff] }
 0x4f4   :  { %17644 = vst [vmem:[#allocation63_spill] sm:$0xff] %v12367_v56  ;;  %17647 = vst [vmem:[#allocation64_spill] sm:$0xff] %v12376_v36  ;;  %v12388_v56 = vmul.f32 %v11181_v10, %v17651_v60  ;;  %v3544_v23 = vadd.f32 %v12376_v36, %v17654_v1  ;;  %v12425_v1 = vmul.f32 %v12286_v9, %v12200_v0  ;;  %v17691_v36 = vld [vmem:[#allocation50_spill] sm:$0xff]  ;;  %v17854_v3 = vld [vmem:[#allocation89_spill] sm:$0xff] }
 0x4f5   :  { %v12407_v60 = vrot.slane %v17655_v35, 4  ;;  %17659 = vst [vmem:[#allocation9_spill] sm:$0xff] %v12417_v12  ;;  %17663 = vst [vmem:[#allocation12_spill] sm:$0xff] %v12434_v6  ;;  %v12446_v0 = vmul.f32 %v12286_v9, %v12220_v28  ;;  %v12469_v28 = vmul.f32 %v12286_v9, %v12240_v29  ;;  %v12477_v34 = vmul.f32 %v12286_v9, %v12248_v53  ;;  %v17856_v6 = vld [vmem:[#allocation98_spill] sm:$0xff]  ;;  %v17862_v45 = vld [vmem:[#allocation101_spill] sm:$0xff] }
 0x4f6   :  { %17652 = vst [vmem:[#allocation66_spill] sm:$0xff] %v12388_v56  ;;  %v12409_v56 = vrot.slane %v3329_v51, 6  ;;  %17661 = vst [vmem:[#allocation10_spill] sm:$0xff] %v12425_v1  ;;  %v12429_v51 = vmul.f32 %v12286_v9, %v12204_v16  ;;  %v12450_v16 = vmul.f32 %v12286_v9, %v12224_v46  ;;  %v12473_v46 = vmul.f32 %v12286_v9, %v12244_v2  ;;  %v17860_v1 = vld [vmem:[#allocation100_spill] sm:$0xff]  ;;  %v17864_v12 = vld [vmem:[#allocation102_spill] sm:$0xff] }
 0x4f7   :  { %17656 = vst [vmem:[#allocation67_spill] sm:$0xff] %v12407_v60  ;;  %v3758_v35 = vadd.f32 %v12407_v60, %v3544_v23  ;;  %17664 = vst [vmem:[#allocation13_spill] sm:$0xff] %v12438_v5  ;;  %v12481_v39 = vmul.f32 %v12286_v9, %v12252_v61  ;;  %v12485_v25 = vmul.f32 %v12286_v9, %v12256_v47  ;;  %v17855_v5 = vld [vmem:[#allocation139_spill] sm:$0xff] }
 0x4f8   :  { %17657 = vst [vmem:[#allocation7_spill] sm:$0xff] %v12409_v56  ;;  %17662 = vst [vmem:[#allocation11_spill] sm:$0xff] %v12429_v51  ;;  %v12489_v29 = vmul.f32 %v12286_v9, %v12260_v59  ;;  %v12499_v53 = vmul.f32 %v12286_v9, %v12268_v27  ;;  %v12503_v61 = vmul.f32 %v12286_v9, %v12272_v33  ;;  %v17858_v51 = vld [vmem:[#allocation99_spill] sm:$0xff] }
 0x4f9   :  { %17666 = vst [vmem:[#allocation15_spill] sm:$0xff] %v12446_v0  ;;  %17667 = vst [vmem:[#allocation16_spill] sm:$0xff] %v12450_v16  ;;  %v12461_v23 = vadd.f32 %v12409_v56, %v3758_v35  ;;  %v17678_v35 = vld [vmem:[#allocation27_spill] sm:$0xff]  ;;  %v12495_v56 = vmul.f32 %v12286_v9, %v12264_v41  ;;  %v12507_v47 = vmul.f32 %v12286_v9, %v12276_v44  ;;  %v17852_v16 = vld [vmem:[#allocation88_spill] sm:$0xff] }
 0x4fa   :  { %17668 = vst [vmem:[#allocation17_spill] sm:$0xff] %v12454_v11  ;;  %17669 = vst [vmem:[#allocation18_spill] sm:$0xff] %v12458_v22  ;;  %v2730_v2 = vmul.f32 %v11181_v10, %v17678_v35  ;;  %v12511_v59 = vmul.f32 %v12286_v9, %v12280_v32  ;;  %v12515_v41 = vmul.f32 %v12286_v9, %v12284_v63  ;;  %v17686_v35 = vld [vmem:[#allocation28_spill] sm:$0xff]  ;;  %v17850_v22 = vld [vmem:[#allocation86_spill] sm:$0xff] }
 0x4fb   :  { %17670 = vst [vmem:[#allocation19_spill] sm:$0xff] %v12461_v23  ;;  %17672 = vst [vmem:[#allocation21_spill] sm:$0xff] %v12469_v28  ;;  %v12519_v27 = vmul.f32 %v12286_v9, %v12290_v20  ;;  %v2731_v33 = vmul.f32 %v11181_v10, %v17686_v35  ;;  %v2750_v23 = vmul.f32 %v11181_v10, %v11707_v15  ;;  %v17848_v28 = vld [vmem:[#allocation84_spill] sm:$0xff]  ;;  %v17851_v11 = vld [vmem:[#allocation87_spill] sm:$0xff] }
 0x4fc   :  { %17673 = vst [vmem:[#allocation22_spill] sm:$0xff] %v12473_v46  ;;  %17674 = vst [vmem:[#allocation23_spill] sm:$0xff] %v12477_v34  ;;  %v2751_v44 = vmul.f32 %v11181_v10, %v11714_v55  ;;  %v2752_v32 = vmul.f32 %v11181_v10, %v11721_v37  ;;  %v2753_v63 = vmul.f32 %v11181_v10, %v11728_v42  ;;  %v17846_v34 = vld [vmem:[#allocation41_spill] sm:$0xff]  ;;  %v17847_v46 = vld [vmem:[#allocation83_spill] sm:$0xff] }
 0x4fd   :  { %17675 = vst [vmem:[#allocation24_spill] sm:$0xff] %v12481_v39  ;;  %17676 = vst [vmem:[#allocation25_spill] sm:$0xff] %v12485_v25  ;;  %v2754_v60 = vmul.f32 %v11181_v10, %v11735_v62  ;;  %v2755_v20 = vmul.f32 %v11181_v10, %v11742_v58  ;;  %v2756_v35 = vmul.f32 %v11181_v10, %v11749_v13  ;;  %v17844_v25 = vld [vmem:[#allocation35_spill] sm:$0xff]  ;;  %v17845_v39 = vld [vmem:[#allocation37_spill] sm:$0xff] }
 0x4fe   :  { %17677 = vst [vmem:[#allocation26_spill] sm:$0xff] %v12489_v29  ;;  %17679 = vst [vmem:[#allocation27_spill] sm:$0xff] %v12495_v56  ;;  %v2757_v15 = vmul.f32 %v11181_v10, %v11756_v7  ;;  %v2758_v55 = vmul.f32 %v11181_v10, %v11763_v17  ;;  %v2759_v37 = vmul.f32 %v11181_v10, %v11770_v19  ;;  %v17842_v56 = vld [vmem:[#allocation32_spill] sm:$0xff]  ;;  %v17843_v29 = vld [vmem:[#allocation33_spill] sm:$0xff] }
 0x4ff   :  { %17680 = vst [vmem:[#allocation148_spill] sm:$0xff] %v12499_v53  ;;  %17681 = vst [vmem:[#allocation149_spill] sm:$0xff] %v12503_v61  ;;  %v2760_v42 = vmul.f32 %v11181_v10, %v11777_v8  ;;  %v2761_v62 = vmul.f32 %v11181_v10, %v11784_v31  ;;  %v2762_v58 = vmul.f32 %v11181_v10, %v11791_v49  ;;  %v17689_v31 = vld [vmem:[#allocation49_spill] sm:$0xff]  ;;  %v17740_v61 = vld [vmem:[#allocation116_spill] sm:$0xff] }
 0x500   :  { %17682 = vst [vmem:[#allocation150_spill] sm:$0xff] %v12507_v47  ;;  %17683 = vst [vmem:[#allocation151_spill] sm:$0xff] %v12511_v59  ;;  %v2763_v13 = vmul.f32 %v11181_v10, %v11798_v43  ;;  %v2764_v7 = vmul.f32 %v11181_v10, %v11805_v18  ;;  %v2765_v17 = vmul.f32 %v11181_v10, %v11812_v57  ;;  %v17693_v18 = vld [vmem:[#allocation51_spill] sm:$0xff]  ;;  %v17695_v57 = vld [vmem:[#allocation53_spill] sm:$0xff] }
 0x501   :  { %17684 = vst [vmem:[#allocation152_spill] sm:$0xff] %v12515_v41  ;;  %17685 = vst [vmem:[#allocation153_spill] sm:$0xff] %v12519_v27  ;;  %v12557_v19 = vmul.f32 %v12286_v9, %v12294_v40  ;;  %v12561_v8 = vmul.f32 %v12286_v9, %v12298_v52  ;;  %v12565_v49 = vmul.f32 %v12286_v9, %v17689_v31  ;;  %v17737_v41 = vld [vmem:[#allocation114_spill] sm:$0xff]  ;;  %v17738_v59 = vld [vmem:[#allocation115_spill] sm:$0xff] }
 0x502   :  { %v12569_v43 = vmul.f32 %v12286_v9, %v17691_v36  ;;  %v12573_v27 = vmul.f32 %v12286_v9, %v17693_v18  ;;  %v12577_v40 = vmul.f32 %v12286_v9, %v17695_v57  ;;  %v12597_v57 = vmul.f32 %v12286_v9, %v12349_v38  ;;  %v17739_v47 = vld [vmem:[#allocation144_spill] sm:$0xff]  ;;  %v17741_v53 = vld [vmem:[#allocation145_spill] sm:$0xff]  ;;  %v17853_v0 = vld [vmem:[#allocation138_spill] sm:$0xff] }
 0x503   :  { %17687 = vst [vmem:[#allocation28_spill] sm:$0xff] %v12557_v19  ;;  %17688 = vst [vmem:[#allocation154_spill] sm:$0xff] %v12561_v8  ;;  %v17697_v19 = vld [vmem:[#allocation54_spill] sm:$0xff]  ;;  %v17699_v8 = vld [vmem:[#allocation57_spill] sm:$0xff]  ;;  %v12617_v38 = vmul.f32 %v12286_v9, %v12371_v48  ;;  %v12637_v48 = vmul.f32 %v12286_v9, %v12396_v26 }
 0x504   :  { %17690 = vst [vmem:[#allocation49_spill] sm:$0xff] %v12565_v49  ;;  %17692 = vst [vmem:[#allocation50_spill] sm:$0xff] %v12569_v43  ;;  %v12581_v52 = vmul.f32 %v12286_v9, %v17697_v19  ;;  %v12585_v31 = vmul.f32 %v12286_v9, %v17699_v8  ;;  %v17701_v49 = vld [vmem:[#allocation58_spill] sm:$0xff]  ;;  %v17703_v43 = vld [vmem:[#allocation59_spill] sm:$0xff] }
 0x505   :  { %17694 = vst [vmem:[#allocation51_spill] sm:$0xff] %v12573_v27  ;;  %17696 = vst [vmem:[#allocation53_spill] sm:$0xff] %v12577_v40  ;;  %v12589_v36 = vmul.f32 %v12286_v9, %v17701_v49  ;;  %v12593_v18 = vmul.f32 %v12286_v9, %v17703_v43  ;;  %v17706_v40 = vld [vmem:[#allocation60_spill] sm:$0xff]  ;;  %v17728_v26 = vld [vmem:[#allocation93_spill] sm:$0xff] }
 0x506   :  { %17698 = vst [vmem:[#allocation54_spill] sm:$0xff] %v12581_v52  ;;  %17700 = vst [vmem:[#allocation57_spill] sm:$0xff] %v12585_v31  ;;  %v12601_v19 = vmul.f32 %v12286_v9, %v17706_v40  ;;  %v17708_v52 = vld [vmem:[#allocation61_spill] sm:$0xff]  ;;  %v17710_v31 = vld [vmem:[#allocation62_spill] sm:$0xff]  ;;  %v12621_v40 = vmul.f32 %v12286_v9, %v12380_v4  ;;  %v12641_v4 = vmul.f32 %v12286_v9, %v12400_v21 }
 0x507   :  { %17702 = vst [vmem:[#allocation58_spill] sm:$0xff] %v12589_v36  ;;  %17704 = vst [vmem:[#allocation59_spill] sm:$0xff] %v12593_v18  ;;  %v12605_v8 = vmul.f32 %v12286_v9, %v17708_v52  ;;  %v12609_v49 = vmul.f32 %v12286_v9, %v17710_v31  ;;  %v17712_v36 = vld [vmem:[#allocation63_spill] sm:$0xff]  ;;  %v17729_v21 = vld [vmem:[#allocation94_spill] sm:$0xff] }
 0x508   :  { %17705 = vst [vmem:[#allocation155_spill] sm:$0xff] %v12597_v57  ;;  %17707 = vst [vmem:[#allocation60_spill] sm:$0xff] %v12601_v19  ;;  %v12613_v43 = vmul.f32 %v12286_v9, %v17712_v36  ;;  %v17716_v19 = vld [vmem:[#allocation65_spill] sm:$0xff]  ;;  %v12633_v36 = vmul.f32 %v12286_v9, %v12392_v50  ;;  %v17733_v57 = vld [vmem:[#allocation142_spill] sm:$0xff] }
 0x509   :  { %17709 = vst [vmem:[#allocation61_spill] sm:$0xff] %v12605_v8  ;;  %17711 = vst [vmem:[#allocation62_spill] sm:$0xff] %v12609_v49  ;;  %v12625_v52 = vmul.f32 %v12286_v9, %v17716_v19  ;;  %v17718_v8 = vld [vmem:[#allocation66_spill] sm:$0xff]  ;;  %v17732_v49 = vld [vmem:[#allocation97_spill] sm:$0xff] }
 0x50a   :  { %17713 = vst [vmem:[#allocation63_spill] sm:$0xff] %v12613_v43  ;;  %17714 = vst [vmem:[#allocation156_spill] sm:$0xff] %v12617_v38  ;;  %v12629_v31 = vmul.f32 %v12286_v9, %v17718_v8  ;;  %v17724_v19 = vld [vmem:[#allocation90_spill] sm:$0xff]  ;;  %v17725_v8 = vld [vmem:[#allocation91_spill] sm:$0xff] }
 0x50b   :  { %17715 = vst [vmem:[#allocation157_spill] sm:$0xff] %v12621_v40  ;;  %17717 = vst [vmem:[#allocation65_spill] sm:$0xff] %v12625_v52  ;;  %v12644_v40 = vmul.f32 %v12286_v9, %v2730_v2  ;;  %v2766_v52 = vmul.f32 %v11181_v10, %v17724_v19  ;;  %v17726_v38 = vld [vmem:[#allocation92_spill] sm:$0xff]  ;;  %v17730_v2 = vld [vmem:[#allocation95_spill] sm:$0xff] }
 0x50c   :  { %17719 = vst [vmem:[#allocation66_spill] sm:$0xff] %v12629_v31  ;;  %17720 = vst [vmem:[#allocation158_spill] sm:$0xff] %v12633_v36  ;;  %v2767_v31 = vmul.f32 %v11181_v10, %v17725_v8  ;;  %v2768_v50 = vmul.f32 %v11181_v10, %v17726_v38  ;;  %v12653_v36 = vmul.f32 %v12286_v9, %v2731_v33  ;;  %v17731_v43 = vld [vmem:[#allocation96_spill] sm:$0xff]  ;;  %v17735_v18 = vld [vmem:[#allocation143_spill] sm:$0xff] }
 0x50d   :  { %17721 = vst [vmem:[#allocation159_spill] sm:$0xff] %v12637_v48  ;;  %17722 = vst [vmem:[#allocation160_spill] sm:$0xff] %v12641_v4  ;;  %v2769_v48 = vmul.f32 %v11181_v10, %v17728_v26  ;;  %v2770_v4 = vmul.f32 %v11181_v10, %v17729_v21  ;;  %v2772_v19 = vmul.f32 %v11181_v10, %v17731_v43  ;;  %v17734_v33 = vld [vmem:[#allocation112_spill] sm:$0xff]  ;;  %v17736_v27 = vld [vmem:[#allocation113_spill] sm:$0xff] }
 0x50e   :  { %17723 = vst [vmem:[#allocation161_spill] sm:$0xff] %v12644_v40  ;;  %17727 = vst [vmem:[#allocation90_spill] sm:$0xff] %v12653_v36  ;;  %v2771_v40 = vmul.f32 %v11181_v10, %v17730_v2  ;;  %v2773_v8 = vmul.f32 %v11181_v10, %v17732_v49  ;;  %v2791_v38 = vmul.f32 %v11181_v10, %v17733_v57 }
 0x50f   :  { %v2792_v36 = vmul.f32 %v11181_v10, %v17734_v33  ;;  %v2793_v26 = vmul.f32 %v11181_v10, %v17735_v18  ;;  %v2794_v21 = vmul.f32 %v11181_v10, %v17736_v27  ;;  %v2795_v2 = vmul.f32 %v11181_v10, %v17737_v41 }
 0x510   :  { %v2796_v43 = vmul.f32 %v11181_v10, %v17738_v59  ;;  %v2797_v49 = vmul.f32 %v11181_v10, %v17739_v47  ;;  %v2798_v57 = vmul.f32 %v11181_v10, %v17740_v61  ;;  %v2799_v33 = vmul.f32 %v11181_v10, %v17741_v53 }
 0x511   :  { %v12684_v18 = vmul.f32 %v12286_v9, %v2750_v23  ;;  %v12687_v27 = vmul.f32 %v12286_v9, %v2751_v44  ;;  %v12690_v41 = vmul.f32 %v12286_v9, %v2752_v32  ;;  %v12693_v59 = vmul.f32 %v12286_v9, %v2753_v63 }
 0x512   :  { %v12696_v47 = vmul.f32 %v12286_v9, %v2754_v60  ;;  %v12699_v61 = vmul.f32 %v12286_v9, %v2755_v20  ;;  %v12702_v53 = vmul.f32 %v12286_v9, %v2756_v35  ;;  %v12705_v23 = vmul.f32 %v12286_v9, %v2757_v15 }
 0x513   :  { %17742 = vst [vmem:[#allocation91_spill] sm:$0xff] %v12684_v18  ;;  %17743 = vst [vmem:[#allocation92_spill] sm:$0xff] %v12687_v27  ;;  %v12708_v44 = vmul.f32 %v12286_v9, %v2758_v55  ;;  %v12711_v32 = vmul.f32 %v12286_v9, %v2759_v37  ;;  %v12714_v63 = vmul.f32 %v12286_v9, %v2760_v42  ;;  %v17840_v27 = vld [vmem:[#allocation30_spill] sm:$0xff]  ;;  %v17841_v18 = vld [vmem:[#allocation31_spill] sm:$0xff] }
 0x514   :  { %17744 = vst [vmem:[#allocation93_spill] sm:$0xff] %v12690_v41  ;;  %17745 = vst [vmem:[#allocation94_spill] sm:$0xff] %v12693_v59  ;;  %v12717_v60 = vmul.f32 %v12286_v9, %v2761_v62  ;;  %v12720_v20 = vmul.f32 %v12286_v9, %v2762_v58  ;;  %v12723_v35 = vmul.f32 %v12286_v9, %v2763_v13  ;;  %v17838_v59 = vld [vmem:[#allocation6_spill] sm:$0xff]  ;;  %v17839_v41 = vld [vmem:[#allocation29_spill] sm:$0xff] }
 0x515   :  { %17746 = vst [vmem:[#allocation95_spill] sm:$0xff] %v12696_v47  ;;  %17747 = vst [vmem:[#allocation96_spill] sm:$0xff] %v12699_v61  ;;  %v12726_v15 = vmul.f32 %v12286_v9, %v2764_v7  ;;  %v12729_v55 = vmul.f32 %v12286_v9, %v2765_v17  ;;  %v12732_v37 = vmul.f32 %v12286_v9, %v2766_v52  ;;  %v17764_v17 = vld [vmem:[#allocation117_spill] sm:$0xff]  ;;  %v17765_v52 = vld [vmem:[#allocation146_spill] sm:$0xff] }
 0x516   :  { %17748 = vst [vmem:[#allocation97_spill] sm:$0xff] %v12702_v53  ;;  %17749 = vst [vmem:[#allocation142_spill] sm:$0xff] %v12705_v23  ;;  %v12735_v42 = vmul.f32 %v12286_v9, %v2767_v31  ;;  %v12738_v62 = vmul.f32 %v12286_v9, %v2768_v50  ;;  %v12741_v58 = vmul.f32 %v12286_v9, %v2769_v48  ;;  %v17768_v48 = vld [vmem:[#allocation118_spill] sm:$0xff]  ;;  %v17834_v23 = vld [vmem:[#allocation80_spill] sm:$0xff] }
 0x517   :  { %17750 = vst [vmem:[#allocation112_spill] sm:$0xff] %v12708_v44  ;;  %17751 = vst [vmem:[#allocation143_spill] sm:$0xff] %v12711_v32  ;;  %v12744_v13 = vmul.f32 %v12286_v9, %v2770_v4  ;;  %v12747_v7 = vmul.f32 %v12286_v9, %v2771_v40  ;;  %v12754_v31 = vmul.f32 %v12286_v9, %v2772_v19  ;;  %v17769_v4 = vld [vmem:[#allocation119_spill] sm:$0xff]  ;;  %v17770_v40 = vld [vmem:[#allocation120_spill] sm:$0xff] }
 0x518   :  { %17752 = vst [vmem:[#allocation113_spill] sm:$0xff] %v12714_v63  ;;  %17753 = vst [vmem:[#allocation114_spill] sm:$0xff] %v12717_v60  ;;  %v12757_v50 = vmul.f32 %v12286_v9, %v2773_v8  ;;  %v17773_v19 = vld [vmem:[#allocation123_spill] sm:$0xff]  ;;  %v17774_v8 = vld [vmem:[#allocation124_spill] sm:$0xff] }
 0x519   :  { %17754 = vst [vmem:[#allocation115_spill] sm:$0xff] %v12720_v20  ;;  %17755 = vst [vmem:[#allocation144_spill] sm:$0xff] %v12723_v35  ;;  %v17776_v35 = vld [vmem:[#allocation126_spill] sm:$0xff]  ;;  %v17777_v20 = vld [vmem:[#allocation127_spill] sm:$0xff] }
 0x51a   :  { %17756 = vst [vmem:[#allocation116_spill] sm:$0xff] %v12726_v15  ;;  %17757 = vst [vmem:[#allocation145_spill] sm:$0xff] %v12729_v55  ;;  %v2800_v55 = vmul.f32 %v11181_v10, %v17764_v17  ;;  %v17775_v15 = vld [vmem:[#allocation125_spill] sm:$0xff]  ;;  %v17778_v60 = vld [vmem:[#allocation128_spill] sm:$0xff] }
 0x51b   :  { %17758 = vst [vmem:[#allocation162_spill] sm:$0xff] %v12732_v37  ;;  %17759 = vst [vmem:[#allocation163_spill] sm:$0xff] %v12735_v42  ;;  %v2801_v37 = vmul.f32 %v11181_v10, %v17765_v52  ;;  %v17772_v42 = vld [vmem:[#allocation122_spill] sm:$0xff]  ;;  %v17779_v63 = vld [vmem:[#allocation129_spill] sm:$0xff] }
 0x51c   :  { %17760 = vst [vmem:[#allocation164_spill] sm:$0xff] %v12738_v62  ;;  %17761 = vst [vmem:[#allocation165_spill] sm:$0xff] %v12741_v58  ;;  %v2802_v58 = vmul.f32 %v11181_v10, %v17768_v48  ;;  %v17771_v62 = vld [vmem:[#allocation121_spill] sm:$0xff]  ;;  %v2806_v52 = vmul.f32 %v11181_v10, %v17772_v42  ;;  %v2809_v48 = vmul.f32 %v11181_v10, %v17775_v15  ;;  %v17780_v32 = vld [vmem:[#allocation130_spill] sm:$0xff] }
 0x51d   :  { %17762 = vst [vmem:[#allocation166_spill] sm:$0xff] %v12744_v13  ;;  %17763 = vst [vmem:[#allocation167_spill] sm:$0xff] %v12747_v7  ;;  %v2803_v13 = vmul.f32 %v11181_v10, %v17769_v4  ;;  %v2804_v7 = vmul.f32 %v11181_v10, %v17770_v40  ;;  %v2805_v17 = vmul.f32 %v11181_v10, %v17771_v62  ;;  %v17781_v44 = vld [vmem:[#allocation131_spill] sm:$0xff]  ;;  %v17835_v53 = vld [vmem:[#allocation81_spill] sm:$0xff] }
 0x51e   :  { %17766 = vst [vmem:[#allocation117_spill] sm:$0xff] %v12754_v31  ;;  %17767 = vst [vmem:[#allocation146_spill] sm:$0xff] %v12757_v50  ;;  %v2807_v31 = vmul.f32 %v11181_v10, %v17773_v19  ;;  %v2808_v50 = vmul.f32 %v11181_v10, %v17774_v8  ;;  %v2810_v4 = vmul.f32 %v11181_v10, %v17776_v35  ;;  %v17836_v61 = vld [vmem:[#allocation82_spill] sm:$0xff]  ;;  %v17837_v47 = vld [vmem:[#allocation5_spill] sm:$0xff] }
 0x51f   :  { %v2811_v40 = vmul.f32 %v11181_v10, %v17777_v20  ;;  %v2812_v62 = vmul.f32 %v11181_v10, %v17778_v60  ;;  %v2813_v42 = vmul.f32 %v11181_v10, %v17779_v63  ;;  %v2814_v19 = vmul.f32 %v11181_v10, %v17780_v32 }
 0x520   :  { %v2815_v8 = vmul.f32 %v11181_v10, %v17781_v44  ;;  %v12788_v15 = vmul.f32 %v12286_v9, %v2791_v38  ;;  %v12791_v35 = vmul.f32 %v12286_v9, %v2792_v36  ;;  %v12794_v20 = vmul.f32 %v12286_v9, %v2793_v26 }
 0x521   :  { %v12797_v60 = vmul.f32 %v12286_v9, %v2794_v21  ;;  %v12800_v63 = vmul.f32 %v12286_v9, %v2795_v2  ;;  %v12803_v32 = vmul.f32 %v12286_v9, %v2796_v43  ;;  %v12806_v44 = vmul.f32 %v12286_v9, %v2797_v49 }
 0x522   :  { %17782 = vst [vmem:[#allocation118_spill] sm:$0xff] %v12788_v15  ;;  %17783 = vst [vmem:[#allocation119_spill] sm:$0xff] %v12791_v35  ;;  %v12809_v38 = vmul.f32 %v12286_v9, %v2798_v57  ;;  %v12812_v36 = vmul.f32 %v12286_v9, %v2799_v33  ;;  %v12815_v26 = vmul.f32 %v12286_v9, %v2800_v55  ;;  %v17832_v35 = vld [vmem:[#allocation78_spill] sm:$0xff]  ;;  %v17833_v15 = vld [vmem:[#allocation79_spill] sm:$0xff] }
 0x523   :  { %17784 = vst [vmem:[#allocation120_spill] sm:$0xff] %v12794_v20  ;;  %17785 = vst [vmem:[#allocation121_spill] sm:$0xff] %v12797_v60  ;;  %v12818_v21 = vmul.f32 %v12286_v9, %v2801_v37  ;;  %v12821_v2 = vmul.f32 %v12286_v9, %v2802_v58  ;;  %v12824_v43 = vmul.f32 %v12286_v9, %v2803_v13  ;;  %v17830_v60 = vld [vmem:[#allocation76_spill] sm:$0xff]  ;;  %v17831_v20 = vld [vmem:[#allocation77_spill] sm:$0xff] }
 0x524   :  { %17786 = vst [vmem:[#allocation122_spill] sm:$0xff] %v12800_v63  ;;  %17787 = vst [vmem:[#allocation123_spill] sm:$0xff] %v12803_v32  ;;  %v12827_v49 = vmul.f32 %v12286_v9, %v2804_v7  ;;  %v12830_v57 = vmul.f32 %v12286_v9, %v2805_v17  ;;  %v12833_v33 = vmul.f32 %v12286_v9, %v2806_v52  ;;  %v17828_v32 = vld [vmem:[#allocation74_spill] sm:$0xff]  ;;  %v17829_v63 = vld [vmem:[#allocation75_spill] sm:$0xff] }
 0x525   :  { %17788 = vst [vmem:[#allocation124_spill] sm:$0xff] %v12806_v44  ;;  %17789 = vst [vmem:[#allocation125_spill] sm:$0xff] %v12809_v38  ;;  %v12836_v55 = vmul.f32 %v12286_v9, %v2807_v31  ;;  %v12839_v37 = vmul.f32 %v12286_v9, %v2808_v50  ;;  %v12842_v58 = vmul.f32 %v12286_v9, %v2809_v48  ;;  %v17807_v48 = vld [vmem:[#allocation38_spill] sm:$0xff]  ;;  %v17826_v38 = vld [vmem:[#allocation72_spill] sm:$0xff] }
 0x526   :  { %17790 = vst [vmem:[#allocation126_spill] sm:$0xff] %v12812_v36  ;;  %17791 = vst [vmem:[#allocation127_spill] sm:$0xff] %v12815_v26  ;;  %v12845_v13 = vmul.f32 %v12286_v9, %v2810_v4  ;;  %v12848_v7 = vmul.f32 %v12286_v9, %v2811_v40  ;;  %v12851_v17 = vmul.f32 %v12286_v9, %v2812_v62  ;;  %v17808_v4 = vld [vmem:[#allocation36_spill] sm:$0xff]  ;;  %v17824_v26 = vld [vmem:[#allocation70_spill] sm:$0xff] }
 0x527   :  { %17792 = vst [vmem:[#allocation128_spill] sm:$0xff] %v12818_v21  ;;  %17793 = vst [vmem:[#allocation129_spill] sm:$0xff] %v12821_v2  ;;  %v12854_v52 = vmul.f32 %v12286_v9, %v2813_v42  ;;  %v12857_v31 = vmul.f32 %v12286_v9, %v2814_v19  ;;  %v12860_v50 = vmul.f32 %v12286_v9, %v2815_v8  ;;  %v17810_v42 = vld [vmem:[#allocation40_spill] sm:$0xff]  ;;  %v17811_v19 = vld [vmem:[#allocation42_spill] sm:$0xff] }
 0x528   :  { %17794 = vst [vmem:[#allocation130_spill] sm:$0xff] %v12824_v43  ;;  %17795 = vst [vmem:[#allocation131_spill] sm:$0xff] %v12827_v49  ;;  %v12868_v40 = vmul.f32 %v11181_v10, %v17808_v4  ;;  %v12880_v8 = vmul.f32 %v11181_v10, %v17811_v19  ;;  %v17820_v49 = vld [vmem:[#allocation136_spill] sm:$0xff]  ;;  %v17821_v43 = vld [vmem:[#allocation47_spill] sm:$0xff] }
 0x529   :  { %17796 = vst [vmem:[#allocation168_spill] sm:$0xff] %v12830_v57  ;;  %17797 = vst [vmem:[#allocation169_spill] sm:$0xff] %v12833_v33  ;;  %v17818_v33 = vld [vmem:[#allocation135_spill] sm:$0xff]  ;;  %v17819_v57 = vld [vmem:[#allocation46_spill] sm:$0xff] }
 0x52a   :  { %17798 = vst [vmem:[#allocation170_spill] sm:$0xff] %v12836_v55  ;;  %17799 = vst [vmem:[#allocation171_spill] sm:$0xff] %v12839_v37  ;;  %v17816_v37 = vld [vmem:[#allocation134_spill] sm:$0xff]  ;;  %v17817_v55 = vld [vmem:[#allocation45_spill] sm:$0xff] }
 0x52b   :  { %17800 = vst [vmem:[#allocation172_spill] sm:$0xff] %v12842_v58  ;;  %17801 = vst [vmem:[#allocation173_spill] sm:$0xff] %v12845_v13  ;;  %v12864_v58 = vmul.f32 %v11181_v10, %v17807_v48  ;;  %v17815_v13 = vld [vmem:[#allocation44_spill] sm:$0xff]  ;;  %v12900_v19 = vmul.f32 %v11181_v10, %v17816_v37  ;;  %v12920_v37 = vmul.f32 %v11181_v10, %v17821_v43  ;;  %v17823_v21 = vld [vmem:[#allocation69_spill] sm:$0xff] }
 0x52c   :  { %17802 = vst [vmem:[#allocation174_spill] sm:$0xff] %v12848_v7  ;;  %17803 = vst [vmem:[#allocation175_spill] sm:$0xff] %v12851_v17  ;;  %v17809_v7 = vld [vmem:[#allocation39_spill] sm:$0xff]  ;;  %v17814_v17 = vld [vmem:[#allocation133_spill] sm:$0xff]  ;;  %v12940_v43 = vmul.f32 %v11181_v10, %v17826_v38  ;;  %v12960_v38 = vmul.f32 %v11181_v10, %v17831_v20  ;;  %v12980_v20 = vmul.f32 %v11181_v10, %v17836_v61 }
 0x52d   :  { %17804 = vst [vmem:[#allocation176_spill] sm:$0xff] %v12854_v52  ;;  %17805 = vst [vmem:[#allocation177_spill] sm:$0xff] %v12857_v31  ;;  %v12872_v62 = vmul.f32 %v11181_v10, %v17809_v7  ;;  %v12876_v52 = vmul.f32 %v11181_v10, %v17810_v42  ;;  %v17813_v31 = vld [vmem:[#allocation43_spill] sm:$0xff]  ;;  %v12892_v7 = vmul.f32 %v11181_v10, %v17814_v17  ;;  %v17822_v2 = vld [vmem:[#allocation68_spill] sm:$0xff] }
 0x52e   :  { %17806 = vst [vmem:[#allocation178_spill] sm:$0xff] %v12860_v50  ;;  %v17812_v50 = vld [vmem:[#allocation132_spill] sm:$0xff]  ;;  %v12888_v4 = vmul.f32 %v11181_v10, %v17813_v31  ;;  %v12896_v42 = vmul.f32 %v11181_v10, %v17815_v13  ;;  %v12908_v31 = vmul.f32 %v11181_v10, %v17818_v33  ;;  %v12912_v17 = vmul.f32 %v11181_v10, %v17819_v57  ;;  %v17825_v36 = vld [vmem:[#allocation71_spill] sm:$0xff]  ;;  %v17827_v44 = vld [vmem:[#allocation73_spill] sm:$0xff] }
 0x52f   :  { %v12884_v48 = vmul.f32 %v11181_v10, %v17812_v50  ;;  %v12904_v50 = vmul.f32 %v11181_v10, %v17817_v55  ;;  %v12916_v13 = vmul.f32 %v11181_v10, %v17820_v49  ;;  %v12924_v55 = vmul.f32 %v11181_v10, %v17822_v2 }
 0x530   :  { %v12928_v33 = vmul.f32 %v11181_v10, %v17823_v21  ;;  %v12932_v57 = vmul.f32 %v11181_v10, %v17824_v26  ;;  %v12936_v49 = vmul.f32 %v11181_v10, %v17825_v36  ;;  %v12944_v2 = vmul.f32 %v11181_v10, %v17827_v44 }
 0x531   :  { %v12948_v21 = vmul.f32 %v11181_v10, %v17828_v32  ;;  %v12952_v26 = vmul.f32 %v11181_v10, %v17829_v63  ;;  %v12956_v36 = vmul.f32 %v11181_v10, %v17830_v60  ;;  %v12964_v44 = vmul.f32 %v11181_v10, %v17832_v35 }
 0x532   :  { %v12968_v32 = vmul.f32 %v11181_v10, %v17833_v15  ;;  %v12972_v63 = vmul.f32 %v11181_v10, %v17834_v23  ;;  %v12976_v60 = vmul.f32 %v11181_v10, %v17835_v53  ;;  %v12984_v35 = vmul.f32 %v11181_v10, %v17837_v47 }
 0x533   :  { %v12988_v15 = vmul.f32 %v11181_v10, %v17838_v59  ;;  %v12992_v23 = vmul.f32 %v11181_v10, %v17839_v41  ;;  %v12996_v53 = vmul.f32 %v11181_v10, %v17840_v27  ;;  %v13000_v61 = vmul.f32 %v11181_v10, %v17841_v18 }
 0x534   :  { %v13004_v47 = vmul.f32 %v11181_v10, %v17842_v56  ;;  %v13008_v59 = vmul.f32 %v11181_v10, %v17843_v29  ;;  %v13012_v41 = vmul.f32 %v11181_v10, %v17844_v25  ;;  %v13016_v27 = vmul.f32 %v11181_v10, %v17845_v39 }
 0x535   :  { %v13020_v18 = vmul.f32 %v11181_v10, %v17846_v34  ;;  %v13024_v56 = vmul.f32 %v11181_v10, %v17847_v46  ;;  %v13028_v29 = vmul.f32 %v11181_v10, %v17848_v28  ;;  %v13032_v25 = vmul.f32 %v11181_v10, %v17849_v54 }
 0x536   :  { %v13036_v39 = vmul.f32 %v11181_v10, %v17850_v22  ;;  %v13040_v34 = vmul.f32 %v11181_v10, %v17851_v11  ;;  %v13044_v46 = vmul.f32 %v11181_v10, %v17852_v16  ;;  %v13048_v28 = vmul.f32 %v11181_v10, %v17853_v0 }
 0x537   :  { %v13052_v54 = vmul.f32 %v11181_v10, %v17854_v3  ;;  %v13056_v22 = vmul.f32 %v11181_v10, %v17855_v5  ;;  %v13060_v11 = vmul.f32 %v11181_v10, %v17856_v6  ;;  %v13064_v16 = vmul.f32 %v11181_v10, %v17858_v51 }
 0x538   :  { %v13068_v0 = vmul.f32 %v11181_v10, %v17860_v1  ;;  %v13072_v3 = vmul.f32 %v11181_v10, %v17862_v45  ;;  %v13076_v5 = vmul.f32 %v11181_v10, %v17864_v12  ;;  %v13080_v6 = vmul.f32 %v11181_v10, %v17866_v14 }
 0x539   :  { %17857 = vst [vmem:[#allocation38_spill] sm:$0xff] %v13060_v11  ;;  %17859 = vst [vmem:[#allocation36_spill] sm:$0xff] %v13064_v16  ;;  %v17868_v11 = vld [vmem:[#allocation104_spill] sm:$0xff]  ;;  %v17870_v16 = vld [vmem:[#allocation105_spill] sm:$0xff] }
 0x53a   :  { %17861 = vst [vmem:[#allocation39_spill] sm:$0xff] %v13068_v0  ;;  %17863 = vst [vmem:[#allocation40_spill] sm:$0xff] %v13072_v3  ;;  %v13084_v51 = vmul.f32 %v11181_v10, %v17868_v11  ;;  %v13088_v1 = vmul.f32 %v11181_v10, %v17870_v16  ;;  %v17872_v0 = vld [vmem:[#allocation106_spill] sm:$0xff]  ;;  %v17874_v3 = vld [vmem:[#allocation107_spill] sm:$0xff] }
 0x53b   :  { %17865 = vst [vmem:[#allocation42_spill] sm:$0xff] %v13076_v5  ;;  %17867 = vst [vmem:[#allocation132_spill] sm:$0xff] %v13080_v6  ;;  %v13092_v45 = vmul.f32 %v11181_v10, %v17872_v0  ;;  %v13096_v12 = vmul.f32 %v11181_v10, %v17874_v3  ;;  %v17876_v5 = vld [vmem:[#allocation108_spill] sm:$0xff]  ;;  %v17877_v6 = vld [vmem:[#allocation109_spill] sm:$0xff] }
 0x53c   :  { %17869 = vst [vmem:[#allocation43_spill] sm:$0xff] %v13084_v51  ;;  %17871 = vst [vmem:[#allocation133_spill] sm:$0xff] %v13088_v1  ;;  %v13100_v14 = vmul.f32 %v11181_v10, %v17876_v5  ;;  %v13104_v11 = vmul.f32 %v11181_v10, %v17877_v6  ;;  %v17878_v51 = vld [vmem:[#allocation140_spill] sm:$0xff]  ;;  %v17879_v1 = vld [vmem:[#allocation110_spill] sm:$0xff]  ;;  %v13124_v6 = vmul.f32 %v12286_v9, %v12864_v58 }
 0x53d   :  { %17873 = vst [vmem:[#allocation44_spill] sm:$0xff] %v13092_v45  ;;  %17875 = vst [vmem:[#allocation134_spill] sm:$0xff] %v13096_v12  ;;  %v13108_v16 = vmul.f32 %v11181_v10, %v17878_v51  ;;  %v13112_v0 = vmul.f32 %v11181_v10, %v17879_v1  ;;  %v17880_v45 = vld [vmem:[#allocation141_spill] sm:$0xff]  ;;  %v17881_v12 = vld [vmem:[#allocation111_spill] sm:$0xff]  ;;  %v13128_v51 = vmul.f32 %v12286_v9, %v12868_v40 }
 0x53e   :  { %v13116_v3 = vmul.f32 %v11181_v10, %v17880_v45  ;;  %v13120_v5 = vmul.f32 %v11181_v10, %v17881_v12  ;;  %v13132_v1 = vmul.f32 %v12286_v9, %v12872_v62  ;;  %v13136_v45 = vmul.f32 %v12286_v9, %v12876_v52 }
 0x53f   :  { %v13140_v12 = vmul.f32 %v12286_v9, %v12880_v8  ;;  %v13144_v58 = vmul.f32 %v12286_v9, %v12884_v48  ;;  %v13148_v40 = vmul.f32 %v12286_v9, %v12888_v4  ;;  %v13152_v62 = vmul.f32 %v12286_v9, %v12892_v7 }
 0x540   :  { %v13156_v52 = vmul.f32 %v12286_v9, %v12896_v42  ;;  %v13160_v8 = vmul.f32 %v12286_v9, %v12900_v19  ;;  %v13164_v48 = vmul.f32 %v12286_v9, %v12904_v50  ;;  %v17885_v10 = vmax.f32 %v12326_v24, 0.0 }
 0x541   :  { %17882 = vst [vmem:[#allocation45_spill] sm:$0xff] %v13144_v58  ;;  %17883 = vst [vmem:[#allocation135_spill] sm:$0xff] %v13148_v40  ;;  %v17887_v40 = vld [vmem:[#allocation56_spill] sm:$0xff]  ;;  %v13180_v19 = vmul.f32 %v12286_v9, %v12908_v31  ;;  %v13184_v50 = vmul.f32 %v12286_v9, %v12912_v17  ;;  %v13192_v24 = vmul.f32 %v12286_v9, %v12920_v37 }
 0x542   :  { %17884 = vst [vmem:[#allocation46_spill] sm:$0xff] %v13152_v62  ;;  %v13168_v4 = vrot.slane %v17885_v10, 2  ;;  %v17888_v58 = vmax.f32 %v17887_v40, 0.0  ;;  %v17890_v62 = vmax.f32 %v12332_v30, 0.0  ;;  %v13188_v10 = vmul.f32 %v12286_v9, %v12916_v13  ;;  %v17895_v40 = vld [vmem:[#allocation36_spill] sm:$0xff] }
 0x543   :  { %17892 = vst [vmem:[#allocation69_spill] sm:$0xff] %v13180_v19  ;;  %17893 = vst [vmem:[#allocation70_spill] sm:$0xff] %v13184_v50  ;;  %v13196_v30 = vmul.f32 %v12286_v9, %v12924_v55  ;;  %v13200_v31 = vmul.f32 %v12286_v9, %v12928_v33  ;;  %v13204_v17 = vmul.f32 %v12286_v9, %v12932_v57  ;;  %v17898_v50 = vld [vmem:[#allocation40_spill] sm:$0xff]  ;;  %v17900_v19 = vld [vmem:[#allocation42_spill] sm:$0xff] }
 0x544   :  { %17886 = vst [vmem:[#allocation136_spill] sm:$0xff] %v13168_v4  ;;  %v13172_v7 = vrot.slane %v17888_v58, 4  ;;  %v13176_v42 = vrot.slane %v17890_v62, 6  ;;  %v13208_v13 = vmul.f32 %v12286_v9, %v12936_v49  ;;  %v13212_v37 = vmul.f32 %v12286_v9, %v12940_v43  ;;  %v17894_v58 = vld [vmem:[#allocation38_spill] sm:$0xff]  ;;  %v17896_v62 = vld [vmem:[#allocation39_spill] sm:$0xff]  ;;  %v17903_v4 = vld [vmem:[#allocation133_spill] sm:$0xff] }
 0x545   :  { %v13216_v55 = vmul.f32 %v12286_v9, %v12944_v2  ;;  %v13220_v33 = vmul.f32 %v12286_v9, %v12948_v21  ;;  %v13224_v57 = vmul.f32 %v12286_v9, %v12952_v26  ;;  %v13228_v49 = vmul.f32 %v12286_v9, %v12956_v36 }
 0x546   :  { %17889 = vst [vmem:[#allocation47_spill] sm:$0xff] %v13172_v7  ;;  %17891 = vst [vmem:[#allocation68_spill] sm:$0xff] %v13176_v42  ;;  %v13232_v43 = vmul.f32 %v12286_v9, %v12960_v38  ;;  %v13236_v2 = vmul.f32 %v12286_v9, %v12964_v44  ;;  %v13240_v21 = vmul.f32 %v12286_v9, %v12968_v32  ;;  %v17901_v7 = vld [vmem:[#allocation132_spill] sm:$0xff]  ;;  %v17902_v42 = vld [vmem:[#allocation43_spill] sm:$0xff] }
 0x547   :  { %v13244_v26 = vmul.f32 %v12286_v9, %v12972_v63  ;;  %v13248_v36 = vmul.f32 %v12286_v9, %v12976_v60  ;;  %v13252_v38 = vmul.f32 %v12286_v9, %v12980_v20  ;;  %v13256_v44 = vmul.f32 %v12286_v9, %v12984_v35 }
 0x548   :  { %v13260_v32 = vmul.f32 %v12286_v9, %v12988_v15  ;;  %v13264_v63 = vmul.f32 %v12286_v9, %v12992_v23  ;;  %v13268_v60 = vmul.f32 %v12286_v9, %v12996_v53  ;;  %v13272_v20 = vmul.f32 %v12286_v9, %v13000_v61 }
 0x549   :  { %v13276_v35 = vmul.f32 %v12286_v9, %v13004_v47  ;;  %v13280_v15 = vmul.f32 %v12286_v9, %v13008_v59  ;;  %v13284_v23 = vmul.f32 %v12286_v9, %v13012_v41  ;;  %v13288_v53 = vmul.f32 %v12286_v9, %v13016_v27 }
 0x54a   :  { %v13292_v61 = vmul.f32 %v12286_v9, %v13020_v18  ;;  %v13296_v47 = vmul.f32 %v12286_v9, %v13024_v56  ;;  %v13300_v59 = vmul.f32 %v12286_v9, %v13028_v29  ;;  %v13304_v41 = vmul.f32 %v12286_v9, %v13032_v25 }
 0x54b   :  { %v13308_v27 = vmul.f32 %v12286_v9, %v13036_v39  ;;  %v13312_v18 = vmul.f32 %v12286_v9, %v13040_v34  ;;  %v13316_v56 = vmul.f32 %v12286_v9, %v13044_v46  ;;  %v13320_v29 = vmul.f32 %v12286_v9, %v13048_v28 }
 0x54c   :  { %v13324_v25 = vmul.f32 %v12286_v9, %v13052_v54  ;;  %v13328_v39 = vmul.f32 %v12286_v9, %v13056_v22  ;;  %v13332_v34 = vmul.f32 %v12286_v9, %v17894_v58  ;;  %v13336_v46 = vmul.f32 %v12286_v9, %v17895_v40 }
 0x54d   :  { %v13340_v28 = vmul.f32 %v12286_v9, %v17896_v62  ;;  %v13344_v54 = vmul.f32 %v12286_v9, %v17898_v50  ;;  %v13348_v22 = vmul.f32 %v12286_v9, %v17900_v19  ;;  %v13352_v58 = vmul.f32 %v12286_v9, %v17901_v7 }
 0x54e   :  { %v13356_v40 = vmul.f32 %v12286_v9, %v17902_v42  ;;  %v13360_v62 = vmul.f32 %v12286_v9, %v17903_v4  ;;  %v13372_v7 = vmul.f32 %v12286_v9, %v13100_v14  ;;  %v13376_v42 = vmul.f32 %v12286_v9, %v13104_v11 }
 0x54f   :  { %17897 = vst [vmem:[#allocation71_spill] sm:$0xff] %v13340_v28  ;;  %17899 = vst [vmem:[#allocation72_spill] sm:$0xff] %v13344_v54  ;;  %v17905_v28 = vld [vmem:[#allocation44_spill] sm:$0xff]  ;;  %v17907_v54 = vld [vmem:[#allocation134_spill] sm:$0xff]  ;;  %v13380_v4 = vmul.f32 %v12286_v9, %v13108_v16  ;;  %v13392_v14 = vmul.f32 %v12286_v9, %v13120_v5 }
 0x550   :  { %17904 = vst [vmem:[#allocation73_spill] sm:$0xff] %v13360_v62  ;;  %v13364_v50 = vmul.f32 %v12286_v9, %v17905_v28  ;;  %v13368_v19 = vmul.f32 %v12286_v9, %v17907_v54  ;;  %17909 = vst [vmem:[#allocation76_spill] sm:$0xff] %v13372_v7  ;;  %v13384_v28 = vmul.f32 %v12286_v9, %v13112_v0  ;;  %v17911_v7 = vld [vmem:[#allocation147_spill] sm:$0xff]  ;;  %v17943_v62 = vld [vmem:[#allocation20_spill] sm:$0xff] }
 0x551   :  { %17910 = vst [vmem:[#allocation77_spill] sm:$0xff] %v13376_v42  ;;  %v13388_v54 = vmul.f32 %v12286_v9, %v13116_v3  ;;  %v13396_v11 = vadd.f32 %v17911_v7, %v13124_v6  ;;  %v13400_v16 = vadd.f32 %v17911_v7, %v13128_v51  ;;  %v13404_v0 = vadd.f32 %v17911_v7, %v13132_v1  ;;  %v17917_v9 = vld [vmem:[#allocation45_spill] sm:$0xff]  ;;  %v17919_v42 = vld [vmem:[#allocation135_spill] sm:$0xff] }
 0x552   :  { %17906 = vst [vmem:[#allocation74_spill] sm:$0xff] %v13364_v50  ;;  %17908 = vst [vmem:[#allocation75_spill] sm:$0xff] %v13368_v19  ;;  %v13408_v3 = vadd.f32 %v17911_v7, %v13136_v45  ;;  %v13412_v5 = vadd.f32 %v17911_v7, %v13140_v12  ;;  %v13416_v6 = vadd.f32 %v17911_v7, %v17917_v9  ;;  %v17937_v19 = vld [vmem:[#allocation16_spill] sm:$0xff]  ;;  %v17941_v50 = vld [vmem:[#allocation18_spill] sm:$0xff] }
 0x553   :  { %17912 = vst [vmem:[#allocation78_spill] sm:$0xff] %v13396_v11  ;;  %17913 = vst [vmem:[#allocation79_spill] sm:$0xff] %v13400_v16  ;;  %v13420_v51 = vadd.f32 %v17911_v7, %v17919_v42  ;;  %v17921_v11 = vld [vmem:[#allocation46_spill] sm:$0xff]  ;;  %v13428_v45 = vadd.f32 %v17911_v7, %v13156_v52  ;;  %v13432_v12 = vadd.f32 %v17911_v7, %v13160_v8  ;;  %v17939_v16 = vld [vmem:[#allocation17_spill] sm:$0xff] }
 0x554   :  { %17914 = vst [vmem:[#allocation80_spill] sm:$0xff] %v13404_v0  ;;  %17915 = vst [vmem:[#allocation81_spill] sm:$0xff] %v13408_v3  ;;  %v13424_v1 = vadd.f32 %v17911_v7, %v17921_v11  ;;  %v13436_v9 = vadd.f32 %v17911_v7, %v13164_v48  ;;  %v13440_v42 = vadd.f32 %v17911_v7, %v13188_v10  ;;  %v17933_v3 = vld [vmem:[#allocation14_spill] sm:$0xff]  ;;  %v17935_v0 = vld [vmem:[#allocation15_spill] sm:$0xff] }
 0x555   :  { %17916 = vst [vmem:[#allocation82_spill] sm:$0xff] %v13412_v5  ;;  %17918 = vst [vmem:[#allocation5_spill] sm:$0xff] %v13416_v6  ;;  %v13444_v11 = vadd.f32 %v17911_v7, %v13192_v24  ;;  %v17931_v6 = vld [vmem:[#allocation12_spill] sm:$0xff]  ;;  %v17932_v5 = vld [vmem:[#allocation13_spill] sm:$0xff] }
 0x556   :  { %17920 = vst [vmem:[#allocation6_spill] sm:$0xff] %v13420_v51  ;;  %17922 = vst [vmem:[#allocation29_spill] sm:$0xff] %v13424_v1  ;;  %v17926_v1 = vld [vmem:[#allocation8_spill] sm:$0xff]  ;;  %v17930_v51 = vld [vmem:[#allocation11_spill] sm:$0xff] }
 0x557   :  { %17923 = vst [vmem:[#allocation30_spill] sm:$0xff] %v13428_v45  ;;  %17924 = vst [vmem:[#allocation31_spill] sm:$0xff] %v13432_v12  ;;  %v13448_v52 = vadd.f32 %v17911_v7, %v17926_v1  ;;  %v17927_v45 = vld [vmem:[#allocation9_spill] sm:$0xff]  ;;  %v17928_v12 = vld [vmem:[#allocation55_spill] sm:$0xff]  ;;  %v13464_v24 = vadd.f32 %v17911_v7, %v17930_v51  ;;  %v13468_v1 = vadd.f32 %v17911_v7, %v17931_v6 }
 0x558   :  { %17925 = vst [vmem:[#allocation32_spill] sm:$0xff] %v13436_v9  ;;  %v13452_v8 = vadd.f32 %v17911_v7, %v17927_v45  ;;  %v13456_v48 = vadd.f32 %v17911_v7, %v17928_v12  ;;  %v17929_v9 = vld [vmem:[#allocation10_spill] sm:$0xff]  ;;  %v13472_v45 = vadd.f32 %v17911_v7, %v17932_v5  ;;  %v13476_v12 = vadd.f32 %v17911_v7, %v17933_v3 }
 0x559   :  { %v13460_v10 = vadd.f32 %v17911_v7, %v17929_v9  ;;  %v13480_v9 = vadd.f32 %v17911_v7, %v17935_v0  ;;  %v13484_v51 = vadd.f32 %v17911_v7, %v17937_v19  ;;  %v13488_v6 = vadd.f32 %v17911_v7, %v17939_v16 }
 0x55a   :  { %17934 = vst [vmem:[#allocation33_spill] sm:$0xff] %v13476_v12  ;;  %v13492_v5 = vadd.f32 %v17911_v7, %v17941_v50  ;;  %v13496_v3 = vadd.f32 %v17911_v7, %v17943_v62  ;;  %v17945_v12 = vld [vmem:[#allocation21_spill] sm:$0xff] }
 0x55b   :  { %17936 = vst [vmem:[#allocation35_spill] sm:$0xff] %v13480_v9  ;;  %17938 = vst [vmem:[#allocation37_spill] sm:$0xff] %v13484_v51  ;;  %v13500_v0 = vadd.f32 %v17911_v7, %v17945_v12  ;;  %v17947_v9 = vld [vmem:[#allocation22_spill] sm:$0xff]  ;;  %v17949_v51 = vld [vmem:[#allocation23_spill] sm:$0xff] }
 0x55c   :  { %17940 = vst [vmem:[#allocation41_spill] sm:$0xff] %v13488_v6  ;;  %17942 = vst [vmem:[#allocation83_spill] sm:$0xff] %v13492_v5  ;;  %v13504_v19 = vadd.f32 %v17911_v7, %v17947_v9  ;;  %v13508_v16 = vadd.f32 %v17911_v7, %v17949_v51  ;;  %v17951_v6 = vld [vmem:[#allocation24_spill] sm:$0xff]  ;;  %v17953_v5 = vld [vmem:[#allocation25_spill] sm:$0xff] }
 0x55d   :  { %17944 = vst [vmem:[#allocation84_spill] sm:$0xff] %v13496_v3  ;;  %17946 = vst [vmem:[#allocation85_spill] sm:$0xff] %v13500_v0  ;;  %v13512_v50 = vadd.f32 %v17911_v7, %v17951_v6  ;;  %v13516_v62 = vadd.f32 %v17911_v7, %v17953_v5  ;;  %v17955_v3 = vld [vmem:[#allocation26_spill] sm:$0xff]  ;;  %v17957_v0 = vld [vmem:[#allocation27_spill] sm:$0xff] }
 0x55e   :  { %17948 = vst [vmem:[#allocation86_spill] sm:$0xff] %v13504_v19  ;;  %17950 = vst [vmem:[#allocation87_spill] sm:$0xff] %v13508_v16  ;;  %v13520_v12 = vadd.f32 %v17911_v7, %v17955_v3  ;;  %v13524_v9 = vadd.f32 %v17911_v7, %v17957_v0  ;;  %v17959_v19 = vld [vmem:[#allocation148_spill] sm:$0xff]  ;;  %v17961_v16 = vld [vmem:[#allocation149_spill] sm:$0xff] }
 0x55f   :  { %17952 = vst [vmem:[#allocation88_spill] sm:$0xff] %v13512_v50  ;;  %17954 = vst [vmem:[#allocation138_spill] sm:$0xff] %v13516_v62  ;;  %v13528_v51 = vadd.f32 %v17911_v7, %v17959_v19  ;;  %v13532_v6 = vadd.f32 %v17911_v7, %v17961_v16  ;;  %v17963_v50 = vld [vmem:[#allocation150_spill] sm:$0xff]  ;;  %v17965_v62 = vld [vmem:[#allocation151_spill] sm:$0xff]  ;;  %v13552_v16 = vadd.f32 %v17911_v7, %v13196_v30 }
 0x560   :  { %17956 = vst [vmem:[#allocation89_spill] sm:$0xff] %v13520_v12  ;;  %17958 = vst [vmem:[#allocation139_spill] sm:$0xff] %v13524_v9  ;;  %v13536_v5 = vadd.f32 %v17911_v7, %v17963_v50  ;;  %v13540_v3 = vadd.f32 %v17911_v7, %v17965_v62  ;;  %v17967_v12 = vld [vmem:[#allocation152_spill] sm:$0xff]  ;;  %v17969_v9 = vld [vmem:[#allocation153_spill] sm:$0xff]  ;;  %v13556_v50 = vadd.f32 %v17911_v7, %v13200_v31 }
 0x561   :  { %17960 = vst [vmem:[#allocation98_spill] sm:$0xff] %v13528_v51  ;;  %17962 = vst [vmem:[#allocation99_spill] sm:$0xff] %v13532_v6  ;;  %v13544_v0 = vadd.f32 %v17911_v7, %v17967_v12  ;;  %v13548_v19 = vadd.f32 %v17911_v7, %v17969_v9  ;;  %v13560_v62 = vadd.f32 %v17911_v7, %v13204_v17  ;;  %v18004_v6 = vld [vmem:[#allocation157_spill] sm:$0xff] }
 0x562   :  { %17964 = vst [vmem:[#allocation100_spill] sm:$0xff] %v13536_v5  ;;  %17966 = vst [vmem:[#allocation101_spill] sm:$0xff] %v13540_v3  ;;  %v13564_v12 = vadd.f32 %v17911_v7, %v13208_v13  ;;  %v13568_v9 = vadd.f32 %v17911_v7, %v13212_v37  ;;  %v13572_v30 = vadd.f32 %v17911_v7, %v13216_v55  ;;  %v18000_v3 = vld [vmem:[#allocation63_spill] sm:$0xff]  ;;  %v18002_v5 = vld [vmem:[#allocation156_spill] sm:$0xff] }
 0x563   :  { %17968 = vst [vmem:[#allocation102_spill] sm:$0xff] %v13544_v0  ;;  %17970 = vst [vmem:[#allocation103_spill] sm:$0xff] %v13548_v19  ;;  %v13576_v31 = vadd.f32 %v17911_v7, %v13220_v33  ;;  %v13580_v17 = vadd.f32 %v17911_v7, %v13224_v57  ;;  %v13584_v13 = vadd.f32 %v17911_v7, %v13228_v49  ;;  %v17996_v19 = vld [vmem:[#allocation61_spill] sm:$0xff]  ;;  %v17998_v0 = vld [vmem:[#allocation62_spill] sm:$0xff] }
 0x564   :  { %17971 = vst [vmem:[#allocation104_spill] sm:$0xff] %v13552_v16  ;;  %17972 = vst [vmem:[#allocation105_spill] sm:$0xff] %v13556_v50  ;;  %v13588_v37 = vadd.f32 %v17911_v7, %v13232_v43  ;;  %v13592_v55 = vadd.f32 %v17911_v7, %v13236_v2  ;;  %v13596_v33 = vadd.f32 %v17911_v7, %v13240_v21  ;;  %v17993_v50 = vld [vmem:[#allocation155_spill] sm:$0xff]  ;;  %v17994_v16 = vld [vmem:[#allocation60_spill] sm:$0xff] }
 0x565   :  { %17973 = vst [vmem:[#allocation106_spill] sm:$0xff] %v13560_v62  ;;  %17974 = vst [vmem:[#allocation107_spill] sm:$0xff] %v13564_v12  ;;  %v13600_v57 = vadd.f32 %v17911_v7, %v13244_v26  ;;  %v13604_v49 = vadd.f32 %v17911_v7, %v13248_v36  ;;  %v13608_v43 = vadd.f32 %v17911_v7, %v13252_v38  ;;  %v17991_v12 = vld [vmem:[#allocation58_spill] sm:$0xff]  ;;  %v17992_v62 = vld [vmem:[#allocation59_spill] sm:$0xff] }
 0x566   :  { %17975 = vst [vmem:[#allocation108_spill] sm:$0xff] %v13568_v9  ;;  %17976 = vst [vmem:[#allocation109_spill] sm:$0xff] %v13572_v30  ;;  %v13612_v2 = vadd.f32 %v17911_v7, %v13256_v44  ;;  %v13616_v21 = vadd.f32 %v17911_v7, %v13260_v32  ;;  %v17989_v30 = vld [vmem:[#allocation54_spill] sm:$0xff]  ;;  %v17990_v9 = vld [vmem:[#allocation57_spill] sm:$0xff] }
 0x567   :  { %17977 = vst [vmem:[#allocation140_spill] sm:$0xff] %v13576_v31  ;;  %17978 = vst [vmem:[#allocation110_spill] sm:$0xff] %v13580_v17  ;;  %v17987_v17 = vld [vmem:[#allocation51_spill] sm:$0xff]  ;;  %v17988_v31 = vld [vmem:[#allocation53_spill] sm:$0xff] }
 0x568   :  { %17979 = vst [vmem:[#allocation141_spill] sm:$0xff] %v13584_v13  ;;  %17980 = vst [vmem:[#allocation111_spill] sm:$0xff] %v13588_v37  ;;  %v17985_v37 = vld [vmem:[#allocation49_spill] sm:$0xff]  ;;  %v17986_v13 = vld [vmem:[#allocation50_spill] sm:$0xff]  ;;  %v13636_v32 = vadd.f32 %v17911_v7, %v17987_v17  ;;  %v13656_v17 = vadd.f32 %v17911_v7, %v17992_v62  ;;  %v13676_v62 = vadd.f32 %v17911_v7, %v18000_v3 }
 0x569   :  { %17981 = vst [vmem:[#allocation56_spill] sm:$0xff] %v13592_v55  ;;  %17982 = vst [vmem:[#allocation38_spill] sm:$0xff] %v13596_v33  ;;  %v17983_v33 = vld [vmem:[#allocation28_spill] sm:$0xff]  ;;  %v17984_v55 = vld [vmem:[#allocation154_spill] sm:$0xff]  ;;  %v13628_v38 = vadd.f32 %v17911_v7, %v17985_v37  ;;  %v13632_v44 = vadd.f32 %v17911_v7, %v17986_v13  ;;  %v13648_v37 = vadd.f32 %v17911_v7, %v17990_v9 }
 0x56a   :  { %v13620_v26 = vadd.f32 %v17911_v7, %v17983_v33  ;;  %v13624_v36 = vadd.f32 %v17911_v7, %v17984_v55  ;;  %v13640_v33 = vadd.f32 %v17911_v7, %v17988_v31  ;;  %v13644_v55 = vadd.f32 %v17911_v7, %v17989_v30  ;;  %18001 = vst [vmem:[#allocation42_spill] sm:$0xff] %v13676_v62  ;;  %v18006_v51 = vld [vmem:[#allocation65_spill] sm:$0xff]  ;;  %v6838_v62 = vld [vmem:[%s16795_s2 + $0x10] sm:$0xff] }
 0x56b   :  { %v13652_v13 = vadd.f32 %v17911_v7, %v17991_v12  ;;  %v13660_v31 = vadd.f32 %v17911_v7, %v17993_v50  ;;  %v13664_v30 = vadd.f32 %v17911_v7, %v17994_v16  ;;  %v13668_v9 = vadd.f32 %v17911_v7, %v17996_v19  ;;  %v6839_v50 = vld [vmem:[%s16795_s2 + $0x18] sm:$0x3] }
 0x56c   :  { %v13672_v12 = vadd.f32 %v17911_v7, %v17998_v0  ;;  %v13683_v16 = vadd.f32 %v17911_v7, %v18002_v5  ;;  %v13687_v19 = vadd.f32 %v17911_v7, %v18004_v6  ;;  %v13691_v0 = vadd.f32 %v17911_v7, %v18006_v51  ;;  %8017 = vmatpush3.msk.msra.mxu1 %vm3801_vm4, %v6839_v50  ;;  %v18010_v5 = vld [vmem:[#allocation158_spill] sm:$0xff]  ;;  %v18011_v6 = vld [vmem:[#allocation159_spill] sm:$0xff]  ;;  %v18012_v51 = vld [vmem:[#allocation160_spill] sm:$0xff] }
 0x56d   :  { %17995 = vst [vmem:[#allocation36_spill] sm:$0xff] %v13664_v30  ;;  %17997 = vst [vmem:[#allocation39_spill] sm:$0xff] %v13668_v9  ;;  %v18014_v50 = vmov 0.0   ;;  %v18015_v9 = vld [vmem:[#allocation90_spill] sm:$0xff] }
 0x56e   :  { %17999 = vst [vmem:[#allocation40_spill] sm:$0xff] %v13672_v12  ;;  %18003 = vst [vmem:[#allocation132_spill] sm:$0xff] %v13683_v16  ;;  %v18008_v12 = vld [vmem:[#allocation66_spill] sm:$0xff]  ;;  %v13703_v16 = vadd.f32 %v17911_v7, %v18010_v5  ;;  %8018 = vmatprep.subr.mxu1 %v18014_v50  ;;  %v13720_v30 = vadd.f32 %v17911_v7, %v18015_v9  ;;  %v13724_v5 = vadd.f32 %v17911_v7, %v13264_v63 }
 0x56f   :  { %18005 = vst [vmem:[#allocation43_spill] sm:$0xff] %v13687_v19  ;;  %18007 = vst [vmem:[#allocation133_spill] sm:$0xff] %v13691_v0  ;;  %v13695_v3 = vadd.f32 %v17911_v7, %v18008_v12  ;;  %v13707_v19 = vadd.f32 %v17911_v7, %v18011_v6  ;;  %v13711_v0 = vadd.f32 %v17911_v7, %v18012_v51  ;;  %v18013_v12 = vld [vmem:[#allocation161_spill] sm:$0xff]  ;;  %8019 = vmatpush3.msra.mxu1 %v6838_v62  ;;  %v18031_v62 = vld [vmem:[#allocation91_spill] sm:$0xff] }
 0x570   :  { %18016 = vst [vmem:[#allocation134_spill] sm:$0xff] %v13724_v5  ;;  %v13728_v6 = vadd.f32 %v17911_v7, %v13268_v60  ;;  %v13732_v51 = vadd.f32 %v17911_v7, %v13272_v20  ;;  %v13740_v9 = vadd.f32 %v17911_v7, %v13280_v15  ;;  %v13744_v63 = vadd.f32 %v17911_v7, %v13284_v23  ;;  %v18057_v5 = vld [vmem:[#allocation144_spill] sm:$0xff] }
 0x571   :  { %18009 = vst [vmem:[#allocation44_spill] sm:$0xff] %v13695_v3  ;;  %v13715_v3 = vadd.f32 %v17911_v7, %v18013_v12  ;;  %v13736_v12 = vadd.f32 %v17911_v7, %v13276_v35  ;;  %v13748_v60 = vadd.f32 %v17911_v7, %v13288_v53  ;;  %8143 = vmatprep.subr.mxu1 %v18014_v50  ;;  %v18039_v50 = vld [vmem:[#allocation95_spill] sm:$0xff] }
 0x572   :  { %18017 = vst [vmem:[#allocation45_spill] sm:$0xff] %v13728_v6  ;;  %18018 = vst [vmem:[#allocation135_spill] sm:$0xff] %v13732_v51  ;;  %v13753_v20 = vadd.f32 %v17911_v7, %v13292_v61  ;;  %v13757_v35 = vadd.f32 %v17911_v7, %v13296_v47  ;;  %v13761_v15 = vadd.f32 %v17911_v7, %v13300_v59  ;;  %v18053_v51 = vld [vmem:[#allocation114_spill] sm:$0xff]  ;;  %v18055_v6 = vld [vmem:[#allocation115_spill] sm:$0xff] }
 0x573   :  { %18019 = vst [vmem:[#allocation46_spill] sm:$0xff] %v13736_v12  ;;  %18020 = vst [vmem:[#allocation8_spill] sm:$0xff] %v13740_v9  ;;  %v13765_v23 = vadd.f32 %v17911_v7, %v13304_v41  ;;  %v13769_v53 = vadd.f32 %v17911_v7, %v13308_v27  ;;  %v13773_v61 = vadd.f32 %v17911_v7, %v13312_v18  ;;  %v18049_v9 = vld [vmem:[#allocation143_spill] sm:$0xff]  ;;  %v18051_v12 = vld [vmem:[#allocation113_spill] sm:$0xff] }
 0x574   :  { %18021 = vst [vmem:[#allocation9_spill] sm:$0xff] %v13744_v63  ;;  %18022 = vst [vmem:[#allocation55_spill] sm:$0xff] %v13748_v60  ;;  %v13777_v47 = vadd.f32 %v17911_v7, %v13316_v56  ;;  %v13781_v59 = vadd.f32 %v17911_v7, %v13320_v29  ;;  %v13785_v41 = vadd.f32 %v17911_v7, %v13324_v25  ;;  %v18045_v60 = vld [vmem:[#allocation142_spill] sm:$0xff]  ;;  %v18047_v63 = vld [vmem:[#allocation112_spill] sm:$0xff] }
 0x575   :  { %18023 = vst [vmem:[#allocation10_spill] sm:$0xff] %v13753_v20  ;;  %18024 = vst [vmem:[#allocation11_spill] sm:$0xff] %v13757_v35  ;;  %v13789_v27 = vadd.f32 %v17911_v7, %v13328_v39  ;;  %v13793_v18 = vadd.f32 %v17911_v7, %v18031_v62  ;;  %v13809_v39 = vadd.f32 %v17911_v7, %v18039_v50  ;;  %v18041_v35 = vld [vmem:[#allocation96_spill] sm:$0xff]  ;;  %v18043_v20 = vld [vmem:[#allocation97_spill] sm:$0xff] }
 0x576   :  { %18025 = vst [vmem:[#allocation12_spill] sm:$0xff] %v13761_v15  ;;  %18026 = vst [vmem:[#allocation13_spill] sm:$0xff] %v13765_v23  ;;  %v18035_v23 = vld [vmem:[#allocation93_spill] sm:$0xff]  ;;  %v18037_v15 = vld [vmem:[#allocation94_spill] sm:$0xff]  ;;  %v13813_v62 = vadd.f32 %v17911_v7, %v18041_v35  ;;  %v13829_v50 = vadd.f32 %v17911_v7, %v18049_v9  ;;  %v13833_v35 = vadd.f32 %v17911_v7, %v18051_v12 }
 0x577   :  { %18027 = vst [vmem:[#allocation14_spill] sm:$0xff] %v13769_v53  ;;  %18028 = vst [vmem:[#allocation15_spill] sm:$0xff] %v13781_v59  ;;  %v18033_v53 = vld [vmem:[#allocation92_spill] sm:$0xff]  ;;  %v13801_v29 = vadd.f32 %v17911_v7, %v18035_v23  ;;  %v13805_v25 = vadd.f32 %v17911_v7, %v18037_v15  ;;  %v13821_v23 = vadd.f32 %v17911_v7, %v18045_v60 }
 0x578   :  { %18029 = vst [vmem:[#allocation16_spill] sm:$0xff] %v13785_v41  ;;  %18030 = vst [vmem:[#allocation17_spill] sm:$0xff] %v13789_v27  ;;  %v13797_v56 = vadd.f32 %v17911_v7, %v18033_v53  ;;  %v13817_v53 = vadd.f32 %v17911_v7, %v18043_v20  ;;  %v13825_v15 = vadd.f32 %v17911_v7, %v18047_v63 }
 0x579   :  { %18032 = vst [vmem:[#allocation18_spill] sm:$0xff] %v13793_v18  ;;  %18036 = vst [vmem:[#allocation21_spill] sm:$0xff] %v13801_v29  ;;  %v13837_v20 = vadd.f32 %v17911_v7, %v18053_v51  ;;  %v13841_v60 = vadd.f32 %v17911_v7, %v18055_v6  ;;  %v13845_v63 = vadd.f32 %v17911_v7, %v18057_v5 }
 0x57a   :  { %18034 = vst [vmem:[#allocation20_spill] sm:$0xff] %v13797_v56  ;;  %18038 = vst [vmem:[#allocation22_spill] sm:$0xff] %v13805_v25  ;;  %v18155_v25 = vld [vmem:[#allocation43_spill] sm:$0xff]  ;;  %v18158_v56 = vld [vmem:[#allocation44_spill] sm:$0xff] }
 0x57b   :  { %18040 = vst [vmem:[#allocation23_spill] sm:$0xff] %v13809_v39  ;;  %18042 = vst [vmem:[#allocation24_spill] sm:$0xff] %v13813_v62  ;;  %v18153_v62 = vld [vmem:[#allocation42_spill] sm:$0xff]  ;;  %v18154_v39 = vld [vmem:[#allocation132_spill] sm:$0xff] }
 0x57c   :  { %18044 = vst [vmem:[#allocation25_spill] sm:$0xff] %v13817_v53  ;;  %18046 = vst [vmem:[#allocation26_spill] sm:$0xff] %v13821_v23  ;;  %v18151_v23 = vld [vmem:[#allocation39_spill] sm:$0xff]  ;;  %v18152_v53 = vld [vmem:[#allocation40_spill] sm:$0xff] }
 0x57d   :  { %18048 = vst [vmem:[#allocation27_spill] sm:$0xff] %v13825_v15  ;;  %18050 = vst [vmem:[#allocation148_spill] sm:$0xff] %v13829_v50  ;;  %v18059_v15 = vld [vmem:[#allocation116_spill] sm:$0xff]  ;;  %v18061_v50 = vld [vmem:[#allocation145_spill] sm:$0xff] }
 0x57e   :  { %18052 = vst [vmem:[#allocation149_spill] sm:$0xff] %v13833_v35  ;;  %18054 = vst [vmem:[#allocation150_spill] sm:$0xff] %v13837_v20  ;;  %v13849_v9 = vadd.f32 %v17911_v7, %v18059_v15  ;;  %v13853_v12 = vadd.f32 %v17911_v7, %v18061_v50  ;;  %v18063_v35 = vld [vmem:[#allocation162_spill] sm:$0xff]  ;;  %v18065_v20 = vld [vmem:[#allocation163_spill] sm:$0xff] }
 0x57f   :  { %18056 = vst [vmem:[#allocation151_spill] sm:$0xff] %v13841_v60  ;;  %18058 = vst [vmem:[#allocation152_spill] sm:$0xff] %v13845_v63  ;;  %v13857_v51 = vadd.f32 %v17911_v7, %v18063_v35  ;;  %v13861_v6 = vadd.f32 %v17911_v7, %v18065_v20  ;;  %v18067_v60 = vld [vmem:[#allocation164_spill] sm:$0xff]  ;;  %v18069_v63 = vld [vmem:[#allocation165_spill] sm:$0xff] }
 0x580   :  { %18060 = vst [vmem:[#allocation153_spill] sm:$0xff] %v13849_v9  ;;  %18062 = vst [vmem:[#allocation28_spill] sm:$0xff] %v13853_v12  ;;  %v13865_v5 = vadd.f32 %v17911_v7, %v18067_v60  ;;  %v13869_v15 = vadd.f32 %v17911_v7, %v18069_v63  ;;  %v18071_v9 = vld [vmem:[#allocation166_spill] sm:$0xff]  ;;  %v18073_v12 = vld [vmem:[#allocation167_spill] sm:$0xff]  ;;  %v13889_v63 = vadd.f32 %v17911_v7, %v13332_v34 }
 0x581   :  { %18064 = vst [vmem:[#allocation154_spill] sm:$0xff] %v13857_v51  ;;  %18066 = vst [vmem:[#allocation49_spill] sm:$0xff] %v13861_v6  ;;  %v13873_v50 = vadd.f32 %v17911_v7, %v18071_v9  ;;  %v13877_v35 = vadd.f32 %v17911_v7, %v18073_v12  ;;  %v18075_v51 = vld [vmem:[#allocation117_spill] sm:$0xff]  ;;  %v18077_v6 = vld [vmem:[#allocation146_spill] sm:$0xff]  ;;  %v13893_v9 = vadd.f32 %v17911_v7, %v13336_v46 }
 0x582   :  { %18068 = vst [vmem:[#allocation50_spill] sm:$0xff] %v13865_v5  ;;  %18070 = vst [vmem:[#allocation51_spill] sm:$0xff] %v13869_v15  ;;  %v13881_v20 = vadd.f32 %v17911_v7, %v18075_v51  ;;  %v13885_v60 = vadd.f32 %v17911_v7, %v18077_v6  ;;  %v13905_v6 = vadd.f32 %v17911_v7, %v13348_v22  ;;  %v18150_v5 = vld [vmem:[#allocation36_spill] sm:$0xff] }
 0x583   :  { %18072 = vst [vmem:[#allocation53_spill] sm:$0xff] %v13873_v50  ;;  %18074 = vst [vmem:[#allocation54_spill] sm:$0xff] %v13877_v35  ;;  %v18081_v50 = vld [vmem:[#allocation71_spill] sm:$0xff]  ;;  %v18083_v35 = vld [vmem:[#allocation72_spill] sm:$0xff]  ;;  %v13909_v34 = vadd.f32 %v17911_v7, %v13352_v58  ;;  %v13913_v46 = vadd.f32 %v17911_v7, %v13356_v40  ;;  %v13925_v22 = vadd.f32 %v17911_v7, %v13388_v54 }
 0x584   :  { %18076 = vst [vmem:[#allocation57_spill] sm:$0xff] %v13881_v20  ;;  %18078 = vst [vmem:[#allocation58_spill] sm:$0xff] %v13885_v60  ;;  %v13897_v12 = vadd.f32 %v17911_v7, %v18081_v50  ;;  %v13901_v51 = vadd.f32 %v17911_v7, %v18083_v35  ;;  %v13917_v50 = vadd.f32 %v17911_v7, %v13380_v4  ;;  %v18164_v20 = vld [vmem:[#allocation98_spill] sm:$0xff]  ;;  %v18167_v60 = vld [vmem:[#allocation64_spill] sm:$0xff] }
 0x585   :  { %18079 = vst [vmem:[#allocation59_spill] sm:$0xff] %v13889_v63  ;;  %18080 = vst [vmem:[#allocation155_spill] sm:$0xff] %v13893_v9  ;;  %v13921_v35 = vadd.f32 %v17911_v7, %v13384_v28  ;;  %v13929_v58 = vadd.f32 %v17911_v7, %v13392_v14  ;;  %v18102_v9 = vld [vmem:[#allocation123_spill] sm:$0xff]  ;;  %v18104_v63 = vld [vmem:[#allocation124_spill] sm:$0xff] }
 0x586   :  { %18082 = vst [vmem:[#allocation60_spill] sm:$0xff] %v13897_v12  ;;  %18084 = vst [vmem:[#allocation61_spill] sm:$0xff] %v13901_v51  ;;  %v18098_v51 = vld [vmem:[#allocation121_spill] sm:$0xff]  ;;  %v18100_v12 = vld [vmem:[#allocation122_spill] sm:$0xff] }
 0x587   :  { %18085 = vst [vmem:[#allocation62_spill] sm:$0xff] %v13905_v6  ;;  %18086 = vst [vmem:[#allocation63_spill] sm:$0xff] %v13909_v34  ;;  %v18092_v34 = vld [vmem:[#allocation118_spill] sm:$0xff]  ;;  %v18096_v6 = vld [vmem:[#allocation120_spill] sm:$0xff]  ;;  %v13945_v54 = vadd.f32 %v17911_v7, %v18098_v51  ;;  %v13949_v14 = vadd.f32 %v17911_v7, %v18100_v12 }
 0x588   :  { %18087 = vst [vmem:[#allocation156_spill] sm:$0xff] %v13913_v46  ;;  %18088 = vst [vmem:[#allocation157_spill] sm:$0xff] %v13917_v50  ;;  %v13933_v40 = vadd.f32 %v17911_v7, %v18092_v34  ;;  %v18094_v46 = vld [vmem:[#allocation119_spill] sm:$0xff]  ;;  %v13941_v28 = vadd.f32 %v17911_v7, %v18096_v6  ;;  %v13953_v34 = vadd.f32 %v17911_v7, %v18102_v9 }
 0x589   :  { %18089 = vst [vmem:[#allocation65_spill] sm:$0xff] %v13921_v35  ;;  %18090 = vst [vmem:[#allocation66_spill] sm:$0xff] %v13925_v22  ;;  %v13937_v4 = vadd.f32 %v17911_v7, %v18094_v46  ;;  %v13957_v46 = vadd.f32 %v17911_v7, %v18104_v63  ;;  %v3219_v22 = vmax.f32 %v13612_v2, 0.0  ;;  %v3229_v2 = vmax.f32 %v13652_v13, 0.0  ;;  %v18157_v13 = vld [vmem:[#allocation133_spill] sm:$0xff]  ;;  %v18170_v50 = vld [vmem:[#allocation103_spill] sm:$0xff] }
 0x58a   :  { %18091 = vst [vmem:[#allocation158_spill] sm:$0xff] %v13929_v58  ;;  %18093 = vst [vmem:[#allocation159_spill] sm:$0xff] %v13933_v40  ;;  %v3217_v40 = vmax.f32 %v13604_v49, 0.0  ;;  %v3218_v58 = vmax.f32 %v13608_v43, 0.0  ;;  %v3227_v49 = vmax.f32 %v13644_v55, 0.0  ;;  %v3228_v43 = vmax.f32 %v13648_v37, 0.0 }
 0x58b   :  { %18095 = vst [vmem:[#allocation160_spill] sm:$0xff] %v13937_v4  ;;  %18097 = vst [vmem:[#allocation161_spill] sm:$0xff] %v13941_v28  ;;  %v18106_v4 = vld [vmem:[#allocation125_spill] sm:$0xff]  ;;  %v18108_v28 = vld [vmem:[#allocation126_spill] sm:$0xff]  ;;  %v3237_v55 = vmax.f32 %v18155_v25, 0.0  ;;  %v14086_v41 = vrot.slane %v3219_v22, 2 }
 0x58c   :  { %18099 = vst [vmem:[#allocation90_spill] sm:$0xff] %v13945_v54  ;;  %18101 = vst [vmem:[#allocation91_spill] sm:$0xff] %v13949_v14  ;;  %v13961_v6 = vadd.f32 %v17911_v7, %v18106_v4  ;;  %v13965_v51 = vadd.f32 %v17911_v7, %v18108_v28  ;;  %v18110_v54 = vld [vmem:[#allocation127_spill] sm:$0xff]  ;;  %v18112_v14 = vld [vmem:[#allocation128_spill] sm:$0xff]  ;;  %v14068_v29 = vrot.slane %v3217_v40, 2  ;;  %v14070_v37 = vrot.slane %v3218_v58, 2 }
 0x58d   :  { %18103 = vst [vmem:[#allocation92_spill] sm:$0xff] %v13953_v34  ;;  %18105 = vst [vmem:[#allocation93_spill] sm:$0xff] %v13957_v46  ;;  %v13969_v12 = vadd.f32 %v17911_v7, %v18110_v54  ;;  %v13973_v9 = vadd.f32 %v17911_v7, %v18112_v14  ;;  %v18114_v34 = vld [vmem:[#allocation129_spill] sm:$0xff]  ;;  %v18116_v46 = vld [vmem:[#allocation130_spill] sm:$0xff]  ;;  %v3202_v35 = vmax.f32 %v18170_v50, 0.0 }
 0x58e   :  { %18107 = vst [vmem:[#allocation94_spill] sm:$0xff] %v13961_v6  ;;  %18109 = vst [vmem:[#allocation95_spill] sm:$0xff] %v13965_v51  ;;  %v13977_v63 = vadd.f32 %v17911_v7, %v18114_v34  ;;  %v13981_v4 = vadd.f32 %v17911_v7, %v18116_v46  ;;  %v18118_v6 = vld [vmem:[#allocation131_spill] sm:$0xff]  ;;  %v18120_v51 = vld [vmem:[#allocation168_spill] sm:$0xff]  ;;  %v14082_v25 = vsel %vm3373_vm5, %v14068_v29, %v14070_v37 }
 0x58f   :  { %18111 = vst [vmem:[#allocation96_spill] sm:$0xff] %v13969_v12  ;;  %18113 = vst [vmem:[#allocation97_spill] sm:$0xff] %v13973_v9  ;;  %v13985_v28 = vadd.f32 %v17911_v7, %v18118_v6  ;;  %v13989_v54 = vadd.f32 %v17911_v7, %v18120_v51  ;;  %v18122_v12 = vld [vmem:[#allocation169_spill] sm:$0xff]  ;;  %v18124_v9 = vld [vmem:[#allocation170_spill] sm:$0xff] }
 0x590   :  { %18115 = vst [vmem:[#allocation142_spill] sm:$0xff] %v13977_v63  ;;  %18117 = vst [vmem:[#allocation112_spill] sm:$0xff] %v13981_v4  ;;  %v13993_v14 = vadd.f32 %v17911_v7, %v18122_v12  ;;  %v13997_v34 = vadd.f32 %v17911_v7, %v18124_v9  ;;  %v18126_v63 = vld [vmem:[#allocation171_spill] sm:$0xff]  ;;  %v18128_v4 = vld [vmem:[#allocation172_spill] sm:$0xff] }
 0x591   :  { %18119 = vst [vmem:[#allocation143_spill] sm:$0xff] %v13985_v28  ;;  %18121 = vst [vmem:[#allocation113_spill] sm:$0xff] %v13989_v54  ;;  %v14001_v46 = vadd.f32 %v17911_v7, %v18126_v63  ;;  %v14005_v6 = vadd.f32 %v17911_v7, %v18128_v4  ;;  %v18130_v28 = vld [vmem:[#allocation173_spill] sm:$0xff]  ;;  %v18132_v54 = vld [vmem:[#allocation174_spill] sm:$0xff] }
 0x592   :  { %18123 = vst [vmem:[#allocation114_spill] sm:$0xff] %v13993_v14  ;;  %18125 = vst [vmem:[#allocation115_spill] sm:$0xff] %v13997_v34  ;;  %v14009_v51 = vadd.f32 %v17911_v7, %v18130_v28  ;;  %v14013_v12 = vadd.f32 %v17911_v7, %v18132_v54  ;;  %v18134_v14 = vld [vmem:[#allocation175_spill] sm:$0xff]  ;;  %v18136_v34 = vld [vmem:[#allocation176_spill] sm:$0xff]  ;;  %v3220_v54 = vmax.f32 %v13616_v21, 0.0  ;;  %v3230_v21 = vmax.f32 %v13656_v17, 0.0 }
 0x593   :  { %18127 = vst [vmem:[#allocation144_spill] sm:$0xff] %v14001_v46  ;;  %18129 = vst [vmem:[#allocation116_spill] sm:$0xff] %v14005_v6  ;;  %v14017_v9 = vadd.f32 %v17911_v7, %v18134_v14  ;;  %v14021_v63 = vadd.f32 %v17911_v7, %v18136_v34  ;;  %v18138_v46 = vld [vmem:[#allocation177_spill] sm:$0xff]  ;;  %v18141_v6 = vld [vmem:[#allocation35_spill] sm:$0xff]  ;;  %v3221_v14 = vmax.f32 %v13620_v26, 0.0  ;;  %v3223_v34 = vmax.f32 %v13628_v38, 0.0 }
 0x594   :  { %18131 = vst [vmem:[#allocation145_spill] sm:$0xff] %v14009_v51  ;;  %18133 = vst [vmem:[#allocation162_spill] sm:$0xff] %v14013_v12  ;;  %v14025_v4 = vadd.f32 %v17911_v7, %v18138_v46  ;;  %v18142_v28 = vld [vmem:[#allocation37_spill] sm:$0xff]  ;;  %v3216_v12 = vmax.f32 %v13600_v57, 0.0  ;;  %v3225_v46 = vmax.f32 %v13636_v32, 0.0  ;;  %v3226_v57 = vmax.f32 %v13640_v33, 0.0 }
 0x595   :  { %18135 = vst [vmem:[#allocation163_spill] sm:$0xff] %v14017_v9  ;;  %18137 = vst [vmem:[#allocation164_spill] sm:$0xff] %v14021_v63  ;;  %v18143_v51 = vld [vmem:[#allocation41_spill] sm:$0xff]  ;;  %v3222_v9 = vmax.f32 %v13624_v36, 0.0  ;;  %v3224_v63 = vmax.f32 %v13632_v44, 0.0  ;;  %v3231_v26 = vmax.f32 %v13660_v31, 0.0 }
 0x596   :  { %18139 = vst [vmem:[#allocation165_spill] sm:$0xff] %v14025_v4  ;;  %v18140_v4 = vld [vmem:[#allocation33_spill] sm:$0xff]  ;;  %v3232_v36 = vmax.f32 %v18150_v5, 0.0  ;;  %v3233_v38 = vmax.f32 %v18151_v23, 0.0  ;;  %v3234_v44 = vmax.f32 %v18152_v53, 0.0  ;;  %v3235_v32 = vmax.f32 %v18153_v62, 0.0 }
 0x597   :  { %v3236_v33 = vmax.f32 %v18154_v39, 0.0  ;;  %18156 = vst [vmem:[#allocation166_spill] sm:$0xff] %v14070_v37  ;;  %v3238_v17 = vmax.f32 %v18157_v13, 0.0  ;;  %v3239_v31 = vmax.f32 %v18158_v56, 0.0  ;;  %v3240_v5 = vmax.f32 %v13703_v16, 0.0  ;;  %18160 = vst [vmem:[#allocation117_spill] sm:$0xff] %v14086_v41 }
 0x598   :  { %v3241_v23 = vmax.f32 %v13707_v19, 0.0  ;;  %v3242_v53 = vmax.f32 %v13711_v0, 0.0  ;;  %v3243_v62 = vmax.f32 %v13715_v3, 0.0  ;;  %v3244_v39 = vmax.f32 %v13720_v30, 0.0  ;;  %v18169_v7 = vld [vmem:[#allocation102_spill] sm:$0xff] }
 0x599   :  { %v14084_v58 = vrot.slane %v3216_v12, 2  ;;  %v3407_v40 = vrot.slane %v3220_v54, 2  ;;  %v3409_v13 = vrot.slane %v3221_v14, 2  ;;  %v3411_v56 = vrot.slane %v3222_v9, 2 }
 0x59a   :  { %v3413_v18 = vrot.slane %v3223_v34, 2  ;;  %v3415_v16 = vrot.slane %v3224_v63, 2  ;;  %v3417_v27 = vrot.slane %v3225_v46, 2  ;;  %v3419_v19 = vrot.slane %v3226_v57, 2 }
 0x59b   :  { %18159 = vst [vmem:[#allocation167_spill] sm:$0xff] %v14084_v58  ;;  %v3410_v0 = vsel %vm3373_vm5, %v3407_v40, %v3409_v13  ;;  %v3412_v30 = vsel %vm3373_vm5, %v3409_v13, %v3411_v56  ;;  %v3421_v3 = vrot.slane %v3227_v49, 2  ;;  %v3423_v63 = vrot.slane %v3228_v43, 2 }
 0x59c   :  { %v3414_v59 = vsel %vm3373_vm5, %v3411_v56, %v3413_v18  ;;  %v3416_v37 = vsel %vm3373_vm5, %v3413_v18, %v3415_v16  ;;  %v3418_v12 = vsel %vm3373_vm5, %v3415_v16, %v3417_v27  ;;  %v3420_v54 = vsel %vm3373_vm5, %v3417_v27, %v3419_v19 }
 0x59d   :  { %v3422_v9 = vsel %vm3373_vm5, %v3419_v19, %v3421_v3  ;;  %v3425_v14 = vrot.slane %v3229_v2, 2  ;;  %v3427_v34 = vrot.slane %v3230_v21, 2  ;;  %v3429_v22 = vrot.slane %v3231_v26, 2 }
 0x59e   :  { %v3431_v46 = vrot.slane %v3232_v36, 2  ;;  %v3433_v57 = vrot.slane %v3233_v38, 2  ;;  %v3435_v15 = vrot.slane %v3234_v44, 2  ;;  %v3424_v13 = vsel %vm3373_vm5, %v3421_v3, %v3423_v63 }
 0x59f   :  { %v3426_v49 = vsel %vm3373_vm5, %v3423_v63, %v3425_v14  ;;  %v3428_v56 = vsel %vm3373_vm5, %v3425_v14, %v3427_v34  ;;  %v3437_v18 = vrot.slane %v3235_v32, 2  ;;  %v3430_v16 = vsel %vm3373_vm5, %v3427_v34, %v3429_v22 }
 0x5a0   :  { %v3432_v27 = vsel %vm3373_vm5, %v3429_v22, %v3431_v46  ;;  %v3434_v19 = vsel %vm3373_vm5, %v3431_v46, %v3433_v57  ;;  %v3436_v43 = vsel %vm3373_vm5, %v3433_v57, %v3435_v15  ;;  %v3439_v21 = vrot.slane %v3236_v33, 2 }
 0x5a1   :  { %v3438_v2 = vsel %vm3373_vm5, %v3435_v15, %v3437_v18  ;;  %v3441_v26 = vrot.slane %v3237_v55, 2  ;;  %v3443_v36 = vrot.slane %v3238_v17, 2  ;;  %v3445_v38 = vrot.slane %v3239_v31, 2  ;;  %v18161_v55 = vld [vmem:[#allocation138_spill] sm:$0xff]  ;;  %v18162_v31 = vld [vmem:[#allocation89_spill] sm:$0xff] }
 0x5a2   :  { %v3447_v44 = vrot.slane %v3240_v5, 2  ;;  %v3449_v3 = vrot.slane %v3241_v23, 2  ;;  %v3451_v63 = vrot.slane %v3242_v53, 2  ;;  %v3440_v14 = vsel %vm3373_vm5, %v3437_v18, %v3439_v21  ;;  %v18163_v18 = vld [vmem:[#allocation139_spill] sm:$0xff] }
 0x5a3   :  { %v3442_v32 = vsel %vm3373_vm5, %v3439_v21, %v3441_v26  ;;  %v3444_v34 = vsel %vm3373_vm5, %v3441_v26, %v3443_v36  ;;  %v3453_v22 = vrot.slane %v3243_v62, 2  ;;  %v3446_v46 = vsel %vm3373_vm5, %v3443_v36, %v3445_v38 }
 0x5a4   :  { %v3448_v57 = vsel %vm3373_vm5, %v3445_v38, %v3447_v44  ;;  %v3450_v15 = vsel %vm3373_vm5, %v3447_v44, %v3449_v3  ;;  %v3452_v33 = vsel %vm3373_vm5, %v3449_v3, %v3451_v63  ;;  %v3194_v17 = vmax.f32 %v18161_v55, 0.0  ;;  %v18165_v38 = vld [vmem:[#allocation99_spill] sm:$0xff]  ;;  %v18166_v3 = vld [vmem:[#allocation100_spill] sm:$0xff] }
 0x5a5   :  { %v3195_v5 = vmax.f32 %v18162_v31, 0.0  ;;  %v3454_v23 = vsel %vm3373_vm5, %v3451_v63, %v3453_v22  ;;  %v3455_v53 = vrot.slane %v3244_v39, 2  ;;  %v3196_v21 = vmax.f32 %v18163_v18, 0.0  ;;  %v18168_v63 = vld [vmem:[#allocation101_spill] sm:$0xff] }
 0x5a6   :  { %v3197_v26 = vmax.f32 %v18164_v20, 0.0  ;;  %v3402_v62 = vsel %vm3373_vm5, %v14084_v58, %v14068_v29  ;;  %v3408_v36 = vsel %vm3373_vm5, %v14086_v41, %v3407_v40  ;;  %v3198_v44 = vmax.f32 %v18165_v38, 0.0  ;;  %v18230_v29 = vld [vmem:[#allocation51_spill] sm:$0xff] }
 0x5a7   :  { %v3199_v55 = vmax.f32 %v18166_v3, 0.0  ;;  %v3456_v31 = vsel %vm3373_vm5, %v3453_v22, %v3455_v53  ;;  %v3458_v39 = vsel %vm3373_vm5, %v3455_v53, %v18167_v60  ;;  %v3200_v18 = vmax.f32 %v18168_v63, 0.0 }
 0x5a8   :  { %v3201_v20 = vmax.f32 %v18169_v7, 0.0  ;;  %v3259_v58 = vmax.f32 %v13777_v47, 0.0  ;;  %v18171_v40 = vmax.f32 %v13440_v42, 0.0  ;;  %v18172_v3 = vmax.f32 %v13444_v11, 0.0 }
 0x5a9   :  { %v18173_v60 = vmax.f32 %v13448_v52, 0.0  ;;  %v18174_v7 = vmax.f32 %v13452_v8, 0.0  ;;  %v18175_v63 = vmax.f32 %v13456_v48, 0.0  ;;  %v18176_v42 = vmax.f32 %v13460_v10, 0.0 }
 0x5aa   :  { %v14132_v38 = vadd.f32 %v3402_v62, %v18171_v40  ;;  %v14137_v22 = vadd.f32 %v14082_v25, %v18172_v3  ;;  %v18177_v11 = vmax.f32 %v13464_v24, 0.0  ;;  %v18178_v52 = vmax.f32 %v13468_v1, 0.0 }
 0x5ab   :  { %v14141_v53 = vadd.f32 %v3408_v36, %v18173_v60  ;;  %v14145_v50 = vadd.f32 %v3410_v0, %v18174_v7  ;;  %v14149_v47 = vadd.f32 %v3412_v30, %v18175_v63  ;;  %v14153_v62 = vadd.f32 %v3414_v59, %v18176_v42  ;;  %v18190_v7 = vld [vmem:[#allocation86_spill] sm:$0xff]  ;;  %v18192_v63 = vld [vmem:[#allocation87_spill] sm:$0xff]  ;;  %v18195_v42 = vld [vmem:[#allocation88_spill] sm:$0xff] }
 0x5ac   :  { %v14157_v25 = vadd.f32 %v3416_v37, %v18177_v11  ;;  %v14161_v36 = vadd.f32 %v3418_v12, %v18178_v52  ;;  %v18179_v8 = vmax.f32 %v13472_v45, 0.0  ;;  %v18180_v48 = vmax.f32 %v18140_v4, 0.0  ;;  %v18184_v45 = vld [vmem:[#allocation83_spill] sm:$0xff]  ;;  %v18186_v4 = vld [vmem:[#allocation84_spill] sm:$0xff] }
 0x5ad   :  { %v18181_v10 = vmax.f32 %v18141_v6, 0.0  ;;  %v18182_v24 = vmax.f32 %v18142_v28, 0.0  ;;  %v18183_v1 = vmax.f32 %v18143_v51, 0.0  ;;  %v18188_v6 = vld [vmem:[#allocation85_spill] sm:$0xff]  ;;  %v18191_v28 = vmax.f32 %v18190_v7, 0.0 }
 0x5ae   :  { %v14165_v0 = vadd.f32 %v3420_v54, %v18179_v8  ;;  %v14169_v30 = vadd.f32 %v3422_v9, %v18180_v48  ;;  %v18185_v54 = vmax.f32 %v18184_v45, 0.0  ;;  %v18187_v9 = vmax.f32 %v18186_v4, 0.0  ;;  %v18217_v4 = vld [vmem:[#allocation26_spill] sm:$0xff]  ;;  %v18220_v7 = vld [vmem:[#allocation149_spill] sm:$0xff] }
 0x5af   :  { %v14173_v59 = vadd.f32 %v3424_v13, %v18181_v10  ;;  %v14177_v37 = vadd.f32 %v3426_v49, %v18182_v24  ;;  %v14181_v12 = vadd.f32 %v3428_v56, %v18183_v1  ;;  %v18189_v13 = vmax.f32 %v18188_v6, 0.0  ;;  %v18206_v24 = vld [vmem:[#allocation15_spill] sm:$0xff] }
 0x5b0   :  { %v14185_v40 = vadd.f32 %v3430_v16, %v18185_v54  ;;  %v14189_v3 = vadd.f32 %v3432_v27, %v18187_v9  ;;  %v14197_v49 = vadd.f32 %v3436_v43, %v18191_v28  ;;  %v18193_v51 = vmax.f32 %v18192_v63, 0.0  ;;  %v18218_v6 = vld [vmem:[#allocation27_spill] sm:$0xff]  ;;  %v18221_v63 = vld [vmem:[#allocation150_spill] sm:$0xff] }
 0x5b1   :  { %v14193_v60 = vadd.f32 %v3434_v19, %v18189_v13  ;;  %v18196_v11 = vmax.f32 %v18195_v42, 0.0  ;;  %v14207_v52 = vadd.f32 %v3442_v32, %v3194_v17  ;;  %v14209_v27 = vadd.f32 %v3444_v34, %v3195_v5  ;;  %v18208_v32 = vld [vmem:[#allocation17_spill] sm:$0xff]  ;;  %v18222_v42 = vld [vmem:[#allocation151_spill] sm:$0xff] }
 0x5b2   :  { %v14201_v56 = vadd.f32 %v3438_v2, %v18193_v51  ;;  %v14211_v8 = vadd.f32 %v3446_v46, %v3196_v21  ;;  %v14213_v19 = vadd.f32 %v3448_v57, %v3197_v26  ;;  %v14215_v48 = vadd.f32 %v3450_v15, %v3198_v44  ;;  %v18210_v46 = vld [vmem:[#allocation18_spill] sm:$0xff]  ;;  %v18211_v57 = vld [vmem:[#allocation20_spill] sm:$0xff]  ;;  %v18212_v15 = vld [vmem:[#allocation21_spill] sm:$0xff] }
 0x5b3   :  { %v14205_v16 = vadd.f32 %v3440_v14, %v18196_v11  ;;  %18198 = vst [vmem:[#allocation72_spill] sm:$0xff] %v14207_v52  ;;  %18199 = vst [vmem:[#allocation118_spill] sm:$0xff] %v14209_v27  ;;  %v14217_v43 = vadd.f32 %v3452_v33, %v3199_v55  ;;  %v14219_v10 = vadd.f32 %v3454_v23, %v3200_v18  ;;  %v3260_v1 = vmax.f32 %v18206_v24, 0.0  ;;  %v18207_v14 = vld [vmem:[#allocation16_spill] sm:$0xff]  ;;  %v18213_v33 = vld [vmem:[#allocation22_spill] sm:$0xff] }
 0x5b4   :  { %18194 = vst [vmem:[#allocation146_spill] sm:$0xff] %v14201_v56  ;;  %18200 = vst [vmem:[#allocation119_spill] sm:$0xff] %v14211_v8  ;;  %v14221_v2 = vadd.f32 %v3456_v31, %v3201_v20  ;;  %v3261_v45 = vmax.f32 %v18207_v14, 0.0  ;;  %v3262_v17 = vmax.f32 %v18208_v32, 0.0  ;;  %v14226_v34 = vadd.f32 %v3458_v39, %v3202_v35  ;;  %v18214_v23 = vld [vmem:[#allocation23_spill] sm:$0xff]  ;;  %v18215_v31 = vld [vmem:[#allocation24_spill] sm:$0xff] }
 0x5b5   :  { %18197 = vst [vmem:[#allocation71_spill] sm:$0xff] %v14205_v16  ;;  %18201 = vst [vmem:[#allocation120_spill] sm:$0xff] %v14213_v19  ;;  %v3263_v5 = vmax.f32 %v18210_v46, 0.0  ;;  %v3264_v21 = vmax.f32 %v18211_v57, 0.0  ;;  %v3265_v26 = vmax.f32 %v18212_v15, 0.0  ;;  %v3266_v44 = vmax.f32 %v18213_v33, 0.0 }
 0x5b6   :  { %18202 = vst [vmem:[#allocation121_spill] sm:$0xff] %v14215_v48  ;;  %18203 = vst [vmem:[#allocation122_spill] sm:$0xff] %v14217_v43  ;;  %v3267_v55 = vmax.f32 %v18214_v23, 0.0  ;;  %v3268_v18 = vmax.f32 %v18215_v31, 0.0  ;;  %v18216_v20 = vld [vmem:[#allocation25_spill] sm:$0xff]  ;;  %v3270_v9 = vmax.f32 %v18217_v4, 0.0 }
 0x5b7   :  { %18204 = vst [vmem:[#allocation123_spill] sm:$0xff] %v14219_v10  ;;  %18205 = vst [vmem:[#allocation124_spill] sm:$0xff] %v14221_v2  ;;  %v3269_v54 = vmax.f32 %v18216_v20, 0.0  ;;  %v3271_v13 = vmax.f32 %v18218_v6, 0.0  ;;  %v18219_v35 = vld [vmem:[#allocation148_spill] sm:$0xff]  ;;  %v3273_v28 = vmax.f32 %v18220_v7, 0.0 }
 0x5b8   :  { %18209 = vst [vmem:[#allocation125_spill] sm:$0xff] %v14226_v34  ;;  %v3272_v39 = vmax.f32 %v18219_v35, 0.0  ;;  %v3274_v51 = vmax.f32 %v18221_v63, 0.0  ;;  %v3275_v11 = vmax.f32 %v18222_v42, 0.0  ;;  %v18223_v24 = vld [vmem:[#allocation152_spill] sm:$0xff]  ;;  %v18224_v32 = vld [vmem:[#allocation153_spill] sm:$0xff] }
 0x5b9   :  { %v3276_v14 = vmax.f32 %v18223_v24, 0.0  ;;  %v3277_v46 = vmax.f32 %v18224_v32, 0.0  ;;  %v18225_v57 = vld [vmem:[#allocation28_spill] sm:$0xff]  ;;  %v18226_v33 = vld [vmem:[#allocation154_spill] sm:$0xff]  ;;  %v18227_v31 = vld [vmem:[#allocation49_spill] sm:$0xff]  ;;  %v14246_v4 = vrot.slane %v3259_v58, 4 }
 0x5ba   :  { %v3278_v15 = vmax.f32 %v18225_v57, 0.0  ;;  %v3279_v23 = vmax.f32 %v18226_v33, 0.0  ;;  %v3280_v20 = vmax.f32 %v18227_v31, 0.0  ;;  %v14248_v6 = vrot.slane %v3260_v1, 4  ;;  %v18229_v35 = vld [vmem:[#allocation50_spill] sm:$0xff]  ;;  %v18231_v34 = vld [vmem:[#allocation53_spill] sm:$0xff] }
 0x5bb   :  { %v3281_v7 = vmax.f32 %v18229_v35, 0.0  ;;  %v3282_v63 = vmax.f32 %v18230_v29, 0.0  ;;  %v3283_v42 = vmax.f32 %v18231_v34, 0.0  ;;  %v14253_v41 = vrot.slane %v3262_v17, 4  ;;  %v18232_v24 = vld [vmem:[#allocation54_spill] sm:$0xff]  ;;  %v18233_v2 = vld [vmem:[#allocation57_spill] sm:$0xff] }
 0x5bc   :  { %18228 = vst [vmem:[#allocation126_spill] sm:$0xff] %v14248_v6  ;;  %v3284_v32 = vmax.f32 %v18232_v24, 0.0  ;;  %v3285_v57 = vmax.f32 %v18233_v2, 0.0  ;;  %v18234_v10 = vld [vmem:[#allocation58_spill] sm:$0xff]  ;;  %v14261_v58 = vsel %vm3587_vm6, %v14246_v4, %v14248_v6  ;;  %v18235_v1 = vmax.f32 %v13773_v61, 0.0  ;;  %v18247_v16 = vld [vmem:[#allocation45_spill] sm:$0xff] }
 0x5bd   :  { %v3286_v33 = vmax.f32 %v18234_v10, 0.0  ;;  %v14267_v29 = vrot.slane %v3261_v45, 4  ;;  %v3623_v34 = vrot.slane %v3263_v5, 4  ;;  %v3625_v17 = vrot.slane %v3264_v21, 4  ;;  %v18246_v52 = vld [vmem:[#allocation134_spill] sm:$0xff]  ;;  %v18252_v56 = vld [vmem:[#allocation159_spill] sm:$0xff] }
 0x5be   :  { %v14265_v31 = vrot.slane %v18235_v1, 4  ;;  %v3627_v35 = vrot.slane %v3265_v26, 4  ;;  %v3629_v43 = vrot.slane %v3266_v44, 4  ;;  %v3631_v24 = vrot.slane %v3267_v55, 4 }
 0x5bf   :  { %18237 = vst [vmem:[#allocation128_spill] sm:$0xff] %v14267_v29  ;;  %v3633_v48 = vrot.slane %v3268_v18, 4  ;;  %v3624_v10 = vsel %vm3587_vm6, %v14253_v41, %v3623_v34  ;;  %v3626_v2 = vsel %vm3587_vm6, %v3623_v34, %v3625_v17  ;;  %v3635_v19 = vrot.slane %v3269_v54, 4 }
 0x5c0   :  { %18236 = vst [vmem:[#allocation127_spill] sm:$0xff] %v14265_v31  ;;  %v3637_v6 = vrot.slane %v3270_v9, 4  ;;  %v3628_v8 = vsel %vm3587_vm6, %v3625_v17, %v3627_v35  ;;  %v3630_v61 = vsel %vm3587_vm6, %v3627_v35, %v3629_v43  ;;  %v3632_v45 = vsel %vm3587_vm6, %v3629_v43, %v3631_v24 }
 0x5c1   :  { %v3634_v5 = vsel %vm3587_vm6, %v3631_v24, %v3633_v48  ;;  %v3636_v21 = vsel %vm3587_vm6, %v3633_v48, %v3635_v19  ;;  %v3639_v44 = vrot.slane %v3271_v13, 4  ;;  %v3641_v55 = vrot.slane %v3272_v39, 4 }
 0x5c2   :  { %v3638_v26 = vsel %vm3587_vm6, %v3635_v19, %v3637_v6  ;;  %v3643_v18 = vrot.slane %v3273_v28, 4  ;;  %v3645_v1 = vrot.slane %v3274_v51, 4  ;;  %v3647_v27 = vrot.slane %v3275_v11, 4 }
 0x5c3   :  { %v3649_v34 = vrot.slane %v3276_v14, 4  ;;  %v3640_v54 = vsel %vm3587_vm6, %v3637_v6, %v3639_v44  ;;  %v3642_v9 = vsel %vm3587_vm6, %v3639_v44, %v3641_v55  ;;  %v3651_v17 = vrot.slane %v3277_v46, 4 }
 0x5c4   :  { %v3653_v35 = vrot.slane %v3278_v15, 4  ;;  %v3644_v43 = vsel %vm3587_vm6, %v3641_v55, %v3643_v18  ;;  %v3646_v24 = vsel %vm3587_vm6, %v3643_v18, %v3645_v1  ;;  %v3648_v48 = vsel %vm3587_vm6, %v3645_v1, %v3647_v27 }
 0x5c5   :  { %v3650_v19 = vsel %vm3587_vm6, %v3647_v27, %v3649_v34  ;;  %v3652_v13 = vsel %vm3587_vm6, %v3649_v34, %v3651_v17  ;;  %v3655_v28 = vrot.slane %v3279_v23, 4  ;;  %v3657_v51 = vrot.slane %v3280_v20, 4  ;;  %v18238_v23 = vld [vmem:[#allocation178_spill] sm:$0xff]  ;;  %v18239_v20 = vld [vmem:[#allocation147_spill] sm:$0xff] }
 0x5c6   :  { %v3654_v39 = vsel %vm3587_vm6, %v3651_v17, %v3653_v35  ;;  %v3659_v11 = vrot.slane %v3281_v7, 4  ;;  %v3661_v14 = vrot.slane %v3282_v63, 4  ;;  %v3663_v6 = vrot.slane %v3283_v42, 4 }
 0x5c7   :  { %v3665_v44 = vrot.slane %v3284_v32, 4  ;;  %v3656_v46 = vsel %vm3587_vm6, %v3653_v35, %v3655_v28  ;;  %v3658_v15 = vsel %vm3587_vm6, %v3655_v28, %v3657_v51  ;;  %v3667_v55 = vrot.slane %v3285_v57, 4  ;;  %v18241_v32 = vld [vmem:[#allocation67_spill] sm:$0xff]  ;;  %v18244_v28 = vld [vmem:[#allocation105_spill] sm:$0xff] }
 0x5c8   :  { %v3669_v18 = vrot.slane %v3286_v33, 4  ;;  %v3660_v1 = vsel %vm3587_vm6, %v3657_v51, %v3659_v11  ;;  %v3662_v27 = vsel %vm3587_vm6, %v3659_v11, %v3661_v14  ;;  %v3664_v34 = vsel %vm3587_vm6, %v3661_v14, %v3663_v6  ;;  %v18243_v33 = vld [vmem:[#allocation104_spill] sm:$0xff]  ;;  %v18245_v11 = vld [vmem:[#allocation106_spill] sm:$0xff] }
 0x5c9   :  { %v3666_v17 = vsel %vm3587_vm6, %v3663_v6, %v3665_v44  ;;  %v14294_v7 = vadd.f32 %v18239_v20, %v18238_v23  ;;  %v3668_v63 = vsel %vm3587_vm6, %v3665_v44, %v3667_v55  ;;  %v18248_v23 = vld [vmem:[#allocation157_spill] sm:$0xff]  ;;  %v3622_v14 = vsel %vm3587_vm6, %v14267_v29, %v14253_v41  ;;  %v18292_v29 = vld [vmem:[#allocation115_spill] sm:$0xff] }
 0x5ca   :  { %v3670_v42 = vsel %vm3587_vm6, %v3667_v55, %v3669_v18  ;;  %v14300_v57 = vsel %vm3587_vm6, %v3669_v18, %v18241_v32  ;;  %v3300_v20 = vmax.f32 %v18248_v23, 0.0  ;;  %v3616_v55 = vsel %vm3587_vm6, %v14265_v31, %v14246_v4  ;;  %v18250_v18 = vld [vmem:[#allocation66_spill] sm:$0xff]  ;;  %v18293_v31 = vld [vmem:[#allocation144_spill] sm:$0xff] }
 0x5cb   :  { %18240 = vst [vmem:[#allocation129_spill] sm:$0xff] %v14294_v7  ;;  %18242 = vst [vmem:[#allocation130_spill] sm:$0xff] %v14300_v57  ;;  %v18249_v7 = vld [vmem:[#allocation65_spill] sm:$0xff]  ;;  %v18251_v57 = vld [vmem:[#allocation158_spill] sm:$0xff]  ;;  %v14318_v6 = vadd.f32 %v3616_v55, %v14132_v38  ;;  %v3304_v51 = vmax.f32 %v18252_v56, 0.0  ;;  %v14326_v23 = vadd.f32 %v3622_v14, %v14141_v53  ;;  %v14329_v4 = vadd.f32 %v3624_v10, %v14145_v50 }
 0x5cc   :  { %v3301_v44 = vmax.f32 %v18249_v7, 0.0  ;;  %v3303_v35 = vmax.f32 %v18251_v57, 0.0  ;;  %v14323_v7 = vadd.f32 %v14261_v58, %v14137_v22  ;;  %v14332_v57 = vadd.f32 %v3626_v2, %v14149_v47  ;;  %v18281_v14 = vld [vmem:[#allocation92_spill] sm:$0xff]  ;;  %v18282_v55 = vld [vmem:[#allocation93_spill] sm:$0xff]  ;;  %v18291_v32 = vld [vmem:[#allocation114_spill] sm:$0xff] }
 0x5cd   :  { %v14335_v41 = vadd.f32 %v3628_v8, %v14153_v62  ;;  %v14338_v38 = vadd.f32 %v3630_v61, %v14157_v25  ;;  %v14341_v56 = vadd.f32 %v3632_v45, %v14161_v36  ;;  %v14344_v22 = vadd.f32 %v3634_v5, %v14165_v0 }
 0x5ce   :  { %v14347_v53 = vadd.f32 %v3636_v21, %v14169_v30  ;;  %v14350_v50 = vadd.f32 %v3638_v26, %v14173_v59  ;;  %v14353_v47 = vadd.f32 %v3640_v54, %v14177_v37  ;;  %v14356_v62 = vadd.f32 %v3642_v9, %v14181_v12  ;;  %v18257_v59 = vld [vmem:[#allocation146_spill] sm:$0xff]  ;;  %v18259_v37 = vld [vmem:[#allocation71_spill] sm:$0xff]  ;;  %v18261_v12 = vld [vmem:[#allocation72_spill] sm:$0xff] }
 0x5cf   :  { %v14359_v25 = vadd.f32 %v3644_v43, %v14185_v40  ;;  %v14362_v36 = vadd.f32 %v3646_v24, %v14189_v3  ;;  %v14365_v0 = vadd.f32 %v3648_v48, %v14193_v60  ;;  %v14368_v30 = vadd.f32 %v3650_v19, %v14197_v49  ;;  %v18263_v40 = vld [vmem:[#allocation118_spill] sm:$0xff]  ;;  %v18265_v3 = vld [vmem:[#allocation119_spill] sm:$0xff]  ;;  %v18267_v60 = vld [vmem:[#allocation120_spill] sm:$0xff] }
 0x5d0   :  { %v14371_v8 = vadd.f32 %v3652_v13, %v18257_v59  ;;  %v14374_v58 = vadd.f32 %v3654_v39, %v18259_v37  ;;  %v14377_v10 = vadd.f32 %v3656_v46, %v18261_v12  ;;  %v14380_v2 = vadd.f32 %v3658_v15, %v18263_v40  ;;  %v18269_v49 = vld [vmem:[#allocation121_spill] sm:$0xff]  ;;  %v18271_v21 = vld [vmem:[#allocation160_spill] sm:$0xff]  ;;  %v18272_v54 = vld [vmem:[#allocation122_spill] sm:$0xff] }
 0x5d1   :  { %18253 = vst [vmem:[#allocation131_spill] sm:$0xff] %v14359_v25  ;;  %18254 = vst [vmem:[#allocation168_spill] sm:$0xff] %v14362_v36  ;;  %v14383_v61 = vadd.f32 %v3660_v1, %v18265_v3  ;;  %v14386_v45 = vadd.f32 %v3662_v27, %v18267_v60  ;;  %v14389_v5 = vadd.f32 %v3664_v34, %v18269_v49  ;;  %v3305_v26 = vmax.f32 %v18271_v21, 0.0  ;;  %v18274_v43 = vld [vmem:[#allocation123_spill] sm:$0xff]  ;;  %v18276_v48 = vld [vmem:[#allocation124_spill] sm:$0xff] }
 0x5d2   :  { %18255 = vst [vmem:[#allocation169_spill] sm:$0xff] %v14365_v0  ;;  %18256 = vst [vmem:[#allocation170_spill] sm:$0xff] %v14368_v30  ;;  %v14393_v9 = vadd.f32 %v3666_v17, %v18272_v54  ;;  %v14396_v24 = vadd.f32 %v3668_v63, %v18274_v43  ;;  %v14399_v19 = vadd.f32 %v3670_v42, %v18276_v48  ;;  %v18278_v13 = vld [vmem:[#allocation161_spill] sm:$0xff]  ;;  %v18279_v46 = vld [vmem:[#allocation90_spill] sm:$0xff]  ;;  %v3309_v34 = vmax.f32 %v18281_v14, 0.0 }
 0x5d3   :  { %18258 = vst [vmem:[#allocation171_spill] sm:$0xff] %v14371_v8  ;;  %18260 = vst [vmem:[#allocation172_spill] sm:$0xff] %v14374_v58  ;;  %v3306_v39 = vmax.f32 %v18278_v13, 0.0  ;;  %v3307_v15 = vmax.f32 %v18279_v46, 0.0  ;;  %v18280_v1 = vld [vmem:[#allocation91_spill] sm:$0xff]  ;;  %v3310_v59 = vmax.f32 %v18282_v55, 0.0 }
 0x5d4   :  { %18262 = vst [vmem:[#allocation173_spill] sm:$0xff] %v14377_v10  ;;  %18264 = vst [vmem:[#allocation174_spill] sm:$0xff] %v14380_v2  ;;  %v3308_v27 = vmax.f32 %v18280_v1, 0.0  ;;  %v18283_v37 = vld [vmem:[#allocation94_spill] sm:$0xff]  ;;  %v18284_v17 = vld [vmem:[#allocation95_spill] sm:$0xff]  ;;  %v3319_v14 = vmax.f32 %v18291_v32, 0.0 }
 0x5d5   :  { %18266 = vst [vmem:[#allocation175_spill] sm:$0xff] %v14383_v61  ;;  %18268 = vst [vmem:[#allocation176_spill] sm:$0xff] %v14386_v45  ;;  %v3311_v12 = vmax.f32 %v18283_v37, 0.0  ;;  %v3312_v40 = vmax.f32 %v18284_v17, 0.0  ;;  %v18285_v3 = vld [vmem:[#allocation96_spill] sm:$0xff]  ;;  %v18286_v60 = vld [vmem:[#allocation97_spill] sm:$0xff] }
 0x5d6   :  { %18270 = vst [vmem:[#allocation177_spill] sm:$0xff] %v14389_v5  ;;  %18273 = vst [vmem:[#allocation33_spill] sm:$0xff] %v14393_v9  ;;  %v3313_v63 = vmax.f32 %v18285_v3, 0.0  ;;  %v3314_v49 = vmax.f32 %v18286_v60, 0.0  ;;  %v18287_v42 = vld [vmem:[#allocation142_spill] sm:$0xff]  ;;  %v18288_v54 = vld [vmem:[#allocation112_spill] sm:$0xff] }
 0x5d7   :  { %18275 = vst [vmem:[#allocation35_spill] sm:$0xff] %v14396_v24  ;;  %18277 = vst [vmem:[#allocation37_spill] sm:$0xff] %v14399_v19  ;;  %v3315_v21 = vmax.f32 %v18287_v42, 0.0  ;;  %v3316_v43 = vmax.f32 %v18288_v54, 0.0  ;;  %v18289_v48 = vld [vmem:[#allocation143_spill] sm:$0xff]  ;;  %v18290_v46 = vld [vmem:[#allocation113_spill] sm:$0xff] }
 0x5d8   :  { %v3317_v13 = vmax.f32 %v18289_v48, 0.0  ;;  %v3318_v1 = vmax.f32 %v18290_v46, 0.0  ;;  %v3320_v55 = vmax.f32 %v18292_v29, 0.0  ;;  %v3321_v37 = vmax.f32 %v18293_v31, 0.0  ;;  %v18294_v19 = vld [vmem:[#allocation116_spill] sm:$0xff]  ;;  %v18295_v24 = vld [vmem:[#allocation145_spill] sm:$0xff] }
 0x5d9   :  { %v3322_v17 = vmax.f32 %v18294_v19, 0.0  ;;  %v3323_v3 = vmax.f32 %v18295_v24, 0.0  ;;  %v18296_v9 = vld [vmem:[#allocation162_spill] sm:$0xff]  ;;  %v14420_v5 = vrot.slane %v3300_v20, 6  ;;  %v18298_v42 = vld [vmem:[#allocation163_spill] sm:$0xff]  ;;  %v14423_v45 = vrot.slane %v3301_v44, 6 }
 0x5da   :  { %v3324_v60 = vmax.f32 %v18296_v9, 0.0  ;;  %v3325_v54 = vmax.f32 %v18298_v42, 0.0  ;;  %v14425_v48 = vrot.slane %v3303_v35, 6  ;;  %v3835_v46 = vrot.slane %v3304_v51, 6  ;;  %v18300_v32 = vld [vmem:[#allocation164_spill] sm:$0xff]  ;;  %v18301_v29 = vld [vmem:[#allocation165_spill] sm:$0xff] }
 0x5db   :  { %18297 = vst [vmem:[#allocation41_spill] sm:$0xff] %v14420_v5  ;;  %v3326_v61 = vmax.f32 %v18300_v32, 0.0  ;;  %v3327_v2 = vmax.f32 %v18301_v29, 0.0  ;;  %v18302_v31 = vld [vmem:[#allocation129_spill] sm:$0xff]  ;;  %v18303_v19 = vmax.f32 %v18243_v33, 0.0  ;;  %v18304_v20 = vmax.f32 %v18244_v28, 0.0 }
 0x5dc   :  { %18299 = vst [vmem:[#allocation36_spill] sm:$0xff] %v14425_v48  ;;  %v3328_v10 = vmax.f32 %v18302_v31, 0.0  ;;  %v14441_v35 = vsel %vm3801_vm4, %v14420_v5, %v14423_v45  ;;  %v18305_v51 = vmax.f32 %v18250_v18, 0.0  ;;  %v14449_v42 = vsel %vm3801_vm4, %v14425_v48, %v3835_v46  ;;  %v18316_v25 = vld [vmem:[#allocation155_spill] sm:$0xff] }
 0x5dd   :  { %v14432_v24 = vrot.slane %v18303_v19, 2  ;;  %v14436_v9 = vrot.slane %v18304_v20, 2  ;;  %v3837_v33 = vrot.slane %v3305_v26, 6  ;;  %v3839_v32 = vrot.slane %v3306_v39, 6 }
 0x5de   :  { %v14445_v44 = vrot.slane %v18305_v51, 6  ;;  %v3841_v29 = vrot.slane %v3307_v15, 6  ;;  %v3843_v31 = vrot.slane %v3308_v27, 6  ;;  %v3845_v28 = vrot.slane %v3309_v34, 6 }
 0x5df   :  { %v3847_v19 = vrot.slane %v3310_v59, 6  ;;  %v3849_v20 = vrot.slane %v3311_v12, 6  ;;  %v3851_v58 = vrot.slane %v3312_v40, 6  ;;  %v3838_v8 = vsel %vm3801_vm4, %v3835_v46, %v3837_v33 }
 0x5e0   :  { %v3840_v5 = vsel %vm3801_vm4, %v3837_v33, %v3839_v32  ;;  %v3842_v18 = vsel %vm3801_vm4, %v3839_v32, %v3841_v29  ;;  %v3844_v51 = vsel %vm3801_vm4, %v3841_v29, %v3843_v31  ;;  %v3846_v30 = vsel %vm3801_vm4, %v3843_v31, %v3845_v28 }
 0x5e1   :  { %v3848_v48 = vsel %vm3801_vm4, %v3845_v28, %v3847_v19  ;;  %v3850_v26 = vsel %vm3801_vm4, %v3847_v19, %v3849_v20  ;;  %v3852_v39 = vsel %vm3801_vm4, %v3849_v20, %v3851_v58  ;;  %v3853_v15 = vrot.slane %v3313_v63, 6 }
 0x5e2   :  { %v3855_v27 = vrot.slane %v3314_v49, 6  ;;  %v3857_v34 = vrot.slane %v3315_v21, 6  ;;  %v3859_v59 = vrot.slane %v3316_v43, 6  ;;  %v3861_v12 = vrot.slane %v3317_v13, 6 }
 0x5e3   :  { %v3863_v40 = vrot.slane %v3318_v1, 6  ;;  %v3865_v46 = vrot.slane %v3319_v14, 6  ;;  %v3867_v33 = vrot.slane %v3320_v55, 6  ;;  %v3854_v32 = vsel %vm3801_vm4, %v3851_v58, %v3853_v15 }
 0x5e4   :  { %v3856_v29 = vsel %vm3801_vm4, %v3853_v15, %v3855_v27  ;;  %v3858_v31 = vsel %vm3801_vm4, %v3855_v27, %v3857_v34  ;;  %v3860_v28 = vsel %vm3801_vm4, %v3857_v34, %v3859_v59  ;;  %v3862_v19 = vsel %vm3801_vm4, %v3859_v59, %v3861_v12 }
 0x5e5   :  { %v3864_v20 = vsel %vm3801_vm4, %v3861_v12, %v3863_v40  ;;  %v3866_v63 = vsel %vm3801_vm4, %v3863_v40, %v3865_v46  ;;  %v3868_v49 = vsel %vm3801_vm4, %v3865_v46, %v3867_v33  ;;  %v3869_v21 = vrot.slane %v3321_v37, 6  ;;  %v18311_v46 = vld [vmem:[#allocation79_spill] sm:$0xff] }
 0x5e6   :  { %v3871_v43 = vrot.slane %v3322_v17, 6  ;;  %v3873_v13 = vrot.slane %v3323_v3, 6  ;;  %v3875_v1 = vrot.slane %v3324_v60, 6  ;;  %v3877_v14 = vrot.slane %v3325_v54, 6  ;;  %v18309_v60 = vld [vmem:[#allocation74_spill] sm:$0xff] }
 0x5e7   :  { %v3879_v58 = vrot.slane %v3326_v61, 6  ;;  %v3881_v55 = vrot.slane %v3327_v2, 6  ;;  %v14467_v15 = vrot.slane %v3328_v10, 6  ;;  %v3870_v27 = vsel %vm3801_vm4, %v3867_v33, %v3869_v21  ;;  %v18307_v2 = vld [vmem:[#allocation73_spill] sm:$0xff]  ;;  %v18308_v10 = vld [vmem:[#allocation147_spill] sm:$0xff] }
 0x5e8   :  { %v3872_v34 = vsel %vm3801_vm4, %v3869_v21, %v3871_v43  ;;  %v3874_v59 = vsel %vm3801_vm4, %v3871_v43, %v3873_v13  ;;  %v3876_v12 = vsel %vm3801_vm4, %v3873_v13, %v3875_v1  ;;  %v3878_v40 = vsel %vm3801_vm4, %v3875_v1, %v3877_v14  ;;  %v18312_v21 = vld [vmem:[#allocation107_spill] sm:$0xff]  ;;  %v18313_v13 = vld [vmem:[#allocation108_spill] sm:$0xff] }
 0x5e9   :  { %18306 = vst [vmem:[#allocation39_spill] sm:$0xff] %v14467_v15  ;;  %v3880_v37 = vsel %vm3801_vm4, %v3877_v14, %v3879_v58  ;;  %v3882_v17 = vsel %vm3801_vm4, %v3879_v58, %v3881_v55  ;;  %v3884_v61 = vsel %vm3801_vm4, %v3881_v55, %v14467_v15  ;;  %v14480_v3 = vadd.f32 %v18308_v10, %v18307_v2  ;;  %v18314_v14 = vld [vmem:[#allocation135_spill] sm:$0xff] }
 0x5ea   :  { %v14484_v54 = vadd.f32 %v18308_v10, %v18309_v60  ;;  %v3162_v33 = vmax.f32 %v18311_v46, 0.0  ;;  %v3207_v43 = vmax.f32 %v18312_v21, 0.0  ;;  %v3208_v1 = vmax.f32 %v18313_v13, 0.0  ;;  %v18315_v58 = vld [vmem:[#allocation59_spill] sm:$0xff] }
 0x5eb   :  { %v3248_v0 = vmax.f32 %v18314_v14, 0.0  ;;  %v3288_v36 = vmax.f32 %v18315_v58, 0.0  ;;  %v3289_v55 = vmax.f32 %v18316_v25, 0.0  ;;  %v3378_v2 = vsel %vm3373_vm5, %v14432_v24, %v14436_v9 }
 0x5ec   :  { %18310 = vst [vmem:[#allocation40_spill] sm:$0xff] %v14484_v54  ;;  %v18317_v15 = vmax.f32 %v18245_v11, 0.0  ;;  %v18318_v54 = vmax.f32 %v18246_v52, 0.0  ;;  %v3832_v21 = vsel %vm3801_vm4, %v14423_v45, %v14445_v44  ;;  %v18319_v13 = vmax.f32 %v18247_v16, 0.0 }
 0x5ed   :  { %v14508_v25 = vadd.f32 %v14441_v35, %v14318_v6  ;;  %v14511_v58 = vadd.f32 %v3832_v21, %v14323_v7  ;;  %v14515_v11 = vadd.f32 %v14449_v42, %v14326_v23  ;;  %v14518_v52 = vadd.f32 %v3838_v8, %v14329_v4 }
 0x5ee   :  { %v3379_v60 = vrot.slane %v18317_v15, 2  ;;  %v14499_v46 = vrot.slane %v18318_v54, 4  ;;  %v3591_v14 = vrot.slane %v18319_v13, 4  ;;  %v14521_v15 = vadd.f32 %v3840_v5, %v14332_v57 }
 0x5ef   :  { %v14524_v16 = vadd.f32 %v3842_v18, %v14335_v41  ;;  %v14527_v45 = vadd.f32 %v3844_v51, %v14338_v38  ;;  %v14530_v6 = vadd.f32 %v3846_v30, %v14341_v56  ;;  %v14533_v7 = vadd.f32 %v3848_v48, %v14344_v22  ;;  %v18320_v38 = vld [vmem:[#allocation131_spill] sm:$0xff]  ;;  %v18321_v56 = vld [vmem:[#allocation168_spill] sm:$0xff]  ;;  %v18322_v22 = vld [vmem:[#allocation169_spill] sm:$0xff] }
 0x5f0   :  { %v14536_v23 = vadd.f32 %v3850_v26, %v14347_v53  ;;  %v14539_v4 = vadd.f32 %v3852_v39, %v14350_v50  ;;  %v14542_v57 = vadd.f32 %v3854_v32, %v14353_v47  ;;  %v14545_v41 = vadd.f32 %v3856_v29, %v14356_v62  ;;  %v18323_v53 = vld [vmem:[#allocation170_spill] sm:$0xff]  ;;  %v18324_v50 = vld [vmem:[#allocation171_spill] sm:$0xff]  ;;  %v18325_v47 = vld [vmem:[#allocation172_spill] sm:$0xff] }
 0x5f1   :  { %v14548_v8 = vadd.f32 %v3858_v31, %v18320_v38  ;;  %v14551_v30 = vadd.f32 %v3860_v28, %v18321_v56  ;;  %v14554_v5 = vadd.f32 %v3862_v19, %v18322_v22  ;;  %v14557_v48 = vadd.f32 %v3864_v20, %v18323_v53  ;;  %v18327_v62 = vld [vmem:[#allocation173_spill] sm:$0xff]  ;;  %v18329_v51 = vld [vmem:[#allocation174_spill] sm:$0xff]  ;;  %v18331_v39 = vld [vmem:[#allocation175_spill] sm:$0xff] }
 0x5f2   :  { %v14560_v35 = vadd.f32 %v3866_v63, %v18324_v50  ;;  %v14563_v42 = vadd.f32 %v3868_v49, %v18325_v47  ;;  %v14566_v18 = vadd.f32 %v3870_v27, %v18327_v62  ;;  %v14569_v26 = vadd.f32 %v3872_v34, %v18329_v51  ;;  %v18333_v29 = vld [vmem:[#allocation176_spill] sm:$0xff]  ;;  %v18335_v28 = vld [vmem:[#allocation177_spill] sm:$0xff]  ;;  %v18339_v49 = vld [vmem:[#allocation35_spill] sm:$0xff] }
 0x5f3   :  { %v14572_v32 = vadd.f32 %v3874_v59, %v18331_v39  ;;  %v14575_v31 = vadd.f32 %v3876_v12, %v18333_v29  ;;  %v14578_v19 = vadd.f32 %v3878_v40, %v18335_v28  ;;  %v18337_v20 = vld [vmem:[#allocation33_spill] sm:$0xff]  ;;  %v14584_v54 = vadd.f32 %v3882_v17, %v18339_v49  ;;  %v18342_v34 = vld [vmem:[#allocation75_spill] sm:$0xff]  ;;  %v18343_v59 = vld [vmem:[#allocation78_spill] sm:$0xff] }
 0x5f4   :  { %18326 = vst [vmem:[#allocation42_spill] sm:$0xff] %v14563_v42  ;;  %18328 = vst [vmem:[#allocation132_spill] sm:$0xff] %v14566_v18  ;;  %v14581_v63 = vadd.f32 %v3880_v37, %v18337_v20  ;;  %v18341_v27 = vld [vmem:[#allocation37_spill] sm:$0xff]  ;;  %v14591_v13 = vadd.f32 %v18308_v10, %v18342_v34  ;;  %v3161_v38 = vmax.f32 %v18343_v59, 0.0  ;;  %v18344_v12 = vld [vmem:[#allocation80_spill] sm:$0xff]  ;;  %v3503_v22 = vadd.f32 %v3378_v2, %v3162_v33 }
 0x5f5   :  { %18330 = vst [vmem:[#allocation43_spill] sm:$0xff] %v14569_v26  ;;  %18332 = vst [vmem:[#allocation133_spill] sm:$0xff] %v14572_v32  ;;  %v14587_v21 = vadd.f32 %v3884_v61, %v18341_v27  ;;  %v3163_v56 = vmax.f32 %v18344_v12, 0.0  ;;  %v18345_v40 = vld [vmem:[#allocation81_spill] sm:$0xff]  ;;  %v3380_v17 = vsel %vm3373_vm5, %v14436_v9, %v3379_v60  ;;  %v3381_v47 = vrot.slane %v3207_v43, 2  ;;  %v18347_v62 = vld [vmem:[#allocation82_spill] sm:$0xff] }
 0x5f6   :  { %18334 = vst [vmem:[#allocation44_spill] sm:$0xff] %v14575_v31  ;;  %18336 = vst [vmem:[#allocation138_spill] sm:$0xff] %v14578_v19  ;;  %v3164_v53 = vmax.f32 %v18345_v40, 0.0  ;;  %v18346_v50 = vld [vmem:[#allocation109_spill] sm:$0xff]  ;;  %v3165_v61 = vmax.f32 %v18347_v62, 0.0  ;;  %v18348_v51 = vld [vmem:[#allocation46_spill] sm:$0xff]  ;;  %v3592_v49 = vsel %vm3587_vm6, %v14499_v46, %v3591_v14 }
 0x5f7   :  { %18338 = vst [vmem:[#allocation89_spill] sm:$0xff] %v14581_v63  ;;  %18340 = vst [vmem:[#allocation139_spill] sm:$0xff] %v14584_v54  ;;  %v3209_v37 = vmax.f32 %v18346_v50, 0.0  ;;  %v3249_v39 = vmax.f32 %v18348_v51, 0.0  ;;  %v18349_v29 = vld [vmem:[#allocation60_spill] sm:$0xff]  ;;  %v3383_v20 = vrot.slane %v3208_v1, 2  ;;  %v3504_v50 = vadd.f32 %v3380_v17, %v3163_v56 }
 0x5f8   :  { %v3290_v28 = vmax.f32 %v18349_v29, 0.0  ;;  %v3593_v27 = vrot.slane %v3248_v0, 4  ;;  %v3803_v33 = vrot.slane %v3288_v36, 6  ;;  %v3805_v2 = vrot.slane %v3289_v55, 6  ;;  %v18350_v34 = vld [vmem:[#allocation5_spill] sm:$0xff]  ;;  %v18351_v12 = vld [vmem:[#allocation6_spill] sm:$0xff] }
 0x5f9   :  { %v3166_v59 = vmax.f32 %v18350_v34, 0.0  ;;  %v3167_v40 = vmax.f32 %v18351_v12, 0.0  ;;  %v3717_v9 = vadd.f32 %v3592_v49, %v3503_v22  ;;  %v18352_v43 = vld [vmem:[#allocation140_spill] sm:$0xff]  ;;  %v18353_v62 = vld [vmem:[#allocation110_spill] sm:$0xff]  ;;  %v3382_v51 = vsel %vm3373_vm5, %v3379_v60, %v3381_v47  ;;  %v18355_v31 = vld [vmem:[#allocation61_spill] sm:$0xff] }
 0x5fa   :  { %v3210_v54 = vmax.f32 %v18352_v43, 0.0  ;;  %v3211_v63 = vmax.f32 %v18353_v62, 0.0  ;;  %v3385_v29 = vrot.slane %v3209_v37, 2  ;;  %v18354_v1 = vld [vmem:[#allocation8_spill] sm:$0xff]  ;;  %v3291_v32 = vmax.f32 %v18355_v31, 0.0  ;;  %v18357_v34 = vld [vmem:[#allocation141_spill] sm:$0xff] }
 0x5fb   :  { %v3250_v19 = vmax.f32 %v18354_v1, 0.0  ;;  %v18356_v36 = vld [vmem:[#allocation136_spill] sm:$0xff]  ;;  %v3384_v55 = vsel %vm3373_vm5, %v3381_v47, %v3383_v20  ;;  %v3594_v56 = vsel %vm3587_vm6, %v3591_v14, %v3593_v27  ;;  %v3595_v22 = vrot.slane %v3249_v39, 4  ;;  %v18358_v62 = vld [vmem:[#allocation9_spill] sm:$0xff]  ;;  %v18359_v31 = vld [vmem:[#allocation62_spill] sm:$0xff] }
 0x5fc   :  { %v3376_v0 = vsel %vm3373_vm5, %v18356_v36, %v14432_v24  ;;  %v3806_v17 = vsel %vm3801_vm4, %v3803_v33, %v3805_v2  ;;  %v3807_v49 = vrot.slane %v3290_v28, 6  ;;  %v3212_v12 = vmax.f32 %v18357_v34, 0.0  ;;  %v18360_v14 = vld [vmem:[#allocation68_spill] sm:$0xff] }
 0x5fd   :  { %v3505_v60 = vadd.f32 %v3382_v51, %v3164_v53  ;;  %v3718_v37 = vadd.f32 %v3594_v56, %v3504_v50  ;;  %v3931_v43 = vadd.f32 %v3806_v17, %v3717_v9  ;;  %v3251_v1 = vmax.f32 %v18358_v62, 0.0  ;;  %v18361_v50 = vld [vmem:[#allocation47_spill] sm:$0xff] }
 0x5fe   :  { %v3292_v26 = vmax.f32 %v18359_v31, 0.0  ;;  %v3386_v18 = vsel %vm3373_vm5, %v3383_v20, %v3385_v29  ;;  %v3387_v24 = vrot.slane %v3210_v54, 2  ;;  %v3506_v36 = vadd.f32 %v3384_v55, %v3165_v61  ;;  %v18362_v61 = vld [vmem:[#allocation111_spill] sm:$0xff] }
 0x5ff   :  { %v3597_v47 = vrot.slane %v3250_v19, 4  ;;  %v3502_v42 = vadd.f32 %v3376_v0, %v3161_v38  ;;  %v3804_v39 = vsel %vm3801_vm4, %v18360_v14, %v3803_v33  ;;  %v3596_v28 = vsel %vm3587_vm6, %v3593_v27, %v3595_v22  ;;  %v18363_v38 = vld [vmem:[#allocation55_spill] sm:$0xff] }
 0x600   :  { %v3808_v34 = vsel %vm3801_vm4, %v3805_v2, %v3807_v49  ;;  %v3809_v53 = vrot.slane %v3291_v32, 6  ;;  %v3590_v9 = vsel %vm3587_vm6, %v18361_v50, %v14499_v46  ;;  %v3719_v51 = vadd.f32 %v3596_v28, %v3505_v60  ;;  %v18364_v0 = vld [vmem:[#allocation63_spill] sm:$0xff]  ;;  %v18366_v50 = vld [vmem:[#allocation156_spill] sm:$0xff] }
 0x601   :  { %v3932_v56 = vadd.f32 %v3808_v34, %v3718_v37  ;;  %v14628_v17 = vmul.f32 0.25, %v3931_v43  ;;  %v3716_v54 = vadd.f32 %v3590_v9, %v3502_v42  ;;  %v3213_v19 = vmax.f32 %v18362_v61, 0.0  ;;  %v18365_v34 = vld [vmem:[#allocation10_spill] sm:$0xff] }
 0x602   :  { %v3252_v20 = vmax.f32 %v18363_v38, 0.0  ;;  %v3293_v33 = vmax.f32 %v18364_v0, 0.0  ;;  %v3389_v55 = vrot.slane %v3211_v63, 2  ;;  %v3388_v27 = vsel %vm3373_vm5, %v3385_v29, %v3387_v24 }
 0x603   :  { %v3598_v32 = vsel %vm3587_vm6, %v3595_v22, %v3597_v47  ;;  %v3599_v2 = vrot.slane %v3251_v1, 4  ;;  %v3930_v62 = vadd.f32 %v3804_v39, %v3716_v54  ;;  %v3507_v31 = vadd.f32 %v3386_v18, %v3166_v59 }
 0x604   :  { %v3720_v46 = vadd.f32 %v3598_v32, %v3506_v36  ;;  %v3810_v60 = vsel %vm3801_vm4, %v3807_v49, %v3809_v53  ;;  %v3811_v37 = vrot.slane %v3292_v26, 6  ;;  %v14636_v42 = vmul.f32 0.25, %v3932_v56 }
 0x605   :  { %v3933_v43 = vadd.f32 %v3810_v60, %v3719_v51  ;;  %v14638_v14 = vmul.f32 0.25, %v3930_v62  ;;  %v4064_v28 = vrot.slane %v14628_v17, 1  ;;  %v3253_v63 = vmax.f32 %v18365_v34, 0.0 }
 0x606   :  { %v3294_v29 = vmax.f32 %v18366_v50, 0.0  ;;  %v3390_v22 = vsel %vm3373_vm5, %v3387_v24, %v3389_v55  ;;  %v3391_v1 = vrot.slane %v3212_v12, 2  ;;  %v3600_v18 = vsel %vm3587_vm6, %v3597_v47, %v3599_v2  ;;  %v18367_v24 = vld [vmem:[#allocation29_spill] sm:$0xff]  ;;  %v18368_v12 = vld [vmem:[#allocation56_spill] sm:$0xff]  ;;  %v18369_v47 = vld [vmem:[#allocation11_spill] sm:$0xff] }
 0x607   :  { %v3601_v59 = vrot.slane %v3252_v20, 4  ;;  %v4063_v26 = vrot.slane %v14638_v14, 1  ;;  %v3508_v49 = vadd.f32 %v3388_v27, %v3167_v40  ;;  %v3721_v36 = vadd.f32 %v3600_v18, %v3507_v31 }
 0x608   :  { %v3812_v39 = vsel %vm3801_vm4, %v3809_v53, %v3811_v37  ;;  %v3813_v9 = vrot.slane %v3293_v33, 6  ;;  %v14647_v56 = vmul.f32 0.25, %v3933_v43  ;;  %v4066_v61 = vrot.slane %v14636_v42, 1 }
 0x609   :  { %v3934_v51 = vadd.f32 %v3812_v39, %v3720_v46  ;;  %v4065_v54 = vsel %vm4062_vm7, %v4063_v26, %v4064_v28  ;;  %v3168_v38 = vmax.f32 %v18367_v24, 0.0  ;;  %v3214_v0 = vmax.f32 %v18368_v12, 0.0  ;;  %v18372_v26 = vld [vmem:[#allocation38_spill] sm:$0xff] }
 0x60a   :  { %v3254_v20 = vmax.f32 %v18369_v47, 0.0  ;;  %v3295_v32 = vmax.f32 %v14480_v3, 0.0  ;;  %8021 = vmatmul.mubr.msk.f32.vlgmr.msra.gmra.mxu1 %vm1616_vm3, %v4065_v54  ;;  %v3392_v40 = vsel %vm3373_vm5, %v3389_v55, %v3391_v1  ;;  %v3393_v53 = vrot.slane %v3213_v19, 2  ;;  %v18371_v55 = vld [vmem:[#allocation30_spill] sm:$0xff]  ;;  %v18374_v54 = vld [vmem:[#allocation40_spill] sm:$0xff] }
 0x60b   :  { %v3602_v33 = vsel %vm3587_vm6, %v3599_v2, %v3601_v59  ;;  %v3603_v27 = vrot.slane %v3253_v63, 4  ;;  %v18370_v62 = vmov 0.0   ;;  %v3509_v31 = vadd.f32 %v3390_v22, %v3168_v38  ;;  %v18373_v63 = vld [vmem:[#allocation12_spill] sm:$0xff] }
 0x60c   :  { %8023 = vmatprep.mubr.msk.f32.mxu1 %vm8627_vm1, %v18370_v62  ;;  %v3722_v46 = vadd.f32 %v3602_v33, %v3508_v49  ;;  %v3814_v60 = vsel %vm3801_vm4, %v3811_v37, %v3813_v9  ;;  %v3815_v43 = vrot.slane %v3294_v29, 6  ;;  %v14661_v50 = vmul.f32 0.25, %v3934_v51 }
 0x60d   :  { %v3935_v34 = vadd.f32 %v3814_v60, %v3721_v36  ;;  %v4067_v3 = vsel %vm4062_vm7, %v4064_v28, %v4066_v61  ;;  %v4068_v18 = vrot.slane %v14647_v56, 1  ;;  %v3169_v19 = vmax.f32 %v18371_v55, 0.0 }
 0x60e   :  { %v3215_v2 = vmax.f32 %v18372_v26, 0.0  ;;  %v3255_v39 = vmax.f32 %v18373_v63, 0.0  ;;  %v3296_v24 = vmax.f32 %v18374_v54, 0.0  ;;  %8024 = vmatmul.mubr.msk.f32.gmra.mxu1 %vm1616_vm3, %v4067_v3  ;;  %v3394_v37 = vsel %vm3373_vm5, %v3391_v1, %v3393_v53  ;;  %v18375_v1 = vld [vmem:[#allocation76_spill] sm:$0xff]  ;;  %v18377_v3 = vld [vmem:[#allocation13_spill] sm:$0xff] }
 0x60f   :  { %v3395_v29 = vrot.slane %v3214_v0, 2  ;;  %v3604_v22 = vsel %vm3587_vm6, %v3601_v59, %v3603_v27  ;;  %v3605_v49 = vrot.slane %v3254_v20, 4  ;;  %8026 = vmatprep.mubr.msk.f32.mxu1 %vm8627_vm1, %v18370_v62  ;;  %v3510_v28 = vadd.f32 %v3392_v40, %v3169_v19  ;;  %v18376_v59 = vld [vmem:[#allocation31_spill] sm:$0xff] }
 0x610   :  { %v3723_v36 = vadd.f32 %v3604_v22, %v3509_v31  ;;  %v3816_v51 = vsel %vm3801_vm4, %v3813_v9, %v3815_v43  ;;  %v3817_v38 = vrot.slane %v3295_v32, 6  ;;  %v14675_v47 = vmul.f32 0.25, %v3935_v34 }
 0x611   :  { %v3936_v12 = vadd.f32 %v3816_v51, %v3722_v46  ;;  %v4069_v33 = vsel %vm4062_vm7, %v4066_v61, %v4068_v18  ;;  %v4070_v60 = vrot.slane %v14661_v50, 1  ;;  %v3129_v0 = vadd.f32 %v18308_v10, %v18375_v1  ;;  %v18380_v51 = vld [vmem:[#allocation32_spill] sm:$0xff] }
 0x612   :  { %v3170_v20 = vmax.f32 %v18376_v59, 0.0  ;;  %v3256_v55 = vmax.f32 %v18377_v3, 0.0  ;;  %v3297_v40 = vmax.f32 %v14591_v13, 0.0  ;;  %8027 = vmatmul.mubr.msk.f32.gmra.mxu1 %vm1616_vm3, %v4069_v33  ;;  %v3396_v9 = vsel %vm3373_vm5, %v3393_v53, %v3395_v29  ;;  %v18378_v53 = vld [vmem:[#allocation69_spill] sm:$0xff] }
 0x613   :  { %v3397_v32 = vrot.slane %v3215_v2, 2  ;;  %v3606_v31 = vsel %vm3587_vm6, %v3603_v27, %v3605_v49  ;;  %v3607_v46 = vrot.slane %v3255_v39, 4  ;;  %8029 = vmatprep.mubr.msk.f32.mxu1 %vm8627_vm1, %v18370_v62  ;;  %v3818_v19 = vsel %vm3801_vm4, %v3815_v43, %v3817_v38  ;;  %v18379_v27 = vld [vmem:[#allocation77_spill] sm:$0xff] }
 0x614   :  { %v3511_v61 = vadd.f32 %v3394_v37, %v3170_v20  ;;  %v3724_v34 = vadd.f32 %v3606_v31, %v3510_v28  ;;  %v3819_v26 = vrot.slane %v3296_v24, 6  ;;  %v3937_v63 = vadd.f32 %v3818_v19, %v3723_v36  ;;  %v18381_v37 = vld [vmem:[#allocation14_spill] sm:$0xff] }
 0x615   :  { %v14690_v54 = vmul.f32 0.25, %v3936_v12  ;;  %v4071_v13 = vsel %vm4062_vm7, %v4068_v18, %v4070_v60  ;;  %v4072_v22 = vrot.slane %v14675_v47, 1  ;;  %v3003_v2 = vadd.f32 %v18308_v10, %v18378_v53  ;;  %v18383_v53 = vld [vmem:[#allocation167_spill] sm:$0xff] }
 0x616   :  { %v3130_v39 = vadd.f32 %v18308_v10, %v18379_v27  ;;  %v3171_v33 = vmax.f32 %v18380_v51, 0.0  ;;  %v3257_v28 = vmax.f32 %v18381_v37, 0.0  ;;  %8030 = vmatmul.mubr.msk.f32.gmra.mxu1 %vm1616_vm3, %v4071_v13  ;;  %v3298_v43 = vmax.f32 %v3129_v0, 0.0  ;;  %v18382_v13 = vld [vmem:[#allocation70_spill] sm:$0xff] }
 0x617   :  { %v3398_v24 = vsel %vm3373_vm5, %v3395_v29, %v3397_v32  ;;  %v3608_v36 = vsel %vm3587_vm6, %v3605_v49, %v3607_v46  ;;  %v3609_v18 = vrot.slane %v3256_v55, 4  ;;  %8032 = vmatprep.mubr.msk.f32.mxu1 %vm8627_vm1, %v18370_v62  ;;  %v3820_v59 = vsel %vm3801_vm4, %v3817_v38, %v3819_v26 }
 0x618   :  { %v3512_v12 = vadd.f32 %v3396_v9, %v3171_v33  ;;  %v3725_v1 = vadd.f32 %v3608_v36, %v3511_v61  ;;  %v3821_v20 = vrot.slane %v3297_v40, 6  ;;  %v3938_v3 = vadd.f32 %v3820_v59, %v3724_v34 }
 0x619   :  { %v14706_v31 = vmul.f32 0.25, %v3937_v63  ;;  %v4073_v19 = vsel %vm4062_vm7, %v4070_v60, %v4072_v22  ;;  %v4074_v0 = vrot.slane %v14690_v54, 1  ;;  %v3004_v29 = vadd.f32 %v18308_v10, %v18382_v13 }
 0x61a   :  { %v3172_v49 = vmax.f32 %v3003_v2, 0.0  ;;  %8033 = vmatmul.mubr.msk.f32.gmra.mxu1 %vm1616_vm3, %v4073_v19  ;;  %v3299_v55 = vmax.f32 %v3130_v39, 0.0  ;;  %v3400_v9 = vsel %vm3373_vm5, %v3397_v32, %v18383_v53  ;;  %v3610_v38 = vsel %vm3587_vm6, %v3607_v46, %v3609_v18  ;;  %v18384_v32 = vld [vmem:[#allocation137_spill] sm:$0xff]  ;;  %v18385_v46 = vld [vmem:[#allocation52_spill] sm:$0xff] }
 0x61b   :  { %v3611_v40 = vrot.slane %v3257_v28, 4  ;;  %8035 = vmatprep.mubr.msk.f32.mxu1 %vm8627_vm1, %v18370_v62  ;;  %v3726_v60 = vadd.f32 %v3610_v38, %v3512_v12  ;;  %v3822_v34 = vsel %vm3801_vm4, %v3819_v26, %v3821_v20  ;;  %v3823_v63 = vrot.slane %v3298_v43, 6  ;;  %v18388_v38 = vld [vmem:[#allocation19_spill] sm:$0xff] }
 0x61c   :  { %v3513_v61 = vadd.f32 %v3398_v24, %v3172_v49  ;;  %v3939_v27 = vadd.f32 %v3822_v34, %v3725_v1  ;;  %v14719_v51 = vmul.f32 0.25, %v3938_v3  ;;  %v4075_v2 = vsel %vm4062_vm7, %v4072_v22, %v4074_v0  ;;  %v18386_v3 = vld [vmem:[#allocation48_spill] sm:$0xff]  ;;  %v18390_v34 = vld [vmem:[#allocation117_spill] sm:$0xff] }
 0x61d   :  { %v4076_v39 = vrot.slane %v14706_v31, 1  ;;  %v3173_v33 = vmax.f32 %v3004_v29, 0.0  ;;  %v2663_v37 = vmul.f32 %v18385_v46, %v18384_v32  ;;  %v3612_v28 = vsel %vm3587_vm6, %v3609_v18, %v3611_v40  ;;  %v18387_v18 = vld [vmem:[#allocation127_spill] sm:$0xff] }
 0x61e   :  { %8036 = vmatmul.mubr.msk.f32.gmra.mxu1 %vm1616_vm3, %v4075_v2  ;;  %v3727_v43 = vadd.f32 %v3612_v28, %v3513_v61  ;;  %v3824_v24 = vsel %vm3801_vm4, %v3821_v20, %v3823_v63  ;;  %v3825_v36 = vrot.slane %v3299_v55, 6  ;;  %v14730_v22 = vmul.f32 0.25, %v3939_v27 }
 0x61f   :  { %8038 = vmatprep.mubr.msk.f32.mxu1 %vm8627_vm1, %v18370_v62  ;;  %v3514_v26 = vadd.f32 %v3400_v9, %v3173_v33  ;;  %v3940_v12 = vadd.f32 %v3824_v24, %v3726_v60  ;;  %v4077_v1 = vsel %vm4062_vm7, %v4074_v0, %v4076_v39  ;;  %v4078_v59 = vrot.slane %v14719_v51, 1  ;;  %v18392_v33 = vld [vmem:[#allocation125_spill] sm:$0xff] }
 0x620   :  { %v2834_v19 = vmul.f32 %v18386_v3, %v2663_v37  ;;  %v3614_v13 = vsel %vm3587_vm6, %v3611_v40, %v18387_v18  ;;  %v3826_v20 = vsel %vm3801_vm4, %v3823_v63, %v3825_v36  ;;  %v4080_v53 = vrot.slane %v14730_v22, 1  ;;  %v18389_v40 = vld [vmem:[#allocation41_spill] sm:$0xff]  ;;  %v18391_v63 = vld [vmem:[#allocation166_spill] sm:$0xff] }
 0x621   :  { %v3728_v29 = vadd.f32 %v3614_v13, %v3514_v26  ;;  %v3941_v49 = vadd.f32 %v3826_v20, %v3727_v43  ;;  %v14741_v55 = vmul.f32 0.25, %v3940_v12  ;;  %v4079_v0 = vsel %vm4062_vm7, %v4076_v39, %v4078_v59  ;;  %v18394_v26 = vld [vmem:[#allocation7_spill] sm:$0xff]  ;;  %v4016_v12 = vld [vmem:[%s16795_s2] sm:$0xff] }
 0x622   :  { %8039 = vmatmul.mubr.msk.f32.gmra.mxu1 %vm1616_vm3, %v4077_v1  ;;  %v3007_v9 = vadd.f32 %v18308_v10, %v2834_v19  ;;  %v4015_v61 = vmul.f32 0.25, %v18388_v38  ;;  %v3828_v60 = vsel %vm3801_vm4, %v3825_v36, %v18389_v40  ;;  %v3406_v27 = vsel %vm3373_vm5, %v18391_v63, %v18390_v34  ;;  %v18393_v10 = vld [vmem:[#allocation130_spill] sm:$0xff]  ;;  %v18395_v43 = vld [vmem:[#allocation39_spill] sm:$0xff] }
 0x623   :  { %8041 = vmatprep.mubr.msk.f32.mxu1 %vm8627_vm1, %v18370_v62  ;;  %v3942_v2 = vadd.f32 %v3828_v60, %v3728_v29  ;;  %v14756_v39 = vmul.f32 0.25, %v14587_v21  ;;  %v3757_v32 = vadd.f32 %v18393_v10, %v18392_v33  ;;  %v14760_v46 = vmul.f32 0.25, %v3941_v49  ;;  %v4017_v21 = vld [vmem:[%s16795_s2 + $0x8] sm:$0x3] }
 0x624   :  { %v4081_v37 = vsel %vm4062_vm7, %v4078_v59, %v4080_v53  ;;  %v4082_v28 = vrot.slane %v14741_v55, 1  ;;  %v3886_v24 = vsel %vm3801_vm4, %v18395_v43, %v18394_v26  ;;  %v3176_v36 = vmax.f32 %v3007_v9, 0.0  ;;  %8144 = vmatpush3.msk.msra.mxu1 %vm3801_vm4, %v4017_v21  ;;  %v18398_v9 = vld [vmem:[#allocation126_spill] sm:$0xff] }
 0x625   :  { %v3971_v1 = vadd.f32 %v3886_v24, %v3757_v32  ;;  %8145 = vmatprep.subr.mxu1 %v18370_v62  ;;  %v17105_v3 = vrot.slane %v14756_v39, 5  ;;  %v4941_v18 = vrot.slane %v4015_v61, 5  ;;  %v14781_v13 = vmul.f32 0.25, %v3942_v2  ;;  %v18399_v2 = vld [vmem:[#allocation36_spill] sm:$0xff] }
 0x626   :  { %8042 = vmatmul.mubr.msk.f32.gmra.mxu1 %vm1616_vm3, %v4079_v0  ;;  %v3517_v59 = vadd.f32 %v3406_v27, %v3176_v36  ;;  %v4083_v29 = vsel %vm4062_vm7, %v4080_v53, %v4082_v28  ;;  %v4084_v20 = vrot.slane %v14760_v46, 1  ;;  %v18397_v0 = vld [vmem:[#allocation128_spill] sm:$0xff]  ;;  %v14802_v34 = vmul.f32 0.25, %v14508_v25 }
 0x627   :  { %8044 = vmatprep.mubr.msk.f32.mxu1 %vm8627_vm1, %v18370_v62  ;;  %v14779_v19 = vmul.f32 0.25, %v3971_v1  ;;  %8146 = vmatpush3.msra.mxu1 %v4016_v12  ;;  %v3620_v38 = vsel %vm3587_vm6, %v18398_v9, %v18397_v0  ;;  %v4086_v27 = vrot.slane %v14781_v13, 1  ;;  %v3834_v33 = vsel %vm3801_vm4, %v14445_v44, %v18399_v2 }
 0x628   :  { %8270 = vmatprep.subr.mxu1 %v18370_v62  ;;  %v3731_v60 = vadd.f32 %v3620_v38, %v3517_v59  ;;  %v4085_v63 = vsel %vm4062_vm7, %v4082_v28, %v4084_v20  ;;  %v14813_v32 = vmul.f32 0.25, %v14511_v58  ;;  %v14828_v44 = vmul.f32 0.25, %v14515_v11 }
 0x629   :  { %18396 = vst [vmem:[#allocation98_spill] sm:$0xff] %v14779_v19  ;;  %v4939_v49 = vrot.slane %v14779_v19, 5  ;;  %v4087_v25 = vsel %vm4062_vm7, %v4084_v20, %v4086_v27  ;;  %v17104_v36 = vrot.slane %v14779_v19, 6  ;;  %v5423_v21 = vrot.slane %v4015_v61, 6 }
 0x62a   :  { %8045 = vmatmul.mubr.msk.f32.gmra.mxu1 %vm1616_vm3, %v4081_v37  ;;  %v3945_v10 = vadd.f32 %v3834_v33, %v3731_v60  ;;  %v4088_v37 = vrot.slane %v14802_v34, 1  ;;  %v4090_v43 = vrot.slane %v14813_v32, 1  ;;  %18401 = vst [vmem:[#allocation100_spill] sm:$0xff] %v14828_v44  ;;  %v14842_v11 = vmul.f32 0.25, %v14518_v52 }
 0x62b   :  { %8047 = vmatprep.mubr.msk.f32.mxu1 %vm8627_vm1, %v18370_v62  ;;  %v14796_v53 = vsel %vm4859_vm8, %v17105_v3, %v4939_v49  ;;  %v14799_v40 = vsel %vm4859_vm8, %v4939_v49, %v4941_v18  ;;  %v14839_v12 = vsel %vm3801_vm4, %v17104_v36, %v5423_v21  ;;  %v4094_v59 = vrot.slane %v14828_v44, 1 }
 0x62c   :  { %v14820_v28 = vmul.f32 0.25, %v3945_v10  ;;  %v4089_v26 = vsel %vm4062_vm7, %v4086_v27, %v4088_v37  ;;  %v4091_v58 = vsel %vm4062_vm7, %v4088_v37, %v4090_v43  ;;  %18402 = vst [vmem:[#allocation64_spill] sm:$0xff] %v14839_v12  ;;  %18403 = vst [vmem:[#allocation101_spill] sm:$0xff] %v14842_v11  ;;  %v14850_v61 = vmul.f32 0.25, %v14521_v15 }
 0x62d   :  { %v14858_v52 = vmul.f32 0.25, %v14524_v16  ;;  %v14866_v15 = vmul.f32 0.25, %v14527_v45  ;;  %v14874_v16 = vmul.f32 0.25, %v14530_v6  ;;  %v14882_v45 = vmul.f32 0.25, %v14533_v7 }
 0x62e   :  { %8048 = vmatmul.mubr.msk.f32.gmra.mxu1 %vm1616_vm3, %v4083_v29  ;;  %18400 = vst [vmem:[#allocation99_spill] sm:$0xff] %v14820_v28  ;;  %v4092_v24 = vrot.slane %v14820_v28, 1  ;;  %18404 = vst [vmem:[#allocation102_spill] sm:$0xff] %v14850_v61  ;;  %v4096_v29 = vrot.slane %v14842_v11, 1  ;;  %v4098_v49 = vrot.slane %v14850_v61, 1  ;;  %v14890_v6 = vmul.f32 0.25, %v14536_v23 }
 0x62f   :  { %8050 = vmatprep.mubr.msk.f32.mxu1 %vm8627_vm1, %v18370_v62  ;;  %18405 = vst [vmem:[#allocation103_spill] sm:$0xff] %v14858_v52  ;;  %18406 = vst [vmem:[#allocation83_spill] sm:$0xff] %v14866_v15  ;;  %v4100_v9 = vrot.slane %v14858_v52, 1  ;;  %v4102_v60 = vrot.slane %v14866_v15, 1  ;;  %v4104_v27 = vrot.slane %v14874_v16, 1  ;;  %v4106_v33 = vrot.slane %v14882_v45, 1 }
 0x630   :  { %v4093_v1 = vsel %vm4062_vm7, %v4090_v43, %v4092_v24  ;;  %v4095_v18 = vsel %vm4062_vm7, %v4092_v24, %v4094_v59  ;;  %v4097_v20 = vsel %vm4062_vm7, %v4094_v59, %v4096_v29  ;;  %v4099_v0 = vsel %vm4062_vm7, %v4096_v29, %v4098_v49  ;;  %18407 = vst [vmem:[#allocation84_spill] sm:$0xff] %v14874_v16 }
 0x631   :  { %v4101_v38 = vsel %vm4062_vm7, %v4098_v49, %v4100_v9  ;;  %18408 = vst [vmem:[#allocation85_spill] sm:$0xff] %v14882_v45  ;;  %18409 = vst [vmem:[#allocation86_spill] sm:$0xff] %v14890_v6  ;;  %v4105_v2 = vsel %vm4062_vm7, %v4102_v60, %v4104_v27  ;;  %v14898_v7 = vmul.f32 0.25, %v14539_v4  ;;  %v4107_v10 = vsel %vm4062_vm7, %v4104_v27, %v4106_v33 }
 0x632   :  { %8051 = vmatmul.mubr.msk.f32.gmra.mxu1 %vm1616_vm3, %v4085_v63  ;;  %v4103_v63 = vsel %vm4062_vm7, %v4100_v9, %v4102_v60  ;;  %v14906_v23 = vmul.f32 0.25, %v14542_v57  ;;  %v14914_v4 = vmul.f32 0.25, %v14545_v41  ;;  %v14922_v57 = vmul.f32 0.25, %v14548_v8 }
 0x633   :  { %8053 = vmatprep.mubr.msk.f32.mxu1 %vm8627_vm1, %v18370_v62  ;;  %18410 = vst [vmem:[#allocation87_spill] sm:$0xff] %v14898_v7  ;;  %v14930_v41 = vmul.f32 0.25, %v14551_v30  ;;  %v14938_v8 = vmul.f32 0.25, %v14554_v5  ;;  %v14946_v30 = vmul.f32 0.25, %v14557_v48  ;;  %v14954_v5 = vmul.f32 0.25, %v14560_v35  ;;  %v18418_v48 = vld [vmem:[#allocation42_spill] sm:$0xff] }
 0x634   :  { %18411 = vst [vmem:[#allocation88_spill] sm:$0xff] %v14906_v23  ;;  %18412 = vst [vmem:[#allocation15_spill] sm:$0xff] %v14914_v4  ;;  %v4114_v21 = vrot.slane %v14914_v4, 1  ;;  %v4116_v59 = vrot.slane %v14922_v57, 1  ;;  %v18420_v35 = vld [vmem:[#allocation132_spill] sm:$0xff] }
 0x635   :  { %18413 = vst [vmem:[#allocation16_spill] sm:$0xff] %v14922_v57  ;;  %18414 = vst [vmem:[#allocation17_spill] sm:$0xff] %v14930_v41  ;;  %v4118_v29 = vrot.slane %v14930_v41, 1  ;;  %v4120_v49 = vrot.slane %v14938_v8, 1  ;;  %v4122_v9 = vrot.slane %v14946_v30, 1  ;;  %v14970_v27 = vmul.f32 0.25, %v18420_v35 }
 0x636   :  { %8054 = vmatmul.mubr.msk.f32.gmra.mxu1 %vm1616_vm3, %v4087_v25  ;;  %v4108_v25 = vrot.slane %v14890_v6, 1  ;;  %18415 = vst [vmem:[#allocation18_spill] sm:$0xff] %v14938_v8  ;;  %18416 = vst [vmem:[#allocation20_spill] sm:$0xff] %v14946_v30 }
 0x637   :  { %8056 = vmatprep.mubr.msk.f32.mxu1 %vm8627_vm1, %v18370_v62  ;;  %18417 = vst [vmem:[#allocation21_spill] sm:$0xff] %v14954_v5  ;;  %v4123_v60 = vsel %vm4062_vm7, %v4120_v49, %v4122_v9  ;;  %18421 = vst [vmem:[#allocation23_spill] sm:$0xff] %v14970_v27 }
 0x638   :  { %v4109_v37 = vsel %vm4062_vm7, %v4106_v33, %v4108_v25 }
 0x63a   :  { %8057 = vmatmul.mubr.msk.f32.gmra.mxu1 %vm1616_vm3, %v4089_v26  ;;  %v4110_v26 = vrot.slane %v14898_v7, 1 }
 0x63b   :  { %8059 = vmatprep.mubr.msk.f32.mxu1 %vm8627_vm1, %v18370_v62 }
 0x63c   :  { %v4111_v43 = vsel %vm4062_vm7, %v4108_v25, %v4110_v26 }
 0x63e   :  { %8060 = vmatmul.mubr.msk.f32.gmra.mxu1 %vm1616_vm3, %v4091_v58  ;;  %v4112_v58 = vrot.slane %v14906_v23, 1 }
 0x63f   :  { %8062 = vmatprep.mubr.msk.f32.mxu1 %vm8627_vm1, %v18370_v62 }
 0x640   :  { %v4113_v24 = vsel %vm4062_vm7, %v4110_v26, %v4112_v58  ;;  %v4128_v26 = vrot.slane %v14970_v27, 1 }
 0x642   :  { %8063 = vmatmul.mubr.msk.f32.gmra.mxu1 %vm1616_vm3, %v4093_v1  ;;  %v4115_v1 = vsel %vm4062_vm7, %v4112_v58, %v4114_v21 }
 0x643   :  { %8065 = vmatprep.mubr.msk.f32.mxu1 %vm8627_vm1, %v18370_v62 }
 0x646   :  { %8066 = vmatmul.mubr.msk.f32.gmra.mxu1 %vm1616_vm3, %v4095_v18  ;;  %v4117_v18 = vsel %vm4062_vm7, %v4114_v21, %v4116_v59 }
 0x647   :  { %8068 = vmatprep.mubr.msk.f32.mxu1 %vm8627_vm1, %v18370_v62 }
 0x64a   :  { %8069 = vmatmul.mubr.msk.f32.gmra.mxu1 %vm1616_vm3, %v4097_v20  ;;  %v4119_v20 = vsel %vm4062_vm7, %v4116_v59, %v4118_v29 }
 0x64b   :  { %8071 = vmatprep.mubr.msk.f32.mxu1 %vm8627_vm1, %v18370_v62 }
 0x64e   :  { %8072 = vmatmul.mubr.msk.f32.gmra.mxu1 %vm1616_vm3, %v4099_v0  ;;  %v4121_v0 = vsel %vm4062_vm7, %v4118_v29, %v4120_v49 }
 0x64f   :  { %8074 = vmatprep.mubr.msk.f32.mxu1 %vm8627_vm1, %v18370_v62 }
 0x652   :  { %8075 = vmatmul.mubr.msk.f32.gmra.mxu1 %vm1616_vm3, %v4101_v38  ;;  %v14962_v38 = vmul.f32 0.25, %v18418_v48  ;;  %v18430_v48 = vld [vmem:[#allocation89_spill] sm:$0xff] }
 0x653   :  { %8077 = vmatprep.mubr.msk.f32.mxu1 %vm8627_vm1, %v18370_v62 }
 0x654   :  { %18419 = vst [vmem:[#allocation22_spill] sm:$0xff] %v14962_v38  ;;  %v4126_v33 = vrot.slane %v14962_v38, 1 }
 0x656   :  { %8078 = vmatmul.mubr.msk.f32.gmra.mxu1 %vm1616_vm3, %v4103_v63  ;;  %v4124_v63 = vrot.slane %v14954_v5, 1 }
 0x657   :  { %8080 = vmatprep.mubr.msk.f32.mxu1 %vm8627_vm1, %v18370_v62 }
 0x65a   :  { %8081 = vmatmul.mubr.msk.f32.gmra.mxu1 %vm1616_vm3, %v4105_v2  ;;  %v4125_v2 = vsel %vm4062_vm7, %v4122_v9, %v4124_v63 }
 0x65b   :  { %8083 = vmatprep.mubr.msk.f32.mxu1 %vm8627_vm1, %v18370_v62 }
 0x65e   :  { %8084 = vmatmul.mubr.msk.f32.gmra.mxu1 %vm1616_vm3, %v4107_v10  ;;  %v18422_v10 = vld [vmem:[#allocation43_spill] sm:$0xff] }
 0x65f   :  { %8086 = vmatprep.mubr.msk.f32.mxu1 %vm8627_vm1, %v18370_v62  ;;  %v14978_v25 = vmul.f32 0.25, %v18422_v10 }
 0x661   :  { %18423 = vst [vmem:[#allocation24_spill] sm:$0xff] %v14978_v25  ;;  %v4130_v21 = vrot.slane %v14978_v25, 1 }
 0x662   :  { %8087 = vmatmul.mubr.msk.f32.gmra.mxu1 %vm1616_vm3, %v4109_v37  ;;  %v4127_v37 = vsel %vm4062_vm7, %v4124_v63, %v4126_v33 }
 0x663   :  { %8089 = vmatprep.mubr.msk.f32.mxu1 %vm8627_vm1, %v18370_v62 }
 0x666   :  { %8090 = vmatmul.mubr.msk.f32.gmra.mxu1 %vm1616_vm3, %v4111_v43  ;;  %v18424_v43 = vld [vmem:[#allocation133_spill] sm:$0xff] }
 0x667   :  { %8092 = vmatprep.mubr.msk.f32.mxu1 %vm8627_vm1, %v18370_v62  ;;  %v14986_v58 = vmul.f32 0.25, %v18424_v43 }
 0x669   :  { %18425 = vst [vmem:[#allocation25_spill] sm:$0xff] %v14986_v58  ;;  %v4132_v29 = vrot.slane %v14986_v58, 1 }
 0x66a   :  { %8093 = vmatmul.mubr.msk.f32.gmra.mxu1 %vm1616_vm3, %v4113_v24  ;;  %v4129_v24 = vsel %vm4062_vm7, %v4126_v33, %v4128_v26 }
 0x66b   :  { %8095 = vmatprep.mubr.msk.f32.mxu1 %vm8627_vm1, %v18370_v62 }
 0x66e   :  { %8096 = vmatmul.mubr.msk.f32.gmra.mxu1 %vm1616_vm3, %v4115_v1  ;;  %v18426_v1 = vld [vmem:[#allocation44_spill] sm:$0xff] }
 0x66f   :  { %8098 = vmatprep.mubr.msk.f32.mxu1 %vm8627_vm1, %v18370_v62  ;;  %v14994_v59 = vmul.f32 0.25, %v18426_v1 }
 0x671   :  { %18427 = vst [vmem:[#allocation26_spill] sm:$0xff] %v14994_v59  ;;  %v4134_v9 = vrot.slane %v14994_v59, 1 }
 0x672   :  { %8099 = vmatmul.mubr.msk.f32.gmra.mxu1 %vm1616_vm3, %v4117_v18  ;;  %v4131_v18 = vsel %vm4062_vm7, %v4128_v26, %v4130_v21 }
 0x673   :  { %8101 = vmatprep.mubr.msk.f32.mxu1 %vm8627_vm1, %v18370_v62  ;;  %v4135_v63 = vsel %vm4062_vm7, %v4132_v29, %v4134_v9 }
 0x676   :  { %8102 = vmatmul.mubr.msk.f32.gmra.mxu1 %vm1616_vm3, %v4119_v20  ;;  %v18428_v20 = vld [vmem:[#allocation138_spill] sm:$0xff] }
 0x677   :  { %8104 = vmatprep.mubr.msk.f32.mxu1 %vm8627_vm1, %v18370_v62  ;;  %v15002_v49 = vmul.f32 0.25, %v18428_v20  ;;  %v6925_v20 = vld [vmem:[%s16795_s2 + $0x28] sm:$0x3] }
 0x679   :  { %18429 = vst [vmem:[#allocation27_spill] sm:$0xff] %v15002_v49  ;;  %v4136_v35 = vrot.slane %v15002_v49, 1 }
 0x67a   :  { %8105 = vmatmul.mubr.msk.f32.gmra.mxu1 %vm1616_vm3, %v4121_v0  ;;  %v4133_v0 = vsel %vm4062_vm7, %v4130_v21, %v4132_v29  ;;  %v4142_v21 = vrot.slane %v14756_v39, 1 }
 0x67b   :  { %8107 = vmatprep.mubr.msk.f32.mxu1 %vm8627_vm1, %v18370_v62  ;;  %v4137_v10 = vsel %vm4062_vm7, %v4134_v9, %v4136_v35  ;;  %v6924_v9 = vld [vmem:[%s16795_s2 + $0x20] sm:$0xff] }
 0x67e   :  { %8108 = vmatmul.mubr.msk.f32.gmra.mxu1 %vm1616_vm3, %v4123_v60  ;;  %v15010_v60 = vmul.f32 0.25, %v18430_v48 }
 0x67f   :  { %8110 = vmatprep.mubr.msk.f32.mxu1 %vm8627_vm1, %v18370_v62 }
 0x680   :  { %18431 = vst [vmem:[#allocation148_spill] sm:$0xff] %v15010_v60 }
 0x682   :  { %8111 = vmatmul.mubr.msk.f32.gmra.mxu1 %vm1616_vm3, %v4125_v2  ;;  %v18432_v2 = vld [vmem:[#allocation139_spill] sm:$0xff] }
 0x683   :  { %8113 = vmatprep.mubr.msk.f32.mxu1 %vm8627_vm1, %v18370_v62  ;;  %v15018_v33 = vmul.f32 0.25, %v18432_v2 }
 0x685   :  { %18433 = vst [vmem:[#allocation149_spill] sm:$0xff] %v15018_v33  ;;  %v4140_v43 = vrot.slane %v15018_v33, 1 }
 0x686   :  { %8114 = vmatmul.mubr.msk.f32.gmra.mxu1 %vm1616_vm3, %v4127_v37  ;;  %v4138_v37 = vrot.slane %v15010_v60, 1 }
 0x687   :  { %8116 = vmatprep.mubr.msk.f32.mxu1 %vm8627_vm1, %v18370_v62  ;;  %v4143_v1 = vsel %vm4062_vm7, %v4140_v43, %v4142_v21 }
 0x688   :  { %v4139_v26 = vsel %vm4062_vm7, %v4136_v35, %v4138_v37 }
 0x68a   :  { %8117 = vmatmul.mubr.msk.f32.gmra.mxu1 %vm1616_vm3, %v4129_v24  ;;  %v4141_v24 = vsel %vm4062_vm7, %v4138_v37, %v4140_v43 }
 0x68b   :  { %8119 = vmatprep.mubr.msk.f32.mxu1 %vm8627_vm1, %v18370_v62 }
 0x68e   :  { %8120 = vmatmul.mubr.msk.f32.gmra.mxu1 %vm1616_vm3, %v4131_v18 }
 0x68f   :  { %8122 = vmatprep.mubr.msk.f32.mxu1 %vm8627_vm1, %v18370_v62 }
 0x692   :  { %8123 = vmatmul.mubr.msk.f32.gmra.mxu1 %vm1616_vm3, %v4133_v0 }
 0x693   :  { %8125 = vmatprep.mubr.msk.f32.mxu1 %vm8627_vm1, %v18370_v62 }
 0x696   :  { %8126 = vmatmul.mubr.msk.f32.gmra.mxu1 %vm1616_vm3, %v4135_v63 }
 0x697   :  { %8128 = vmatprep.mubr.msk.f32.mxu1 %vm8627_vm1, %v18370_v62 }
 0x69a   :  { %8129 = vmatmul.mubr.msk.f32.gmra.mxu1 %vm1616_vm3, %v4137_v10 }
 0x69b   :  { %8131 = vmatprep.mubr.msk.f32.mxu1 %vm8627_vm1, %v18370_v62 }
 0x69e   :  { %8132 = vmatmul.mubr.msk.f32.gmra.mxu1 %vm1616_vm3, %v4139_v26 }
 0x69f   :  { %8134 = vmatprep.mubr.msk.f32.mxu1 %vm8627_vm1, %v18370_v62 }
 0x6a2   :  { %8135 = vmatmul.mubr.msk.f32.gmra.mxu1 %vm1616_vm3, %v4141_v24 }
 0x6a3   :  { %8137 = vmatprep.mubr.msk.f32.mxu1 %vm8627_vm1, %v18370_v62 }
 0x6a6   :  { %8138 = vmatmul.mubr.msk.f32.gmra.mxu1 %vm1616_vm3, %v4143_v1 }
 0x6a7   :  { %8140 = vmatprep.mubr.msk.f32.mxu1 %vm8627_vm1, %v18370_v62 }
 0x6aa   :  { %8141 = vmatmul.mubr.msk.f32.gmra.mxu1 %vm1616_vm3, %v4142_v21 }
 0x6ab   :  { %8147 = vmatprep.mubr.msk.f32.mxu1 %vm8627_vm1, %v18370_v62 }
 0x6ae   :  { %8148 = vmatmul.mubr.msk.f32.vlgmr.msra.gmra.mxu1 %vm1616_vm3, %v14638_v14 }
 0x6af   :  { %8150 = vmatprep.mubr.msk.f32.mxu1 %vm8627_vm1, %v18370_v62  ;;  %8271 = vmatpush3.msk.msra.mxu1 %vm3801_vm4, %v6925_v20 }
 0x6b0   :  { %8272 = vmatprep.subr.mxu1 %v18370_v62 }
 0x6b1   :  { %8273 = vmatpush3.msra.mxu1 %v6924_v9 }
 0x6b2   :  { %8151 = vmatmul.mubr.msk.f32.gmra.mxu1 %vm1616_vm3, %v14628_v17  ;;  %8397 = vmatprep.subr.mxu1 %v18370_v62 }
 0x6b3   :  { %8153 = vmatprep.mubr.msk.f32.mxu1 %vm8627_vm1, %v18370_v62 }
 0x6b6   :  { %8154 = vmatmul.mubr.msk.f32.gmra.mxu1 %vm1616_vm3, %v14636_v42 }
 0x6b7   :  { %8156 = vmatprep.mubr.msk.f32.mxu1 %vm8627_vm1, %v18370_v62 }
 0x6ba   :  { %8157 = vmatmul.mubr.msk.f32.gmra.mxu1 %vm1616_vm3, %v14647_v56 }
 0x6bb   :  { %8159 = vmatprep.mubr.msk.f32.mxu1 %vm8627_vm1, %v18370_v62 }
 0x6be   :  { %8160 = vmatmul.mubr.msk.f32.gmra.mxu1 %vm1616_vm3, %v14661_v50 }
 0x6bf   :  { %8162 = vmatprep.mubr.msk.f32.mxu1 %vm8627_vm1, %v18370_v62 }
 0x6c2   :  { %8163 = vmatmul.mubr.msk.f32.gmra.mxu1 %vm1616_vm3, %v14675_v47 }
 0x6c3   :  { %8165 = vmatprep.mubr.msk.f32.mxu1 %vm8627_vm1, %v18370_v62 }
 0x6c6   :  { %8166 = vmatmul.mubr.msk.f32.gmra.mxu1 %vm1616_vm3, %v14690_v54 }
 0x6c7   :  { %8168 = vmatprep.mubr.msk.f32.mxu1 %vm8627_vm1, %v18370_v62 }
 0x6ca   :  { %v15070_v14 = vpop.f32.mrf.mxu1  ;;  %8169 = vmatmul.mubr.msk.f32.gmra.mxu1 %vm1616_vm3, %v14706_v31 }
 0x6cb   :  { %8171 = vmatprep.mubr.msk.f32.mxu1 %vm8627_vm1, %v18370_v62 }
 0x6cc   :  { %v8022_v18 = vpop.f32.mrf.mxu1 }
 0x6ce   :  { %v15076_v29 = vpop.f32.mrf.mxu1  ;;  %8172 = vmatmul.mubr.msk.f32.gmra.mxu1 %vm1616_vm3, %v14719_v51 }
 0x6cf   :  { %8174 = vmatprep.mubr.msk.f32.mxu1 %vm8627_vm1, %v18370_v62 }
 0x6d0   :  { %v8025_v0 = vpop.f32.mrf.mxu1 }
 0x6d2   :  { %v15090_v48 = vpop.f32.mrf.mxu1  ;;  %8175 = vmatmul.mubr.msk.f32.gmra.mxu1 %vm1616_vm3, %v14730_v22 }
 0x6d3   :  { %8177 = vmatprep.mubr.msk.f32.mxu1 %vm8627_vm1, %v18370_v62 }
 0x6d4   :  { %v8028_v63 = vpop.f32.mrf.mxu1 }
 0x6d6   :  { %v15097_v35 = vpop.f32.mrf.mxu1  ;;  %8178 = vmatmul.mubr.msk.f32.gmra.mxu1 %vm1616_vm3, %v14741_v55 }
 0x6d7   :  { %8180 = vmatprep.mubr.msk.f32.mxu1 %vm8627_vm1, %v18370_v62 }
 0x6d8   :  { %v8031_v2 = vpop.f32.mrf.mxu1 }
 0x6da   :  { %v15103_v10 = vpop.f32.mrf.mxu1  ;;  %8181 = vmatmul.mubr.msk.f32.gmra.mxu1 %vm1616_vm3, %v14760_v46 }
 0x6db   :  { %8183 = vmatprep.mubr.msk.f32.mxu1 %vm8627_vm1, %v18370_v62 }
 0x6dc   :  { %v8034_v37 = vpop.f32.mrf.mxu1 }
 0x6de   :  { %v15109_v26 = vpop.f32.mrf.mxu1  ;;  %8184 = vmatmul.mubr.msk.f32.gmra.mxu1 %vm1616_vm3, %v14781_v13 }
 0x6df   :  { %8186 = vmatprep.mubr.msk.f32.mxu1 %vm8627_vm1, %v18370_v62 }
 0x6e0   :  { %v8037_v43 = vpop.f32.mrf.mxu1 }
 0x6e2   :  { %v15115_v24 = vpop.f32.mrf.mxu1  ;;  %8187 = vmatmul.mubr.msk.f32.gmra.mxu1 %vm1616_vm3, %v14802_v34 }
 0x6e3   :  { %18434 = vst [vmem:[#allocation150_spill] sm:$0xff] %v15115_v24  ;;  %8189 = vmatprep.mubr.msk.f32.mxu1 %vm8627_vm1, %v18370_v62 }
 0x6e4   :  { %v8040_v21 = vpop.f32.mrf.mxu1 }
 0x6e6   :  { %v15121_v1 = vpop.f32.mrf.mxu1  ;;  %8190 = vmatmul.mubr.msk.f32.gmra.mxu1 %vm1616_vm3, %v14813_v32 }
 0x6e7   :  { %18435 = vst [vmem:[#allocation151_spill] sm:$0xff] %v15121_v1  ;;  %8192 = vmatprep.mubr.msk.f32.mxu1 %vm8627_vm1, %v18370_v62 }
 0x6e8   :  { %v8043_v18 = vpop.f32.mrf.mxu1 }
 0x6ea   :  { %v15127_v20 = vpop.f32.mrf.mxu1  ;;  %8193 = vmatmul.mubr.msk.f32.gmra.mxu1 %vm1616_vm3, %v14820_v28 }
 0x6eb   :  { %18436 = vst [vmem:[#allocation152_spill] sm:$0xff] %v15127_v20  ;;  %8195 = vmatprep.mubr.msk.f32.mxu1 %vm8627_vm1, %v18370_v62 }
 0x6ec   :  { %v8046_v0 = vpop.f32.mrf.mxu1 }
 0x6ee   :  { %v15133_v9 = vpop.f32.mrf.mxu1  ;;  %8196 = vmatmul.mubr.msk.f32.gmra.mxu1 %vm1616_vm3, %v14828_v44 }
 0x6ef   :  { %18437 = vst [vmem:[#allocation153_spill] sm:$0xff] %v15133_v9  ;;  %8198 = vmatprep.mubr.msk.f32.mxu1 %vm8627_vm1, %v18370_v62 }
 0x6f0   :  { %v8049_v63 = vpop.f32.mrf.mxu1 }
 0x6f2   :  { %v15139_v2 = vpop.f32.mrf.mxu1  ;;  %8199 = vmatmul.mubr.msk.f32.gmra.mxu1 %vm1616_vm3, %v14842_v11 }
 0x6f3   :  { %18438 = vst [vmem:[#allocation28_spill] sm:$0xff] %v15139_v2  ;;  %8201 = vmatprep.mubr.msk.f32.mxu1 %vm8627_vm1, %v18370_v62  ;;  %v4883_v2 = vrot.slane %v14802_v34, 5 }
 0x6f4   :  { %v8052_v37 = vpop.f32.mrf.mxu1 }
 0x6f6   :  { %v15145_v43 = vpop.f32.mrf.mxu1  ;;  %8202 = vmatmul.mubr.msk.f32.gmra.mxu1 %vm1616_vm3, %v14850_v61 }
 0x6f7   :  { %18439 = vst [vmem:[#allocation154_spill] sm:$0xff] %v15145_v43  ;;  %8204 = vmatprep.mubr.msk.f32.mxu1 %vm8627_vm1, %v18370_v62 }
 0x6f8   :  { %v8055_v21 = vpop.f32.mrf.mxu1 }
 0x6fa   :  { %v15151_v18 = vpop.f32.mrf.mxu1  ;;  %8205 = vmatmul.mubr.msk.f32.gmra.mxu1 %vm1616_vm3, %v14858_v52 }
 0x6fb   :  { %18440 = vst [vmem:[#allocation49_spill] sm:$0xff] %v15151_v18  ;;  %8207 = vmatprep.mubr.msk.f32.mxu1 %vm8627_vm1, %v18370_v62  ;;  %v4865_v18 = vrot.slane %v14661_v50, 5 }
 0x6fc   :  { %v8058_v0 = vpop.f32.mrf.mxu1 }
 0x6fe   :  { %v15157_v63 = vpop.f32.mrf.mxu1  ;;  %8208 = vmatmul.mubr.msk.f32.gmra.mxu1 %vm1616_vm3, %v14866_v15 }
 0x6ff   :  { %18441 = vst [vmem:[#allocation50_spill] sm:$0xff] %v15157_v63  ;;  %8210 = vmatprep.mubr.msk.f32.mxu1 %vm8627_vm1, %v18370_v62 }
 0x700   :  { %v8061_v37 = vpop.f32.mrf.mxu1 }
 0x702   :  { %v15163_v36 = vpop.f32.mrf.mxu1  ;;  %8211 = vmatmul.mubr.msk.f32.gmra.mxu1 %vm1616_vm3, %v14874_v16 }
 0x703   :  { %18442 = vst [vmem:[#allocation51_spill] sm:$0xff] %v15163_v36  ;;  %8213 = vmatprep.mubr.msk.f32.mxu1 %vm8627_vm1, %v18370_v62  ;;  %v4863_v36 = vrot.slane %v14647_v56, 5 }
 0x704   :  { %v8064_v21 = vpop.f32.mrf.mxu1 }
 0x706   :  { %v15169_v3 = vpop.f32.mrf.mxu1  ;;  %8214 = vmatmul.mubr.msk.f32.gmra.mxu1 %vm1616_vm3, %v14882_v45 }
 0x707   :  { %18443 = vst [vmem:[#allocation53_spill] sm:$0xff] %v15169_v3  ;;  %8216 = vmatprep.mubr.msk.f32.mxu1 %vm8627_vm1, %v18370_v62 }
 0x708   :  { %v8067_v0 = vpop.f32.mrf.mxu1 }
 0x70a   :  { %v15175_v12 = vpop.f32.mrf.mxu1  ;;  %8217 = vmatmul.mubr.msk.f32.gmra.mxu1 %vm1616_vm3, %v14890_v6 }
 0x70b   :  { %18444 = vst [vmem:[#allocation54_spill] sm:$0xff] %v15175_v12  ;;  %8219 = vmatprep.mubr.msk.f32.mxu1 %vm8627_vm1, %v18370_v62 }
 0x70c   :  { %v8070_v37 = vpop.f32.mrf.mxu1 }
 0x70e   :  { %v15181_v19 = vpop.f32.mrf.mxu1  ;;  %8220 = vmatmul.mubr.msk.f32.gmra.mxu1 %vm1616_vm3, %v14898_v7 }
 0x70f   :  { %18445 = vst [vmem:[#allocation57_spill] sm:$0xff] %v15181_v19  ;;  %8222 = vmatprep.mubr.msk.f32.mxu1 %vm8627_vm1, %v18370_v62 }
 0x710   :  { %v8073_v21 = vpop.f32.mrf.mxu1 }
 0x712   :  { %v15187_v3 = vpop.f32.mrf.mxu1  ;;  %8223 = vmatmul.mubr.msk.f32.gmra.mxu1 %vm1616_vm3, %v14906_v23 }
 0x713   :  { %18446 = vst [vmem:[#allocation58_spill] sm:$0xff] %v15187_v3  ;;  %8225 = vmatprep.mubr.msk.f32.mxu1 %vm8627_vm1, %v18370_v62 }
 0x714   :  { %v8076_v0 = vpop.f32.mrf.mxu1 }
 0x716   :  { %v15193_v12 = vpop.f32.mrf.mxu1  ;;  %8226 = vmatmul.mubr.msk.f32.gmra.mxu1 %vm1616_vm3, %v14914_v4 }
 0x717   :  { %18447 = vst [vmem:[#allocation178_spill] sm:$0xff] %v15193_v12  ;;  %8228 = vmatprep.mubr.msk.f32.mxu1 %vm8627_vm1, %v18370_v62 }
 0x718   :  { %v8079_v37 = vpop.f32.mrf.mxu1 }
 0x71a   :  { %v15199_v19 = vpop.f32.mrf.mxu1  ;;  %8229 = vmatmul.mubr.msk.f32.gmra.mxu1 %vm1616_vm3, %v14922_v57 }
 0x71b   :  { %18448 = vst [vmem:[#allocation67_spill] sm:$0xff] %v15199_v19  ;;  %8231 = vmatprep.mubr.msk.f32.mxu1 %vm8627_vm1, %v18370_v62 }
 0x71c   :  { %v8082_v21 = vpop.f32.mrf.mxu1 }
 0x71e   :  { %v15205_v3 = vpop.f32.mrf.mxu1  ;;  %8232 = vmatmul.mubr.msk.f32.gmra.mxu1 %vm1616_vm3, %v14930_v41 }
 0x71f   :  { %18449 = vst [vmem:[#allocation104_spill] sm:$0xff] %v15205_v3  ;;  %8234 = vmatprep.mubr.msk.f32.mxu1 %vm8627_vm1, %v18370_v62 }
 0x720   :  { %v8085_v0 = vpop.f32.mrf.mxu1 }
 0x722   :  { %v15211_v12 = vpop.f32.mrf.mxu1  ;;  %8235 = vmatmul.mubr.msk.f32.gmra.mxu1 %vm1616_vm3, %v14938_v8 }
 0x723   :  { %18450 = vst [vmem:[#allocation105_spill] sm:$0xff] %v15211_v12  ;;  %8237 = vmatprep.mubr.msk.f32.mxu1 %vm8627_vm1, %v18370_v62 }
 0x724   :  { %v8088_v37 = vpop.f32.mrf.mxu1 }
 0x726   :  { %v15217_v19 = vpop.f32.mrf.mxu1  ;;  %8238 = vmatmul.mubr.msk.f32.gmra.mxu1 %vm1616_vm3, %v14946_v30 }
 0x727   :  { %18451 = vst [vmem:[#allocation106_spill] sm:$0xff] %v15217_v19  ;;  %8240 = vmatprep.mubr.msk.f32.mxu1 %vm8627_vm1, %v18370_v62 }
 0x728   :  { %v8091_v21 = vpop.f32.mrf.mxu1 }
 0x72a   :  { %v15223_v3 = vpop.f32.mrf.mxu1  ;;  %8241 = vmatmul.mubr.msk.f32.gmra.mxu1 %vm1616_vm3, %v14954_v5 }
 0x72b   :  { %18452 = vst [vmem:[#allocation134_spill] sm:$0xff] %v15223_v3  ;;  %8243 = vmatprep.mubr.msk.f32.mxu1 %vm8627_vm1, %v18370_v62 }
 0x72c   :  { %v8094_v0 = vpop.f32.mrf.mxu1 }
 0x72e   :  { %v15229_v12 = vpop.f32.mrf.mxu1  ;;  %8244 = vmatmul.mubr.msk.f32.gmra.mxu1 %vm1616_vm3, %v14962_v38 }
 0x72f   :  { %18453 = vst [vmem:[#allocation45_spill] sm:$0xff] %v15229_v12  ;;  %8246 = vmatprep.mubr.msk.f32.mxu1 %vm8627_vm1, %v18370_v62 }
 0x730   :  { %v8097_v37 = vpop.f32.mrf.mxu1 }
 0x732   :  { %v15235_v19 = vpop.f32.mrf.mxu1  ;;  %8247 = vmatmul.mubr.msk.f32.gmra.mxu1 %vm1616_vm3, %v14970_v27 }
 0x733   :  { %18454 = vst [vmem:[#allocation157_spill] sm:$0xff] %v15235_v19  ;;  %8249 = vmatprep.mubr.msk.f32.mxu1 %vm8627_vm1, %v18370_v62 }
 0x734   :  { %v8100_v21 = vpop.f32.mrf.mxu1 }
 0x736   :  { %v15241_v3 = vpop.f32.mrf.mxu1  ;;  %8250 = vmatmul.mubr.msk.f32.gmra.mxu1 %vm1616_vm3, %v14978_v25 }
 0x737   :  { %18455 = vst [vmem:[#allocation65_spill] sm:$0xff] %v15241_v3  ;;  %8252 = vmatprep.mubr.msk.f32.mxu1 %vm8627_vm1, %v18370_v62 }
 0x738   :  { %v8103_v0 = vpop.f32.mrf.mxu1 }
 0x73a   :  { %v15247_v12 = vpop.f32.mrf.mxu1  ;;  %8253 = vmatmul.mubr.msk.f32.gmra.mxu1 %vm1616_vm3, %v14986_v58 }
 0x73b   :  { %18456 = vst [vmem:[#allocation66_spill] sm:$0xff] %v15247_v12  ;;  %8255 = vmatprep.mubr.msk.f32.mxu1 %vm8627_vm1, %v18370_v62 }
 0x73c   :  { %v8106_v37 = vpop.f32.mrf.mxu1 }
 0x73e   :  { %v15253_v19 = vpop.f32.mrf.mxu1  ;;  %8256 = vmatmul.mubr.msk.f32.gmra.mxu1 %vm1616_vm3, %v14994_v59 }
 0x73f   :  { %18457 = vst [vmem:[#allocation158_spill] sm:$0xff] %v15253_v19  ;;  %8258 = vmatprep.mubr.msk.f32.mxu1 %vm8627_vm1, %v18370_v62 }
 0x740   :  { %v8109_v21 = vpop.f32.mrf.mxu1 }
 0x742   :  { %v15259_v3 = vpop.f32.mrf.mxu1  ;;  %8259 = vmatmul.mubr.msk.f32.gmra.mxu1 %vm1616_vm3, %v15002_v49 }
 0x743   :  { %18458 = vst [vmem:[#allocation159_spill] sm:$0xff] %v15259_v3  ;;  %8261 = vmatprep.mubr.msk.f32.mxu1 %vm8627_vm1, %v18370_v62 }
 0x744   :  { %v8112_v0 = vpop.f32.mrf.mxu1 }
 0x745   :  { %v4860_v0 = vrot.slane %v14628_v17, 5 }
 0x746   :  { %v15265_v12 = vpop.f32.mrf.mxu1  ;;  %8262 = vmatmul.mubr.msk.f32.gmra.mxu1 %vm1616_vm3, %v15010_v60 }
 0x747   :  { %18459 = vst [vmem:[#allocation146_spill] sm:$0xff] %v15265_v12  ;;  %8264 = vmatprep.mubr.msk.f32.mxu1 %vm8627_vm1, %v18370_v62  ;;  %v4861_v12 = vrot.slane %v14636_v42, 5 }
 0x748   :  { %v8115_v37 = vpop.f32.mrf.mxu1 }
 0x74a   :  { %v15271_v19 = vpop.f32.mrf.mxu1  ;;  %8265 = vmatmul.mubr.msk.f32.gmra.mxu1 %vm1616_vm3, %v15018_v33 }
 0x74b   :  { %18460 = vst [vmem:[#allocation71_spill] sm:$0xff] %v15271_v19  ;;  %8267 = vmatprep.mubr.msk.f32.mxu1 %vm8627_vm1, %v18370_v62  ;;  %v4862_v19 = vsel %vm4859_vm8, %v4860_v0, %v4861_v12 }
 0x74c   :  { %v8118_v21 = vpop.f32.mrf.mxu1 }
 0x74e   :  { %v15279_v3 = vpop.f32.mrf.mxu1  ;;  %8268 = vmatmul.mubr.msk.f32.gmra.mxu1 %vm1616_vm3, %v14756_v39 }
 0x74f   :  { %18461 = vst [vmem:[#allocation72_spill] sm:$0xff] %v15279_v3  ;;  %8274 = vmatprep.mubr.msk.f32.mxu1 %vm8627_vm1, %v18370_v62  ;;  %v4864_v3 = vsel %vm4859_vm8, %v4861_v12, %v4863_v36 }
 0x750   :  { %v8121_v37 = vpop.f32.mrf.mxu1 }
 0x751   :  { %v4866_v37 = vsel %vm4859_vm8, %v4863_v36, %v4865_v18 }
 0x752   :  { %v15287_v63 = vpop.f32.mrf.mxu1  ;;  %8275 = vmatmul.mubr.msk.f32.vlgmr.msra.gmra.mxu1 %vm1616_vm3, %v4862_v19  ;;  %v4867_v19 = vrot.slane %v14675_v47, 5 }
 0x753   :  { %18462 = vst [vmem:[#allocation118_spill] sm:$0xff] %v15287_v63  ;;  %8277 = vmatprep.mubr.msk.f32.mxu1 %vm8627_vm1, %v18370_v62 }
 0x754   :  { %v8124_v21 = vpop.f32.mrf.mxu1 }
 0x755   :  { %v4868_v21 = vsel %vm4859_vm8, %v4865_v18, %v4867_v19 }
 0x756   :  { %v15294_v43 = vpop.f32.mrf.mxu1  ;;  %8278 = vmatmul.mubr.msk.f32.gmra.mxu1 %vm1616_vm3, %v4864_v3  ;;  %v4869_v3 = vrot.slane %v14690_v54, 5 }
 0x757   :  { %18463 = vst [vmem:[#allocation119_spill] sm:$0xff] %v15294_v43  ;;  %8280 = vmatprep.mubr.msk.f32.mxu1 %vm8627_vm1, %v18370_v62 }
 0x758   :  { %v8127_v0 = vpop.f32.mrf.mxu1 }
 0x759   :  { %v4870_v0 = vsel %vm4859_vm8, %v4867_v19, %v4869_v3 }
 0x75a   :  { %v15301_v63 = vpop.f32.mrf.mxu1  ;;  %8281 = vmatmul.mubr.msk.f32.gmra.mxu1 %vm1616_vm3, %v4866_v37  ;;  %v4871_v37 = vrot.slane %v14706_v31, 5 }
 0x75b   :  { %18464 = vst [vmem:[#allocation120_spill] sm:$0xff] %v15301_v63  ;;  %8283 = vmatprep.mubr.msk.f32.mxu1 %vm8627_vm1, %v18370_v62 }
 0x75c   :  { %v8130_v12 = vpop.f32.mrf.mxu1 }
 0x75d   :  { %v4872_v12 = vsel %vm4859_vm8, %v4869_v3, %v4871_v37 }
 0x75e   :  { %v15308_v43 = vpop.f32.mrf.mxu1  ;;  %8284 = vmatmul.mubr.msk.f32.gmra.mxu1 %vm1616_vm3, %v4868_v21  ;;  %v4873_v21 = vrot.slane %v14719_v51, 5 }
 0x75f   :  { %18465 = vst [vmem:[#allocation121_spill] sm:$0xff] %v15308_v43  ;;  %8286 = vmatprep.mubr.msk.f32.mxu1 %vm8627_vm1, %v18370_v62 }
 0x760   :  { %v8133_v36 = vpop.f32.mrf.mxu1 }
 0x761   :  { %v4874_v36 = vsel %vm4859_vm8, %v4871_v37, %v4873_v21 }
 0x762   :  { %v15315_v63 = vpop.f32.mrf.mxu1  ;;  %8287 = vmatmul.mubr.msk.f32.gmra.mxu1 %vm1616_vm3, %v4870_v0  ;;  %v4875_v0 = vrot.slane %v14730_v22, 5 }
 0x763   :  { %18466 = vst [vmem:[#allocation160_spill] sm:$0xff] %v15315_v63  ;;  %8289 = vmatprep.mubr.msk.f32.mxu1 %vm8627_vm1, %v18370_v62 }
 0x764   :  { %v8136_v18 = vpop.f32.mrf.mxu1 }
 0x765   :  { %v4876_v18 = vsel %vm4859_vm8, %v4873_v21, %v4875_v0  ;;  %v6969_v21 = vld [vmem:[%s16795_s2 + $0x38] sm:$0x3] }
 0x766   :  { %v15322_v43 = vpop.f32.mrf.mxu1  ;;  %8290 = vmatmul.mubr.msk.f32.gmra.mxu1 %vm1616_vm3, %v4872_v12  ;;  %v4877_v12 = vrot.slane %v14741_v55, 5 }
 0x767   :  { %18467 = vst [vmem:[#allocation122_spill] sm:$0xff] %v15322_v43  ;;  %8292 = vmatprep.mubr.msk.f32.mxu1 %vm8627_vm1, %v18370_v62  ;;  %8398 = vmatpush3.msk.msra.mxu1 %vm3801_vm4, %v6969_v21 }
 0x768   :  { %v8139_v19 = vpop.f32.mrf.mxu1  ;;  %8399 = vmatprep.subr.mxu1 %v18370_v62 }
 0x769   :  { %v4878_v19 = vsel %vm4859_vm8, %v4875_v0, %v4877_v12  ;;  %v6968_v0 = vld [vmem:[%s16795_s2 + $0x30] sm:$0xff] }
 0x76a   :  { %v15329_v63 = vpop.f32.mrf.mxu1  ;;  %8293 = vmatmul.mubr.msk.f32.gmra.mxu1 %vm1616_vm3, %v4874_v36  ;;  %v4879_v36 = vrot.slane %v14760_v46, 5 }
 0x76b   :  { %18468 = vst [vmem:[#allocation123_spill] sm:$0xff] %v15329_v63  ;;  %8295 = vmatprep.mubr.msk.f32.mxu1 %vm8627_vm1, %v18370_v62  ;;  %8400 = vmatpush3.msra.mxu1 %v6968_v0 }
 0x76c   :  { %v8142_v3 = vpop.f32.mrf.mxu1 }
 0x76e   :  { %v15336_v43 = vpop.f32.mrf.mxu1  ;;  %8296 = vmatmul.mubr.msk.f32.gmra.mxu1 %vm1616_vm3, %v4876_v18  ;;  %v4880_v18 = vsel %vm4859_vm8, %v4877_v12, %v4879_v36 }
 0x76f   :  { %8298 = vmatprep.mubr.msk.f32.mxu1 %vm8627_vm1, %v18370_v62 }
 0x770   :  { %v8149_v37 = vpop.f32.mrf.mxu1 }
 0x771   :  { %v4881_v37 = vrot.slane %v14781_v13, 5 }
 0x772   :  { %v15343_v63 = vpop.f32.mrf.mxu1  ;;  %8299 = vmatmul.mubr.msk.f32.gmra.mxu1 %vm1616_vm3, %v4878_v19 }
 0x773   :  { %8301 = vmatprep.mubr.msk.f32.mxu1 %vm8627_vm1, %v18370_v62  ;;  %v4882_v21 = vsel %vm4859_vm8, %v4879_v36, %v4881_v37  ;;  %v4884_v20 = vsel %vm4859_vm8, %v4881_v37, %v4883_v2 }
 0x774   :  { %v8152_v3 = vpop.f32.mrf.mxu1 }
 0x776   :  { %v15358_v19 = vpop.f32.mrf.mxu1  ;;  %8302 = vmatmul.mubr.msk.f32.gmra.mxu1 %vm1616_vm3, %v4880_v18  ;;  %v4885_v18 = vrot.slane %v14813_v32, 5 }
 0x777   :  { %8304 = vmatprep.mubr.msk.f32.mxu1 %vm8627_vm1, %v18370_v62 }
 0x778   :  { %v8155_v3 = vpop.f32.mrf.mxu1  ;;  %v4886_v0 = vsel %vm4859_vm8, %v4883_v2, %v4885_v18 }
 0x779   :  { %v4887_v3 = vrot.slane %v14820_v28, 5 }
 0x77a   :  { %v15365_v9 = vpop.f32.mrf.mxu1  ;;  %8305 = vmatmul.mubr.msk.f32.gmra.mxu1 %vm1616_vm3, %v4882_v21 }
 0x77b   :  { %8307 = vmatprep.mubr.msk.f32.mxu1 %vm8627_vm1, %v18370_v62 }
 0x77c   :  { %v8158_v12 = vpop.f32.mrf.mxu1 }
 0x77d   :  { %v4888_v12 = vsel %vm4859_vm8, %v4885_v18, %v4887_v3 }
 0x77e   :  { %v15372_v1 = vpop.f32.mrf.mxu1  ;;  %8308 = vmatmul.mubr.msk.f32.gmra.mxu1 %vm1616_vm3, %v4884_v20  ;;  %v4889_v20 = vrot.slane %v14828_v44, 5 }
 0x77f   :  { %8310 = vmatprep.mubr.msk.f32.mxu1 %vm8627_vm1, %v18370_v62 }
 0x780   :  { %v8161_v36 = vpop.f32.mrf.mxu1 }
 0x781   :  { %v4890_v36 = vsel %vm4859_vm8, %v4887_v3, %v4889_v20 }
 0x782   :  { %v15379_v21 = vpop.f32.mrf.mxu1  ;;  %8311 = vmatmul.mubr.msk.f32.gmra.mxu1 %vm1616_vm3, %v4886_v0  ;;  %v4891_v0 = vrot.slane %v14842_v11, 5 }
 0x783   :  { %8313 = vmatprep.mubr.msk.f32.mxu1 %vm8627_vm1, %v18370_v62 }
 0x784   :  { %v8164_v37 = vpop.f32.mrf.mxu1 }
 0x785   :  { %v4892_v37 = vsel %vm4859_vm8, %v4889_v20, %v4891_v0 }
 0x786   :  { %v15386_v24 = vpop.f32.mrf.mxu1  ;;  %8314 = vmatmul.mubr.msk.f32.gmra.mxu1 %vm1616_vm3, %v4888_v12  ;;  %v4893_v12 = vrot.slane %v14850_v61, 5 }
 0x787   :  { %8316 = vmatprep.mubr.msk.f32.mxu1 %vm8627_vm1, %v18370_v62 }
 0x788   :  { %v8167_v2 = vpop.f32.mrf.mxu1 }
 0x789   :  { %v4894_v2 = vsel %vm4859_vm8, %v4891_v0, %v4893_v12 }
 0x78a   :  { %v15393_v28 = vpop.f32.mrf.mxu1  ;;  %8317 = vmatmul.mubr.msk.f32.gmra.mxu1 %vm1616_vm3, %v4890_v36  ;;  %v4895_v36 = vrot.slane %v14858_v52, 5 }
 0x78b   :  { %8319 = vmatprep.mubr.msk.f32.mxu1 %vm8627_vm1, %v18370_v62 }
 0x78c   :  { %v8170_v18 = vpop.f32.mrf.mxu1 }
 0x78d   :  { %v4896_v18 = vsel %vm4859_vm8, %v4893_v12, %v4895_v36 }
 0x78e   :  { %v15400_v44 = vpop.f32.mrf.mxu1  ;;  %8320 = vmatmul.mubr.msk.f32.gmra.mxu1 %vm1616_vm3, %v4892_v37  ;;  %v4897_v37 = vrot.slane %v14866_v15, 5 }
 0x78f   :  { %8322 = vmatprep.mubr.msk.f32.mxu1 %vm8627_vm1, %v18370_v62 }
 0x790   :  { %v8173_v3 = vpop.f32.mrf.mxu1 }
 0x791   :  { %v4898_v3 = vsel %vm4859_vm8, %v4895_v36, %v4897_v37 }
 0x792   :  { %v15407_v11 = vpop.f32.mrf.mxu1  ;;  %8323 = vmatmul.mubr.msk.f32.gmra.mxu1 %vm1616_vm3, %v4894_v2  ;;  %v4899_v2 = vrot.slane %v14874_v16, 5 }
 0x793   :  { %8325 = vmatprep.mubr.msk.f32.mxu1 %vm8627_vm1, %v18370_v62 }
 0x794   :  { %v8176_v20 = vpop.f32.mrf.mxu1 }
 0x795   :  { %v4900_v20 = vsel %vm4859_vm8, %v4897_v37, %v4899_v2 }
 0x796   :  { %v15414_v61 = vpop.f32.mrf.mxu1  ;;  %8326 = vmatmul.mubr.msk.f32.gmra.mxu1 %vm1616_vm3, %v4896_v18  ;;  %v4901_v18 = vrot.slane %v14882_v45, 5 }
 0x797   :  { %8328 = vmatprep.mubr.msk.f32.mxu1 %vm8627_vm1, %v18370_v62 }
 0x798   :  { %v8179_v0 = vpop.f32.mrf.mxu1 }
 0x799   :  { %v4902_v0 = vsel %vm4859_vm8, %v4899_v2, %v4901_v18 }
 0x79a   :  { %v15421_v52 = vpop.f32.mrf.mxu1  ;;  %8329 = vmatmul.mubr.msk.f32.gmra.mxu1 %vm1616_vm3, %v4898_v3  ;;  %v4903_v3 = vrot.slane %v14890_v6, 5 }
 0x79b   :  { %8331 = vmatprep.mubr.msk.f32.mxu1 %vm8627_vm1, %v18370_v62 }
 0x79c   :  { %v8182_v12 = vpop.f32.mrf.mxu1 }
 0x79d   :  { %v4904_v12 = vsel %vm4859_vm8, %v4901_v18, %v4903_v3 }
 0x79e   :  { %v15428_v15 = vpop.f32.mrf.mxu1  ;;  %8332 = vmatmul.mubr.msk.f32.gmra.mxu1 %vm1616_vm3, %v4900_v20  ;;  %v4905_v20 = vrot.slane %v14898_v7, 5 }
 0x79f   :  { %8334 = vmatprep.mubr.msk.f32.mxu1 %vm8627_vm1, %v18370_v62 }
 0x7a0   :  { %v8185_v36 = vpop.f32.mrf.mxu1 }
 0x7a1   :  { %v4906_v36 = vsel %vm4859_vm8, %v4903_v3, %v4905_v20 }
 0x7a2   :  { %v15435_v16 = vpop.f32.mrf.mxu1  ;;  %8335 = vmatmul.mubr.msk.f32.gmra.mxu1 %vm1616_vm3, %v4902_v0  ;;  %v4907_v0 = vrot.slane %v14906_v23, 5 }
 0x7a3   :  { %8337 = vmatprep.mubr.msk.f32.mxu1 %vm8627_vm1, %v18370_v62 }
 0x7a4   :  { %v8188_v37 = vpop.f32.mrf.mxu1 }
 0x7a5   :  { %v4908_v37 = vsel %vm4859_vm8, %v4905_v20, %v4907_v0 }
 0x7a6   :  { %v15442_v45 = vpop.f32.mrf.mxu1  ;;  %8338 = vmatmul.mubr.msk.f32.gmra.mxu1 %vm1616_vm3, %v4904_v12  ;;  %v4909_v12 = vrot.slane %v14914_v4, 5 }
 0x7a7   :  { %8340 = vmatprep.mubr.msk.f32.mxu1 %vm8627_vm1, %v18370_v62 }
 0x7a8   :  { %v8191_v2 = vpop.f32.mrf.mxu1 }
 0x7a9   :  { %v4910_v2 = vsel %vm4859_vm8, %v4907_v0, %v4909_v12 }
 0x7aa   :  { %v15449_v6 = vpop.f32.mrf.mxu1  ;;  %8341 = vmatmul.mubr.msk.f32.gmra.mxu1 %vm1616_vm3, %v4906_v36  ;;  %v4911_v36 = vrot.slane %v14922_v57, 5 }
 0x7ab   :  { %8343 = vmatprep.mubr.msk.f32.mxu1 %vm8627_vm1, %v18370_v62 }
 0x7ac   :  { %v8194_v18 = vpop.f32.mrf.mxu1 }
 0x7ad   :  { %v4912_v18 = vsel %vm4859_vm8, %v4909_v12, %v4911_v36 }
 0x7ae   :  { %v15456_v7 = vpop.f32.mrf.mxu1  ;;  %8344 = vmatmul.mubr.msk.f32.gmra.mxu1 %vm1616_vm3, %v4908_v37  ;;  %v4913_v37 = vrot.slane %v14930_v41, 5 }
 0x7af   :  { %8346 = vmatprep.mubr.msk.f32.mxu1 %vm8627_vm1, %v18370_v62 }
 0x7b0   :  { %v8197_v3 = vpop.f32.mrf.mxu1 }
 0x7b1   :  { %v4914_v3 = vsel %vm4859_vm8, %v4911_v36, %v4913_v37 }
 0x7b2   :  { %v15463_v23 = vpop.f32.mrf.mxu1  ;;  %8347 = vmatmul.mubr.msk.f32.gmra.mxu1 %vm1616_vm3, %v4910_v2  ;;  %v4915_v2 = vrot.slane %v14938_v8, 5 }
 0x7b3   :  { %8349 = vmatprep.mubr.msk.f32.mxu1 %vm8627_vm1, %v18370_v62 }
 0x7b4   :  { %v8200_v20 = vpop.f32.mrf.mxu1 }
 0x7b5   :  { %v4916_v20 = vsel %vm4859_vm8, %v4913_v37, %v4915_v2 }
 0x7b6   :  { %v15470_v4 = vpop.f32.mrf.mxu1  ;;  %8350 = vmatmul.mubr.msk.f32.gmra.mxu1 %vm1616_vm3, %v4912_v18  ;;  %v4917_v18 = vrot.slane %v14946_v30, 5 }
 0x7b7   :  { %8352 = vmatprep.mubr.msk.f32.mxu1 %vm8627_vm1, %v18370_v62 }
 0x7b8   :  { %v8203_v0 = vpop.f32.mrf.mxu1 }
 0x7b9   :  { %v4918_v0 = vsel %vm4859_vm8, %v4915_v2, %v4917_v18 }
 0x7ba   :  { %v15477_v57 = vpop.f32.mrf.mxu1  ;;  %8353 = vmatmul.mubr.msk.f32.gmra.mxu1 %vm1616_vm3, %v4914_v3  ;;  %v4919_v3 = vrot.slane %v14954_v5, 5 }
 0x7bb   :  { %8355 = vmatprep.mubr.msk.f32.mxu1 %vm8627_vm1, %v18370_v62 }
 0x7bc   :  { %v8206_v12 = vpop.f32.mrf.mxu1 }
 0x7bd   :  { %v4920_v12 = vsel %vm4859_vm8, %v4917_v18, %v4919_v3 }
 0x7be   :  { %v15484_v41 = vpop.f32.mrf.mxu1  ;;  %8356 = vmatmul.mubr.msk.f32.gmra.mxu1 %vm1616_vm3, %v4916_v20  ;;  %v4921_v20 = vrot.slane %v14962_v38, 5 }
 0x7bf   :  { %8358 = vmatprep.mubr.msk.f32.mxu1 %vm8627_vm1, %v18370_v62 }
 0x7c0   :  { %v8209_v36 = vpop.f32.mrf.mxu1 }
 0x7c1   :  { %v4922_v36 = vsel %vm4859_vm8, %v4919_v3, %v4921_v20 }
 0x7c2   :  { %v15491_v8 = vpop.f32.mrf.mxu1  ;;  %8359 = vmatmul.mubr.msk.f32.gmra.mxu1 %vm1616_vm3, %v4918_v0  ;;  %v4923_v0 = vrot.slane %v14970_v27, 5 }
 0x7c3   :  { %8361 = vmatprep.mubr.msk.f32.mxu1 %vm8627_vm1, %v18370_v62 }
 0x7c4   :  { %v8212_v37 = vpop.f32.mrf.mxu1 }
 0x7c5   :  { %v4924_v37 = vsel %vm4859_vm8, %v4921_v20, %v4923_v0 }
 0x7c6   :  { %v15498_v30 = vpop.f32.mrf.mxu1  ;;  %8362 = vmatmul.mubr.msk.f32.gmra.mxu1 %vm1616_vm3, %v4920_v12  ;;  %v4925_v12 = vrot.slane %v14978_v25, 5 }
 0x7c7   :  { %8364 = vmatprep.mubr.msk.f32.mxu1 %vm8627_vm1, %v18370_v62 }
 0x7c8   :  { %v8215_v2 = vpop.f32.mrf.mxu1 }
 0x7c9   :  { %v4926_v2 = vsel %vm4859_vm8, %v4923_v0, %v4925_v12 }
 0x7ca   :  { %v15505_v5 = vpop.f32.mrf.mxu1  ;;  %8365 = vmatmul.mubr.msk.f32.gmra.mxu1 %vm1616_vm3, %v4922_v36  ;;  %v4927_v36 = vrot.slane %v14986_v58, 5 }
 0x7cb   :  { %8367 = vmatprep.mubr.msk.f32.mxu1 %vm8627_vm1, %v18370_v62 }
 0x7cc   :  { %v8218_v18 = vpop.f32.mrf.mxu1 }
 0x7cd   :  { %v4928_v18 = vsel %vm4859_vm8, %v4925_v12, %v4927_v36 }
 0x7ce   :  { %v15512_v38 = vpop.f32.mrf.mxu1  ;;  %8368 = vmatmul.mubr.msk.f32.gmra.mxu1 %vm1616_vm3, %v4924_v37  ;;  %v4929_v37 = vrot.slane %v14994_v59, 5 }
 0x7cf   :  { %8370 = vmatprep.mubr.msk.f32.mxu1 %vm8627_vm1, %v18370_v62 }
 0x7d0   :  { %v8221_v3 = vpop.f32.mrf.mxu1 }
 0x7d1   :  { %v4930_v3 = vsel %vm4859_vm8, %v4927_v36, %v4929_v37 }
 0x7d2   :  { %v15519_v27 = vpop.f32.mrf.mxu1  ;;  %8371 = vmatmul.mubr.msk.f32.gmra.mxu1 %vm1616_vm3, %v4926_v2  ;;  %v4931_v2 = vrot.slane %v15002_v49, 5 }
 0x7d3   :  { %8373 = vmatprep.mubr.msk.f32.mxu1 %vm8627_vm1, %v18370_v62 }
 0x7d4   :  { %v8224_v20 = vpop.f32.mrf.mxu1 }
 0x7d5   :  { %v4932_v20 = vsel %vm4859_vm8, %v4929_v37, %v4931_v2 }
 0x7d6   :  { %v15526_v25 = vpop.f32.mrf.mxu1  ;;  %8374 = vmatmul.mubr.msk.f32.gmra.mxu1 %vm1616_vm3, %v4928_v18  ;;  %v4933_v18 = vrot.slane %v15010_v60, 5 }
 0x7d7   :  { %8376 = vmatprep.mubr.msk.f32.mxu1 %vm8627_vm1, %v18370_v62 }
 0x7d8   :  { %v8227_v0 = vpop.f32.mrf.mxu1 }
 0x7d9   :  { %v4934_v0 = vsel %vm4859_vm8, %v4931_v2, %v4933_v18 }
 0x7da   :  { %v15533_v58 = vpop.f32.mrf.mxu1  ;;  %8377 = vmatmul.mubr.msk.f32.gmra.mxu1 %vm1616_vm3, %v4930_v3  ;;  %v4935_v3 = vrot.slane %v15018_v33, 5 }
 0x7db   :  { %8379 = vmatprep.mubr.msk.f32.mxu1 %vm8627_vm1, %v18370_v62 }
 0x7dc   :  { %v8230_v12 = vpop.f32.mrf.mxu1 }
 0x7dd   :  { %v4936_v12 = vsel %vm4859_vm8, %v4933_v18, %v4935_v3 }
 0x7de   :  { %v15540_v59 = vpop.f32.mrf.mxu1  ;;  %8380 = vmatmul.mubr.msk.f32.gmra.mxu1 %vm1616_vm3, %v4932_v20  ;;  %v18469_v20 = vrot.slane %v14756_v39, 5 }
 0x7df   :  { %8382 = vmatprep.mubr.msk.f32.mxu1 %vm8627_vm1, %v18370_v62 }
 0x7e0   :  { %v8233_v36 = vpop.f32.mrf.mxu1 }
 0x7e1   :  { %v4938_v36 = vsel %vm4859_vm8, %v4935_v3, %v18469_v20  ;;  %v5343_v3 = vrot.slane %v14636_v42, 6 }
 0x7e2   :  { %v15547_v49 = vpop.f32.mrf.mxu1  ;;  %8383 = vmatmul.mubr.msk.f32.gmra.mxu1 %vm1616_vm3, %v4934_v0 }
 0x7e3   :  { %8385 = vmatprep.mubr.msk.f32.mxu1 %vm8627_vm1, %v18370_v62 }
 0x7e4   :  { %v8236_v37 = vpop.f32.mrf.mxu1 }
 0x7e6   :  { %v15553_v60 = vpop.f32.mrf.mxu1  ;;  %8386 = vmatmul.mubr.msk.f32.gmra.mxu1 %vm1616_vm3, %v4936_v12  ;;  %v5342_v12 = vrot.slane %v14628_v17, 6 }
 0x7e7   :  { %8388 = vmatprep.mubr.msk.f32.mxu1 %vm8627_vm1, %v18370_v62 }
 0x7e8   :  { %v8239_v2 = vpop.f32.mrf.mxu1 }
 0x7ea   :  { %v15561_v33 = vpop.f32.mrf.mxu1  ;;  %8389 = vmatmul.mubr.msk.f32.gmra.mxu1 %vm1616_vm3, %v4938_v36  ;;  %v5344_v36 = vsel %vm3801_vm4, %v5342_v12, %v5343_v3 }
 0x7eb   :  { %8391 = vmatprep.mubr.msk.f32.mxu1 %vm8627_vm1, %v18370_v62 }
 0x7ec   :  { %v8242_v18 = vpop.f32.mrf.mxu1 }
 0x7ee   :  { %v15566_v0 = vpop.f32.mrf.mxu1  ;;  %8392 = vmatmul.mubr.msk.f32.gmra.mxu1 %vm1616_vm3, %v14796_v53  ;;  %v5345_v53 = vrot.slane %v14647_v56, 6 }
 0x7ef   :  { %8394 = vmatprep.mubr.msk.f32.mxu1 %vm8627_vm1, %v18370_v62 }
 0x7f0   :  { %v8245_v37 = vpop.f32.mrf.mxu1  ;;  %v5346_v42 = vsel %vm3801_vm4, %v5343_v3, %v5345_v53 }
 0x7f2   :  { %v15574_v2 = vpop.f32.mrf.mxu1  ;;  %8395 = vmatmul.mubr.msk.f32.gmra.mxu1 %vm1616_vm3, %v14799_v40  ;;  %v5347_v40 = vrot.slane %v14661_v50, 6 }
 0x7f3   :  { %8401 = vmatprep.mubr.msk.f32.mxu1 %vm8627_vm1, %v18370_v62 }
 0x7f4   :  { %v8248_v20 = vpop.f32.mrf.mxu1  ;;  %v5348_v12 = vsel %vm3801_vm4, %v5345_v53, %v5347_v40 }
 0x7f5   :  { %v5349_v20 = vrot.slane %v14675_v47, 6 }
 0x7f6   :  { %v15582_v18 = vpop.f32.mrf.mxu1  ;;  %8402 = vmatmul.mubr.msk.f32.vlgmr.msra.gmra.mxu1 %vm1616_vm3, %v5344_v36 }
 0x7f7   :  { %8404 = vmatprep.mubr.msk.f32.mxu1 %vm8627_vm1, %v18370_v62  ;;  %v5350_v3 = vsel %vm3801_vm4, %v5347_v40, %v5349_v20 }
 0x7f8   :  { %v8251_v17 = vpop.f32.mrf.mxu1 }
 0x7f9   :  { %v5351_v17 = vrot.slane %v14690_v54, 6 }
 0x7fa   :  { %v15589_v37 = vpop.f32.mrf.mxu1  ;;  %8405 = vmatmul.mubr.msk.f32.gmra.mxu1 %vm1616_vm3, %v5346_v42 }
 0x7fb   :  { %8407 = vmatprep.mubr.msk.f32.mxu1 %vm8627_vm1, %v18370_v62  ;;  %v5352_v53 = vsel %vm3801_vm4, %v5349_v20, %v5351_v17 }
 0x7fc   :  { %v8254_v56 = vpop.f32.mrf.mxu1 }
 0x7fd   :  { %v5353_v56 = vrot.slane %v14706_v31, 6 }
 0x7fe   :  { %v15596_v36 = vpop.f32.mrf.mxu1  ;;  %8408 = vmatmul.mubr.msk.f32.gmra.mxu1 %vm1616_vm3, %v5348_v12 }
 0x7ff   :  { %8410 = vmatprep.mubr.msk.f32.mxu1 %vm8627_vm1, %v18370_v62  ;;  %v5354_v40 = vsel %vm3801_vm4, %v5351_v17, %v5353_v56  ;;  %v4651_v17 = vadd.f32 %v15336_v43, %v15070_v14  ;;  %v5361_v14 = vrot.slane %v14760_v46, 6 }
 0x800   :  { %v8257_v50 = vpop.f32.mrf.mxu1 }
 0x801   :  { %v5355_v50 = vrot.slane %v14719_v51, 6 }
 0x802   :  { %v15603_v42 = vpop.f32.mrf.mxu1  ;;  %8411 = vmatmul.mubr.msk.f32.gmra.mxu1 %vm1616_vm3, %v5350_v3 }
 0x803   :  { %8413 = vmatprep.mubr.msk.f32.mxu1 %vm8627_vm1, %v18370_v62  ;;  %v5356_v20 = vsel %vm3801_vm4, %v5353_v56, %v5355_v50 }
 0x804   :  { %v8260_v47 = vpop.f32.mrf.mxu1 }
 0x805   :  { %v5357_v47 = vrot.slane %v14730_v22, 6 }
 0x806   :  { %v15610_v12 = vpop.f32.mrf.mxu1  ;;  %8414 = vmatmul.mubr.msk.f32.gmra.mxu1 %vm1616_vm3, %v5352_v53 }
 0x807   :  { %8416 = vmatprep.mubr.msk.f32.mxu1 %vm8627_vm1, %v18370_v62 }
 0x808   :  { %v8263_v54 = vpop.f32.mrf.mxu1 }
 0x809   :  { %v5358_v54 = vsel %vm3801_vm4, %v5355_v50, %v5357_v47 }
 0x80a   :  { %v15617_v3 = vpop.f32.mrf.mxu1  ;;  %8417 = vmatmul.mubr.msk.f32.gmra.mxu1 %vm1616_vm3, %v5354_v40  ;;  %v5359_v40 = vrot.slane %v14741_v55, 6 }
 0x80b   :  { %8419 = vmatprep.mubr.msk.f32.mxu1 %vm8627_vm1, %v18370_v62 }
 0x80c   :  { %v8266_v31 = vpop.f32.mrf.mxu1 }
 0x80e   :  { %v15624_v53 = vpop.f32.mrf.mxu1  ;;  %8420 = vmatmul.mubr.msk.f32.gmra.mxu1 %vm1616_vm3, %v5356_v20  ;;  %v4656_v20 = vadd.f32 %v15343_v63, %v15076_v29  ;;  %v5363_v29 = vrot.slane %v14781_v13, 6 }
 0x80f   :  { %8422 = vmatprep.mubr.msk.f32.mxu1 %vm8627_vm1, %v18370_v62 }
 0x810   :  { %v8269_v51 = vpop.f32.mrf.mxu1 }
 0x811   :  { %v5360_v51 = vsel %vm3801_vm4, %v5357_v47, %v5359_v40 }
 0x812   :  { %v5094_v31 = vpop.f32.mrf.mxu1  ;;  %8423 = vmatmul.mubr.msk.f32.gmra.mxu1 %vm1616_vm3, %v5358_v54  ;;  %v5362_v54 = vsel %vm3801_vm4, %v5359_v40, %v5361_v14 }
 0x813   :  { %v15634_v56 = vadd.f32 %v5094_v31, %v4651_v17  ;;  %8425 = vmatprep.mubr.msk.f32.mxu1 %vm8627_vm1, %v18370_v62  ;;  %v4661_v17 = vadd.f32 %v15358_v19, %v15090_v48  ;;  %v4666_v31 = vadd.f32 %v15365_v9, %v15097_v35  ;;  %v5365_v48 = vrot.slane %v14802_v34, 6 }
 0x814   :  { %v8276_v22 = vpop.f32.mrf.mxu1  ;;  %v5367_v35 = vrot.slane %v14813_v32, 6 }
 0x815   :  { %v5364_v22 = vsel %vm3801_vm4, %v5361_v14, %v5363_v29 }
 0x816   :  { %v5099_v43 = vpop.f32.mrf.mxu1  ;;  %8426 = vmatmul.mubr.msk.f32.gmra.mxu1 %vm1616_vm3, %v5360_v51  ;;  %v5366_v51 = vsel %vm3801_vm4, %v5363_v29, %v5365_v48  ;;  %v18471_v29 = vld [vmem:[#allocation150_spill] sm:$0xff] }
 0x817   :  { %v15643_v55 = vadd.f32 %v5099_v43, %v4656_v20  ;;  %8428 = vmatprep.mubr.msk.f32.mxu1 %vm8627_vm1, %v18370_v62  ;;  %v4671_v20 = vadd.f32 %v15372_v1, %v15103_v10  ;;  %v4676_v43 = vadd.f32 %v15379_v21, %v15109_v26 }
 0x818   :  { %v8279_v50 = vpop.f32.mrf.mxu1 }
 0x819   :  { %v5368_v50 = vsel %vm3801_vm4, %v5365_v48, %v5367_v35 }
 0x81a   :  { %v5104_v63 = vpop.f32.mrf.mxu1  ;;  %8429 = vmatmul.mubr.msk.f32.gmra.mxu1 %vm1616_vm3, %v5362_v54 }
 0x81b   :  { %v15652_v46 = vadd.f32 %v5104_v63, %v4661_v17  ;;  %8431 = vmatprep.mubr.msk.f32.mxu1 %vm8627_vm1, %v18370_v62  ;;  %v18470_v17 = vld [vmem:[#allocation99_spill] sm:$0xff]  ;;  %v4681_v63 = vadd.f32 %v15386_v24, %v18471_v29 }
 0x81c   :  { %v8282_v47 = vpop.f32.mrf.mxu1  ;;  %v5369_v10 = vrot.slane %v18470_v17, 6 }
 0x81e   :  { %v5109_v19 = vpop.f32.mrf.mxu1  ;;  %8432 = vmatmul.mubr.msk.f32.gmra.mxu1 %vm1616_vm3, %v5364_v22  ;;  %v5370_v47 = vsel %vm3801_vm4, %v5367_v35, %v5369_v10 }
 0x81f   :  { %v15661_v13 = vadd.f32 %v5109_v19, %v4666_v31  ;;  %8434 = vmatprep.mubr.msk.f32.mxu1 %vm8627_vm1, %v18370_v62  ;;  %v18472_v31 = vld [vmem:[#allocation100_spill] sm:$0xff]  ;;  %v18473_v19 = vld [vmem:[#allocation151_spill] sm:$0xff] }
 0x820   :  { %v8285_v40 = vpop.f32.mrf.mxu1  ;;  %v5371_v26 = vrot.slane %v18472_v31, 6 }
 0x821   :  { %v4686_v40 = vadd.f32 %v15393_v28, %v18473_v19 }
 0x822   :  { %v5114_v9 = vpop.f32.mrf.mxu1  ;;  %8435 = vmatmul.mubr.msk.f32.gmra.mxu1 %vm1616_vm3, %v5366_v51  ;;  %v18474_v51 = vld [vmem:[#allocation101_spill] sm:$0xff] }
 0x823   :  { %v15670_v34 = vadd.f32 %v5114_v9, %v4671_v20  ;;  %8437 = vmatprep.mubr.msk.f32.mxu1 %vm8627_vm1, %v18370_v62  ;;  %v5372_v20 = vsel %vm3801_vm4, %v5369_v10, %v5371_v26  ;;  %v5373_v24 = vrot.slane %v18474_v51, 6 }
 0x824   :  { %v8288_v14 = vpop.f32.mrf.mxu1 }
 0x825   :  { %v5374_v17 = vsel %vm3801_vm4, %v5371_v26, %v5373_v24 }
 0x826   :  { %v5119_v1 = vpop.f32.mrf.mxu1  ;;  %8438 = vmatmul.mubr.msk.f32.gmra.mxu1 %vm1616_vm3, %v5368_v50 }
 0x827   :  { %v15679_v32 = vadd.f32 %v5119_v1, %v4676_v43  ;;  %8440 = vmatprep.mubr.msk.f32.mxu1 %vm8627_vm1, %v18370_v62  ;;  %v18475_v43 = vld [vmem:[#allocation152_spill] sm:$0xff]  ;;  %v18476_v1 = vld [vmem:[#allocation102_spill] sm:$0xff] }
 0x828   :  { %v8291_v54 = vpop.f32.mrf.mxu1  ;;  %v4691_v50 = vadd.f32 %v15400_v44, %v18475_v43  ;;  %v5375_v28 = vrot.slane %v18476_v1, 6 }
 0x82a   :  { %v5124_v21 = vpop.f32.mrf.mxu1  ;;  %8441 = vmatmul.mubr.msk.f32.gmra.mxu1 %vm1616_vm3, %v5370_v47  ;;  %v5376_v31 = vsel %vm3801_vm4, %v5373_v24, %v5375_v28 }
 0x82b   :  { %v15688_v22 = vadd.f32 %v5124_v21, %v4681_v63  ;;  %8443 = vmatprep.mubr.msk.f32.mxu1 %vm8627_vm1, %v18370_v62  ;;  %v18477_v63 = vld [vmem:[#allocation153_spill] sm:$0xff]  ;;  %v18478_v21 = vld [vmem:[#allocation103_spill] sm:$0xff] }
 0x82c   :  { %v8294_v48 = vpop.f32.mrf.mxu1  ;;  %v4696_v47 = vadd.f32 %v15407_v11, %v18477_v63  ;;  %v5377_v44 = vrot.slane %v18478_v21, 6 }
 0x82e   :  { %v5129_v9 = vpop.f32.mrf.mxu1  ;;  %8444 = vmatmul.mubr.msk.f32.gmra.mxu1 %vm1616_vm3, %v5372_v20  ;;  %v5378_v51 = vsel %vm3801_vm4, %v5375_v28, %v5377_v44 }
 0x82f   :  { %v15697_v35 = vadd.f32 %v5129_v9, %v4686_v40  ;;  %8446 = vmatprep.mubr.msk.f32.mxu1 %vm8627_vm1, %v18370_v62  ;;  %v18479_v40 = vld [vmem:[#allocation28_spill] sm:$0xff]  ;;  %v18480_v9 = vld [vmem:[#allocation83_spill] sm:$0xff] }
 0x830   :  { %v8297_v14 = vpop.f32.mrf.mxu1  ;;  %v4701_v20 = vadd.f32 %v15414_v61, %v18479_v40  ;;  %v5379_v11 = vrot.slane %v18480_v9, 6 }
 0x832   :  { %v5134_v54 = vpop.f32.mrf.mxu1  ;;  %8447 = vmatmul.mubr.msk.f32.gmra.mxu1 %vm1616_vm3, %v5374_v17  ;;  %v5380_v1 = vsel %vm3801_vm4, %v5377_v44, %v5379_v11 }
 0x833   :  { %v15706_v10 = vadd.f32 %v5134_v54, %v4691_v50  ;;  %8449 = vmatprep.mubr.msk.f32.mxu1 %vm8627_vm1, %v18370_v62  ;;  %v18481_v50 = vld [vmem:[#allocation154_spill] sm:$0xff]  ;;  %v18482_v54 = vld [vmem:[#allocation84_spill] sm:$0xff] }
 0x834   :  { %v8300_v29 = vpop.f32.mrf.mxu1  ;;  %v4706_v17 = vadd.f32 %v15421_v52, %v18481_v50  ;;  %v5381_v61 = vrot.slane %v18482_v54, 6 }
 0x836   :  { %v5139_v48 = vpop.f32.mrf.mxu1  ;;  %8450 = vmatmul.mubr.msk.f32.gmra.mxu1 %vm1616_vm3, %v5376_v31  ;;  %v5382_v21 = vsel %vm3801_vm4, %v5379_v11, %v5381_v61 }
 0x837   :  { %v15715_v26 = vadd.f32 %v5139_v48, %v4696_v47  ;;  %8452 = vmatprep.mubr.msk.f32.mxu1 %vm8627_vm1, %v18370_v62  ;;  %v18483_v47 = vld [vmem:[#allocation49_spill] sm:$0xff] }
 0x838   :  { %v8303_v19 = vpop.f32.mrf.mxu1  ;;  %v4711_v31 = vadd.f32 %v15428_v15, %v18483_v47  ;;  %v18484_v48 = vld [vmem:[#allocation85_spill] sm:$0xff] }
 0x839   :  { %v5383_v52 = vrot.slane %v18484_v48, 6 }
 0x83a   :  { %v5144_v14 = vpop.f32.mrf.mxu1  ;;  %8453 = vmatmul.mubr.msk.f32.gmra.mxu1 %vm1616_vm3, %v5378_v51 }
 0x83b   :  { %v15724_v24 = vadd.f32 %v5144_v14, %v4701_v20  ;;  %8455 = vmatprep.mubr.msk.f32.mxu1 %vm8627_vm1, %v18370_v62  ;;  %v18485_v20 = vld [vmem:[#allocation50_spill] sm:$0xff]  ;;  %v5384_v9 = vsel %vm3801_vm4, %v5381_v61, %v5383_v52 }
 0x83c   :  { %v8306_v43 = vpop.f32.mrf.mxu1  ;;  %v4716_v51 = vadd.f32 %v15435_v16, %v18485_v20  ;;  %v18486_v14 = vld [vmem:[#allocation86_spill] sm:$0xff] }
 0x83d   :  { %v5385_v15 = vrot.slane %v18486_v14, 6 }
 0x83e   :  { %v5149_v29 = vpop.f32.mrf.mxu1  ;;  %8456 = vmatmul.mubr.msk.f32.gmra.mxu1 %vm1616_vm3, %v5380_v1 }
 0x83f   :  { %v15733_v28 = vadd.f32 %v5149_v29, %v4706_v17  ;;  %8458 = vmatprep.mubr.msk.f32.mxu1 %vm8627_vm1, %v18370_v62  ;;  %v18487_v17 = vld [vmem:[#allocation51_spill] sm:$0xff]  ;;  %v5386_v54 = vsel %vm3801_vm4, %v5383_v52, %v5385_v15 }
 0x840   :  { %v8309_v63 = vpop.f32.mrf.mxu1  ;;  %v4721_v1 = vadd.f32 %v15442_v45, %v18487_v17  ;;  %v18488_v29 = vld [vmem:[#allocation87_spill] sm:$0xff] }
 0x841   :  { %v5387_v16 = vrot.slane %v18488_v29, 6 }
 0x842   :  { %v5154_v19 = vpop.f32.mrf.mxu1  ;;  %8459 = vmatmul.mubr.msk.f32.gmra.mxu1 %vm1616_vm3, %v5382_v21 }
 0x843   :  { %v15742_v44 = vadd.f32 %v5154_v19, %v4711_v31  ;;  %8461 = vmatprep.mubr.msk.f32.mxu1 %vm8627_vm1, %v18370_v62  ;;  %v18489_v31 = vld [vmem:[#allocation53_spill] sm:$0xff]  ;;  %v5388_v48 = vsel %vm3801_vm4, %v5385_v15, %v5387_v16  ;;  %v18490_v19 = vld [vmem:[#allocation88_spill] sm:$0xff] }
 0x844   :  { %v8312_v40 = vpop.f32.mrf.mxu1  ;;  %v4726_v21 = vadd.f32 %v15449_v6, %v18489_v31  ;;  %v5389_v45 = vrot.slane %v18490_v19, 6 }
 0x846   :  { %v5159_v43 = vpop.f32.mrf.mxu1  ;;  %8462 = vmatmul.mubr.msk.f32.gmra.mxu1 %vm1616_vm3, %v5384_v9  ;;  %v5390_v14 = vsel %vm3801_vm4, %v5387_v16, %v5389_v45 }
 0x847   :  { %v15751_v11 = vadd.f32 %v5159_v43, %v4716_v51  ;;  %8464 = vmatprep.mubr.msk.f32.mxu1 %vm8627_vm1, %v18370_v62  ;;  %v18491_v51 = vld [vmem:[#allocation54_spill] sm:$0xff]  ;;  %v18492_v43 = vld [vmem:[#allocation15_spill] sm:$0xff] }
 0x848   :  { %v8315_v50 = vpop.f32.mrf.mxu1  ;;  %v4731_v9 = vadd.f32 %v15456_v7, %v18491_v51  ;;  %v5391_v6 = vrot.slane %v18492_v43, 6 }
 0x84a   :  { %v5164_v63 = vpop.f32.mrf.mxu1  ;;  %8465 = vmatmul.mubr.msk.f32.gmra.mxu1 %vm1616_vm3, %v5386_v54  ;;  %v5392_v29 = vsel %vm3801_vm4, %v5389_v45, %v5391_v6 }
 0x84b   :  { %v15760_v61 = vadd.f32 %v5164_v63, %v4721_v1  ;;  %8467 = vmatprep.mubr.msk.f32.mxu1 %vm8627_vm1, %v18370_v62  ;;  %v18493_v1 = vld [vmem:[#allocation57_spill] sm:$0xff]  ;;  %v18494_v63 = vld [vmem:[#allocation16_spill] sm:$0xff] }
 0x84c   :  { %v8318_v47 = vpop.f32.mrf.mxu1  ;;  %v4736_v54 = vadd.f32 %v15463_v23, %v18493_v1  ;;  %v5393_v7 = vrot.slane %v18494_v63, 6 }
 0x84e   :  { %v5169_v40 = vpop.f32.mrf.mxu1  ;;  %8468 = vmatmul.mubr.msk.f32.gmra.mxu1 %vm1616_vm3, %v5388_v48  ;;  %v5394_v19 = vsel %vm3801_vm4, %v5391_v6, %v5393_v7 }
 0x84f   :  { %v15769_v52 = vadd.f32 %v5169_v40, %v4726_v21  ;;  %8470 = vmatprep.mubr.msk.f32.mxu1 %vm8627_vm1, %v18370_v62  ;;  %v18495_v21 = vld [vmem:[#allocation58_spill] sm:$0xff]  ;;  %v18496_v40 = vld [vmem:[#allocation17_spill] sm:$0xff] }
 0x850   :  { %v8321_v20 = vpop.f32.mrf.mxu1  ;;  %v4741_v48 = vadd.f32 %v15470_v4, %v18495_v21  ;;  %v5395_v23 = vrot.slane %v18496_v40, 6 }
 0x852   :  { %v5174_v50 = vpop.f32.mrf.mxu1  ;;  %8471 = vmatmul.mubr.msk.f32.gmra.mxu1 %vm1616_vm3, %v5390_v14  ;;  %v5396_v43 = vsel %vm3801_vm4, %v5393_v7, %v5395_v23 }
 0x853   :  { %v15778_v15 = vadd.f32 %v5174_v50, %v4731_v9  ;;  %8473 = vmatprep.mubr.msk.f32.mxu1 %vm8627_vm1, %v18370_v62  ;;  %v18497_v9 = vld [vmem:[#allocation178_spill] sm:$0xff] }
 0x854   :  { %v8324_v17 = vpop.f32.mrf.mxu1  ;;  %v4746_v14 = vadd.f32 %v15477_v57, %v18497_v9  ;;  %v18498_v50 = vld [vmem:[#allocation18_spill] sm:$0xff] }
 0x855   :  { %v5397_v4 = vrot.slane %v18498_v50, 6 }
 0x856   :  { %v5179_v47 = vpop.f32.mrf.mxu1  ;;  %8474 = vmatmul.mubr.msk.f32.gmra.mxu1 %vm1616_vm3, %v5392_v29 }
 0x857   :  { %v15787_v16 = vadd.f32 %v5179_v47, %v4736_v54  ;;  %8476 = vmatprep.mubr.msk.f32.mxu1 %vm8627_vm1, %v18370_v62  ;;  %v18499_v54 = vld [vmem:[#allocation67_spill] sm:$0xff]  ;;  %v5398_v63 = vsel %vm3801_vm4, %v5395_v23, %v5397_v4  ;;  %v18500_v47 = vld [vmem:[#allocation20_spill] sm:$0xff] }
 0x858   :  { %v8327_v31 = vpop.f32.mrf.mxu1  ;;  %v4751_v29 = vadd.f32 %v15484_v41, %v18499_v54  ;;  %v5399_v57 = vrot.slane %v18500_v47, 6 }
 0x85a   :  { %v5184_v20 = vpop.f32.mrf.mxu1  ;;  %8477 = vmatmul.mubr.msk.f32.gmra.mxu1 %vm1616_vm3, %v5394_v19  ;;  %v5400_v40 = vsel %vm3801_vm4, %v5397_v4, %v5399_v57 }
 0x85b   :  { %v15796_v45 = vadd.f32 %v5184_v20, %v4741_v48  ;;  %8479 = vmatprep.mubr.msk.f32.mxu1 %vm8627_vm1, %v18370_v62  ;;  %v18501_v48 = vld [vmem:[#allocation104_spill] sm:$0xff]  ;;  %v18502_v20 = vld [vmem:[#allocation21_spill] sm:$0xff] }
 0x85c   :  { %v8330_v51 = vpop.f32.mrf.mxu1  ;;  %v4756_v19 = vadd.f32 %v15491_v8, %v18501_v48  ;;  %v5401_v41 = vrot.slane %v18502_v20, 6 }
 0x85e   :  { %v5189_v17 = vpop.f32.mrf.mxu1  ;;  %8480 = vmatmul.mubr.msk.f32.gmra.mxu1 %vm1616_vm3, %v5396_v43  ;;  %v5402_v50 = vsel %vm3801_vm4, %v5399_v57, %v5401_v41 }
 0x85f   :  { %v15805_v6 = vadd.f32 %v5189_v17, %v4746_v14  ;;  %8482 = vmatprep.mubr.msk.f32.mxu1 %vm8627_vm1, %v18370_v62  ;;  %v18503_v14 = vld [vmem:[#allocation105_spill] sm:$0xff]  ;;  %v18504_v17 = vld [vmem:[#allocation22_spill] sm:$0xff] }
 0x860   :  { %v8333_v1 = vpop.f32.mrf.mxu1  ;;  %v4761_v43 = vadd.f32 %v15498_v30, %v18503_v14  ;;  %v5403_v8 = vrot.slane %v18504_v17, 6 }
 0x862   :  { %v5194_v31 = vpop.f32.mrf.mxu1  ;;  %8483 = vmatmul.mubr.msk.f32.gmra.mxu1 %vm1616_vm3, %v5398_v63  ;;  %v5404_v47 = vsel %vm3801_vm4, %v5401_v41, %v5403_v8 }
 0x863   :  { %v15814_v7 = vadd.f32 %v5194_v31, %v4751_v29  ;;  %8485 = vmatprep.mubr.msk.f32.mxu1 %vm8627_vm1, %v18370_v62  ;;  %v18505_v29 = vld [vmem:[#allocation106_spill] sm:$0xff]  ;;  %v18506_v31 = vld [vmem:[#allocation23_spill] sm:$0xff] }
 0x864   :  { %v8336_v21 = vpop.f32.mrf.mxu1  ;;  %v4766_v63 = vadd.f32 %v15505_v5, %v18505_v29  ;;  %v5405_v30 = vrot.slane %v18506_v31, 6 }
 0x866   :  { %v5199_v51 = vpop.f32.mrf.mxu1  ;;  %8486 = vmatmul.mubr.msk.f32.gmra.mxu1 %vm1616_vm3, %v5400_v40  ;;  %v5406_v20 = vsel %vm3801_vm4, %v5403_v8, %v5405_v30 }
 0x867   :  { %v15823_v23 = vadd.f32 %v5199_v51, %v4756_v19  ;;  %8488 = vmatprep.mubr.msk.f32.mxu1 %vm8627_vm1, %v18370_v62  ;;  %v18507_v19 = vld [vmem:[#allocation134_spill] sm:$0xff]  ;;  %v18508_v51 = vld [vmem:[#allocation24_spill] sm:$0xff] }
 0x868   :  { %v8339_v9 = vpop.f32.mrf.mxu1  ;;  %v4771_v40 = vadd.f32 %v15512_v38, %v18507_v19  ;;  %v5407_v5 = vrot.slane %v18508_v51, 6 }
 0x86a   :  { %v5204_v1 = vpop.f32.mrf.mxu1  ;;  %8489 = vmatmul.mubr.msk.f32.gmra.mxu1 %vm1616_vm3, %v5402_v50  ;;  %v5408_v17 = vsel %vm3801_vm4, %v5405_v30, %v5407_v5 }
 0x86b   :  { %v15832_v4 = vadd.f32 %v5204_v1, %v4761_v43  ;;  %8491 = vmatprep.mubr.msk.f32.mxu1 %vm8627_vm1, %v18370_v62  ;;  %v18509_v43 = vld [vmem:[#allocation45_spill] sm:$0xff] }
 0x86c   :  { %v8342_v54 = vpop.f32.mrf.mxu1  ;;  %v4776_v50 = vadd.f32 %v15519_v27, %v18509_v43  ;;  %v18510_v1 = vld [vmem:[#allocation25_spill] sm:$0xff] }
 0x86d   :  { %v5409_v38 = vrot.slane %v18510_v1, 6 }
 0x86e   :  { %v5209_v21 = vpop.f32.mrf.mxu1  ;;  %8492 = vmatmul.mubr.msk.f32.gmra.mxu1 %vm1616_vm3, %v5404_v47 }
 0x86f   :  { %v15841_v57 = vadd.f32 %v5209_v21, %v4766_v63  ;;  %8494 = vmatprep.mubr.msk.f32.mxu1 %vm8627_vm1, %v18370_v62  ;;  %v18511_v63 = vld [vmem:[#allocation157_spill] sm:$0xff]  ;;  %v5410_v31 = vsel %vm3801_vm4, %v5407_v5, %v5409_v38  ;;  %v18512_v21 = vld [vmem:[#allocation26_spill] sm:$0xff] }
 0x870   :  { %v8345_v48 = vpop.f32.mrf.mxu1  ;;  %v4781_v47 = vadd.f32 %v15526_v25, %v18511_v63  ;;  %v5411_v27 = vrot.slane %v18512_v21, 6 }
 0x872   :  { %v5214_v9 = vpop.f32.mrf.mxu1  ;;  %8495 = vmatmul.mubr.msk.f32.gmra.mxu1 %vm1616_vm3, %v5406_v20  ;;  %v5412_v51 = vsel %vm3801_vm4, %v5409_v38, %v5411_v27 }
 0x873   :  { %v15850_v41 = vadd.f32 %v5214_v9, %v4771_v40  ;;  %8497 = vmatprep.mubr.msk.f32.mxu1 %vm8627_vm1, %v18370_v62  ;;  %v18513_v40 = vld [vmem:[#allocation65_spill] sm:$0xff]  ;;  %v18514_v9 = vld [vmem:[#allocation27_spill] sm:$0xff] }
 0x874   :  { %v8348_v14 = vpop.f32.mrf.mxu1  ;;  %v4786_v20 = vadd.f32 %v15533_v58, %v18513_v40  ;;  %v5413_v25 = vrot.slane %v18514_v9, 6 }
 0x876   :  { %v5219_v54 = vpop.f32.mrf.mxu1  ;;  %8498 = vmatmul.mubr.msk.f32.gmra.mxu1 %vm1616_vm3, %v5408_v17  ;;  %v5414_v1 = vsel %vm3801_vm4, %v5411_v27, %v5413_v25 }
 0x877   :  { %v15859_v8 = vadd.f32 %v5219_v54, %v4776_v50  ;;  %8500 = vmatprep.mubr.msk.f32.mxu1 %vm8627_vm1, %v18370_v62  ;;  %v18515_v50 = vld [vmem:[#allocation66_spill] sm:$0xff]  ;;  %v18516_v54 = vld [vmem:[#allocation148_spill] sm:$0xff] }
 0x878   :  { %v8351_v29 = vpop.f32.mrf.mxu1  ;;  %v4791_v17 = vadd.f32 %v15540_v59, %v18515_v50  ;;  %v5415_v58 = vrot.slane %v18516_v54, 6  ;;  %v18520_v50 = vld [vmem:[#allocation146_spill] sm:$0xff] }
 0x87a   :  { %v5224_v48 = vpop.f32.mrf.mxu1  ;;  %8501 = vmatmul.mubr.msk.f32.gmra.mxu1 %vm1616_vm3, %v5410_v31  ;;  %v5416_v21 = vsel %vm3801_vm4, %v5413_v25, %v5415_v58 }
 0x87b   :  { %v15868_v30 = vadd.f32 %v5224_v48, %v4781_v47  ;;  %8503 = vmatprep.mubr.msk.f32.mxu1 %vm8627_vm1, %v18370_v62  ;;  %v18517_v47 = vld [vmem:[#allocation158_spill] sm:$0xff]  ;;  %v18518_v48 = vld [vmem:[#allocation149_spill] sm:$0xff] }
 0x87c   :  { %v8354_v19 = vpop.f32.mrf.mxu1  ;;  %v4796_v31 = vadd.f32 %v15547_v49, %v18517_v47  ;;  %v5417_v59 = vrot.slane %v18518_v48, 6  ;;  %v5419_v49 = vrot.slane %v14756_v39, 6 }
 0x87e   :  { %v5229_v14 = vpop.f32.mrf.mxu1  ;;  %8504 = vmatmul.mubr.msk.f32.gmra.mxu1 %vm1616_vm3, %v5412_v51  ;;  %v5418_v9 = vsel %vm3801_vm4, %v5415_v58, %v5417_v59  ;;  %v18521_v58 = vld [vmem:[#allocation71_spill] sm:$0xff] }
 0x87f   :  { %v15877_v5 = vadd.f32 %v5229_v14, %v4786_v20  ;;  %8506 = vmatprep.mubr.msk.f32.mxu1 %vm8627_vm1, %v18370_v62  ;;  %v18519_v20 = vld [vmem:[#allocation159_spill] sm:$0xff] }
 0x880   :  { %v8357_v43 = vpop.f32.mrf.mxu1  ;;  %v4801_v51 = vadd.f32 %v15553_v60, %v18519_v20  ;;  %v18526_v20 = vld [vmem:[#allocation64_spill] sm:$0xff] }
 0x882   :  { %v5234_v29 = vpop.f32.mrf.mxu1  ;;  %8507 = vmatmul.mubr.msk.f32.gmra.mxu1 %vm1616_vm3, %v5414_v1  ;;  %v5420_v1 = vsel %vm3801_vm4, %v5417_v59, %v5419_v49  ;;  %v18525_v59 = vld [vmem:[#allocation72_spill] sm:$0xff] }
 0x883   :  { %v15886_v38 = vadd.f32 %v5234_v29, %v4791_v17  ;;  %8509 = vmatprep.mubr.msk.f32.mxu1 %vm8627_vm1, %v18370_v62  ;;  %v4806_v17 = vadd.f32 %v15561_v33, %v18520_v50  ;;  %v4811_v29 = vadd.f32 %v15566_v0, %v18521_v58  ;;  %v18529_v58 = vld [vmem:[#allocation120_spill] sm:$0xff] }
 0x884   :  { %v8360_v63 = vpop.f32.mrf.mxu1 }
 0x885   :  { %v18522_v63 = vld [vmem:[#allocation98_spill] sm:$0xff] }
 0x886   :  { %v5239_v19 = vpop.f32.mrf.mxu1  ;;  %8510 = vmatmul.mubr.msk.f32.gmra.mxu1 %vm1616_vm3, %v5416_v21  ;;  %v18523_v47 = vrot.slane %v18522_v63, 6 }
 0x887   :  { %v15895_v27 = vadd.f32 %v5239_v19, %v4796_v31  ;;  %8512 = vmatprep.mubr.msk.f32.mxu1 %vm8627_vm1, %v18370_v62  ;;  %v4816_v19 = vadd.f32 %v15574_v2, %v18525_v59 }
 0x888   :  { %v8363_v40 = vpop.f32.mrf.mxu1  ;;  %v5422_v31 = vsel %vm3801_vm4, %v5419_v49, %v18523_v47 }
 0x88a   :  { %v5244_v14 = vpop.f32.mrf.mxu1  ;;  %8513 = vmatmul.mubr.msk.f32.gmra.mxu1 %vm1616_vm3, %v5418_v9  ;;  %v18527_v9 = vld [vmem:[#allocation118_spill] sm:$0xff] }
 0x88b   :  { %v15904_v25 = vadd.f32 %v5244_v14, %v4801_v51  ;;  %8515 = vmatprep.mubr.msk.f32.mxu1 %vm8627_vm1, %v18370_v62  ;;  %v4821_v49 = vadd.f32 %v15582_v18, %v18527_v9 }
 0x88c   :  { %v8366_v43 = vpop.f32.mrf.mxu1 }
 0x88e   :  { %v5249_v54 = vpop.f32.mrf.mxu1  ;;  %8516 = vmatmul.mubr.msk.f32.gmra.mxu1 %vm1616_vm3, %v5420_v1 }
 0x88f   :  { %v15912_v60 = vadd.f32 %v5249_v54, %v4806_v17  ;;  %8518 = vmatprep.mubr.msk.f32.mxu1 %vm8627_vm1, %v18370_v62  ;;  %v18528_v17 = vld [vmem:[#allocation119_spill] sm:$0xff] }
 0x890   :  { %v8369_v39 = vpop.f32.mrf.mxu1  ;;  %v4826_v1 = vadd.f32 %v15589_v37, %v18528_v17 }
 0x892   :  { %v5254_v21 = vpop.f32.mrf.mxu1  ;;  %8519 = vmatmul.mubr.msk.f32.gmra.mxu1 %vm1616_vm3, %v5422_v31 }
 0x893   :  { %v15922_v33 = vadd.f32 %v5254_v21, %v4811_v29  ;;  %8521 = vmatprep.mubr.msk.f32.mxu1 %vm8627_vm1, %v18370_v62  ;;  %v4831_v29 = vadd.f32 %v15596_v36, %v18529_v58  ;;  %v18530_v21 = vld [vmem:[#allocation121_spill] sm:$0xff] }
 0x894   :  { %v8372_v48 = vpop.f32.mrf.mxu1  ;;  %v4836_v18 = vadd.f32 %v15603_v42, %v18530_v21 }
 0x895   :  { %18524 = vst [vmem:[#allocation124_spill] sm:$0xff] %v15922_v33 }
 0x896   :  { %v5259_v40 = vpop.f32.mrf.mxu1  ;;  %8522 = vmatmul.mubr.msk.f32.gmra.mxu1 %vm1616_vm3, %v18526_v20 }
 0x897   :  { %v15930_v0 = vadd.f32 %v5259_v40, %v4816_v19  ;;  %v18531_v40 = vld [vmem:[#allocation160_spill] sm:$0xff] }
 0x898   :  { %v8375_v51 = vpop.f32.mrf.mxu1  ;;  %v4841_v37 = vadd.f32 %v15610_v12, %v18531_v40 }
 0x89a   :  { %v5264_v14 = vpop.f32.mrf.mxu1 }
 0x89b   :  { %v15934_v43 = vadd.f32 %v5264_v14, %v4821_v49  ;;  %v18532_v49 = vld [vmem:[#allocation122_spill] sm:$0xff] }
 0x89c   :  { %v8378_v50 = vpop.f32.mrf.mxu1  ;;  %v4846_v36 = vadd.f32 %v15617_v3, %v18532_v49 }
 0x89e   :  { %v5269_v54 = vpop.f32.mrf.mxu1 }
 0x89f   :  { %v15938_v39 = vadd.f32 %v5269_v54, %v4826_v1  ;;  %v18533_v1 = vld [vmem:[#allocation123_spill] sm:$0xff] }
 0x8a0   :  { %v8381_v2 = vpop.f32.mrf.mxu1  ;;  %v4851_v42 = vadd.f32 %v15624_v53, %v18533_v1 }
 0x8a2   :  { %v5274_v63 = vpop.f32.mrf.mxu1 }
 0x8a3   :  { %v15942_v47 = vadd.f32 %v5274_v63, %v4831_v29 }
 0x8a4   :  { %v8384_v31 = vpop.f32.mrf.mxu1 }
 0x8a6   :  { %v5279_v48 = vpop.f32.mrf.mxu1 }
 0x8a7   :  { %v15946_v59 = vadd.f32 %v5279_v48, %v4836_v18 }
 0x8a8   :  { %v8387_v19 = vpop.f32.mrf.mxu1 }
 0x8aa   :  { %v5284_v20 = vpop.f32.mrf.mxu1 }
 0x8ab   :  { %v15950_v51 = vadd.f32 %v5284_v20, %v4841_v37 }
 0x8ac   :  { %v8390_v9 = vpop.f32.mrf.mxu1 }
 0x8ae   :  { %v5289_v14 = vpop.f32.mrf.mxu1 }
 0x8af   :  { %v15954_v50 = vadd.f32 %v5289_v14, %v4846_v36 }
 0x8b0   :  { %v8393_v17 = vpop.f32.mrf.mxu1 }
 0x8b2   :  { %v5294_v54 = vpop.f32.mrf.mxu1 }
 0x8b3   :  { %v15958_v2 = vadd.f32 %v5294_v54, %v4851_v42 }
 0x8b4   :  { %v8396_v58 = vpop.f32.mrf.mxu1 }
 0x8b6   :  { %v5576_v29 = vpop.f32.mrf.mxu1 }
 0x8b7   :  { %v15961_v12 = vadd.f32 %v5576_v29, %v15634_v56  ;;  %v18534_v29 = vlaneseq }
 0x8b8   :  { %v8403_v63 = vpop.f32.mrf.mxu1 }
 0x8b9   :  { %v5869_v63 = vand.u32 127, %v18534_v29 }
 0x8ba   :  { %v5581_v31 = vpop.f32.mrf.mxu1 }
 0x8bb   :  { %v15964_v21 = vadd.f32 %v5581_v31, %v15643_v55 }
 0x8bc   :  { %v8406_v3 = vpop.f32.mrf.mxu1 }
 0x8be   :  { %v5586_v18 = vpop.f32.mrf.mxu1 }
 0x8bf   :  { %v15967_v48 = vadd.f32 %v5586_v18, %v15652_v46 }
 0x8c0   :  { %v8409_v19 = vpop.f32.mrf.mxu1 }
 0x8c2   :  { %v5591_v53 = vpop.f32.mrf.mxu1 }
 0x8c3   :  { %v15970_v40 = vadd.f32 %v5591_v53, %v15661_v13 }
 0x8c4   :  { %v8412_v37 = vpop.f32.mrf.mxu1 }
 0x8c6   :  { %v5596_v20 = vpop.f32.mrf.mxu1 }
 0x8c7   :  { %v15973_v56 = vadd.f32 %v5596_v20, %v15670_v34 }
 0x8c8   :  { %v8415_v9 = vpop.f32.mrf.mxu1 }
 0x8ca   :  { %v5601_v49 = vpop.f32.mrf.mxu1 }
 0x8cb   :  { %v15976_v55 = vadd.f32 %v5601_v49, %v15679_v32  ;;  %v18535_v32 = vld [vmem:[#allocation34_spill] sm:$0xff] }
 0x8cc   :  { %v8418_v36 = vpop.f32.mrf.mxu1  ;;  %v5872_v31 = vmul.u32 169, %v18535_v32 }
 0x8ce   :  { %v5606_v14 = vpop.f32.mrf.mxu1  ;;  %v5873_v19 = vsub.s32 %v5869_v63, %v5872_v31 }
 0x8cf   :  { %v15979_v46 = vadd.f32 %v5606_v14, %v15688_v22  ;;  %v5870_v22 = vadd.s32 128, %v5869_v63 }
 0x8d0   :  { %v8421_v17 = vpop.f32.mrf.mxu1  ;;  %vm5876_vm9 = vcmp.ge.s32.totalorder %v5873_v19, 0  ;;  %vm5879_vm10 = vcmp.lt.s32.totalorder %v5873_v19, 155 }
 0x8d1   :  { %v15995_v20 = vmul.u32.u64.low 2643056798, %v5870_v22  ;;  %v15996_v9 = vmul.u32.u64.high 2643056798, %v5870_v22, %v15995_v20  ;;  %v5874_v36 = vsub.s32 %v5870_v22, %v5872_v31  ;;  %vm16006_vm13 = vmand %vm5876_vm9, %vm5879_vm10 }
 0x8d2   :  { %v5611_v1 = vpop.f32.mrf.mxu1 }
 0x8d3   :  { %v15982_v13 = vadd.f32 %v5611_v1, %v15697_v35  ;;  %v15992_v37 = vmul.u32.u64.low 2643056798, %v5869_v63  ;;  %v15993_v35 = vmul.u32.u64.high 2643056798, %v5869_v63, %v15992_v37  ;;  %vm5877_vm11 = vcmp.ge.s32.totalorder %v5874_v36, 0 }
 0x8d4   :  { %v8424_v42 = vpop.f32.mrf.mxu1  ;;  %vm5880_vm12 = vcmp.lt.s32.totalorder %v5874_v36, 155 }
 0x8d5   :  { %v5891_v17 = vshrl.u32 %v15993_v35, 3  ;;  %vm16010_vm14 = vmand %vm5877_vm11, %vm5880_vm12 }
 0x8d6   :  { %v5616_v54 = vpop.f32.mrf.mxu1 }
 0x8d7   :  { %v15985_v34 = vadd.f32 %v5616_v54, %v15706_v10  ;;  %v5892_v42 = vmul.u32 13, %v5891_v17  ;;  %v18542_v17 = vmov 0 }
 0x8d8   :  { %v8427_v58 = vpop.f32.mrf.mxu1 }
 0x8da   :  { %v5621_v3 = vpop.f32.mrf.mxu1 }
 0x8db   :  { %v15990_v18 = vadd.f32 %v5621_v3, %v15715_v26  ;;  %v5902_v26 = vshrl.u32 %v15996_v9, 3  ;;  %v5893_v3 = vsub.s32 %v5869_v63, %v5892_v42  ;;  %v17132_v42 = vmov 1.0  }
 0x8dc   :  { %v8430_v53 = vpop.f32.mrf.mxu1 }
 0x8dd   :  { %v5903_v58 = vmul.u32 13, %v5902_v26  ;;  %vm5918_vm15 = vcmp.ne.s32.totalorder %v5893_v3, 0  ;;  %vm5921_vm0 = vcmp.lt.s32.totalorder %v5893_v3, 0  ;;  %v5927_v19 = vadd.s32 13, %v5893_v3 }
 0x8de   :  { %v5626_v10 = vpop.f32.mrf.mxu1  ;;  %vm5924_vm4 = vmand %vm5921_vm0, %vm5918_vm15  ;;  %v5871_v26 = vadd.s32 256, %v5869_v63 }
 0x8df   :  { %v15999_v49 = vadd.f32 %v5626_v10, %v15724_v24  ;;  %v5904_v24 = vsub.s32 %v5870_v22, %v5903_v58  ;;  %v5930_v9 = vsel %vm5924_vm4, %v5927_v19, %v5893_v3  ;;  %vm5945_vm4 = vcmask 556032  }
 0x8e0   :  { %v8433_v14 = vpop.f32.mrf.mxu1  ;;  %vm5933_vm7 = vcmp.lt.s32.totalorder %v5930_v9, 12  ;;  %v5875_v58 = vsub.s32 %v5871_v26, %v5872_v31 }
 0x8e1   :  { %vm5919_vm2 = vcmp.ne.s32.totalorder %v5904_v24, 0  ;;  %vm5922_vm3 = vcmp.lt.s32.totalorder %v5904_v24, 0  ;;  %v5928_v20 = vadd.s32 13, %v5904_v24  ;;  %vm16019_vm9 = vmand %vm16006_vm13, %vm5933_vm7 }
 0x8e2   :  { %v5631_v1 = vpop.f32.mrf.mxu1  ;;  %vm5925_vm5 = vmand %vm5922_vm3, %vm5919_vm2  ;;  %vm5878_vm11 = vcmp.ge.s32.totalorder %v5875_v58, 0  ;;  %vm5881_vm12 = vcmp.lt.s32.totalorder %v5875_v58, 155 }
 0x8e3   :  { %v16004_v54 = vadd.f32 %v5631_v1, %v15733_v28  ;;  %v5931_v10 = vsel %vm5925_vm5, %v5928_v20, %v5904_v24  ;;  %vm16049_vm13 = vmand %vm5878_vm11, %vm5881_vm12  ;;  %vm6092_vm5 = vcmask 74752  }
 0x8e4   :  { %v8436_v29 = vpop.f32.mrf.mxu1  ;;  %vm5934_vm8 = vcmp.lt.s32.totalorder %v5931_v10, 12  ;;  %v18545_v10 = vmov 0 }
 0x8e5   :  { %vm16028_vm10 = vmand %vm16010_vm14, %vm5934_vm8  ;;  %v18546_v10 = vsel %vm16049_vm13, 4294967295, %v18545_v10 }
 0x8e6   :  { %v5636_v37 = vpop.f32.mrf.mxu1  ;;  %v18543_v17 = vsel %vm16028_vm10, 4294967295, %v18542_v17  ;;  %7015 = vmatprep.mubr.msk.f32.mxu1 %vm16028_vm10, %v17132_v42  ;;  %7019 = vmatprep.mubr.msk.f32.mxu0 %vm16028_vm10, %v17132_v42  ;;  %18547 = vst [vmem:[#allocation90_spill] sm:$0xff] %v18546_v10 }
 0x8e7   :  { %v16015_v28 = vadd.f32 %v5636_v37, %v15742_v44  ;;  %18544 = vst [vmem:[#allocation161_spill] sm:$0xff] %v18543_v17 }
 0x8e8   :  { %v8439_v22 = vpop.f32.mrf.mxu1 }
 0x8ea   :  { %v5641_v36 = vpop.f32.mrf.mxu1 }
 0x8eb   :  { %v16024_v44 = vadd.f32 %v5641_v36, %v15751_v11  ;;  %v16038_v11 = vmul.u32.u64.low 2643056798, %v5871_v26  ;;  %v16039_v29 = vmul.u32.u64.high 2643056798, %v5871_v26, %v16038_v11 }
 0x8ec   :  { %v8442_v1 = vpop.f32.mrf.mxu1  ;;  %v18548_v11 = vmov 0 }
 0x8ed   :  { %v5913_v63 = vshrl.u32 %v16039_v29, 3 }
 0x8ee   :  { %v5646_v3 = vpop.f32.mrf.mxu1 }
 0x8ef   :  { %v16042_v24 = vadd.f32 %v5646_v3, %v15760_v61  ;;  %v5914_v19 = vmul.u32 13, %v5913_v63 }
 0x8f0   :  { %v8445_v53 = vpop.f32.mrf.mxu1 }
 0x8f1   :  { %v5915_v22 = vsub.s32 %v5871_v26, %v5914_v19 }
 0x8f2   :  { %v5651_v37 = vpop.f32.mrf.mxu1 }
 0x8f3   :  { %v5795_v35 = vadd.f32 %v5651_v37, %v15769_v52  ;;  %vm5920_vm14 = vcmp.ne.s32.totalorder %v5915_v22, 0  ;;  %vm5923_vm15 = vcmp.lt.s32.totalorder %v5915_v22, 0  ;;  %v5929_v61 = vadd.s32 13, %v5915_v22 }
 0x8f4   :  { %v8448_v20 = vpop.f32.mrf.mxu1  ;;  %vm5926_vm0 = vmand %vm5923_vm15, %vm5920_vm14 }
 0x8f5   :  { %v5932_v1 = vsel %vm5926_vm0, %v5929_v61, %v5915_v22 }
 0x8f6   :  { %v5656_v9 = vpop.f32.mrf.mxu1  ;;  %vm16053_vm2 = vcmp.lt.s32.totalorder %v5932_v1, 12 }
 0x8f7   :  { %v16047_v31 = vadd.f32 %v5656_v9, %v15778_v15  ;;  %v18549_v11 = vsel %vm16053_vm2, 4294967295, %v18548_v11  ;;  %vm5938_vm3 = vmand %vm16049_vm13, %vm16053_vm2 }
 0x8f8   :  { %v8451_v36 = vpop.f32.mrf.mxu1  ;;  %18550 = vst [vmem:[#allocation91_spill] sm:$0xff] %v18549_v11 }
 0x8fa   :  { %v5661_v52 = vpop.f32.mrf.mxu1 }
 0x8fb   :  { %v16058_v26 = vadd.f32 %v5661_v52, %v15787_v16 }
 0x8fc   :  { %v8454_v15 = vpop.f32.mrf.mxu1 }
 0x8fe   :  { %v5666_v58 = vpop.f32.mrf.mxu1 }
 0x8ff   :  { %v16065_v29 = vadd.f32 %v5666_v58, %v15796_v45 }
 0x900   :  { %v8457_v3 = vpop.f32.mrf.mxu1 }
 0x902   :  { %v5671_v53 = vpop.f32.mrf.mxu1 }
 0x903   :  { %v16068_v63 = vadd.f32 %v5671_v53, %v15805_v6 }
 0x904   :  { %v8460_v37 = vpop.f32.mrf.mxu1 }
 0x906   :  { %v5676_v19 = vpop.f32.mrf.mxu1 }
 0x907   :  { %v16071_v16 = vadd.f32 %v5676_v19, %v15814_v7 }
 0x908   :  { %v8463_v20 = vpop.f32.mrf.mxu1 }
 0x90a   :  { %v16073_v22 = vpop.f32.mrf.mxu1 }
 0x90c   :  { %v8466_v9 = vpop.f32.mrf.mxu1 }
 0x90d   :  { %v5823_v9 = vsub.s32 3, %v18535_v32 }
 0x90e   :  { %v16075_v61 = vpop.f32.mrf.mxu1 }
 0x910   :  { %v8469_v36 = vpop.f32.mrf.mxu1 }
 0x911   :  { %v16081_v36 = vld [vmem:[%s16796_s3] sm:$0xff]  ;;  %s8629_s3 = smov [#allocation2]  }
 0x912   :  { %v5691_v1 = vpop.f32.mrf.mxu1  ;;  %s6660_s27 = sshll.u32 %s8629_s3, 4  ;;  %s6661_s27 = int_to_ptr.vmem [resolvable:$true] %s6660_s27 }
 0x913   :  { %s8604_s28 = scalar_lea.vmem %s6661_s27, 32  ;;  %p8609_p1 = scmp.lt.s32.totalorder %s6661_s27, %s6661_s27 }
 0x914   :  { %v8472_v45 = vpop.f32.mrf.mxu1  ;;  %p8605_p0 = scmp.ne.s32.totalorder %s6661_s27, %s8604_s28  ;;  %p8610_p2 = scmp.lt.s32.totalorder %s8604_s28, %s8604_s28 }
 0x915   :  { %v16084_v45 = vrot.slane %v16081_v36, %v5823_v9 }
 0x916   :  { %v5696_v52 = vpop.f32.mrf.mxu1  ;;  %p8611_p3 = por %p8610_p2, %p8609_p1 }
 0x918   :  { %v8475_v15 = vpop.f32.mrf.mxu1  ;;  %p8612_p4 = pnand %p8611_p3, %p8605_p0 }
 0x91a   :  { %v5701_v58 = vpop.f32.mrf.mxu1 }
 0x91c   :  { %v8478_v3 = vpop.f32.mrf.mxu1 }
 0x91e   :  { %v5706_v6 = vpop.f32.mrf.mxu1 }
 0x920   :  { %v8481_v53 = vpop.f32.mrf.mxu1 }
 0x922   :  { %v5711_v37 = vpop.f32.mrf.mxu1 }
 0x924   :  { %v8484_v42 = vpop.f32.mrf.mxu1 }
 0x926   :  { %v5716_v17 = vpop.f32.mrf.mxu1 }
 0x927   :  { %v5808_v32 = vadd.f32 %v5716_v17, %v15886_v38  ;;  %v16114_v38 = vadd.f32 %v16084_v45, %v16024_v44  ;;  %v5805_v44 = vadd.f32 %v5701_v58, %v15859_v8  ;;  %v16148_v8 = vadd.f32 %v16084_v45, %v15999_v49 }
 0x928   :  { %v8487_v7 = vpop.f32.mrf.mxu1  ;;  %v5802_v49 = vadd.f32 %v16075_v61, %v15832_v4  ;;  %v16182_v4 = vadd.f32 %v16084_v45, %v15982_v13  ;;  %v16200_v13 = vadd.f32 %v16084_v45, %v15976_v55  ;;  %v16215_v55 = vadd.f32 %v16084_v45, %v16068_v63 }
 0x92a   :  { %v5721_v19 = vpop.f32.mrf.mxu1 }
 0x92b   :  { %v5809_v53 = vadd.f32 %v5721_v19, %v15895_v27  ;;  %v16153_v19 = vadd.f32 %v16084_v45, %v5805_v44  ;;  %v16240_v44 = vadd.f32 %v16084_v45, %v15964_v21 }
 0x92c   :  { %v8490_v20 = vpop.f32.mrf.mxu1 }
 0x92e   :  { %v5726_v11 = vpop.f32.mrf.mxu1 }
 0x92f   :  { %v5810_v15 = vadd.f32 %v5726_v11, %v15904_v25  ;;  %v16104_v25 = vadd.f32 %v16084_v45, %v16042_v24  ;;  %v5806_v24 = vadd.f32 %v5706_v6, %v15868_v30  ;;  %v16136_v30 = vadd.f32 %v16084_v45, %v16004_v54 }
 0x930   :  { %v8493_v10 = vpop.f32.mrf.mxu1  ;;  %v5803_v54 = vadd.f32 %v5691_v1, %v15841_v57  ;;  %v16171_v57 = vadd.f32 %v16084_v45, %v15985_v34  ;;  %v16186_v34 = vadd.f32 %v16084_v45, %v5802_v49 }
 0x931   :  { %v16093_v10 = vadd.f32 %v16084_v45, %v5795_v35  ;;  %v16099_v9 = vadd.f32 %v16084_v45, %v5810_v15  ;;  %v16121_v35 = vadd.f32 %v16084_v45, %v5808_v32  ;;  %v16143_v6 = vadd.f32 %v16084_v45, %v5806_v24 }
 0x932   :  { %v5731_v33 = vpop.f32.mrf.mxu1  ;;  %v16220_v24 = vadd.f32 %v16084_v45, %v15970_v40  ;;  %v16235_v40 = vadd.f32 %v16084_v45, %v16058_v26 }
 0x933   :  { %v5811_v42 = vadd.f32 %v5731_v33, %v15912_v60  ;;  %v5807_v60 = vadd.f32 %v5711_v37, %v15877_v5  ;;  %v16109_v33 = vadd.f32 %v16084_v45, %v5809_v53  ;;  %v16126_v5 = vadd.f32 %v16084_v45, %v16015_v28 }
 0x934   :  { %v8496_v3 = vpop.f32.mrf.mxu1  ;;  %v5804_v28 = vadd.f32 %v5696_v52, %v15850_v41  ;;  %v16158_v41 = vadd.f32 %v16084_v45, %v15990_v18  ;;  %v5801_v18 = vadd.f32 %v16073_v22, %v15823_v23  ;;  %v16191_v23 = vadd.f32 %v16084_v45, %v15979_v46 }
 0x935   :  { %v16090_v7 = vadd.f32 %v16084_v45, %v5811_v42  ;;  %v16131_v37 = vadd.f32 %v16084_v45, %v5807_v60  ;;  %v16177_v42 = vadd.f32 %v16084_v45, %v5803_v54  ;;  %v16210_v46 = vadd.f32 %v16084_v45, %v15973_v56 }
 0x936   :  { %v16095_v20 = vpop.f32.mrf.mxu1  ;;  %v16166_v15 = vadd.f32 %v16084_v45, %v5804_v28  ;;  %v16195_v3 = vadd.f32 %v16084_v45, %v5801_v18  ;;  %v16225_v56 = vadd.f32 %v16084_v45, %v16065_v29  ;;  %v16250_v28 = vadd.f32 %v16084_v45, %v15961_v12 }
 0x937   :  { %7370 = vmatprep.subr.mxu1 %v16090_v7 }
 0x938   :  { %v8499_v27 = vpop.f32.mrf.mxu1  ;;  %7371 = vmatpush3.msra.mxu1 %v16093_v10 }
 0x939   :  { %7372 = vmatprep.subr.mxu1 %v16099_v9  ;;  %v16205_v27 = vadd.f32 %v16084_v45, %v16071_v16 }
 0x93a   :  { %v16116_v17 = vpop.f32.mrf.mxu1  ;;  %7373 = vmatpush3.msra.mxu1 %v16104_v25 }
 0x93b   :  { %7374 = vmatprep.subr.mxu1 %v16109_v33 }
 0x93c   :  { %v8502_v11 = vpop.f32.mrf.mxu1  ;;  %7375 = vmatpush3.msra.mxu1 %v16114_v38 }
 0x93d   :  { %7376 = vmatprep.subr.mxu1 %v16121_v35  ;;  %v16230_v11 = vadd.f32 %v16084_v45, %v15967_v48  ;;  %v16245_v48 = vadd.f32 %v16084_v45, %v16047_v31  ;;  %v18551_v31 = vmov 1.0  }
 0x93e   :  { %v16138_v32 = vpop.f32.mrf.mxu1  ;;  %7377 = vmatpush3.msra.mxu1 %v16126_v5 }
 0x93f   :  { %7378 = vmatprep.subr.mxu1 %v16131_v37 }
 0x940   :  { %v8505_v58 = vpop.f32.mrf.mxu1  ;;  %7379 = vmatpush3.msra.mxu1 %v16136_v30 }
 0x941   :  { %7380 = vmatprep.subr.mxu1 %v16143_v6 }
 0x942   :  { %v16160_v52 = vpop.f32.mrf.mxu1  ;;  %7381 = vmatpush3.msra.mxu1 %v16148_v8 }
 0x943   :  { %7382 = vmatprep.subr.mxu1 %v16153_v19 }
 0x944   :  { %v8508_v1 = vpop.f32.mrf.mxu1  ;;  %7383 = vmatpush3.msra.mxu1 %v16158_v41 }
 0x945   :  { %7384 = vmatprep.subr.mxu1 %v16166_v15 }
 0x946   :  { %v5756_v61 = vpop.f32.mrf.mxu1  ;;  %7385 = vmatpush3.msra.mxu1 %v16171_v57 }
 0x947   :  { %7386 = vmatprep.subr.mxu1 %v16177_v42 }
 0x948   :  { %v8511_v22 = vpop.f32.mrf.mxu1  ;;  %7387 = vmatpush3.msra.mxu1 %v16182_v4 }
 0x949   :  { %7388 = vmatprep.subr.mxu1 %v16186_v34 }
 0x94a   :  { %v5761_v53 = vpop.f32.mrf.mxu1  ;;  %7389 = vmatpush3.msra.mxu1 %v16191_v23 }
 0x94b   :  { %7390 = vmatprep.subr.mxu1 %v16195_v3  ;;  %v5817_v18 = vadd.f32 %v5761_v53, %v15946_v59  ;;  %v5814_v59 = vadd.f32 %v16138_v32, %v15934_v43 }
 0x94c   :  { %v8514_v60 = vpop.f32.mrf.mxu1  ;;  %7391 = vmatpush3.msra.mxu1 %v16200_v13 }
 0x94d   :  { %7392 = vmatprep.subr.mxu1 %v16205_v27  ;;  %v5862_v60 = vadd.f32 %v16084_v45, %v5817_v18 }
 0x94e   :  { %v5766_v16 = vpop.f32.mrf.mxu1  ;;  %7393 = vmatpush3.msra.mxu1 %v16210_v46 }
 0x94f   :  { %7394 = vmatprep.subr.mxu1 %v16215_v55  ;;  %v5818_v49 = vadd.f32 %v5766_v16, %v15950_v51  ;;  %v5815_v51 = vadd.f32 %v16160_v52, %v15938_v39  ;;  %v18552_v39 = vld [vmem:[#allocation124_spill] sm:$0xff]  ;;  %v5859_v16 = vadd.f32 %v16084_v45, %v5814_v59 }
 0x950   :  { %v8517_v63 = vpop.f32.mrf.mxu1  ;;  %7395 = vmatpush3.msra.mxu1 %v16220_v24  ;;  %v5812_v52 = vadd.f32 %v16095_v20, %v18552_v39  ;;  %v16297_v20 = vsel %vm5938_vm3, 1.0, %v18370_v62 }
 0x951   :  { %7396 = vmatprep.subr.mxu1 %v16225_v56  ;;  %v5863_v22 = vadd.f32 %v16084_v45, %v5818_v49 }
 0x952   :  { %v5771_v29 = vpop.f32.mrf.mxu1  ;;  %7397 = vmatpush3.msra.mxu1 %v16230_v11 }
 0x953   :  { %7398 = vmatprep.subr.mxu1 %v16235_v40  ;;  %v5819_v58 = vadd.f32 %v5771_v29, %v15954_v50 }
 0x954   :  { %v8520_v26 = vpop.f32.mrf.mxu1  ;;  %7399 = vmatpush3.msra.mxu1 %v16240_v44 }
 0x955   :  { %7400 = vmatprep.subr.mxu1 %v16245_v48  ;;  %v5864_v50 = vadd.f32 %v16084_v45, %v5819_v58 }
 0x956   :  { %v5776_v21 = vpop.f32.mrf.mxu1  ;;  %7401 = vmatpush3.msra.mxu1 %v16250_v28 }
 0x957   :  { %v5820_v54 = vadd.f32 %v5776_v21, %v15958_v2  ;;  %7016 = vmatmul.mubr.msk.f32.vlgmr.msra.gmra.mxu1 %vm16019_vm9, %v18551_v31  ;;  %8524 = vmatprep.subr.mxu1 %v18370_v62  ;;  %v5816_v2 = vadd.f32 %v5756_v61, %v15942_v47  ;;  %v5813_v47 = vadd.f32 %v16116_v17, %v15930_v0 }
 0x958   :  { %v8523_v12 = vpop.f32.mrf.mxu1  ;;  %8542 = vmatprep.mubr.msk.f32.mxu1 %vm8627_vm1, %v18370_v62  ;;  %v5860_v61 = vadd.f32 %v16084_v45, %v5815_v51  ;;  %v5857_v0 = vadd.f32 %v16084_v45, %v5812_v52 }
 0x959   :  { %v5865_v1 = vadd.f32 %v16084_v45, %v5820_v54  ;;  %v5861_v53 = vadd.f32 %v16084_v45, %v5816_v2  ;;  %v5858_v43 = vadd.f32 %v16084_v45, %v5813_v47 }
 0x95b   :  { %8525 = vmatpush3.msk.msra.mxu1 %vm3587_vm6, %v5865_v1 }
 0x95c   :  { %8526 = vmatprep.subr.mxu1 %v18370_v62 }
 0x95d   :  { %8527 = vmatpush3.msra.mxu1 %v5864_v50 }
 0x95e   :  { %8528 = vmatprep.subr.mxu1 %v18370_v62 }
 0x95f   :  { %8529 = vmatpush3.msra.mxu1 %v5863_v22 }
 0x960   :  { %8530 = vmatprep.subr.mxu1 %v18370_v62 }
 0x961   :  { %8531 = vmatpush3.msra.mxu1 %v5862_v60 }
 0x962   :  { %8532 = vmatprep.subr.mxu1 %v18370_v62 }
 0x963   :  { %8533 = vmatpush3.msra.mxu1 %v5861_v53 }
 0x964   :  { %8534 = vmatprep.subr.mxu1 %v18370_v62 }
 0x965   :  { %8535 = vmatpush3.msra.mxu1 %v5860_v61 }
 0x966   :  { %8536 = vmatprep.subr.mxu1 %v18370_v62 }
 0x967   :  { %8537 = vmatpush3.msra.mxu1 %v5859_v16 }
 0x968   :  { %8538 = vmatprep.subr.mxu1 %v18370_v62 }
 0x969   :  { %8539 = vmatpush3.msra.mxu1 %v5858_v43 }
 0x96a   :  { %8540 = vmatprep.subr.mxu1 %v18370_v62 }
 0x96b   :  { %8541 = vmatpush3.msra.mxu1 %v5857_v0 }
 0x96c   :  { %8543 = vmatmul.mubr.msk.f32.vlgmr.msra.gmra.mxu1 %vm5945_vm4, %v16297_v20  ;;  %8545 = vmatprep.subr.mxu1 %v18370_v62 }
 0x96d   :  { %8563 = vmatprep.mubr.msk.f32.mxu1 %vm8627_vm1, %v18370_v62 }
 0xa17   :  { %v7402_v45 = vpop.f32.mrf.mxu1 }
 0xa19   :  { %v7403_v63 = vpop.f32.mrf.mxu1 }
 0xa1a   :  { %v7404_v29 = vadd.f32 %v7403_v63, %v7402_v45 }
 0xa2c   :  { %v6088_v26 = vpop.f32.mrf.mxu1 }
 0xa2d   :  { %v6089_v21 = vadd.f32 %v7404_v29, %v6088_v26 }
 0xa2e   :  { %v8544_v58 = vpop.f32.mrf.mxu1 }
 0xa2f   :  { %v6093_v54 = vsel %vm6092_vm5, %v6089_v21, 0.0 }
 0xa30   :  { %v6094_v12 = vrot.slane %v6093_v54, 4 }
 0xa32   :  { %v6095_v49 = vadd.f32 %v6094_v12, %v6093_v54 }
 0xa34   :  { %v6096_v18 = vrot.slane %v6095_v49, 2 }
 0xa36   :  { %v6097_v2 = vadd.f32 %v6096_v18, %v6095_v49 }
 0xa38   :  { %v6098_v51 = vrot.slane %v6097_v2, 1 }
 0xa3a   :  { %v6099_v59 = vadd.f32 %v6098_v51, %v6097_v2 }
 0xa3c   :  { %v16306_v47 = vmul.f32 0.0034722222, %v6099_v59 }
 0xa3e   :  { %v16309_v39 = vsub.f32 %v5865_v1, %v16306_v47  ;;  %v16312_v52 = vsub.f32 %v5864_v50, %v16306_v47  ;;  %v16315_v17 = vsub.f32 %v5863_v22, %v16306_v47  ;;  %v16320_v45 = vsub.f32 %v5862_v60, %v16306_v47 }
 0xa3f   :  { %v16327_v1 = vsub.f32 %v5861_v53, %v16306_v47  ;;  %v16333_v22 = vsub.f32 %v16093_v10, %v16306_v47  ;;  %v16338_v60 = vsub.f32 %v16090_v7, %v16306_v47  ;;  %v16341_v29 = vsub.f32 %v5860_v61, %v16306_v47 }
 0xa40   :  { %v6183_v32 = vmul.f32 %v16309_v39, %v16309_v39  ;;  %v6182_v63 = vmul.f32 %v16312_v52, %v16312_v52  ;;  %v6181_v50 = vmul.f32 %v16315_v17, %v16315_v17  ;;  %v6180_v53 = vmul.f32 %v16320_v45, %v16320_v45 }
 0xa41   :  { %v16348_v26 = vsub.f32 %v16099_v9, %v16306_v47  ;;  %v16351_v10 = vsub.f32 %v5859_v16, %v16306_v47  ;;  %v6179_v7 = vmul.f32 %v16327_v1, %v16327_v1  ;;  %v16357_v61 = vsub.f32 %v16104_v25, %v16306_v47 }
 0xa42   :  { %8546 = vmatpush3.msk.msra.mxu1 %vm3587_vm6, %v6183_v32  ;;  %v6158_v21 = vmul.f32 %v16333_v22, %v16333_v22  ;;  %v16364_v9 = vsub.f32 %v16109_v33, %v16306_v47  ;;  %v16367_v16 = vsub.f32 %v5858_v43, %v16306_v47  ;;  %v6178_v58 = vmul.f32 %v16341_v29, %v16341_v29 }
 0xa43   :  { %8547 = vmatprep.subr.mxu1 %v18370_v62  ;;  %v6174_v54 = vmul.f32 %v16338_v60, %v16338_v60  ;;  %v16375_v25 = vsub.f32 %v16114_v38, %v16306_v47  ;;  %v16379_v12 = vsub.f32 %v16121_v35, %v16306_v47  ;;  %v16383_v33 = vsub.f32 %v5857_v0, %v16306_v47 }
 0xa44   :  { %8548 = vmatpush3.msra.mxu1 %v6182_v63  ;;  %v6177_v43 = vmul.f32 %v16351_v10, %v16351_v10  ;;  %v6173_v49 = vmul.f32 %v16348_v26, %v16348_v26  ;;  %v16391_v38 = vsub.f32 %v16126_v5, %v16306_v47  ;;  %v6157_v35 = vmul.f32 %v16357_v61, %v16357_v61 }
 0xa45   :  { %8549 = vmatprep.subr.mxu1 %v18370_v62  ;;  %7415 = vmatprep.subr.mxu0 %v6174_v54  ;;  %v16398_v0 = vsub.f32 %v16131_v37, %v16306_v47  ;;  %v6176_v18 = vmul.f32 %v16367_v16, %v16367_v16  ;;  %v6172_v2 = vmul.f32 %v16364_v9, %v16364_v9 }
 0xa46   :  { %8550 = vmatpush3.msra.mxu1 %v6181_v50  ;;  %7416 = vmatpush3.msra.mxu0 %v6158_v21  ;;  %v16406_v5 = vsub.f32 %v16136_v30, %v16306_v47  ;;  %v6156_v51 = vmul.f32 %v16375_v25, %v16375_v25  ;;  %v16413_v37 = vsub.f32 %v16143_v6, %v16306_v47 }
 0xa47   :  { %8551 = vmatprep.subr.mxu1 %v18370_v62  ;;  %7417 = vmatprep.subr.mxu0 %v6173_v49  ;;  %v6175_v59 = vmul.f32 %v16383_v33, %v16383_v33  ;;  %v6171_v32 = vmul.f32 %v16379_v12, %v16379_v12  ;;  %v16421_v30 = vsub.f32 %v16148_v8, %v16306_v47 }
 0xa48   :  { %8552 = vmatpush3.msra.mxu1 %v6180_v53  ;;  %7418 = vmatpush3.msra.mxu0 %v6157_v35  ;;  %v6155_v63 = vmul.f32 %v16391_v38, %v16391_v38  ;;  %v16428_v6 = vsub.f32 %v16153_v19, %v16306_v47  ;;  %v6170_v50 = vmul.f32 %v16398_v0, %v16398_v0 }
 0xa49   :  { %8553 = vmatprep.subr.mxu1 %v18370_v62  ;;  %7419 = vmatprep.subr.mxu0 %v6172_v2  ;;  %v16434_v53 = vsub.f32 %v16158_v41, %v16306_v47  ;;  %v6154_v8 = vmul.f32 %v16406_v5, %v16406_v5  ;;  %v16442_v19 = vsub.f32 %v16166_v15, %v16306_v47 }
 0xa4a   :  { %8554 = vmatpush3.msra.mxu1 %v6179_v7  ;;  %7420 = vmatpush3.msra.mxu0 %v6156_v51  ;;  %v6169_v7 = vmul.f32 %v16413_v37, %v16413_v37  ;;  %v16449_v41 = vsub.f32 %v16171_v57, %v16306_v47  ;;  %v6153_v21 = vmul.f32 %v16421_v30, %v16421_v30 }
 0xa4b   :  { %8555 = vmatprep.subr.mxu1 %v18370_v62  ;;  %7421 = vmatprep.subr.mxu0 %v6171_v32  ;;  %v16457_v15 = vsub.f32 %v16177_v42, %v16306_v47  ;;  %v16463_v54 = vsub.f32 %v16182_v4, %v16306_v47  ;;  %v6152_v57 = vmul.f32 %v16434_v53, %v16434_v53 }
 0xa4c   :  { %8556 = vmatpush3.msra.mxu1 %v6178_v58  ;;  %7422 = vmatpush3.msra.mxu0 %v6155_v63  ;;  %v6168_v58 = vmul.f32 %v16428_v6, %v16428_v6  ;;  %v6167_v42 = vmul.f32 %v16442_v19, %v16442_v19  ;;  %v16475_v49 = vsub.f32 %v16191_v23, %v16306_v47 }
 0xa4d   :  { %8557 = vmatprep.subr.mxu1 %v18370_v62  ;;  %7423 = vmatprep.subr.mxu0 %v6170_v50  ;;  %v6151_v4 = vmul.f32 %v16449_v41, %v16449_v41  ;;  %v16481_v35 = vsub.f32 %v16195_v3, %v16306_v47  ;;  %v6150_v23 = vmul.f32 %v16463_v54, %v16463_v54 }
 0xa4e   :  { %8558 = vmatpush3.msra.mxu1 %v6177_v43  ;;  %7424 = vmatpush3.msra.mxu0 %v6154_v8  ;;  %v16469_v43 = vsub.f32 %v16186_v34, %v16306_v47  ;;  %v6166_v34 = vmul.f32 %v16457_v15, %v16457_v15  ;;  %v16493_v2 = vsub.f32 %v16205_v27, %v16306_v47 }
 0xa4f   :  { %8559 = vmatprep.subr.mxu1 %v18370_v62  ;;  %7425 = vmatprep.subr.mxu0 %v6169_v7  ;;  %v6106_v51 = vsub.f32 %v16210_v46, %v16306_v47  ;;  %v6164_v27 = vmul.f32 %v16481_v35, %v16481_v35  ;;  %v6105_v32 = vsub.f32 %v16220_v24, %v16306_v47 }
 0xa50   :  { %8560 = vmatpush3.msra.mxu1 %v6176_v18  ;;  %7426 = vmatpush3.msra.mxu0 %v6153_v21  ;;  %v16487_v18 = vsub.f32 %v16200_v13, %v16306_v47  ;;  %v6165_v3 = vmul.f32 %v16469_v43, %v16469_v43  ;;  %v16503_v13 = vsub.f32 %v16215_v55, %v16306_v47 }
 0xa51   :  { %8561 = vmatprep.subr.mxu1 %v18370_v62  ;;  %7427 = vmatprep.subr.mxu0 %v6168_v58  ;;  %v16513_v46 = vsub.f32 %v16225_v56, %v16306_v47  ;;  %v6163_v55 = vmul.f32 %v16493_v2, %v16493_v2  ;;  %v16519_v50 = vsub.f32 %v16230_v11, %v16306_v47 }
 0xa52   :  { %8562 = vmatpush3.msra.mxu1 %v6175_v59  ;;  %7428 = vmatpush3.msra.mxu0 %v6152_v57  ;;  %v6149_v59 = vmul.f32 %v16475_v49, %v16475_v49  ;;  %v6148_v63 = vmul.f32 %v16487_v18, %v16487_v18  ;;  %v6147_v8 = vmul.f32 %v6106_v51, %v6106_v51 }
 0xa53   :  { %8564 = vmatmul.mubr.msk.f32.vlgmr.msra.gmra.mxu1 %vm5945_vm4, %v16297_v20  ;;  %8566 = vmatprep.subr.mxu1 %v18370_v62  ;;  %v16523_v24 = vsub.f32 %v16235_v40, %v16306_v47  ;;  %v6162_v7 = vmul.f32 %v16503_v13, %v16503_v13  ;;  %v16529_v56 = vsub.f32 %v16240_v44, %v16306_v47 }
 0xa54   :  { %8584 = vmatprep.mubr.msk.f32.mxu1 %vm8627_vm1, %v18370_v62  ;;  %7429 = vmatprep.subr.mxu0 %v6167_v42  ;;  %v6146_v21 = vmul.f32 %v6105_v32, %v6105_v32  ;;  %v16533_v11 = vsub.f32 %v16245_v48, %v16306_v47  ;;  %v6161_v58 = vmul.f32 %v16513_v46, %v16513_v46 }
 0xa55   :  { %7430 = vmatpush3.msra.mxu0 %v6151_v4  ;;  %v16539_v40 = vsub.f32 %v16250_v28, %v16306_v47  ;;  %v6145_v57 = vmul.f32 %v16519_v50, %v16519_v50  ;;  %v6160_v44 = vmul.f32 %v16523_v24, %v16523_v24  ;;  %v6144_v48 = vmul.f32 %v16529_v56, %v16529_v56 }
 0xa56   :  { %7431 = vmatprep.subr.mxu0 %v6166_v34  ;;  %v6159_v42 = vmul.f32 %v16533_v11, %v16533_v11 }
 0xa57   :  { %7432 = vmatpush3.msra.mxu0 %v6150_v23  ;;  %v6143_v28 = vmul.f32 %v16539_v40, %v16539_v40 }
 0xa58   :  { %7433 = vmatprep.subr.mxu0 %v6165_v3 }
 0xa59   :  { %7434 = vmatpush3.msra.mxu0 %v6149_v59 }
 0xa5a   :  { %7435 = vmatprep.subr.mxu0 %v6164_v27 }
 0xa5b   :  { %7436 = vmatpush3.msra.mxu0 %v6148_v63 }
 0xa5c   :  { %7437 = vmatprep.subr.mxu0 %v6163_v55 }
 0xa5d   :  { %7438 = vmatpush3.msra.mxu0 %v6147_v8 }
 0xa5e   :  { %7439 = vmatprep.subr.mxu0 %v6162_v7 }
 0xa5f   :  { %7440 = vmatpush3.msra.mxu0 %v6146_v21 }
 0xa60   :  { %7441 = vmatprep.subr.mxu0 %v6161_v58 }
 0xa61   :  { %7442 = vmatpush3.msra.mxu0 %v6145_v57 }
 0xa62   :  { %7443 = vmatprep.subr.mxu0 %v6160_v44 }
 0xa63   :  { %7444 = vmatpush3.msra.mxu0 %v6144_v48 }
 0xa64   :  { %7445 = vmatprep.subr.mxu0 %v6159_v42  ;;  %v18556_v42 = vld [vmem:[#allocation34_spill] sm:$0xff] }
 0xa65   :  { %7446 = vmatpush3.msra.mxu0 %v6143_v28  ;;  %v6339_v28 = vsub.s32 4, %v18556_v42 }
 0xa66   :  { %7020 = vmatmul.mubr.msk.f32.vlgmr.msra.gmra.mxu0 %vm16019_vm9, %v18551_v31 }
 0xa67   :  { %7023 = vmatprep.mubr.msk.f32.mxu0 %vm16028_vm10, %v18551_v31  ;;  %v16560_v47 = vrot.slane %v16081_v36, %v6339_v28 }
 0xb13   :  { %v6323_v4 = vpop.f32.mrf.mxu1 }
 0xb15   :  { %v8565_v34 = vpop.f32.mrf.mxu1 }
 0xb16   :  { %v6425_v34 = vsub.s32 5, %v18556_v42 }
 0xb26   :  { %v7447_v23 = vpop.f32.mrf.mxu0 }
 0xb28   :  { %v7448_v3 = vpop.f32.mrf.mxu0 }
 0xb29   :  { %v7449_v59 = vadd.f32 %v7448_v3, %v7447_v23  ;;  %v16567_v23 = vmul.f32 %v16560_v47, %v6105_v32  ;;  %v16570_v3 = vmul.f32 %v16560_v47, %v6106_v51  ;;  %v6350_v32 = vmul.f32 %v16560_v47, %v16434_v53 }
 0xb2a   :  { %v6351_v51 = vmul.f32 %v16560_v47, %v16421_v30  ;;  %v16600_v53 = vmul.f32 %v16560_v47, %v16493_v2  ;;  %v16604_v30 = vmul.f32 %v16560_v47, %v16481_v35  ;;  %v6367_v35 = vmul.f32 %v16560_v47, %v16413_v37 }
 0xb2b   :  { %v6324_v27 = vadd.f32 %v7449_v59, %v6323_v4  ;;  %v16564_v4 = vrot.slane %v16081_v36, %v6425_v34  ;;  %v16574_v59 = vmul.f32 %v16560_v47, %v16487_v18  ;;  %v6349_v36 = vmul.f32 %v16560_v47, %v16449_v41 }
 0xb2c   :  { %v6352_v18 = vmul.f32 %v16560_v47, %v16406_v5  ;;  %v6356_v41 = vmul.f32 %v16560_v47, %v16333_v22  ;;  %v16622_v5 = vmul.f32 %v16560_v47, %v16428_v6  ;;  %v6370_v2 = vmul.f32 %v16560_v47, %v16364_v9 }
 0xb2d   :  { %v6327_v63 = vsel %vm6092_vm5, %v6324_v27, 0.0  ;;  %v16578_v27 = vmul.f32 %v16560_v47, %v16475_v49  ;;  %v6354_v49 = vmul.f32 %v16560_v47, %v16375_v25  ;;  %v16612_v25 = vmul.f32 %v16560_v47, %v16457_v15 }
 0xb2e   :  { %v6328_v55 = vrot.slane %v6327_v63, 4  ;;  %v6369_v15 = vmul.f32 %v16560_v47, %v16379_v12  ;;  %v16638_v6 = vmul.f32 %v16560_v47, %v16383_v33  ;;  %v16642_v37 = vmul.f32 %v16560_v47, %v16367_v16 }
 0xb2f   :  { %v6375_v12 = vmul.f32 %v16560_v47, %v16351_v10  ;;  %v6376_v9 = vmul.f32 %v16560_v47, %v16341_v29  ;;  %v6379_v33 = vmul.f32 %v16560_v47, %v16315_v17  ;;  %v6381_v10 = vmul.f32 %v16560_v47, %v16309_v39 }
 0xb30   :  { %v6329_v8 = vadd.f32 %v6328_v55, %v6327_v63  ;;  %v6348_v63 = vmul.f32 %v16560_v47, %v16463_v54  ;;  %v6353_v55 = vmul.f32 %v16560_v47, %v16391_v38  ;;  %v6355_v54 = vmul.f32 %v16560_v47, %v16357_v61 }
 0xb31   :  { %v16608_v38 = vmul.f32 %v16560_v47, %v16469_v43  ;;  %v16616_v61 = vmul.f32 %v16560_v47, %v16442_v19  ;;  %v6368_v43 = vmul.f32 %v16560_v47, %v16398_v0  ;;  %v6371_v19 = vmul.f32 %v16560_v47, %v16348_v26 }
 0xb32   :  { %v6330_v7 = vrot.slane %v6329_v8, 2  ;;  %v6377_v26 = vmul.f32 %v16560_v47, %v16327_v1  ;;  %v6380_v0 = vmul.f32 %v16560_v47, %v16312_v52 }
 0xb34   :  { %v6331_v21 = vadd.f32 %v6330_v7, %v6329_v8  ;;  %v6372_v8 = vmul.f32 %v16560_v47, %v16338_v60  ;;  %v6378_v60 = vmul.f32 %v16560_v47, %v16320_v45 }
 0xb36   :  { %v6332_v58 = vrot.slane %v6331_v21, 1 }
 0xb38   :  { %v6333_v57 = vadd.f32 %v6332_v58, %v6331_v21 }
 0xb3a   :  { %v6334_v44 = vmul.f32 0.0034722222, %v6333_v57 }
 0xb3c   :  { %v6335_v48 = vadd.f32 1e-05, %v6334_v44 }
 0xb3e   :  { %8599 = vrsqrt.f32 %v6335_v48 }
 0xb4b   :  { %v16618_v22 = vpop.eup %8599 }
 0xb4c   :  { %v6397_v16 = vmul.f32 %v16618_v22, %v6356_v41  ;;  %v16660_v7 = vmul.f32 %v16618_v22, %v6348_v63  ;;  %v16663_v29 = vmul.f32 %v16618_v22, %v6349_v36  ;;  %v16666_v1 = vmul.f32 %v16618_v22, %v6350_v32 }
 0xb4d   :  { %v6392_v45 = vmul.f32 %v16618_v22, %v6351_v51  ;;  %v6396_v17 = vmul.f32 %v16618_v22, %v6355_v54  ;;  %v6420_v52 = vmul.f32 %v16618_v22, %v6379_v33  ;;  %v6421_v21 = vmul.f32 %v16618_v22, %v6380_v0 }
 0xb4e   :  { %v6422_v58 = vmul.f32 %v16618_v22, %v6381_v10  ;;  %v6413_v39 = vmul.f32 %v16618_v22, %v6372_v8  ;;  %v6442_v57 = vadd.f32 %v16564_v4, %v6397_v16  ;;  %v6412_v44 = vmul.f32 %v16618_v22, %v6371_v19 }
 0xb4f   :  { %v6393_v48 = vmul.f32 %v16618_v22, %v6352_v18  ;;  %v6395_v42 = vmul.f32 %v16618_v22, %v6354_v49  ;;  %v6419_v28 = vmul.f32 %v16618_v22, %v6378_v60  ;;  %v6411_v34 = vmul.f32 %v16618_v22, %v6370_v2 }
 0xb50   :  { %v6467_v63 = vadd.f32 %v16564_v4, %v6422_v58  ;;  %v6458_v36 = vadd.f32 %v16564_v4, %v6413_v39  ;;  %v6457_v32 = vadd.f32 %v16564_v4, %v6412_v44  ;;  %v6466_v51 = vadd.f32 %v16564_v4, %v6421_v21 }
 0xb51   :  { %v6394_v54 = vmul.f32 %v16618_v22, %v6353_v55  ;;  %v6418_v41 = vmul.f32 %v16618_v22, %v6377_v26  ;;  %v6483_v19 = vmax.f32 %v6442_v57, 0.0  ;;  %v6441_v18 = vadd.f32 %v16564_v4, %v6396_v17 }
 0xb52   :  { %v6499_v49 = vmax.f32 %v6458_v36, 0.0  ;;  %v6508_v8 = vmax.f32 %v6467_v63, 0.0  ;;  %v6456_v60 = vadd.f32 %v16564_v4, %v6411_v34  ;;  %v6465_v2 = vadd.f32 %v16564_v4, %v6420_v52 }
 0xb53   :  { %v6416_v33 = vmul.f32 %v16618_v22, %v6375_v12  ;;  %v6417_v0 = vmul.f32 %v16618_v22, %v6376_v9  ;;  %v6440_v16 = vadd.f32 %v16564_v4, %v6395_v42  ;;  %v6410_v10 = vmul.f32 %v16618_v22, %v6369_v15 }
 0xb54   :  { %7460 = vmatprep.subr.mxu0 %v6499_v49  ;;  %8567 = vmatpush3.msk.msra.mxu1 %vm3587_vm6, %v6508_v8  ;;  %v6498_v55 = vmax.f32 %v6457_v32, 0.0  ;;  %v6507_v26 = vmax.f32 %v6466_v51, 0.0  ;;  %v6464_v17 = vadd.f32 %v16564_v4, %v6419_v28  ;;  %v6409_v21 = vmul.f32 %v16618_v22, %v6368_v43 }
 0xb55   :  { %7461 = vmatpush3.msra.mxu0 %v6483_v19  ;;  %8568 = vmatprep.subr.mxu1 %v18370_v62  ;;  %v6482_v52 = vmax.f32 %v6441_v18, 0.0  ;;  %v6455_v12 = vadd.f32 %v16564_v4, %v6410_v10  ;;  %v6439_v9 = vadd.f32 %v16564_v4, %v6394_v54  ;;  %v6408_v58 = vmul.f32 %v16618_v22, %v6367_v35 }
 0xb56   :  { %7462 = vmatprep.subr.mxu0 %v6498_v55  ;;  %8569 = vmatpush3.msra.mxu1 %v6507_v26  ;;  %v6497_v15 = vmax.f32 %v6456_v60, 0.0  ;;  %v6506_v39 = vmax.f32 %v6465_v2, 0.0  ;;  %v6454_v57 = vadd.f32 %v16564_v4, %v6409_v21  ;;  %v6463_v44 = vadd.f32 %v16564_v4, %v6418_v41 }
 0xb57   :  { %7463 = vmatpush3.msra.mxu0 %v6482_v52  ;;  %8570 = vmatprep.subr.mxu1 %v18370_v62  ;;  %v6481_v43 = vmax.f32 %v6440_v16, 0.0  ;;  %v6438_v42 = vadd.f32 %v16564_v4, %v6393_v48  ;;  %v6462_v28 = vadd.f32 %v16564_v4, %v6417_v0  ;;  %v6407_v34 = vmul.f32 %v16618_v22, %v16622_v5 }
 0xb58   :  { %v6415_v35 = vmul.f32 %v16618_v22, %v16642_v37  ;;  %7464 = vmatprep.subr.mxu0 %v6497_v15  ;;  %8571 = vmatpush3.msra.mxu1 %v6506_v39  ;;  %v6496_v63 = vmax.f32 %v6455_v12, 0.0  ;;  %v6505_v36 = vmax.f32 %v6464_v17, 0.0  ;;  %v6453_v32 = vadd.f32 %v16564_v4, %v6408_v58 }
 0xb59   :  { %7465 = vmatpush3.msra.mxu0 %v6481_v43  ;;  %8572 = vmatprep.subr.mxu1 %v18370_v62  ;;  %v6480_v51 = vmax.f32 %v6439_v9, 0.0  ;;  %v6437_v48 = vadd.f32 %v16564_v4, %v6392_v45  ;;  %v6461_v54 = vadd.f32 %v16564_v4, %v6416_v33  ;;  %v6406_v5 = vmul.f32 %v16618_v22, %v16616_v61 }
 0xb5a   :  { %v6414_v37 = vmul.f32 %v16618_v22, %v16638_v6  ;;  %7466 = vmatprep.subr.mxu0 %v6496_v63  ;;  %8573 = vmatpush3.msra.mxu1 %v6505_v36  ;;  %v6495_v41 = vmax.f32 %v6454_v57, 0.0  ;;  %v6504_v19 = vmax.f32 %v6463_v44, 0.0  ;;  %v6452_v18 = vadd.f32 %v16564_v4, %v6407_v34 }
 0xb5b   :  { %7467 = vmatpush3.msra.mxu0 %v6480_v51  ;;  %8574 = vmatprep.subr.mxu1 %v18370_v62  ;;  %v6479_v49 = vmax.f32 %v6438_v42, 0.0  ;;  %v6503_v8 = vmax.f32 %v6462_v28, 0.0  ;;  %v6436_v45 = vadd.f32 %v16564_v4, %v16666_v1  ;;  %v6405_v61 = vmul.f32 %v16618_v22, %v16612_v25 }
 0xb5c   :  { %7468 = vmatprep.subr.mxu0 %v6495_v41  ;;  %8575 = vmatpush3.msra.mxu1 %v6504_v19  ;;  %v6494_v6 = vmax.f32 %v6453_v32, 0.0  ;;  %v6451_v60 = vadd.f32 %v16564_v4, %v6406_v5  ;;  %v6460_v2 = vadd.f32 %v16564_v4, %v6415_v35  ;;  %v6404_v33 = vmul.f32 %v16618_v22, %v16608_v38 }
 0xb5d   :  { %v6388_v0 = vmul.f32 %v16618_v22, %v16578_v27  ;;  %7469 = vmatpush3.msra.mxu0 %v6479_v49  ;;  %8576 = vmatprep.subr.mxu1 %v18370_v62  ;;  %v6478_v1 = vmax.f32 %v6437_v48, 0.0  ;;  %v6502_v16 = vmax.f32 %v6461_v54, 0.0  ;;  %v6435_v25 = vadd.f32 %v16564_v4, %v16663_v29 }
 0xb5e   :  { %7470 = vmatprep.subr.mxu0 %v6494_v6  ;;  %8577 = vmatpush3.msra.mxu1 %v6503_v8  ;;  %v6493_v10 = vmax.f32 %v6452_v18, 0.0  ;;  %v6450_v55 = vadd.f32 %v16564_v4, %v6405_v61  ;;  %v6459_v26 = vadd.f32 %v16564_v4, %v6414_v37  ;;  %v6403_v38 = vmul.f32 %v16618_v22, %v16604_v30 }
 0xb5f   :  { %v6360_v27 = vmul.f32 %v16560_v47, %v16503_v13  ;;  %v6387_v17 = vmul.f32 %v16618_v22, %v16574_v59  ;;  %7471 = vmatpush3.msra.mxu0 %v6478_v1  ;;  %8578 = vmatprep.subr.mxu1 %v18370_v62  ;;  %v6477_v29 = vmax.f32 %v6436_v45, 0.0  ;;  %v6434_v21 = vadd.f32 %v16564_v4, %v16660_v7 }
 0xb60   :  { %7472 = vmatprep.subr.mxu0 %v6493_v10  ;;  %8579 = vmatpush3.msra.mxu1 %v6502_v16  ;;  %v6492_v52 = vmax.f32 %v6451_v60, 0.0  ;;  %v6501_v12 = vmax.f32 %v6460_v2, 0.0  ;;  %v6449_v9 = vadd.f32 %v16564_v4, %v6404_v33  ;;  %v6402_v30 = vmul.f32 %v16618_v22, %v16600_v53 }
 0xb61   :  { %v6359_v13 = vmul.f32 %v16560_v47, %v16513_v46  ;;  %v6386_v59 = vmul.f32 %v16618_v22, %v16570_v3  ;;  %7473 = vmatpush3.msra.mxu0 %v6477_v29  ;;  %8580 = vmatprep.subr.mxu1 %v18370_v62  ;;  %v6476_v58 = vmax.f32 %v6435_v25, 0.0  ;;  %v6433_v7 = vadd.f32 %v16564_v4, %v6388_v0 }
 0xb62   :  { %7474 = vmatprep.subr.mxu0 %v6492_v52  ;;  %8581 = vmatpush3.msra.mxu1 %v6501_v12  ;;  %v6491_v15 = vmax.f32 %v6450_v55, 0.0  ;;  %v6500_v39 = vmax.f32 %v6459_v26, 0.0  ;;  %v6448_v57 = vadd.f32 %v16564_v4, %v6403_v38  ;;  %v6401_v53 = vmul.f32 %v16618_v22, %v6360_v27 }
 0xb63   :  { %v6343_v46 = vmul.f32 %v16560_v47, %v16519_v50  ;;  %v6385_v3 = vmul.f32 %v16618_v22, %v16567_v23  ;;  %7475 = vmatpush3.msra.mxu0 %v6476_v58  ;;  %8582 = vmatprep.subr.mxu1 %v18370_v62  ;;  %v6475_v44 = vmax.f32 %v6434_v21, 0.0  ;;  %v6432_v43 = vadd.f32 %v16564_v4, %v6387_v17 }
 0xb64   :  { %v6358_v42 = vmul.f32 %v16560_v47, %v16523_v24  ;;  %7476 = vmatprep.subr.mxu0 %v6491_v15  ;;  %8583 = vmatpush3.msra.mxu1 %v6500_v39  ;;  %v6490_v28 = vmax.f32 %v6449_v9, 0.0  ;;  %v6447_v34 = vadd.f32 %v16564_v4, %v6402_v30  ;;  %v6400_v35 = vmul.f32 %v16618_v22, %v6359_v13 }
 0xb65   :  { %v6342_v50 = vmul.f32 %v16560_v47, %v16529_v56  ;;  %v6384_v23 = vmul.f32 %v16618_v22, %v6343_v46  ;;  %7477 = vmatpush3.msra.mxu0 %v6475_v44  ;;  %v6474_v62 = vmax.f32 %v6433_v7, 0.0  ;;  %v6431_v63 = vadd.f32 %v16564_v4, %v6386_v59  ;;  %8585 = vmatmul.mubr.msk.f32.vlgmr.msra.gmra.mxu1 %vm5945_vm4, %v16297_v20 }
 0xb66   :  { %v6357_v24 = vmul.f32 %v16560_v47, %v16533_v11  ;;  %7478 = vmatprep.subr.mxu0 %v6490_v28  ;;  %v6489_v36 = vmax.f32 %v6448_v57, 0.0  ;;  %v6446_v32 = vadd.f32 %v16564_v4, %v6401_v53  ;;  %v6399_v51 = vmul.f32 %v16618_v22, %v6358_v42 }
 0xb67   :  { %v6341_v56 = vmul.f32 %v16560_v47, %v16539_v40  ;;  %v6383_v48 = vmul.f32 %v16618_v22, %v6342_v50  ;;  %7479 = vmatpush3.msra.mxu0 %v6474_v62  ;;  %v6473_v54 = vmax.f32 %v6432_v43, 0.0  ;;  %v6430_v5 = vadd.f32 %v16564_v4, %v6385_v3 }
 0xb68   :  { %7480 = vmatprep.subr.mxu0 %v6489_v36  ;;  %v6488_v20 = vmax.f32 %v6447_v34, 0.0  ;;  %v6445_v37 = vadd.f32 %v16564_v4, %v6400_v35  ;;  %v6398_v11 = vmul.f32 %v16618_v22, %v6357_v24  ;;  %v6472_v19 = vmax.f32 %v6431_v63, 0.0 }
 0xb69   :  { %v6382_v41 = vmul.f32 %v16618_v22, %v6341_v56  ;;  %7481 = vmatpush3.msra.mxu0 %v6473_v54  ;;  %v6429_v18 = vadd.f32 %v16564_v4, %v6384_v23  ;;  %v6487_v40 = vmax.f32 %v6446_v32, 0.0  ;;  %v6444_v47 = vadd.f32 %v16564_v4, %v6399_v51 }
 0xb6a   :  { %7482 = vmatprep.subr.mxu0 %v6488_v20  ;;  %v6471_v49 = vmax.f32 %v6430_v5, 0.0  ;;  %v6428_v8 = vadd.f32 %v16564_v4, %v6383_v48  ;;  %v6486_v45 = vmax.f32 %v6445_v37, 0.0  ;;  %v6443_v61 = vadd.f32 %v16564_v4, %v6398_v11 }
 0xb6b   :  { %7483 = vmatpush3.msra.mxu0 %v6472_v19  ;;  %v6470_v6 = vmax.f32 %v6429_v18, 0.0  ;;  %v6427_v22 = vadd.f32 %v16564_v4, %v6382_v41  ;;  %v6485_v60 = vmax.f32 %v6444_v47, 0.0 }
 0xb6c   :  { %7484 = vmatprep.subr.mxu0 %v6487_v40  ;;  %v6469_v2 = vmax.f32 %v6428_v8, 0.0  ;;  %v6484_v33 = vmax.f32 %v6443_v61, 0.0 }
 0xb6d   :  { %7485 = vmatpush3.msra.mxu0 %v6471_v49  ;;  %v6468_v0 = vmax.f32 %v6427_v22, 0.0 }
 0xb6e   :  { %7486 = vmatprep.subr.mxu0 %v6486_v45 }
 0xb6f   :  { %7487 = vmatpush3.msra.mxu0 %v6470_v6 }
 0xb70   :  { %7488 = vmatprep.subr.mxu0 %v6485_v60 }
 0xb71   :  { %7489 = vmatpush3.msra.mxu0 %v6469_v2 }
 0xb72   :  { %7490 = vmatprep.subr.mxu0 %v6484_v33 }
 0xb73   :  { %7491 = vmatpush3.msra.mxu0 %v6468_v0 }
 0xb74   :  { %7024 = vmatmul.mubr.msk.f32.vlgmr.msra.gmra.mxu0 %vm16019_vm9, %v18551_v31 }
 0xc25   :  { %v6648_v1 = vpop.f32.mrf.mxu1 }
 0xc27   :  { %v8586_v16 = vpop.f32.mrf.mxu1 }
 0xc34   :  { %v7492_v25 = vpop.f32.mrf.mxu0 }
 0xc36   :  { %v7493_v10 = vpop.f32.mrf.mxu0 }
 0xc37   :  { %v7494_v55 = vadd.f32 %v7493_v10, %v7492_v25 }
 0xc39   :  { %v6649_v4 = vadd.f32 %v7494_v55, %v6648_v1 }
 0xc3b   :  { %v6652_v26 = vmul.f32 0.0069444445, %v6649_v4 }
 0xc3d   :  { %6653 = vst.msk [vmem:[#allocation2] sm:$0x3] %vm6092_vm5, %v6652_v26 }
 0xc3e   :  { %8615 = shalt.err (!%p8612_p4)
}
 0xc3f   :  { %6663 = dma.vmem_to_hbm [thread:$0]  %s6661_s27, 32, %s16797_s4, [#allocation3]  }
 0xc40   :  { %8624 = dma.done.wait [#allocation3], 32  }
 0xc41   :  { %8625 = vsyncadd [#allocation3], 4294967264 }
 0xc42   :  { %6667 = vsyncpa [#allocation3], 1 }

</bundles_post_ra>
